<compile_context>
chip_gen: v7x
topology: tpu7x:2x2x1
jax: 0.10.0
libtpu: 0.0.40
codegen_flags: <defaults>
</compile_context>

<pallas_src>
import functools

import numpy as np

import jax
import jax.numpy as jnp
from jax.experimental import pallas as pl
from jax.experimental.pallas import tpu as pltpu


# ----------------------------------------------------------------------------
# Fused Pallas kernel: whole forward pass, everything VMEM-resident
# ----------------------------------------------------------------------------
def _net_kernel(x_ref, w1_ref, b1_ref, w2_ref, b2_ref, gsel_ref,
                fc1w_ref, fc1b_ref, fc2w_ref, fc2b_ref, fc3w_ref, fc3b_ref,
                out_ref, xflat_ref, *, batch):
    f32 = jnp.float32
    m = batch * 1024  # flattened (n, h, w) columns of the 32x32 input grid

    def shifted(arr, shifts, pad):
        """Lane-shift-left views of `arr` (zero filled on the right), width kept = m."""
        arrp = jnp.concatenate([arr, jnp.zeros((arr.shape[0], pad), f32)], axis=1)
        return [arrp[:, k:k + m] for k in shifts]

    # ---- conv1: 5x5, 3->6 channels (padded to 8 rows) + ReLU -------------------------
    # tap (i, j) of the conv reads column col + i*32 + j of the flattened input.
    x3 = x_ref[...]                                               # (8, m)
    taps = shifted(x3, [i * 32 + j for i in range(5) for j in range(5)], 132)
    p1 = jnp.concatenate(taps, axis=0)                            # (200, m), rows = (tap, ci)
    a1 = jnp.dot(w1_ref[...], p1, preferred_element_type=f32) + b1_ref[...]
    a1 = jnp.maximum(a1, 0.0)                                     # valid where h, w < 28

    # ---- pool1 (2x2 / 2): output lives on the stride-2 sub-grid of the 32x32 layout --
    s = shifted(a1, [0, 1, 32, 33], 33)
    m1 = jnp.maximum(jnp.maximum(s[0], s[1]), jnp.maximum(s[2], s[3]))

    # ---- conv2: 5x5, 6->16 channels + ReLU (taps step by 2 on the sub-grid) ----------
    taps = shifted(m1, [i * 64 + 2 * j for i in range(5) for j in range(5)], 264)
    p2 = jnp.concatenate(taps, axis=0)                            # (200, m)
    a2 = jnp.dot(w2_ref[...], p2, preferred_element_type=f32) + b2_ref[...]
    a2 = jnp.maximum(a2, 0.0)                                     # valid on stride-2 grid, oh2, ow2 < 10

    # ---- pool2 (2x2 / 2): output lives on the stride-4 sub-grid ----------------------
    s = shifted(a2, [0, 2, 64, 66], 66)
    m2 = jnp.maximum(jnp.maximum(s[0], s[1]), jnp.maximum(s[2], s[3]))

    # ---- gather the 16 x 5 x 5 pooled maps, flatten to (batch, 400) in (c, h, w) order
    for n in range(batch):
        # lane-aligned full-image slice (16, 1024)  x  0/1 gather matrix -> (16, 25)
        zsel = jnp.dot(m2[:, n * 1024:(n + 1) * 1024], gsel_ref[...],
                       preferred_element_type=f32)
        for c in range(16):
            xflat_ref[n:n + 1, c * 25:(c + 1) * 25] = zsel[c:c + 1, :]

    # ---- fully-connected head (weights pre-transposed on host) ----------------------
    xf = xflat_ref[...]                                           # (batch, 400)
    h = jnp.maximum(jnp.dot(xf, fc1w_ref[...], preferred_element_type=f32) + fc1b_ref[...], 0.0)
    h = jnp.maximum(jnp.dot(h, fc2w_ref[...], preferred_element_type=f32) + fc2b_ref[...], 0.0)
    out_ref[...] = jnp.dot(h, fc3w_ref[...], preferred_element_type=f32) + fc3b_ref[...]


# ----------------------------------------------------------------------------
# Host-side, one-time parameter packing (no per-call transposes inside the jit)
# ----------------------------------------------------------------------------
def pack_params(params):
    # conv weights -> (Cout, 25 taps * 8 padded-in-channels), matching the kernel's
    # tap-major / channel-minor im2col row order.
    w1 = jnp.transpose(params["conv1_w"], (0, 2, 3, 1))           # (6, 5, 5, 3)
    w1 = jnp.pad(w1, ((0, 2), (0, 0), (0, 0), (0, 5))).reshape(8, 200)
    b1 = jnp.pad(params["conv1_b"], (0, 2)).reshape(8, 1)
    w2 = jnp.transpose(params["conv2_w"], (0, 2, 3, 1))           # (16, 5, 5, 6)
    w2 = jnp.pad(w2, ((0, 0), (0, 0), (0, 0), (0, 2))).reshape(16, 200)
    b2 = params["conv2_b"].reshape(16, 1)
    # 0/1 gather matrix over a full (lane-aligned) 1024-wide image window: picks the
    # 5x5 pool2 outputs (stride-4 sub-grid) in (qh, qw) order.
    gsel = np.zeros((1024, 25), np.float32)
    for qh in range(5):
        for qw in range(5):
            gsel[4 * qh * 32 + 4 * qw, qh * 5 + qw] = 1.0
    return {
        "w1": w1, "b1": b1, "w2": w2, "b2": b2, "gsel": jnp.asarray(gsel),
        "fc1_w": params["fc1_w"].T, "fc1_b": params["fc1_b"].reshape(1, -1),
        "fc2_w": params["fc2_w"].T, "fc2_b": params["fc2_b"].reshape(1, -1),
        "fc3_w": params["fc3_w"].T, "fc3_b": params["fc3_b"].reshape(1, -1),
    }


# ----------------------------------------------------------------------------
# Forward pass: one tiny XLA ingress transpose + ONE pallas_call
# ----------------------------------------------------------------------------
@jax.jit
def net_forward(packed, x):
    n = x.shape[0]
    m = n * 32 * 32
    # Ingress-only layout conversion: NCHW -> channel-major flattened, pad channels to 8.
    x3 = jnp.pad(x.transpose(1, 0, 2, 3).reshape(3, m), ((0, 5), (0, 0)))

    operands = (x3, packed["w1"], packed["b1"], packed["w2"], packed["b2"], packed["gsel"],
                packed["fc1_w"], packed["fc1_b"], packed["fc2_w"], packed["fc2_b"],
                packed["fc3_w"], packed["fc3_b"])
    return pl.pallas_call(
        functools.partial(_net_kernel, batch=n),
        out_shape=jax.ShapeDtypeStruct((n, 10), jnp.float32),
        in_specs=[pl.BlockSpec(op.shape, lambda: (0, 0)) for op in operands],
        out_specs=pl.BlockSpec((n, 10), lambda: (0, 0)),
        scratch_shapes=[pltpu.VMEM((n, 400), jnp.float32)],
    )(*operands)


# ----------------------------------------------------------------------------
# Deterministic synthetic parameters (PyTorch shapes / init convention)
# ----------------------------------------------------------------------------
def init_params(key):
    ks = jax.random.split(key, 10)

    def u(k, shape, fan_in):
        bound = 1.0 / jnp.sqrt(fan_in)
        return jax.random.uniform(k, shape, jnp.float32, -bound, bound)

    return {
        "conv1_w": u(ks[0], (6, 3, 5, 5), 3 * 5 * 5),
        "conv1_b": u(ks[1], (6,), 3 * 5 * 5),
        "conv2_w": u(ks[2], (16, 6, 5, 5), 6 * 5 * 5),
        "conv2_b": u(ks[3], (16,), 6 * 5 * 5),
        "fc1_w": u(ks[4], (120, 400), 400),
        "fc1_b": u(ks[5], (120,), 400),
        "fc2_w": u(ks[6], (84, 120), 120),
        "fc2_b": u(ks[7], (84,), 120),
        "fc3_w": u(ks[8], (10, 84), 84),
        "fc3_b": u(ks[9], (10,), 84),
    }


# ----------------------------------------------------------------------------
# Plain-JAX reference (matches PyTorch Net.forward) for a correctness check
# ----------------------------------------------------------------------------
def reference_forward(params, x):
    hi = jax.lax.Precision.HIGHEST
    dn = ("NCHW", "OIHW", "NCHW")
    y = jax.lax.conv_general_dilated(x, params["conv1_w"], (1, 1), "VALID",
                                     dimension_numbers=dn, precision=hi)
    y = jnp.maximum(y + params["conv1_b"][None, :, None, None], 0.0)
    y = y.reshape(y.shape[0], 6, 14, 2, 14, 2).max(axis=(3, 5))
    y = jax.lax.conv_general_dilated(y, params["conv2_w"], (1, 1), "VALID",
                                     dimension_numbers=dn, precision=hi)
    y = jnp.maximum(y + params["conv2_b"][None, :, None, None], 0.0)
    y = y.reshape(y.shape[0], 16, 5, 2, 5, 2).max(axis=(3, 5))
    y = y.reshape(y.shape[0], 400)
    y = jnp.maximum(jnp.dot(y, params["fc1_w"].T, precision=hi) + params["fc1_b"], 0.0)
    y = jnp.maximum(jnp.dot(y, params["fc2_w"].T, precision=hi) + params["fc2_b"], 0.0)
    return jnp.dot(y, params["fc3_w"].T, precision=hi) + params["fc3_b"]


if __name__ == "__main__":
    key = jax.random.PRNGKey(0)
    pkey, xkey = jax.random.split(key)
    params = init_params(pkey)
    packed = pack_params(params)
    # Net's architecture implies 3x32x32 inputs (CIFAR-10); use batch=2.
    x = jax.random.normal(xkey, (2, 3, 32, 32), jnp.float32)

    out = jax.block_until_ready(net_forward(packed, x))
    assert out.shape == (2, 10) and out.dtype == jnp.float32, (out.shape, out.dtype)

    ref = jax.block_until_ready(jax.jit(reference_forward)(params, x))
    np.testing.assert_allclose(np.asarray(out), np.asarray(ref), rtol=2e-2, atol=2e-2)
    print("KERNEL_OK")
</pallas_src>

<mosaic_0001>
module attributes {stable_mosaic.version = 11 : i64} {
  func.func @_net_kernel(%arg0: memref<8x2048xf32, #tpu.memory_space<vmem>>, %arg1: memref<8x200xf32, #tpu.memory_space<vmem>>, %arg2: memref<8x1xf32, #tpu.memory_space<vmem>>, %arg3: memref<16x200xf32, #tpu.memory_space<vmem>>, %arg4: memref<16x1xf32, #tpu.memory_space<vmem>>, %arg5: memref<1024x25xf32, #tpu.memory_space<vmem>>, %arg6: memref<400x120xf32, #tpu.memory_space<vmem>>, %arg7: memref<1x120xf32, #tpu.memory_space<vmem>>, %arg8: memref<120x84xf32, #tpu.memory_space<vmem>>, %arg9: memref<1x84xf32, #tpu.memory_space<vmem>>, %arg10: memref<84x10xf32, #tpu.memory_space<vmem>>, %arg11: memref<1x10xf32, #tpu.memory_space<vmem>>, %arg12: memref<2x10xf32, #tpu.memory_space<vmem>>, %arg13: memref<2x400xf32, #tpu.memory_space<vmem>>) attributes {dimension_semantics = [], scalar_prefetch = 0 : i64, scratch_operands = 1 : i64, tpu.core_type = #tpu.core_type<tc>} {
    %c0 = arith.constant 0 : index
    %c0_0 = arith.constant 0 : index
    %0 = vector.load %arg0[%c0, %c0_0] : memref<8x2048xf32, #tpu.memory_space<vmem>>, vector<8x2048xf32>
    %cst = arith.constant 0.000000e+00 : f32
    %1 = vector.broadcast %cst : f32 to vector<8x132xf32>
    %2 = tpu.concatenate %0, %1 in 1 : vector<8x2048xf32>, vector<8x132xf32> -> vector<8x2180xf32>
    %3 = vector.extract_strided_slice %2 {offsets = [0, 0], sizes = [8, 2048], strides = [1, 1]} : vector<8x2180xf32> to vector<8x2048xf32>
    %4 = vector.extract_strided_slice %2 {offsets = [0, 1], sizes = [8, 2048], strides = [1, 1]} : vector<8x2180xf32> to vector<8x2048xf32>
    %5 = vector.extract_strided_slice %2 {offsets = [0, 2], sizes = [8, 2048], strides = [1, 1]} : vector<8x2180xf32> to vector<8x2048xf32>
    %6 = vector.extract_strided_slice %2 {offsets = [0, 3], sizes = [8, 2048], strides = [1, 1]} : vector<8x2180xf32> to vector<8x2048xf32>
    %7 = vector.extract_strided_slice %2 {offsets = [0, 4], sizes = [8, 2048], strides = [1, 1]} : vector<8x2180xf32> to vector<8x2048xf32>
    %8 = vector.extract_strided_slice %2 {offsets = [0, 32], sizes = [8, 2048], strides = [1, 1]} : vector<8x2180xf32> to vector<8x2048xf32>
    %9 = vector.extract_strided_slice %2 {offsets = [0, 33], sizes = [8, 2048], strides = [1, 1]} : vector<8x2180xf32> to vector<8x2048xf32>
    %10 = vector.extract_strided_slice %2 {offsets = [0, 34], sizes = [8, 2048], strides = [1, 1]} : vector<8x2180xf32> to vector<8x2048xf32>
    %11 = vector.extract_strided_slice %2 {offsets = [0, 35], sizes = [8, 2048], strides = [1, 1]} : vector<8x2180xf32> to vector<8x2048xf32>
    %12 = vector.extract_strided_slice %2 {offsets = [0, 36], sizes = [8, 2048], strides = [1, 1]} : vector<8x2180xf32> to vector<8x2048xf32>
    %13 = vector.extract_strided_slice %2 {offsets = [0, 64], sizes = [8, 2048], strides = [1, 1]} : vector<8x2180xf32> to vector<8x2048xf32>
    %14 = vector.extract_strided_slice %2 {offsets = [0, 65], sizes = [8, 2048], strides = [1, 1]} : vector<8x2180xf32> to vector<8x2048xf32>
    %15 = vector.extract_strided_slice %2 {offsets = [0, 66], sizes = [8, 2048], strides = [1, 1]} : vector<8x2180xf32> to vector<8x2048xf32>
    %16 = vector.extract_strided_slice %2 {offsets = [0, 67], sizes = [8, 2048], strides = [1, 1]} : vector<8x2180xf32> to vector<8x2048xf32>
    %17 = vector.extract_strided_slice %2 {offsets = [0, 68], sizes = [8, 2048], strides = [1, 1]} : vector<8x2180xf32> to vector<8x2048xf32>
    %18 = vector.extract_strided_slice %2 {offsets = [0, 96], sizes = [8, 2048], strides = [1, 1]} : vector<8x2180xf32> to vector<8x2048xf32>
    %19 = vector.extract_strided_slice %2 {offsets = [0, 97], sizes = [8, 2048], strides = [1, 1]} : vector<8x2180xf32> to vector<8x2048xf32>
    %20 = vector.extract_strided_slice %2 {offsets = [0, 98], sizes = [8, 2048], strides = [1, 1]} : vector<8x2180xf32> to vector<8x2048xf32>
    %21 = vector.extract_strided_slice %2 {offsets = [0, 99], sizes = [8, 2048], strides = [1, 1]} : vector<8x2180xf32> to vector<8x2048xf32>
    %22 = vector.extract_strided_slice %2 {offsets = [0, 100], sizes = [8, 2048], strides = [1, 1]} : vector<8x2180xf32> to vector<8x2048xf32>
    %23 = vector.extract_strided_slice %2 {offsets = [0, 128], sizes = [8, 2048], strides = [1, 1]} : vector<8x2180xf32> to vector<8x2048xf32>
    %24 = vector.extract_strided_slice %2 {offsets = [0, 129], sizes = [8, 2048], strides = [1, 1]} : vector<8x2180xf32> to vector<8x2048xf32>
    %25 = vector.extract_strided_slice %2 {offsets = [0, 130], sizes = [8, 2048], strides = [1, 1]} : vector<8x2180xf32> to vector<8x2048xf32>
    %26 = vector.extract_strided_slice %2 {offsets = [0, 131], sizes = [8, 2048], strides = [1, 1]} : vector<8x2180xf32> to vector<8x2048xf32>
    %27 = vector.extract_strided_slice %2 {offsets = [0, 132], sizes = [8, 2048], strides = [1, 1]} : vector<8x2180xf32> to vector<8x2048xf32>
    %28 = tpu.concatenate %3, %4, %5, %6, %7, %8, %9, %10, %11, %12, %13, %14, %15, %16, %17, %18 in 0 : vector<8x2048xf32>, vector<8x2048xf32>, vector<8x2048xf32>, vector<8x2048xf32>, vector<8x2048xf32>, vector<8x2048xf32>, vector<8x2048xf32>, vector<8x2048xf32>, vector<8x2048xf32>, vector<8x2048xf32>, vector<8x2048xf32>, vector<8x2048xf32>, vector<8x2048xf32>, vector<8x2048xf32>, vector<8x2048xf32>, vector<8x2048xf32> -> vector<128x2048xf32>
    %29 = tpu.concatenate %19, %20, %21, %22, %23, %24, %25, %26, %27 in 0 : vector<8x2048xf32>, vector<8x2048xf32>, vector<8x2048xf32>, vector<8x2048xf32>, vector<8x2048xf32>, vector<8x2048xf32>, vector<8x2048xf32>, vector<8x2048xf32>, vector<8x2048xf32> -> vector<72x2048xf32>
    %30 = tpu.concatenate %28, %29 in 0 : vector<128x2048xf32>, vector<72x2048xf32> -> vector<200x2048xf32>
    %c0_1 = arith.constant 0 : index
    %c0_2 = arith.constant 0 : index
    %31 = vector.load %arg1[%c0_1, %c0_2] : memref<8x200xf32, #tpu.memory_space<vmem>>, vector<8x200xf32>
    %cst_3 = arith.constant dense<0.000000e+00> : vector<8x2048xf32>
    %32 = tpu.matmul %31, %30, %cst_3 {dimension_numbers = #tpu.dot_dimension_numbers<[1], [0], [0], [1], [0, 0, 1, 1], [], []>} : vector<8x200xf32>, vector<200x2048xf32>, vector<8x2048xf32> -> vector<8x2048xf32>
    %c0_4 = arith.constant 0 : index
    %c0_5 = arith.constant 0 : index
    %33 = vector.load %arg2[%c0_4, %c0_5] : memref<8x1xf32, #tpu.memory_space<vmem>>, vector<8x1xf32>
    %34 = vector.broadcast %33 : vector<8x1xf32> to vector<8x2048xf32>
    %35 = arith.addf %32, %34 : vector<8x2048xf32>
    %cst_6 = arith.constant 0.000000e+00 : f32
    %36 = vector.broadcast %cst_6 : f32 to vector<8x2048xf32>
    %37 = arith.maximumf %35, %36 : vector<8x2048xf32>
    %cst_7 = arith.constant 0.000000e+00 : f32
    %38 = vector.broadcast %cst_7 : f32 to vector<8x33xf32>
    %39 = tpu.concatenate %37, %38 in 1 : vector<8x2048xf32>, vector<8x33xf32> -> vector<8x2081xf32>
    %40 = vector.extract_strided_slice %39 {offsets = [0, 0], sizes = [8, 2048], strides = [1, 1]} : vector<8x2081xf32> to vector<8x2048xf32>
    %41 = vector.extract_strided_slice %39 {offsets = [0, 1], sizes = [8, 2048], strides = [1, 1]} : vector<8x2081xf32> to vector<8x2048xf32>
    %42 = vector.extract_strided_slice %39 {offsets = [0, 32], sizes = [8, 2048], strides = [1, 1]} : vector<8x2081xf32> to vector<8x2048xf32>
    %43 = vector.extract_strided_slice %39 {offsets = [0, 33], sizes = [8, 2048], strides = [1, 1]} : vector<8x2081xf32> to vector<8x2048xf32>
    %44 = arith.maximumf %40, %41 : vector<8x2048xf32>
    %45 = arith.maximumf %42, %43 : vector<8x2048xf32>
    %46 = arith.maximumf %44, %45 : vector<8x2048xf32>
    %cst_8 = arith.constant 0.000000e+00 : f32
    %47 = vector.broadcast %cst_8 : f32 to vector<8x264xf32>
    %48 = tpu.concatenate %46, %47 in 1 : vector<8x2048xf32>, vector<8x264xf32> -> vector<8x2312xf32>
    %49 = vector.extract_strided_slice %48 {offsets = [0, 0], sizes = [8, 2048], strides = [1, 1]} : vector<8x2312xf32> to vector<8x2048xf32>
    %50 = vector.extract_strided_slice %48 {offsets = [0, 2], sizes = [8, 2048], strides = [1, 1]} : vector<8x2312xf32> to vector<8x2048xf32>
    %51 = vector.extract_strided_slice %48 {offsets = [0, 4], sizes = [8, 2048], strides = [1, 1]} : vector<8x2312xf32> to vector<8x2048xf32>
    %52 = vector.extract_strided_slice %48 {offsets = [0, 6], sizes = [8, 2048], strides = [1, 1]} : vector<8x2312xf32> to vector<8x2048xf32>
    %53 = vector.extract_strided_slice %48 {offsets = [0, 8], sizes = [8, 2048], strides = [1, 1]} : vector<8x2312xf32> to vector<8x2048xf32>
    %54 = vector.extract_strided_slice %48 {offsets = [0, 64], sizes = [8, 2048], strides = [1, 1]} : vector<8x2312xf32> to vector<8x2048xf32>
    %55 = vector.extract_strided_slice %48 {offsets = [0, 66], sizes = [8, 2048], strides = [1, 1]} : vector<8x2312xf32> to vector<8x2048xf32>
    %56 = vector.extract_strided_slice %48 {offsets = [0, 68], sizes = [8, 2048], strides = [1, 1]} : vector<8x2312xf32> to vector<8x2048xf32>
    %57 = vector.extract_strided_slice %48 {offsets = [0, 70], sizes = [8, 2048], strides = [1, 1]} : vector<8x2312xf32> to vector<8x2048xf32>
    %58 = vector.extract_strided_slice %48 {offsets = [0, 72], sizes = [8, 2048], strides = [1, 1]} : vector<8x2312xf32> to vector<8x2048xf32>
    %59 = vector.extract_strided_slice %48 {offsets = [0, 128], sizes = [8, 2048], strides = [1, 1]} : vector<8x2312xf32> to vector<8x2048xf32>
    %60 = vector.extract_strided_slice %48 {offsets = [0, 130], sizes = [8, 2048], strides = [1, 1]} : vector<8x2312xf32> to vector<8x2048xf32>
    %61 = vector.extract_strided_slice %48 {offsets = [0, 132], sizes = [8, 2048], strides = [1, 1]} : vector<8x2312xf32> to vector<8x2048xf32>
    %62 = vector.extract_strided_slice %48 {offsets = [0, 134], sizes = [8, 2048], strides = [1, 1]} : vector<8x2312xf32> to vector<8x2048xf32>
    %63 = vector.extract_strided_slice %48 {offsets = [0, 136], sizes = [8, 2048], strides = [1, 1]} : vector<8x2312xf32> to vector<8x2048xf32>
    %64 = vector.extract_strided_slice %48 {offsets = [0, 192], sizes = [8, 2048], strides = [1, 1]} : vector<8x2312xf32> to vector<8x2048xf32>
    %65 = vector.extract_strided_slice %48 {offsets = [0, 194], sizes = [8, 2048], strides = [1, 1]} : vector<8x2312xf32> to vector<8x2048xf32>
    %66 = vector.extract_strided_slice %48 {offsets = [0, 196], sizes = [8, 2048], strides = [1, 1]} : vector<8x2312xf32> to vector<8x2048xf32>
    %67 = vector.extract_strided_slice %48 {offsets = [0, 198], sizes = [8, 2048], strides = [1, 1]} : vector<8x2312xf32> to vector<8x2048xf32>
    %68 = vector.extract_strided_slice %48 {offsets = [0, 200], sizes = [8, 2048], strides = [1, 1]} : vector<8x2312xf32> to vector<8x2048xf32>
    %69 = vector.extract_strided_slice %48 {offsets = [0, 256], sizes = [8, 2048], strides = [1, 1]} : vector<8x2312xf32> to vector<8x2048xf32>
    %70 = vector.extract_strided_slice %48 {offsets = [0, 258], sizes = [8, 2048], strides = [1, 1]} : vector<8x2312xf32> to vector<8x2048xf32>
    %71 = vector.extract_strided_slice %48 {offsets = [0, 260], sizes = [8, 2048], strides = [1, 1]} : vector<8x2312xf32> to vector<8x2048xf32>
    %72 = vector.extract_strided_slice %48 {offsets = [0, 262], sizes = [8, 2048], strides = [1, 1]} : vector<8x2312xf32> to vector<8x2048xf32>
    %73 = vector.extract_strided_slice %48 {offsets = [0, 264], sizes = [8, 2048], strides = [1, 1]} : vector<8x2312xf32> to vector<8x2048xf32>
    %74 = tpu.concatenate %49, %50, %51, %52, %53, %54, %55, %56, %57, %58, %59, %60, %61, %62, %63, %64 in 0 : vector<8x2048xf32>, vector<8x2048xf32>, vector<8x2048xf32>, vector<8x2048xf32>, vector<8x2048xf32>, vector<8x2048xf32>, vector<8x2048xf32>, vector<8x2048xf32>, vector<8x2048xf32>, vector<8x2048xf32>, vector<8x2048xf32>, vector<8x2048xf32>, vector<8x2048xf32>, vector<8x2048xf32>, vector<8x2048xf32>, vector<8x2048xf32> -> vector<128x2048xf32>
    %75 = tpu.concatenate %65, %66, %67, %68, %69, %70, %71, %72, %73 in 0 : vector<8x2048xf32>, vector<8x2048xf32>, vector<8x2048xf32>, vector<8x2048xf32>, vector<8x2048xf32>, vector<8x2048xf32>, vector<8x2048xf32>, vector<8x2048xf32>, vector<8x2048xf32> -> vector<72x2048xf32>
    %76 = tpu.concatenate %74, %75 in 0 : vector<128x2048xf32>, vector<72x2048xf32> -> vector<200x2048xf32>
    %c0_9 = arith.constant 0 : index
    %c0_10 = arith.constant 0 : index
    %77 = vector.load %arg3[%c0_9, %c0_10] : memref<16x200xf32, #tpu.memory_space<vmem>>, vector<16x200xf32>
    %cst_11 = arith.constant dense<0.000000e+00> : vector<16x2048xf32>
    %78 = tpu.matmul %77, %76, %cst_11 {dimension_numbers = #tpu.dot_dimension_numbers<[1], [0], [0], [1], [0, 0, 1, 1], [], []>} : vector<16x200xf32>, vector<200x2048xf32>, vector<16x2048xf32> -> vector<16x2048xf32>
    %c0_12 = arith.constant 0 : index
    %c0_13 = arith.constant 0 : index
    %79 = vector.load %arg4[%c0_12, %c0_13] : memref<16x1xf32, #tpu.memory_space<vmem>>, vector<16x1xf32>
    %80 = vector.broadcast %79 : vector<16x1xf32> to vector<16x2048xf32>
    %81 = arith.addf %78, %80 : vector<16x2048xf32>
    %cst_14 = arith.constant 0.000000e+00 : f32
    %82 = vector.broadcast %cst_14 : f32 to vector<16x2048xf32>
    %83 = arith.maximumf %81, %82 : vector<16x2048xf32>
    %cst_15 = arith.constant 0.000000e+00 : f32
    %84 = vector.broadcast %cst_15 : f32 to vector<16x66xf32>
    %85 = tpu.concatenate %83, %84 in 1 : vector<16x2048xf32>, vector<16x66xf32> -> vector<16x2114xf32>
    %86 = vector.extract_strided_slice %85 {offsets = [0, 0], sizes = [16, 2048], strides = [1, 1]} : vector<16x2114xf32> to vector<16x2048xf32>
    %87 = vector.extract_strided_slice %85 {offsets = [0, 2], sizes = [16, 2048], strides = [1, 1]} : vector<16x2114xf32> to vector<16x2048xf32>
    %88 = vector.extract_strided_slice %85 {offsets = [0, 64], sizes = [16, 2048], strides = [1, 1]} : vector<16x2114xf32> to vector<16x2048xf32>
    %89 = vector.extract_strided_slice %85 {offsets = [0, 66], sizes = [16, 2048], strides = [1, 1]} : vector<16x2114xf32> to vector<16x2048xf32>
    %90 = arith.maximumf %86, %87 : vector<16x2048xf32>
    %91 = arith.maximumf %88, %89 : vector<16x2048xf32>
    %92 = arith.maximumf %90, %91 : vector<16x2048xf32>
    %93 = vector.extract_strided_slice %92 {offsets = [0, 0], sizes = [16, 1024], strides = [1, 1]} : vector<16x2048xf32> to vector<16x1024xf32>
    %c0_16 = arith.constant 0 : index
    %c0_17 = arith.constant 0 : index
    %94 = vector.load %arg5[%c0_16, %c0_17] : memref<1024x25xf32, #tpu.memory_space<vmem>>, vector<1024x25xf32>
    %cst_18 = arith.constant dense<0.000000e+00> : vector<16x25xf32>
    %95 = tpu.matmul %93, %94, %cst_18 {dimension_numbers = #tpu.dot_dimension_numbers<[1], [0], [0], [1], [0, 0, 1, 1], [], []>} : vector<16x1024xf32>, vector<1024x25xf32>, vector<16x25xf32> -> vector<16x25xf32>
    %96 = vector.extract_strided_slice %95 {offsets = [0, 0], sizes = [1, 25], strides = [1, 1]} : vector<16x25xf32> to vector<1x25xf32>
    %c0_19 = arith.constant 0 : index
    %c0_20 = arith.constant 0 : index
    %97 = vector.load %arg13[%c0_19, %c0_20] : memref<2x400xf32, #tpu.memory_space<vmem>>, vector<1x25xf32>
    tpu.vector_store %arg13[%c0_19, %c0_20], %96 {strides = array<i32>} : memref<2x400xf32, #tpu.memory_space<vmem>>, vector<1x25xf32>,
    %98 = vector.extract_strided_slice %95 {offsets = [1, 0], sizes = [1, 25], strides = [1, 1]} : vector<16x25xf32> to vector<1x25xf32>
    %c0_21 = arith.constant 0 : index
    %c25 = arith.constant 25 : index
    %99 = vector.load %arg13[%c0_21, %c25] : memref<2x400xf32, #tpu.memory_space<vmem>>, vector<1x25xf32>
    tpu.vector_store %arg13[%c0_21, %c25], %98 {strides = array<i32>} : memref<2x400xf32, #tpu.memory_space<vmem>>, vector<1x25xf32>,
    %100 = vector.extract_strided_slice %95 {offsets = [2, 0], sizes = [1, 25], strides = [1, 1]} : vector<16x25xf32> to vector<1x25xf32>
    %c0_22 = arith.constant 0 : index
    %c50 = arith.constant 50 : index
    %101 = vector.load %arg13[%c0_22, %c50] : memref<2x400xf32, #tpu.memory_space<vmem>>, vector<1x25xf32>
    tpu.vector_store %arg13[%c0_22, %c50], %100 {strides = array<i32>} : memref<2x400xf32, #tpu.memory_space<vmem>>, vector<1x25xf32>,
    %102 = vector.extract_strided_slice %95 {offsets = [3, 0], sizes = [1, 25], strides = [1, 1]} : vector<16x25xf32> to vector<1x25xf32>
    %c0_23 = arith.constant 0 : index
    %c75 = arith.constant 75 : index
    %103 = vector.load %arg13[%c0_23, %c75] : memref<2x400xf32, #tpu.memory_space<vmem>>, vector<1x25xf32>
    tpu.vector_store %arg13[%c0_23, %c75], %102 {strides = array<i32>} : memref<2x400xf32, #tpu.memory_space<vmem>>, vector<1x25xf32>,
    %104 = vector.extract_strided_slice %95 {offsets = [4, 0], sizes = [1, 25], strides = [1, 1]} : vector<16x25xf32> to vector<1x25xf32>
    %c0_24 = arith.constant 0 : index
    %c100 = arith.constant 100 : index
    %105 = vector.load %arg13[%c0_24, %c100] : memref<2x400xf32, #tpu.memory_space<vmem>>, vector<1x25xf32>
    tpu.vector_store %arg13[%c0_24, %c100], %104 {strides = array<i32>} : memref<2x400xf32, #tpu.memory_space<vmem>>, vector<1x25xf32>,
    %106 = vector.extract_strided_slice %95 {offsets = [5, 0], sizes = [1, 25], strides = [1, 1]} : vector<16x25xf32> to vector<1x25xf32>
    %c0_25 = arith.constant 0 : index
    %c125 = arith.constant 125 : index
    %107 = vector.load %arg13[%c0_25, %c125] : memref<2x400xf32, #tpu.memory_space<vmem>>, vector<1x25xf32>
    tpu.vector_store %arg13[%c0_25, %c125], %106 {strides = array<i32>} : memref<2x400xf32, #tpu.memory_space<vmem>>, vector<1x25xf32>,
    %108 = vector.extract_strided_slice %95 {offsets = [6, 0], sizes = [1, 25], strides = [1, 1]} : vector<16x25xf32> to vector<1x25xf32>
    %c0_26 = arith.constant 0 : index
    %c150 = arith.constant 150 : index
    %109 = vector.load %arg13[%c0_26, %c150] : memref<2x400xf32, #tpu.memory_space<vmem>>, vector<1x25xf32>
    tpu.vector_store %arg13[%c0_26, %c150], %108 {strides = array<i32>} : memref<2x400xf32, #tpu.memory_space<vmem>>, vector<1x25xf32>,
    %110 = vector.extract_strided_slice %95 {offsets = [7, 0], sizes = [1, 25], strides = [1, 1]} : vector<16x25xf32> to vector<1x25xf32>
    %c0_27 = arith.constant 0 : index
    %c175 = arith.constant 175 : index
    %111 = vector.load %arg13[%c0_27, %c175] : memref<2x400xf32, #tpu.memory_space<vmem>>, vector<1x25xf32>
    tpu.vector_store %arg13[%c0_27, %c175], %110 {strides = array<i32>} : memref<2x400xf32, #tpu.memory_space<vmem>>, vector<1x25xf32>,
    %112 = vector.extract_strided_slice %95 {offsets = [8, 0], sizes = [1, 25], strides = [1, 1]} : vector<16x25xf32> to vector<1x25xf32>
    %c0_28 = arith.constant 0 : index
    %c200 = arith.constant 200 : index
    %113 = vector.load %arg13[%c0_28, %c200] : memref<2x400xf32, #tpu.memory_space<vmem>>, vector<1x25xf32>
    tpu.vector_store %arg13[%c0_28, %c200], %112 {strides = array<i32>} : memref<2x400xf32, #tpu.memory_space<vmem>>, vector<1x25xf32>,
    %114 = vector.extract_strided_slice %95 {offsets = [9, 0], sizes = [1, 25], strides = [1, 1]} : vector<16x25xf32> to vector<1x25xf32>
    %c0_29 = arith.constant 0 : index
    %c225 = arith.constant 225 : index
    %115 = vector.load %arg13[%c0_29, %c225] : memref<2x400xf32, #tpu.memory_space<vmem>>, vector<1x25xf32>
    tpu.vector_store %arg13[%c0_29, %c225], %114 {strides = array<i32>} : memref<2x400xf32, #tpu.memory_space<vmem>>, vector<1x25xf32>,
    %116 = vector.extract_strided_slice %95 {offsets = [10, 0], sizes = [1, 25], strides = [1, 1]} : vector<16x25xf32> to vector<1x25xf32>
    %c0_30 = arith.constant 0 : index
    %c250 = arith.constant 250 : index
    %117 = vector.load %arg13[%c0_30, %c250] : memref<2x400xf32, #tpu.memory_space<vmem>>, vector<1x25xf32>
    tpu.vector_store %arg13[%c0_30, %c250], %116 {strides = array<i32>} : memref<2x400xf32, #tpu.memory_space<vmem>>, vector<1x25xf32>,
    %118 = vector.extract_strided_slice %95 {offsets = [11, 0], sizes = [1, 25], strides = [1, 1]} : vector<16x25xf32> to vector<1x25xf32>
    %c0_31 = arith.constant 0 : index
    %c275 = arith.constant 275 : index
    %119 = vector.load %arg13[%c0_31, %c275] : memref<2x400xf32, #tpu.memory_space<vmem>>, vector<1x25xf32>
    tpu.vector_store %arg13[%c0_31, %c275], %118 {strides = array<i32>} : memref<2x400xf32, #tpu.memory_space<vmem>>, vector<1x25xf32>,
    %120 = vector.extract_strided_slice %95 {offsets = [12, 0], sizes = [1, 25], strides = [1, 1]} : vector<16x25xf32> to vector<1x25xf32>
    %c0_32 = arith.constant 0 : index
    %c300 = arith.constant 300 : index
    %121 = vector.load %arg13[%c0_32, %c300] : memref<2x400xf32, #tpu.memory_space<vmem>>, vector<1x25xf32>
    tpu.vector_store %arg13[%c0_32, %c300], %120 {strides = array<i32>} : memref<2x400xf32, #tpu.memory_space<vmem>>, vector<1x25xf32>,
    %122 = vector.extract_strided_slice %95 {offsets = [13, 0], sizes = [1, 25], strides = [1, 1]} : vector<16x25xf32> to vector<1x25xf32>
    %c0_33 = arith.constant 0 : index
    %c325 = arith.constant 325 : index
    %123 = vector.load %arg13[%c0_33, %c325] : memref<2x400xf32, #tpu.memory_space<vmem>>, vector<1x25xf32>
    tpu.vector_store %arg13[%c0_33, %c325], %122 {strides = array<i32>} : memref<2x400xf32, #tpu.memory_space<vmem>>, vector<1x25xf32>,
    %124 = vector.extract_strided_slice %95 {offsets = [14, 0], sizes = [1, 25], strides = [1, 1]} : vector<16x25xf32> to vector<1x25xf32>
    %c0_34 = arith.constant 0 : index
    %c350 = arith.constant 350 : index
    %125 = vector.load %arg13[%c0_34, %c350] : memref<2x400xf32, #tpu.memory_space<vmem>>, vector<1x25xf32>
    tpu.vector_store %arg13[%c0_34, %c350], %124 {strides = array<i32>} : memref<2x400xf32, #tpu.memory_space<vmem>>, vector<1x25xf32>,
    %126 = vector.extract_strided_slice %95 {offsets = [15, 0], sizes = [1, 25], strides = [1, 1]} : vector<16x25xf32> to vector<1x25xf32>
    %c0_35 = arith.constant 0 : index
    %c375 = arith.constant 375 : index
    %127 = vector.load %arg13[%c0_35, %c375] : memref<2x400xf32, #tpu.memory_space<vmem>>, vector<1x25xf32>
    tpu.vector_store %arg13[%c0_35, %c375], %126 {strides = array<i32>} : memref<2x400xf32, #tpu.memory_space<vmem>>, vector<1x25xf32>,
    %128 = vector.extract_strided_slice %92 {offsets = [0, 1024], sizes = [16, 1024], strides = [1, 1]} : vector<16x2048xf32> to vector<16x1024xf32>
    %c0_36 = arith.constant 0 : index
    %c0_37 = arith.constant 0 : index
    %129 = vector.load %arg5[%c0_36, %c0_37] : memref<1024x25xf32, #tpu.memory_space<vmem>>, vector<1024x25xf32>
    %cst_38 = arith.constant dense<0.000000e+00> : vector<16x25xf32>
    %130 = tpu.matmul %128, %129, %cst_38 {dimension_numbers = #tpu.dot_dimension_numbers<[1], [0], [0], [1], [0, 0, 1, 1], [], []>} : vector<16x1024xf32>, vector<1024x25xf32>, vector<16x25xf32> -> vector<16x25xf32>
    %131 = vector.extract_strided_slice %130 {offsets = [0, 0], sizes = [1, 25], strides = [1, 1]} : vector<16x25xf32> to vector<1x25xf32>
    %c1 = arith.constant 1 : index
    %c0_39 = arith.constant 0 : index
    %132 = vector.load %arg13[%c1, %c0_39] : memref<2x400xf32, #tpu.memory_space<vmem>>, vector<1x25xf32>
    tpu.vector_store %arg13[%c1, %c0_39], %131 {strides = array<i32>} : memref<2x400xf32, #tpu.memory_space<vmem>>, vector<1x25xf32>,
    %133 = vector.extract_strided_slice %130 {offsets = [1, 0], sizes = [1, 25], strides = [1, 1]} : vector<16x25xf32> to vector<1x25xf32>
    %c1_40 = arith.constant 1 : index
    %c25_41 = arith.constant 25 : index
    %134 = vector.load %arg13[%c1_40, %c25_41] : memref<2x400xf32, #tpu.memory_space<vmem>>, vector<1x25xf32>
    tpu.vector_store %arg13[%c1_40, %c25_41], %133 {strides = array<i32>} : memref<2x400xf32, #tpu.memory_space<vmem>>, vector<1x25xf32>,
    %135 = vector.extract_strided_slice %130 {offsets = [2, 0], sizes = [1, 25], strides = [1, 1]} : vector<16x25xf32> to vector<1x25xf32>
    %c1_42 = arith.constant 1 : index
    %c50_43 = arith.constant 50 : index
    %136 = vector.load %arg13[%c1_42, %c50_43] : memref<2x400xf32, #tpu.memory_space<vmem>>, vector<1x25xf32>
    tpu.vector_store %arg13[%c1_42, %c50_43], %135 {strides = array<i32>} : memref<2x400xf32, #tpu.memory_space<vmem>>, vector<1x25xf32>,
    %137 = vector.extract_strided_slice %130 {offsets = [3, 0], sizes = [1, 25], strides = [1, 1]} : vector<16x25xf32> to vector<1x25xf32>
    %c1_44 = arith.constant 1 : index
    %c75_45 = arith.constant 75 : index
    %138 = vector.load %arg13[%c1_44, %c75_45] : memref<2x400xf32, #tpu.memory_space<vmem>>, vector<1x25xf32>
    tpu.vector_store %arg13[%c1_44, %c75_45], %137 {strides = array<i32>} : memref<2x400xf32, #tpu.memory_space<vmem>>, vector<1x25xf32>,
    %139 = vector.extract_strided_slice %130 {offsets = [4, 0], sizes = [1, 25], strides = [1, 1]} : vector<16x25xf32> to vector<1x25xf32>
    %c1_46 = arith.constant 1 : index
    %c100_47 = arith.constant 100 : index
    %140 = vector.load %arg13[%c1_46, %c100_47] : memref<2x400xf32, #tpu.memory_space<vmem>>, vector<1x25xf32>
    tpu.vector_store %arg13[%c1_46, %c100_47], %139 {strides = array<i32>} : memref<2x400xf32, #tpu.memory_space<vmem>>, vector<1x25xf32>,
    %141 = vector.extract_strided_slice %130 {offsets = [5, 0], sizes = [1, 25], strides = [1, 1]} : vector<16x25xf32> to vector<1x25xf32>
    %c1_48 = arith.constant 1 : index
    %c125_49 = arith.constant 125 : index
    %142 = vector.load %arg13[%c1_48, %c125_49] : memref<2x400xf32, #tpu.memory_space<vmem>>, vector<1x25xf32>
    tpu.vector_store %arg13[%c1_48, %c125_49], %141 {strides = array<i32>} : memref<2x400xf32, #tpu.memory_space<vmem>>, vector<1x25xf32>,
    %143 = vector.extract_strided_slice %130 {offsets = [6, 0], sizes = [1, 25], strides = [1, 1]} : vector<16x25xf32> to vector<1x25xf32>
    %c1_50 = arith.constant 1 : index
    %c150_51 = arith.constant 150 : index
    %144 = vector.load %arg13[%c1_50, %c150_51] : memref<2x400xf32, #tpu.memory_space<vmem>>, vector<1x25xf32>
    tpu.vector_store %arg13[%c1_50, %c150_51], %143 {strides = array<i32>} : memref<2x400xf32, #tpu.memory_space<vmem>>, vector<1x25xf32>,
    %145 = vector.extract_strided_slice %130 {offsets = [7, 0], sizes = [1, 25], strides = [1, 1]} : vector<16x25xf32> to vector<1x25xf32>
    %c1_52 = arith.constant 1 : index
    %c175_53 = arith.constant 175 : index
    %146 = vector.load %arg13[%c1_52, %c175_53] : memref<2x400xf32, #tpu.memory_space<vmem>>, vector<1x25xf32>
    tpu.vector_store %arg13[%c1_52, %c175_53], %145 {strides = array<i32>} : memref<2x400xf32, #tpu.memory_space<vmem>>, vector<1x25xf32>,
    %147 = vector.extract_strided_slice %130 {offsets = [8, 0], sizes = [1, 25], strides = [1, 1]} : vector<16x25xf32> to vector<1x25xf32>
    %c1_54 = arith.constant 1 : index
    %c200_55 = arith.constant 200 : index
    %148 = vector.load %arg13[%c1_54, %c200_55] : memref<2x400xf32, #tpu.memory_space<vmem>>, vector<1x25xf32>
    tpu.vector_store %arg13[%c1_54, %c200_55], %147 {strides = array<i32>} : memref<2x400xf32, #tpu.memory_space<vmem>>, vector<1x25xf32>,
    %149 = vector.extract_strided_slice %130 {offsets = [9, 0], sizes = [1, 25], strides = [1, 1]} : vector<16x25xf32> to vector<1x25xf32>
    %c1_56 = arith.constant 1 : index
    %c225_57 = arith.constant 225 : index
    %150 = vector.load %arg13[%c1_56, %c225_57] : memref<2x400xf32, #tpu.memory_space<vmem>>, vector<1x25xf32>
    tpu.vector_store %arg13[%c1_56, %c225_57], %149 {strides = array<i32>} : memref<2x400xf32, #tpu.memory_space<vmem>>, vector<1x25xf32>,
    %151 = vector.extract_strided_slice %130 {offsets = [10, 0], sizes = [1, 25], strides = [1, 1]} : vector<16x25xf32> to vector<1x25xf32>
    %c1_58 = arith.constant 1 : index
    %c250_59 = arith.constant 250 : index
    %152 = vector.load %arg13[%c1_58, %c250_59] : memref<2x400xf32, #tpu.memory_space<vmem>>, vector<1x25xf32>
    tpu.vector_store %arg13[%c1_58, %c250_59], %151 {strides = array<i32>} : memref<2x400xf32, #tpu.memory_space<vmem>>, vector<1x25xf32>,
    %153 = vector.extract_strided_slice %130 {offsets = [11, 0], sizes = [1, 25], strides = [1, 1]} : vector<16x25xf32> to vector<1x25xf32>
    %c1_60 = arith.constant 1 : index
    %c275_61 = arith.constant 275 : index
    %154 = vector.load %arg13[%c1_60, %c275_61] : memref<2x400xf32, #tpu.memory_space<vmem>>, vector<1x25xf32>
    tpu.vector_store %arg13[%c1_60, %c275_61], %153 {strides = array<i32>} : memref<2x400xf32, #tpu.memory_space<vmem>>, vector<1x25xf32>,
    %155 = vector.extract_strided_slice %130 {offsets = [12, 0], sizes = [1, 25], strides = [1, 1]} : vector<16x25xf32> to vector<1x25xf32>
    %c1_62 = arith.constant 1 : index
    %c300_63 = arith.constant 300 : index
    %156 = vector.load %arg13[%c1_62, %c300_63] : memref<2x400xf32, #tpu.memory_space<vmem>>, vector<1x25xf32>
    tpu.vector_store %arg13[%c1_62, %c300_63], %155 {strides = array<i32>} : memref<2x400xf32, #tpu.memory_space<vmem>>, vector<1x25xf32>,
    %157 = vector.extract_strided_slice %130 {offsets = [13, 0], sizes = [1, 25], strides = [1, 1]} : vector<16x25xf32> to vector<1x25xf32>
    %c1_64 = arith.constant 1 : index
    %c325_65 = arith.constant 325 : index
    %158 = vector.load %arg13[%c1_64, %c325_65] : memref<2x400xf32, #tpu.memory_space<vmem>>, vector<1x25xf32>
    tpu.vector_store %arg13[%c1_64, %c325_65], %157 {strides = array<i32>} : memref<2x400xf32, #tpu.memory_space<vmem>>, vector<1x25xf32>,
    %159 = vector.extract_strided_slice %130 {offsets = [14, 0], sizes = [1, 25], strides = [1, 1]} : vector<16x25xf32> to vector<1x25xf32>
    %c1_66 = arith.constant 1 : index
    %c350_67 = arith.constant 350 : index
    %160 = vector.load %arg13[%c1_66, %c350_67] : memref<2x400xf32, #tpu.memory_space<vmem>>, vector<1x25xf32>
    tpu.vector_store %arg13[%c1_66, %c350_67], %159 {strides = array<i32>} : memref<2x400xf32, #tpu.memory_space<vmem>>, vector<1x25xf32>,
    %161 = vector.extract_strided_slice %130 {offsets = [15, 0], sizes = [1, 25], strides = [1, 1]} : vector<16x25xf32> to vector<1x25xf32>
    %c1_68 = arith.constant 1 : index
    %c375_69 = arith.constant 375 : index
    %162 = vector.load %arg13[%c1_68, %c375_69] : memref<2x400xf32, #tpu.memory_space<vmem>>, vector<1x25xf32>
    tpu.vector_store %arg13[%c1_68, %c375_69], %161 {strides = array<i32>} : memref<2x400xf32, #tpu.memory_space<vmem>>, vector<1x25xf32>,
    %c0_70 = arith.constant 0 : index
    %c0_71 = arith.constant 0 : index
    %163 = vector.load %arg13[%c0_70, %c0_71] : memref<2x400xf32, #tpu.memory_space<vmem>>, vector<2x400xf32>
    %c0_72 = arith.constant 0 : index
    %c0_73 = arith.constant 0 : index
    %164 = vector.load %arg6[%c0_72, %c0_73] : memref<400x120xf32, #tpu.memory_space<vmem>>, vector<400x120xf32>
    %cst_74 = arith.constant dense<0.000000e+00> : vector<2x120xf32>
    %165 = tpu.matmul %163, %164, %cst_74 {dimension_numbers = #tpu.dot_dimension_numbers<[1], [0], [0], [1], [0, 0, 1, 1], [], []>} : vector<2x400xf32>, vector<400x120xf32>, vector<2x120xf32> -> vector<2x120xf32>
    %c0_75 = arith.constant 0 : index
    %c0_76 = arith.constant 0 : index
    %166 = vector.load %arg7[%c0_75, %c0_76] : memref<1x120xf32, #tpu.memory_space<vmem>>, vector<1x120xf32>
    %167 = vector.broadcast %166 : vector<1x120xf32> to vector<2x120xf32>
    %168 = arith.addf %165, %167 : vector<2x120xf32>
    %cst_77 = arith.constant 0.000000e+00 : f32
    %169 = vector.broadcast %cst_77 : f32 to vector<2x120xf32>
    %170 = arith.maximumf %168, %169 : vector<2x120xf32>
    %c0_78 = arith.constant 0 : index
    %c0_79 = arith.constant 0 : index
    %171 = vector.load %arg8[%c0_78, %c0_79] : memref<120x84xf32, #tpu.memory_space<vmem>>, vector<120x84xf32>
    %cst_80 = arith.constant dense<0.000000e+00> : vector<2x84xf32>
    %172 = tpu.matmul %170, %171, %cst_80 {dimension_numbers = #tpu.dot_dimension_numbers<[1], [0], [0], [1], [0, 0, 1, 1], [], []>} : vector<2x120xf32>, vector<120x84xf32>, vector<2x84xf32> -> vector<2x84xf32>
    %c0_81 = arith.constant 0 : index
    %c0_82 = arith.constant 0 : index
    %173 = vector.load %arg9[%c0_81, %c0_82] : memref<1x84xf32, #tpu.memory_space<vmem>>, vector<1x84xf32>
    %174 = vector.broadcast %173 : vector<1x84xf32> to vector<2x84xf32>
    %175 = arith.addf %172, %174 : vector<2x84xf32>
    %cst_83 = arith.constant 0.000000e+00 : f32
    %176 = vector.broadcast %cst_83 : f32 to vector<2x84xf32>
    %177 = arith.maximumf %175, %176 : vector<2x84xf32>
    %c0_84 = arith.constant 0 : index
    %c0_85 = arith.constant 0 : index
    %178 = vector.load %arg10[%c0_84, %c0_85] : memref<84x10xf32, #tpu.memory_space<vmem>>, vector<84x10xf32>
    %cst_86 = arith.constant dense<0.000000e+00> : vector<2x10xf32>
    %179 = tpu.matmul %177, %178, %cst_86 {dimension_numbers = #tpu.dot_dimension_numbers<[1], [0], [0], [1], [0, 0, 1, 1], [], []>} : vector<2x84xf32>, vector<84x10xf32>, vector<2x10xf32> -> vector<2x10xf32>
    %c0_87 = arith.constant 0 : index
    %c0_88 = arith.constant 0 : index
    %180 = vector.load %arg11[%c0_87, %c0_88] : memref<1x10xf32, #tpu.memory_space<vmem>>, vector<1x10xf32>
    %181 = vector.broadcast %180 : vector<1x10xf32> to vector<2x10xf32>
    %182 = arith.addf %179, %181 : vector<2x10xf32>
    %c0_89 = arith.constant 0 : index
    %c0_90 = arith.constant 0 : index
    %183 = vector.load %arg12[%c0_89, %c0_90] : memref<2x10xf32, #tpu.memory_space<vmem>>, vector<2x10xf32>
    tpu.vector_store %arg12[%c0_89, %c0_90], %182 {strides = array<i32>} : memref<2x10xf32, #tpu.memory_space<vmem>>, vector<2x10xf32>,
    return
  }
}

</mosaic_0001>

<bundles_post_ra>
// kernel: net_forward.1
= control target key start
LH: loop header
LB: loop body
LE: loop exit
PB: predicated region body
PF: predicated region fallthrough
CT: control target
= control target key end

     0   :  { %s17008_s29 = smov 126   ;;  %s17040_s30 = smov 127   ;;  %s16964_s0 = inlined_call_operand.vmem [shape: f32[8,2048], index: 0, kind: input, shape index: {}]   ;;  %s16965_s1 = inlined_call_operand.vmem [shape: f32[8,200], index: 1, kind: input, shape index: {}]   ;;  %s16966_s2 = inlined_call_operand.vmem [shape: f32[8,1], index: 2, kind: input, shape index: {}]   ;;  %s16967_s3 = inlined_call_operand.vmem [shape: f32[16,200], index: 3, kind: input, shape index: {}]   ;;  %s16968_s4 = inlined_call_operand.vmem [shape: f32[16,1], index: 4, kind: input, shape index: {}]   ;;  %s16969_s5 = inlined_call_operand.vmem [shape: f32[1024,25], index: 5, kind: input, shape index: {}]   ;;  %s16970_s6 = inlined_call_operand.vmem [shape: f32[400,120], index: 6, kind: input, shape index: {}]   ;;  %s16971_s7 = inlined_call_operand.vmem [shape: f32[1,120], index: 7, kind: input, shape index: {}]   ;;  %s16972_s8 = inlined_call_operand.vmem [shape: f32[120,84], index: 8, kind: input, shape index: {}]   ;;  %s16973_s9 = inlined_call_operand.vmem [shape: f32[1,84], index: 9, kind: input, shape index: {}]   ;;  %s16974_s10 = inlined_call_operand.vmem [shape: f32[84,10], index: 10, kind: input, shape index: {}]   ;;  %s16975_s11 = inlined_call_operand.vmem [shape: f32[1,10], index: 11, kind: input, shape index: {}]   ;;  %s16976_s12 = inlined_call_operand.hbm [shape: f32[2,10], index: 12, kind: output, shape index: {}]  }
   0x1   :  { %v9817_v0 = vld [vmem:[%s16964_s0 + $0x8] sm:$0xff]  ;;  %v9822_v1 = vld [vmem:[%s16964_s0 + $0x10] sm:$0xff]  ;;  %v9827_v2 = vld [vmem:[%s16964_s0] sm:$0xff] }
   0x2   :  { %v9831_v3 = vpack.i.bf16 %v9822_v1, %v9817_v0  ;;  %v9836_v4 = vld [vmem:[%s16964_s0 + $0x18] sm:$0xff] }
   0x3   :  { %v7930_v5 = vpack.i.bf16 %v9827_v2, %v9836_v4 }
   0x4   :  { %7926 = vrot.lane.b32.xlu1 %v9831_v3, %s17008_s29  ;;  %7916 = vrot.lane.b32.xlu0 %v9831_v3, %s17040_s30 }
   0x5   :  { %17 = vsyncpa [#allocation4], 0  ;;  %v46_v6 = vld [vmem:[%s16964_s0 + $0x20] sm:$0xff]  ;;  %s16977_s15 = smov 125   ;;  %s17051_s16 = smov 96   ;;  %v47_v8 = vld [vmem:[%s16964_s0 + $0x28] sm:$0xff]  ;;  %v8025_v13 = vpack.i.bf16 %v9836_v4, %v9827_v2 }
   0x6   :  { %v9853_v7 = vpack.i.bf16 %v46_v6, %v9836_v4  ;;  %s17053_s17 = smov 97   ;;  %s9715_s18 = smov 95   ;;  %v9878_v9 = vpack.i.bf16 %v47_v8, %v46_v6  ;;  %v9887_v10 = vld [vmem:[%s16964_s0 + $0x30] sm:$0xff]  ;;  %v8000_v12 = vpack.i.bf16 %v9827_v2, %v47_v8  ;;  %v16981_v14 = vmov 0.0   ;;  %v9920_v16 = vld [vmem:[%s16964_s0 + $0x38] sm:$0xff]  ;;  %v9952_v18 = vld [vmem:[%s16964_s0 + $0x40] sm:$0xff] }
   0x7   :  { %s17135_s19 = smov 94   ;;  %s9717_s22 = smov 93   ;;  %v9894_v11 = vpack.i.bf16 %v9887_v10, %v47_v8  ;;  %v8035_v15 = vpack.i.bf16 %v16981_v14, %v9827_v2  ;;  %v9927_v17 = vpack.i.bf16 %v9920_v16, %v9887_v10  ;;  %v8130_v19 = vpack.i.bf16 %v9952_v18, %v9920_v16 }
   0x8   :  { %7931 = vrot.lane.b32.xlu1 %v7930_v5, %s17008_s29  ;;  %7921 = vrot.lane.b32.xlu0 %v7930_v5, %s17040_s30  ;;  %s17075_s25 = smov 124   ;;  %s9720_s26 = smov 92   ;;  %vm109_vm0 = vcmask 1039360   ;;  %vm17145_vm1 = vcmask 1031168   ;;  %vm243_vm2 = vcmask 1022976   ;;  %vm377_vm3 = vcmask 785408  }
   0x9   :  { %s9721_s27 = smov 64   ;;  %s9722_s14 = smov 63   ;;  %vm1112_vm4 = vcmask 793600   ;;  %vm511_vm5 = vcmask 769024   ;;  %vm444_vm6 = vcmask 777216   ;;  %vm17101_vm7 = vcmask 1014784  }
   0xa   :  { %s16979_s20 = smov 61   ;;  %s9724_s21 = smov 62   ;;  %vm578_vm8 = vcmask 760832   ;;  %vm16993_vm9 = vcmask 588800   ;;  %vm17011_vm10 = vcmask 752640   ;;  %vm712_vm11 = vcmask 523264  }
   0xb   :  { %s17055_s23 = smov 32   ;;  %s17057_s24 = smov 60   ;;  %vm779_vm12 = vcmask 515072   ;;  %vm846_vm13 = vcmask 506880   ;;  %vm913_vm14 = vcmask 498688   ;;  %vm980_vm15 = vcmask 490496  }
   0xc   :  { %7941 = vrot.lane.b32.xlu1 %v7930_v5, %s16977_s15  ;;  %7936 = vrot.lane.b32.xlu0 %v9831_v3, %s16977_s15  ;;  %s17432_s28 = smov 61   ;;  %s17516_s13 = smov 32  }
  0x10   :  { %7951 = vrot.lane.b32.xlu1 %v9853_v7, %s17051_s16  ;;  %7946 = vrot.lane.b32.xlu0 %v9831_v3, %s17051_s16 }
  0x14   :  { %7961 = vrot.lane.b32.xlu1 %v9853_v7, %s17053_s17  ;;  %7956 = vrot.lane.b32.xlu0 %v9831_v3, %s17053_s17 }
  0x18   :  { %7971 = vrot.lane.b32.xlu1 %v9853_v7, %s9715_s18  ;;  %7966 = vrot.lane.b32.xlu0 %v9831_v3, %s9715_s18 }
  0x1c   :  { %7981 = vrot.lane.b32.xlu1 %v9853_v7, %s17135_s19  ;;  %7976 = vrot.lane.b32.xlu0 %v9831_v3, %s17135_s19 }
  0x20   :  { %548 = vrot.lane.b32.xlu1 %v9822_v1, %s9717_s22  ;;  %546 = vrot.lane.b32.xlu0 %v9817_v0, %s9717_s22 }
  0x24   :  { %7986 = vrot.lane.b32.xlu1 %v9878_v9, %s17040_s30  ;;  %550 = vrot.lane.b32.xlu0 %v9836_v4, %s9717_s22 }
  0x28   :  { %7996 = vrot.lane.b32.xlu1 %v9878_v9, %s16977_s15  ;;  %7991 = vrot.lane.b32.xlu0 %v9878_v9, %s17008_s29 }
  0x2c   :  { %8006 = vrot.lane.b32.xlu1 %v9894_v11, %s17053_s17  ;;  %8001 = vrot.lane.b32.xlu0 %v8000_v12, %s17051_s16 }
  0x30   :  { %8016 = vrot.lane.b32.xlu1 %v8000_v12, %s17135_s19  ;;  %8011 = vrot.lane.b32.xlu0 %v8000_v12, %s9715_s18 }
  0x34   :  { %8026 = vrot.lane.b32.xlu1 %v8025_v13, %s17075_s25  ;;  %8021 = vrot.lane.b32.xlu0 %v9831_v3, %s17075_s25 }
  0x38   :  { %554 = vrot.lane.b32.xlu1 %v47_v8, %s9717_s22  ;;  %552 = vrot.lane.b32.xlu0 %v46_v6, %s9717_s22 }
  0x3c   :  { %8036 = vrot.lane.b32.xlu1 %v8035_v15, %s9717_s22  ;;  %8031 = vrot.lane.b32.xlu0 %v9831_v3, %s9720_s26 }
  0x40   :  { %8046 = vrot.lane.b32.xlu1 %v9831_v3, %s9721_s27  ;;  %8041 = vrot.lane.b32.xlu0 %v8025_v13, %s9720_s26 }
  0x44   :  { %8056 = vrot.lane.b32.xlu1 %v8025_v13, %s9721_s27  ;;  %8051 = vrot.lane.b32.xlu0 %v9831_v3, %s9722_s14 }
  0x48   :  { %8066 = vrot.lane.b32.xlu1 %v9927_v17, %s17040_s30  ;;  %8061 = vrot.lane.b32.xlu0 %v8025_v13, %s9722_s14 }
  0x4c   :  { %8076 = vrot.lane.b32.xlu1 %v9831_v3, %s16979_s20  ;;  %8071 = vrot.lane.b32.xlu0 %v9831_v3, %s9724_s21 }
  0x50   :  { %8086 = vrot.lane.b32.xlu1 %v8025_v13, %s16979_s20  ;;  %8081 = vrot.lane.b32.xlu0 %v8025_v13, %s9724_s21 }
  0x54   :  { %8096 = vrot.lane.b32.xlu1 %v9927_v17, %s16977_s15  ;;  %8091 = vrot.lane.b32.xlu0 %v9927_v17, %s17008_s29  ;;  %s9727_s15 = smov 31  }
  0x58   :  { %8106 = vrot.lane.b32.xlu1 %v9831_v3, %s17055_s23  ;;  %8101 = vrot.lane.b32.xlu0 %v9831_v3, %s17057_s24 }
  0x5c   :  { %8116 = vrot.lane.b32.xlu1 %v8025_v13, %s17057_s24  ;;  %8111 = vrot.lane.b32.xlu0 %v9878_v9, %s17075_s25 }
  0x60   :  { %8126 = vrot.lane.b32.xlu1 %v9927_v17, %s17051_s16  ;;  %8121 = vrot.lane.b32.xlu0 %v8025_v13, %s17055_s23 }
  0x64   :  { %8136 = vrot.lane.b32.xlu1 %v9831_v3, %s9727_s15  ;;  %8131 = vrot.lane.b32.xlu0 %v8130_v19, %s17053_s17 }
  0x68   :  { %8146 = vrot.lane.b32.xlu1 %v9927_v17, %s17135_s19  ;;  %8141 = vrot.lane.b32.xlu0 %v9927_v17, %s9715_s18 }
  0x6c   :  { %8151 = vrot.lane.b32.xlu0 %v9878_v9, %s9720_s26 }
  0x76   :  { %v7927_v20 = vpop.permute.xlu1 %7926  ;;  %v7917_v21 = vpop.permute.xlu0 %7916 }
  0x77   :  { %v7919_v22 = vunpack.i.h.bf16 %v7917_v21  ;;  %v7918_v23 = vunpack.i.l.bf16 %v7917_v21  ;;  %v7929_v30 = vunpack.i.h.bf16 %v7927_v20  ;;  %v7928_v31 = vunpack.i.l.bf16 %v7927_v20 }
  0x79   :  { %v111_v24 = vsel %vm109_vm0, %v7918_v23, %v7919_v22  ;;  %v178_v45 = vsel %vm17145_vm1, %v7928_v31, %v7929_v30 }
  0x7a   :  { %v9969_v25 = vpop.permute.xlu1 %7931  ;;  %v9971_v26 = vpop.permute.xlu0 %7921  ;;  %v6757_v27 = vpack.c.bf16 %v111_v24, %v9817_v0 }
  0x7b   :  { %v7924_v28 = vunpack.i.h.bf16 %v9971_v26  ;;  %v7923_v29 = vunpack.i.l.bf16 %v9971_v26  ;;  %v7933_v32 = vunpack.i.l.bf16 %v9969_v25  ;;  %v7934_v33 = vunpack.i.h.bf16 %v9969_v25 }
  0x7c   :  { %6758 = vmatprep.subr.bf16.mxu0 %v6757_v27  ;;  %v10051_v27 = vld [vmem:[%s16964_s0 + $0x48] sm:$0xff] }
  0x7d   :  { %v9981_v34 = vsel %vm109_vm0, %v7919_v22, %v7923_v29  ;;  %v110_v35 = vsel %vm109_vm0, %v7924_v28, %v7918_v23  ;;  %v9996_v46 = vsel %vm17145_vm1, %v7929_v30, %v7933_v32  ;;  %v177_v49 = vsel %vm17145_vm1, %v7934_v33, %v7928_v31 }
  0x7e   :  { %v8155_v36 = vpack.i.bf16 %v9981_v34, %v111_v24  ;;  %v9985_v37 = vpop.permute.xlu1 %7941  ;;  %v7937_v38 = vpop.permute.xlu0 %7936  ;;  %v8160_v39 = vpack.i.bf16 %v110_v35, %v9827_v2  ;;  %v6759_v40 = vpack.c.bf16 %v110_v35, %v9827_v2  ;;  %v8165_v59 = vpack.i.bf16 %v9996_v46, %v178_v45 }
  0x7f   :  { %v7944_v41 = vunpack.i.h.bf16 %v9985_v37  ;;  %v7943_v42 = vunpack.i.l.bf16 %v9985_v37  ;;  %v7939_v43 = vunpack.i.h.bf16 %v7937_v38  ;;  %v7938_v44 = vunpack.i.l.bf16 %v7937_v38 }
  0x80   :  { %8161 = vrot.lane.b32.xlu1 %v8160_v39, %s9727_s15  ;;  %6760 = vmatpush1.bf16.msra.mxu0 %v6759_v40 }
  0x81   :  { %8156 = vrot.lane.b32.xlu0 %v8155_v36, %s9727_s15  ;;  %v245_v47 = vsel %vm243_vm2, %v7938_v44, %v7939_v43  ;;  %v10003_v48 = vsel %vm243_vm2, %v7939_v43, %v7943_v42  ;;  %v244_v50 = vsel %vm243_vm2, %v7944_v41, %v7938_v44 }
  0x82   :  { %v10007_v51 = vpop.permute.xlu1 %7951  ;;  %v7947_v52 = vpop.permute.xlu0 %7946  ;;  %v8170_v53 = vpack.i.bf16 %v10003_v48, %v245_v47  ;;  %v6761_v54 = vpack.c.bf16 %v245_v47, %v178_v45  ;;  %v6763_v55 = vpack.c.bf16 %v244_v50, %v177_v49  ;;  %v8175_v62 = vpack.i.bf16 %v244_v50, %v177_v49 }
  0x83   :  { %v7953_v56 = vunpack.i.l.bf16 %v10007_v51  ;;  %v7949_v57 = vunpack.i.h.bf16 %v7947_v52  ;;  %v10011_v58 = vunpack.i.l.bf16 %v7947_v52 }
  0x84   :  { %8171 = vrot.lane.b32.xlu1 %v8170_v53, %s9727_s15  ;;  %6762 = vmatprep.subr.bf16.mxu0 %v6761_v54  ;;  %v6807_v54 = vpack.c.bf16 %v9981_v34, %v9822_v1 }
  0x85   :  { %8166 = vrot.lane.b32.xlu0 %v8165_v59, %s9727_s15  ;;  %6764 = vmatpush1.bf16.msra.mxu0 %v6763_v55  ;;  %v10020_v63 = vsel %vm377_vm3, %v10011_v58, %v7949_v57  ;;  %v10026_v5 = vsel %vm377_vm3, %v7949_v57, %v7953_v56 }
  0x86   :  { %v10016_v60 = vpop.permute.xlu1 %7961  ;;  %v7957_v61 = vpop.permute.xlu0 %7956  ;;  %v8185_v15 = vpack.i.bf16 %v10026_v5, %v10020_v63 }
  0x87   :  { %v7963_v0 = vunpack.i.l.bf16 %v10016_v60  ;;  %v7959_v2 = vunpack.i.h.bf16 %v7957_v61  ;;  %v7958_v3 = vunpack.i.l.bf16 %v7957_v61 }
  0x88   :  { %8176 = vrot.lane.b32.xlu1 %v8175_v62, %s9727_s15  ;;  %v6811_v62 = vpack.c.bf16 %v10003_v48, %v9996_v46 }
  0x89   :  { %v1113_v6 = vsel %vm1112_vm4, %v7958_v3, %v7959_v2  ;;  %v1114_v8 = vsel %vm1112_vm4, %v7959_v2, %v7963_v0  ;;  %v8200_v40 = vpack.i.bf16 %v10011_v58, %v7958_v3 }
  0x8a   :  { %v10033_v12 = vpop.permute.xlu1 %7971  ;;  %v7967_v13 = vpop.permute.xlu0 %7966  ;;  %v8180_v19 = vpack.i.bf16 %v1114_v8, %v1113_v6 }
  0x8b   :  { %v7973_v28 = vunpack.i.l.bf16 %v10033_v12  ;;  %v7969_v30 = vunpack.i.h.bf16 %v7967_v13  ;;  %v10054_v31 = vunpack.i.l.bf16 %v7967_v13 }
  0x8c   :  { %8186 = vrot.lane.b32.xlu1 %v8185_v15, %s9727_s15  ;;  %8181 = vrot.lane.b32.xlu0 %v8180_v19, %s9727_s15 }
  0x8d   :  { %v10084_v41 = vsel %vm444_vm6, %v10054_v31, %v7969_v30  ;;  %v10089_v43 = vsel %vm444_vm6, %v7969_v30, %v7973_v28 }
  0x8e   :  { %v10039_v20 = vpop.permute.xlu1 %7981  ;;  %v7977_v21 = vpop.permute.xlu0 %7976  ;;  %v8210_v49 = vpack.i.bf16 %v10089_v43, %v10084_v41 }
  0x8f   :  { %v16991_v22 = vunpack.i.l.bf16 %v10039_v20  ;;  %v7979_v23 = vunpack.i.h.bf16 %v7977_v21  ;;  %v10046_v24 = vunpack.i.l.bf16 %v7977_v21  ;;  %v7984_v2 = vunpack.i.h.bf16 %v10039_v20 }
  0x90   :  { %558 = vrot.lane.b32.xlu1 %v9920_v16, %s9717_s22  ;;  %556 = vrot.lane.b32.xlu0 %v9887_v10, %s9717_s22  ;;  %v10066_v10 = vpack.i.bf16 %v10051_v27, %v9952_v18 }
  0x91   :  { %v10070_v35 = vsel %vm511_vm5, %v10046_v24, %v7979_v23  ;;  %v10075_v36 = vsel %vm511_vm5, %v7979_v23, %v16991_v22  ;;  %v8230_v8 = vpack.i.bf16 %v10046_v24, %v10054_v31 }
  0x92   :  { %v10056_v33 = vpop.permute.xlu1 %548  ;;  %v10058_v16 = vpop.permute.xlu0 %546  ;;  %v8215_v45 = vpack.i.bf16 %v10075_v36, %v10070_v35 }
  0x94   :  { %8196 = vrot.lane.b32.xlu1 %v9878_v9, %s9722_s14  ;;  %8191 = vrot.lane.b32.xlu0 %v9878_v9, %s9721_s27 }
  0x96   :  { %v10077_v38 = vpop.permute.xlu1 %7986  ;;  %v10079_v39 = vpop.permute.xlu0 %550 }
  0x97   :  { %v7988_v44 = vunpack.i.l.bf16 %v10077_v38 }
  0x98   :  { %8206 = vrot.lane.b32.xlu1 %v10066_v10, %s17040_s30  ;;  %8201 = vrot.lane.b32.xlu0 %v8200_v40, %s9727_s15 }
  0x99   :  { %v10102_v47 = vsel %vm109_vm0, %v7923_v29, %v7988_v44 }
  0x9a   :  { %v10106_v50 = vpop.permute.xlu1 %7996  ;;  %v10108_v52 = vpop.permute.xlu0 %7991  ;;  %v6805_v53 = vpack.c.bf16 %v10102_v47, %v9836_v4 }
  0x9b   :  { %v16986_v55 = vunpack.i.h.bf16 %v10106_v50  ;;  %v7998_v26 = vunpack.i.l.bf16 %v10106_v50  ;;  %v16985_v29 = vunpack.i.h.bf16 %v10108_v52  ;;  %v7993_v57 = vunpack.i.l.bf16 %v10108_v52 }
  0x9c   :  { %8216 = vrot.lane.b32.xlu1 %v8215_v45, %s9727_s15  ;;  %6806 = vmatprep.subr.bf16.mxu1 %v6805_v53  ;;  %v10194_v53 = vld [vmem:[%s16965_s1 + $0x8] sm:$0xff] }
  0x9d   :  { %8211 = vrot.lane.b32.xlu0 %v8210_v49, %s9727_s15  ;;  %6808 = vmatpush1.bf16.msra.mxu1 %v6807_v54  ;;  %v10123_v4 = vsel %vm17145_vm1, %v7933_v32, %v7993_v57  ;;  %v10128_v1 = vsel %vm243_vm2, %v7943_v42, %v7998_v26  ;;  %v10141_v25 = vsel %vm243_vm2, %v7998_v26, %v16986_v55  ;;  %v7974_v42 = vunpack.i.h.bf16 %v10033_v12 }
  0x9e   :  { %v10130_v34 = vpop.permute.xlu1 %8006  ;;  %v10132_v59 = vpop.permute.xlu0 %8001  ;;  %v6809_v61 = vpack.c.bf16 %v10128_v1, %v10123_v4  ;;  %v10146_v32 = vsel %vm17145_vm1, %v7993_v57, %v16985_v29  ;;  %6285 = vmatprep.mubr.msk.f32.mxu0 %vm16993_vm9, %v10194_v53  ;;  %6286 = vmatprep.mubr.msk.f32.mxu1 %vm16993_vm9, %v10194_v53  ;;  %vm17059_vm9 = vcmask 261120  }
  0x9f   :  { %v8004_v13 = vunpack.i.h.bf16 %v10132_v59 }
  0xa0   :  { %8226 = vrot.lane.b32.xlu1 %v9878_v9, %s16979_s20  ;;  %6810 = vmatprep.subr.bf16.mxu1 %v6809_v61  ;;  %s17417_s20 = smov 125  }
  0xa1   :  { %8221 = vrot.lane.b32.xlu0 %v9878_v9, %s9724_s21  ;;  %6812 = vmatpush1.bf16.msra.mxu1 %v6811_v62  ;;  %v378_v62 = vsel %vm377_vm3, %v8004_v13, %v10011_v58  ;;  %v6769_v58 = vpack.c.bf16 %v10070_v35, %v10084_v41 }
  0xa2   :  { %v10155_v46 = vpop.permute.xlu1 %8016  ;;  %v10157_v48 = vpop.permute.xlu0 %8011 }
  0xa3   :  { %v16984_v3 = vunpack.i.l.bf16 %v10155_v46  ;;  %v16983_v6 = vunpack.i.l.bf16 %v10157_v48  ;;  %v8019_v54 = vunpack.i.h.bf16 %v10155_v46  ;;  %v8014_v26 = vunpack.i.h.bf16 %v10157_v48 }
  0xa4   :  { %8236 = vrot.lane.b32.xlu1 %v10066_v10, %s17008_s29 }
  0xa5   :  { %8231 = vrot.lane.b32.xlu0 %v8230_v8, %s9727_s15  ;;  %v10173_v15 = vsel %vm444_vm6, %v7974_v42, %v16983_v6  ;;  %v10180_v19 = vsel %vm511_vm5, %v7984_v2, %v16984_v3  ;;  %v445_v13 = vsel %vm444_vm6, %v8014_v26, %v10054_v31  ;;  %v16987_v31 = vunpack.i.h.bf16 %v10077_v38 }
  0xa6   :  { %17415 = vst [vmem:[#allocation6_spill] sm:$0xff] %v10173_v15  ;;  %17416 = vst [vmem:[#allocation7_spill] sm:$0xff] %v10180_v19  ;;  %v10182_v21 = vpop.permute.xlu1 %8026  ;;  %v10184_v23 = vpop.permute.xlu0 %8021 }
  0xa7   :  { %v8028_v40 = vunpack.i.l.bf16 %v10182_v21  ;;  %v16990_v45 = vunpack.i.h.bf16 %v10184_v23  ;;  %v8023_v49 = vunpack.i.l.bf16 %v10184_v23 }
  0xa8   :  { %8246 = vrot.lane.b32.xlu1 %v9878_v9, %s17057_s24 }
  0xa9   :  { %8241 = vrot.lane.b32.xlu0 %v10066_v10, %s17417_s20  ;;  %v312_v57 = vsel %vm17101_vm7, %v8023_v49, %v16990_v45  ;;  %v311_v61 = vsel %vm17101_vm7, %v8028_v40, %v8023_v49  ;;  %v580_v40 = vsel %vm578_vm8, %v10058_v16, %v10056_v33  ;;  %v10232_v49 = vld [vmem:[%s16964_s0 + $0x50] sm:$0xff] }
  0xaa   :  { %v10210_v8 = vpop.permute.xlu1 %554  ;;  %v10212_v14 = vpop.permute.xlu0 %552  ;;  %v6765_v30 = vpack.c.bf16 %v10020_v63, %v312_v57  ;;  %v6767_v37 = vpack.c.bf16 %v378_v62, %v311_v61  ;;  %v512_v63 = vsel %vm511_vm5, %v8019_v54, %v10046_v24 }
  0xab   :  { %v6771_v41 = vpack.c.bf16 %v512_v63, %v445_v13 }
  0xac   :  { %1402 = vrot.lane.b32.xlu1 %v580_v40, %s9727_s15  ;;  %6766 = vmatprep.subr.bf16.mxu0 %v6765_v30 }
  0xad   :  { %8251 = vrot.lane.b32.xlu0 %v9878_v9, %s17055_s23  ;;  %6768 = vmatpush1.bf16.msra.mxu0 %v6767_v37  ;;  %v10246_v9 = vsel %vm578_vm8, %v10056_v33, %v10079_v39  ;;  %v8260_v37 = vpack.i.bf16 %v10232_v49, %v10051_v27  ;;  %v10263_v33 = vsel %vm109_vm0, %v7988_v44, %v16987_v31 }
  0xae   :  { %v10234_v57 = vpop.permute.xlu1 %8036  ;;  %v10236_v30 = vpop.permute.xlu0 %8031  ;;  %6770 = vmatprep.subr.bf16.mxu0 %v6769_v58  ;;  %v8270_v6 = vpack.i.bf16 %v10263_v33, %v10102_v47  ;;  %v16999_v47 = vunpack.i.l.bf16 %v10130_v34 }
  0xaf   :  { %17418 = vst [vmem:[#allocation8_spill] sm:$0xff] %v10234_v57  ;;  %v16989_v35 = vunpack.i.h.bf16 %v10236_v30  ;;  %v8033_v24 = vunpack.i.l.bf16 %v10236_v30  ;;  %v8038_v54 = vunpack.i.l.bf16 %v10234_v57 }
  0xb0   :  { %1400 = vrot.lane.b32.xlu1 %v10058_v16, %s9727_s15 }
  0xb1   :  { %1404 = vrot.lane.b32.xlu0 %v10246_v9, %s9727_s15  ;;  %6772 = vmatpush1.bf16.msra.mxu0 %v6771_v41  ;;  %v647_v26 = vsel %vm17011_vm10, %v8033_v24, %v16989_v35 }
  0xb2   :  { %v8047_v61 = vpop.permute.xlu1 %8046  ;;  %v10256_v62 = vpop.permute.xlu0 %8041  ;;  %v6773_v58 = vpack.c.bf16 %v647_v26, %v580_v40  ;;  %v579_v40 = vsel %vm578_vm8, %v8038_v54, %v10058_v16 }
  0xb3   :  { %v8049_v13 = vunpack.i.h.bf16 %v8047_v61  ;;  %v8048_v63 = vunpack.i.l.bf16 %v8047_v61  ;;  %v8043_v41 = vunpack.i.l.bf16 %v10256_v62 }
  0xb4   :  { %8261 = vrot.lane.b32.xlu1 %v8260_v37, %s17053_s17  ;;  %6774 = vmatprep.subr.bf16.mxu0 %v6773_v58 }
  0xb5   :  { %8256 = vrot.lane.b32.xlu0 %v10066_v10, %s17051_s16  ;;  %v646_v26 = vsel %vm17011_vm10, %v8043_v41, %v8033_v24  ;;  %v714_v29 = vsel %vm712_vm11, %v8048_v63, %v8049_v13 }
  0xb6   :  { %v10274_v44 = vpop.permute.xlu1 %8056  ;;  %v8052_v3 = vpop.permute.xlu0 %8051  ;;  %v6775_v61 = vpack.c.bf16 %v646_v26, %v579_v40 }
  0xb7   :  { %v16988_v37 = vunpack.i.h.bf16 %v10274_v44  ;;  %v8058_v58 = vunpack.i.l.bf16 %v10274_v44  ;;  %v8054_v55 = vunpack.i.h.bf16 %v8052_v3  ;;  %v8053_v31 = vunpack.i.l.bf16 %v8052_v3 }
  0xb8   :  { %6776 = vmatpush1.bf16.msra.mxu0 %v6775_v61  ;;  %8271 = vrot.lane.b32.xlu1 %v8270_v6, %s9727_s15 }
  0xb9   :  { %8266 = vrot.lane.b32.xlu0 %v9853_v7, %s9727_s15  ;;  %v781_v16 = vsel %vm779_vm12, %v8053_v31, %v8054_v55  ;;  %v713_v3 = vsel %vm712_vm11, %v8058_v58, %v8048_v63  ;;  %v10294_v6 = vsel %vm712_vm11, %v8049_v13, %v16988_v37  ;;  %v7964_v7 = vunpack.i.h.bf16 %v10016_v60 }
  0xba   :  { %v10284_v24 = vpop.permute.xlu1 %8066  ;;  %v10286_v54 = vpop.permute.xlu0 %8061  ;;  %v6777_v41 = vpack.c.bf16 %v781_v16, %v714_v29  ;;  %v16998_v29 = vunpack.i.l.bf16 %v10132_v59  ;;  %v8290_v63 = vpack.i.bf16 %v10141_v25, %v10128_v1 }
  0xbb   :  { %v16997_v40 = vunpack.i.h.bf16 %v10286_v54  ;;  %v8063_v26 = vunpack.i.l.bf16 %v10286_v54  ;;  %v1116_v37 = vsel %vm1112_vm4, %v7964_v7, %v16999_v47 }
  0xbc   :  { %8281 = vrot.lane.b32.xlu1 %v10066_v10, %s17135_s19  ;;  %6778 = vmatprep.subr.bf16.mxu0 %v6777_v41  ;;  %v8285_v41 = vpack.i.bf16 %v10146_v32, %v10123_v4  ;;  %v1115_v4 = vsel %vm1112_vm4, %v7963_v0, %v7964_v7 }
  0xbd   :  { %8276 = vrot.lane.b32.xlu0 %v10066_v10, %s9715_s18  ;;  %v780_v61 = vsel %vm779_vm12, %v8063_v26, %v8053_v31  ;;  %v10308_v13 = vsel %vm779_vm12, %v8054_v55, %v16997_v40  ;;  %v7954_v55 = vunpack.i.h.bf16 %v10007_v51 }
  0xbe   :  { %v8077_v58 = vpop.permute.xlu1 %8076  ;;  %v8072_v16 = vpop.permute.xlu0 %8071  ;;  %v6779_v35 = vpack.c.bf16 %v780_v61, %v713_v3 }
  0xbf   :  { %v8079_v45 = vunpack.i.h.bf16 %v8077_v58  ;;  %v8078_v31 = vunpack.i.l.bf16 %v8077_v58  ;;  %v8074_v26 = vunpack.i.h.bf16 %v8072_v16  ;;  %v8073_v22 = vunpack.i.l.bf16 %v8072_v16 }
  0xc0   :  { %8291 = vrot.lane.b32.xlu1 %v8290_v63, %s9727_s15  ;;  %6780 = vmatpush1.bf16.msra.mxu0 %v6779_v35  ;;  %v8300_v16 = vpack.i.bf16 %v1116_v37, %v1115_v4  ;;  %v10332_v63 = vsel %vm377_vm3, %v7954_v55, %v16998_v29  ;;  %v381_v37 = vsel %vm377_vm3, %v7953_v56, %v7954_v55 }
  0xc1   :  { %8286 = vrot.lane.b32.xlu0 %v8285_v41, %s9727_s15  ;;  %v848_v3 = vsel %vm846_vm13, %v8073_v22, %v8074_v26  ;;  %v915_v61 = vsel %vm913_vm14, %v8078_v31, %v8079_v45  ;;  %17419 = vst [vmem:[#allocation9_spill] sm:$0xff] %v10332_v63  ;;  %v8305_v55 = vpack.i.bf16 %v10332_v63, %v381_v37 }
  0xc2   :  { %v10325_v1 = vpop.permute.xlu1 %8086  ;;  %v10327_v58 = vpop.permute.xlu0 %8081  ;;  %v6781_v35 = vpack.c.bf16 %v915_v61, %v848_v3 }
  0xc3   :  { %v16996_v41 = vunpack.i.h.bf16 %v10325_v1  ;;  %v8088_v60 = vunpack.i.l.bf16 %v10325_v1  ;;  %v16994_v0 = vunpack.i.h.bf16 %v10327_v58  ;;  %v8083_v7 = vunpack.i.l.bf16 %v10327_v58 }
  0xc4   :  { %8301 = vrot.lane.b32.xlu1 %v8300_v16, %s9727_s15  ;;  %6782 = vmatprep.subr.bf16.mxu0 %v6781_v35 }
  0xc5   :  { %8296 = vrot.lane.b32.xlu0 %v9927_v17, %s17075_s25  ;;  %v847_v4 = vsel %vm846_vm13, %v8083_v7, %v8073_v22  ;;  %v914_v3 = vsel %vm913_vm14, %v8088_v60, %v8078_v31  ;;  %v10349_v61 = vsel %vm846_vm13, %v8074_v26, %v16994_v0  ;;  %v10354_v16 = vsel %vm913_vm14, %v8079_v45, %v16996_v41 }
  0xc6   :  { %v10356_v51 = vpop.permute.xlu1 %8096  ;;  %v10358_v56 = vpop.permute.xlu0 %8091  ;;  %v6783_v35 = vpack.c.bf16 %v914_v3, %v847_v4 }
  0xc7   :  { %v16992_v31 = vunpack.i.h.bf16 %v10356_v51  ;;  %v17001_v26 = vunpack.i.l.bf16 %v10356_v51  ;;  %v16995_v60 = vunpack.i.h.bf16 %v10358_v56  ;;  %v17000_v7 = vunpack.i.l.bf16 %v10358_v56 }
  0xc8   :  { %560 = vrot.lane.b32.xlu1 %v9952_v18, %s9717_s22  ;;  %6784 = vmatpush1.bf16.msra.mxu0 %v6783_v35  ;;  %v448_v18 = vsel %vm444_vm6, %v7973_v28, %v7974_v42 }
  0xc9   :  { %v10374_v45 = vsel %vm243_vm2, %v17001_v26, %v16992_v31  ;;  %v10381_v4 = vsel %vm17145_vm1, %v17000_v7, %v16995_v60  ;;  %8306 = vrot.lane.b32.xlu0 %v8305_v55, %s9727_s15  ;;  %v8310_v31 = vpack.i.bf16 %v10173_v15, %v448_v18  ;;  %v8029_v55 = vunpack.i.h.bf16 %v10182_v21 }
  0xca   :  { %17420 = vst [vmem:[#allocation10_spill] sm:$0xff] %v10374_v45  ;;  %17421 = vst [vmem:[#allocation11_spill] sm:$0xff] %v10381_v4  ;;  %v8107_v3 = vpop.permute.xlu1 %8106  ;;  %v8102_v35 = vpop.permute.xlu0 %8101  ;;  %v17423_v26 = vunpack.i.h.bf16 %v10184_v23 }
  0xcb   :  { %v8109_v0 = vunpack.i.h.bf16 %v8107_v3  ;;  %v8108_v60 = vunpack.i.l.bf16 %v8107_v3  ;;  %v8104_v41 = vunpack.i.h.bf16 %v8102_v35  ;;  %v8103_v40 = vunpack.i.l.bf16 %v8102_v35 }
  0xcc   :  { %8311 = vrot.lane.b32.xlu1 %v8310_v31, %s9727_s15  ;;  %v17422_v3 = vunpack.i.l.bf16 %v10039_v20  ;;  %v313_v57 = vsel %vm17101_vm7, %v17423_v26, %v8029_v55 }
  0xcd   :  { %562 = vrot.lane.b32.xlu0 %v10051_v27, %s9717_s22  ;;  %v982_v12 = vsel %vm980_vm15, %v8103_v40, %v8104_v41  ;;  %v1049_v28 = vsel %vm17059_vm9, %v8108_v60, %v8109_v0  ;;  %v6815_v20 = vpack.c.bf16 %v10026_v5, %v313_v57 }
  0xce   :  { %v10398_v42 = vpop.permute.xlu1 %8116  ;;  %v10400_v29 = vpop.permute.xlu0 %8111  ;;  %v515_v35 = vsel %vm511_vm5, %v17422_v3, %v7984_v2  ;;  %v6785_v21 = vpack.c.bf16 %v1049_v28, %v982_v12 }
  0xcf   :  { %v8118_v31 = vunpack.i.l.bf16 %v10398_v42  ;;  %v17004_v22 = vunpack.i.h.bf16 %v10400_v29  ;;  %v8113_v47 = vunpack.i.l.bf16 %v10400_v29  ;;  %v8315_v7 = vpack.i.bf16 %v10180_v19, %v515_v35 }
  0xd0   :  { %8321 = vrot.lane.b32.xlu1 %v9927_v17, %s9720_s26  ;;  %6786 = vmatprep.subr.bf16.mxu0 %v6785_v21 }
  0xd1   :  { %v10420_v2 = vsel %vm17101_vm7, %v8113_v47, %v17004_v22  ;;  %8316 = vrot.lane.b32.xlu0 %v8315_v7, %s9727_s15  ;;  %v314_v12 = vsel %vm17101_vm7, %v8029_v55, %v8113_v47  ;;  %v981_v22 = vsel %vm980_vm15, %v8118_v31, %v8103_v40  ;;  %v6817_v47 = vpack.c.bf16 %v515_v35, %v448_v18 }
  0xd2   :  { %17424 = vst [vmem:[#allocation12_spill] sm:$0xff] %v10420_v2  ;;  %v10424_v28 = vpop.permute.xlu1 %8126  ;;  %v10426_v3 = vpop.permute.xlu0 %8121  ;;  %v6813_v15 = vpack.c.bf16 %v381_v37, %v314_v12  ;;  %v17425_v7 = vunpack.i.h.bf16 %v10398_v42 }
  0xd3   :  { %v17007_v26 = vunpack.i.h.bf16 %v10426_v3  ;;  %v8123_v21 = vunpack.i.l.bf16 %v10426_v3 }
  0xd4   :  { %8331 = vrot.lane.b32.xlu1 %v9927_v17, %s9722_s14  ;;  %6814 = vmatprep.subr.bf16.mxu1 %v6813_v15  ;;  %v10442_v55 = vsel %vm980_vm15, %v8104_v41, %v17425_v7  ;;  %v10451_v15 = vld [vmem:[%s16964_s0 + $0x58] sm:$0xff]  ;;  %v10461_v41 = vsel %vm578_vm8, %v10212_v14, %v10210_v8 }
  0xd5   :  { %8326 = vrot.lane.b32.xlu0 %v9927_v17, %s9721_s27  ;;  %6816 = vmatpush1.bf16.msra.mxu1 %v6815_v20  ;;  %v1048_v37 = vsel %vm17059_vm9, %v8123_v21, %v8108_v60  ;;  %v10456_v40 = vsel %vm17059_vm9, %v8109_v0, %v17007_v26  ;;  %17426 = vst [vmem:[#allocation13_spill] sm:$0xff] %v10461_v41  ;;  %v8044_v20 = vunpack.i.h.bf16 %v10256_v62 }
  0xd6   :  { %v10444_v12 = vpop.permute.xlu1 %8136  ;;  %v10446_v5 = vpop.permute.xlu0 %8131  ;;  %6818 = vmatprep.subr.bf16.mxu1 %v6817_v47  ;;  %v6787_v57 = vpack.c.bf16 %v1048_v37, %v981_v22  ;;  %v6819_v60 = vpack.c.bf16 %v10075_v36, %v10089_v43  ;;  %v582_v22 = vsel %vm578_vm8, %v10079_v39, %v10212_v14  ;;  %v10475_v18 = vpack.i.bf16 %v10451_v15, %v10232_v49 }
  0xd7   :  { %v17022_v0 = vunpack.i.l.bf16 %v10446_v5 }
  0xd8   :  { %1408 = vrot.lane.b32.xlu1 %v10461_v41, %s9727_s15  ;;  %6788 = vmatpush1.bf16.msra.mxu0 %v6787_v57 }
  0xd9   :  { %1406 = vrot.lane.b32.xlu0 %v582_v22, %s9727_s15  ;;  %6820 = vmatpush1.bf16.msra.mxu1 %v6819_v60  ;;  %v17430_v60 = vunpack.i.h.bf16 %v10236_v30  ;;  %v10533_v30 = vld [vmem:[%s16964_s0 + $0x60] sm:$0xff] }
  0xda   :  { %v10477_v35 = vpop.permute.xlu1 %8146  ;;  %v10479_v36 = vpop.permute.xlu0 %8141 }
  0xdb   :  { %v17005_v43 = vunpack.i.h.bf16 %v10477_v35  ;;  %v17014_v31 = vunpack.i.l.bf16 %v10477_v35  ;;  %v17006_v14 = vunpack.i.h.bf16 %v10479_v36  ;;  %v17013_v39 = vunpack.i.l.bf16 %v10479_v36 }
  0xdc   :  { %8341 = vrot.lane.b32.xlu1 %v9927_v17, %s9724_s21  ;;  %v648_v23 = vsel %vm17011_vm10, %v17430_v60, %v8044_v20  ;;  %v17437_v60 = vunpack.i.l.bf16 %v10358_v56 }
  0xdd   :  { %v10493_v21 = vsel %vm511_vm5, %v17014_v31, %v17005_v43  ;;  %v10500_v47 = vsel %vm444_vm6, %v17013_v39, %v17006_v14  ;;  %8336 = vrot.lane.b32.xlu0 %v10475_v18, %s17040_s30  ;;  %v6823_v26 = vpack.c.bf16 %v648_v23, %v10246_v9  ;;  %v8380_v9 = vpack.i.bf16 %v10533_v30, %v10451_v15 }
  0xde   :  { %17427 = vst [vmem:[#allocation14_spill] sm:$0xff] %v10493_v21  ;;  %17428 = vst [vmem:[#allocation15_spill] sm:$0xff] %v10500_v47  ;;  %v10504_v62 = vpop.permute.xlu0 %8151  ;;  %v17433_v23 = vunpack.i.h.bf16 %v10077_v38  ;;  %v17436_v38 = vunpack.i.h.bf16 %v10106_v50  ;;  %v8128_v39 = vunpack.i.l.bf16 %v10424_v28 }
  0xdf   :  { %17429 = vst [vmem:[#allocation16_spill] sm:$0xff] %v10504_v62  ;;  %v17010_v7 = vunpack.i.h.bf16 %v10504_v62  ;;  %v8153_v57 = vunpack.i.l.bf16 %v10504_v62 }
  0xe0   :  { %8351 = vrot.lane.b32.xlu1 %v10475_v18, %s17008_s29  ;;  %s17455_s29 = smov 126  }
  0xe1   :  { %v10518_v43 = vsel %vm17011_vm10, %v8153_v57, %v17010_v7  ;;  %8346 = vrot.lane.b32.xlu0 %v9927_v17, %s17432_s28  ;;  %v649_v37 = vsel %vm17011_vm10, %v8044_v20, %v8153_v57  ;;  %v8068_v20 = vunpack.i.l.bf16 %v10284_v24  ;;  %vm1434_vm10 = vcmask 252928  }
  0xe2   :  { %17431 = vst [vmem:[#allocation17_spill] sm:$0xff] %v10518_v43  ;;  %v6821_v14 = vpack.c.bf16 %v649_v37, %v582_v22  ;;  %v17012_v22 = vunpack.i.h.bf16 %v10284_v24 }
  0xe4   :  { %8361 = vrot.lane.b32.xlu1 %v9927_v17, %s17057_s24  ;;  %6822 = vmatprep.subr.bf16.mxu1 %v6821_v14  ;;  %v10551_v14 = vsel %vm109_vm0, %v8068_v20, %v17012_v22 }
  0xe5   :  { %8356 = vrot.lane.b32.xlu0 %v10475_v18, %s17417_s20  ;;  %6824 = vmatpush1.bf16.msra.mxu1 %v6823_v26  ;;  %v10546_v26 = vsel %vm109_vm0, %v17433_v23, %v8068_v20  ;;  %17434 = vst [vmem:[#allocation18_spill] sm:$0xff] %v10551_v14  ;;  %v17438_v20 = vunpack.i.h.bf16 %v10108_v52 }
  0xe6   :  { %v8390_v37 = vpack.i.bf16 %v10551_v14, %v10546_v26 }
  0xe8   :  { %8371 = vrot.lane.b32.xlu1 %v10066_v10, %s17075_s25 }
  0xe9   :  { %8366 = vrot.lane.b32.xlu0 %v9927_v17, %s17055_s23  ;;  %v17435_v17 = vunpack.i.l.bf16 %v10356_v51 }
  0xeb   :  { %v10564_v57 = vsel %vm243_vm2, %v17436_v38, %v17435_v17 }
  0xec   :  { %8381 = vrot.lane.b32.xlu1 %v8380_v9, %s17053_s17  ;;  %v10573_v9 = vsel %vm17145_vm1, %v17438_v20, %v17437_v60  ;;  %v8410_v60 = vpack.i.bf16 %v10374_v45, %v10564_v57  ;;  %v17439_v45 = vunpack.i.h.bf16 %v10444_v12 }
  0xed   :  { %8376 = vrot.lane.b32.xlu0 %v10475_v18, %s17051_s16 }
  0xf0   :  { %8391 = vrot.lane.b32.xlu1 %v8390_v37, %s9727_s15  ;;  %v8138_v37 = vunpack.i.l.bf16 %v10444_v12 }
  0xf1   :  { %8386 = vrot.lane.b32.xlu0 %v9894_v11, %s9727_s15  ;;  %v8009_v11 = vunpack.i.h.bf16 %v10130_v34 }
  0xf2   :  { %v8162_v50 = vpop.permute.xlu1 %8161  ;;  %v1436_v20 = vsel %vm1434_vm10, %v8138_v37, %v17439_v45  ;;  %v17441_v45 = vunpack.i.l.bf16 %v10130_v34 }
  0xf3   :  { %v8164_v7 = vunpack.i.h.bf16 %v8162_v50  ;;  %v8163_v17 = vunpack.i.l.bf16 %v8162_v50  ;;  %v10578_v38 = vpop.permute.xlu0 %8156  ;;  %v8405_v50 = vpack.i.bf16 %v10381_v4, %v10573_v9  ;;  %v1118_v22 = vsel %vm1112_vm4, %v8009_v11, %v17022_v0 }
  0xf4   :  { %v8158_v52 = vunpack.i.l.bf16 %v10578_v38  ;;  %8401 = vrot.lane.b32.xlu1 %v10475_v18, %s17135_s19  ;;  %v17440_v14 = vunpack.i.h.bf16 %v10578_v38 }
  0xf5   :  { %8396 = vrot.lane.b32.xlu0 %v10475_v18, %s9715_s18  ;;  %v1435_v31 = vsel %vm1434_vm10, %v8163_v17, %v8138_v37 }
  0xf6   :  { %v10597_v23 = vpop.permute.xlu1 %8171  ;;  %v1452_v41 = vsel %vm1434_vm10, %v8158_v52, %v17440_v14  ;;  %v1451_v43 = vsel %vm1434_vm10, %v8164_v7, %v8158_v52  ;;  %v1117_v14 = vsel %vm1112_vm4, %v17441_v45, %v8009_v11  ;;  %v17443_v11 = vunpack.i.h.bf16 %v10424_v28 }
  0xf7   :  { %v17028_v4 = vunpack.i.h.bf16 %v10597_v23  ;;  %v8173_v17 = vunpack.i.l.bf16 %v10597_v23  ;;  %v10608_v62 = vpop.permute.xlu0 %8166  ;;  %v6789_v19 = vpack.c.bf16 %v1452_v41, %v1436_v20  ;;  %v6791_v0 = vpack.c.bf16 %v1451_v43, %v1435_v31 }
  0xf8   :  { %v17027_v2 = vunpack.i.h.bf16 %v10608_v62  ;;  %v8168_v63 = vunpack.i.l.bf16 %v10608_v62  ;;  %8411 = vrot.lane.b32.xlu1 %v8410_v60, %s9727_s15  ;;  %v17442_v41 = vunpack.i.l.bf16 %v10132_v59  ;;  %v8420_v37 = vpack.i.bf16 %v1118_v22, %v1117_v14 }
  0xf9   :  { %8406 = vrot.lane.b32.xlu0 %v8405_v50, %s9727_s15  ;;  %6790 = vmatprep.subr.bf16.mxu0 %v6789_v19  ;;  %v1484_v7 = vsel %vm1434_vm10, %v8173_v17, %v17028_v4  ;;  %v10631_v19 = vsel %vm377_vm3, %v8128_v39, %v17443_v11 }
  0xfa   :  { %v10623_v43 = vsel %vm377_vm3, %v17442_v41, %v8128_v39  ;;  %6792 = vmatpush1.bf16.msra.mxu0 %v6791_v0  ;;  %v8177_v31 = vpop.permute.xlu1 %8176  ;;  %v1468_v34 = vsel %vm1434_vm10, %v8168_v63, %v17027_v2  ;;  %17444 = vst [vmem:[#allocation19_spill] sm:$0xff] %v10631_v19 }
  0xfb   :  { %v8179_v52 = vunpack.i.h.bf16 %v8177_v31  ;;  %v8178_v60 = vunpack.i.l.bf16 %v8177_v31  ;;  %v6793_v20 = vpack.c.bf16 %v1484_v7, %v1468_v34  ;;  %v8425_v39 = vpack.i.bf16 %v10631_v19, %v10623_v43 }
  0xfc   :  { %8421 = vrot.lane.b32.xlu1 %v8420_v37, %s9727_s15  ;;  %v10660_v37 = vld [vmem:[%s16964_s0 + $0x68] sm:$0xff] }
  0xfd   :  { %8416 = vrot.lane.b32.xlu0 %v10066_v10, %s9720_s26  ;;  %6794 = vmatprep.subr.bf16.mxu0 %v6793_v20  ;;  %v1467_v59 = vsel %vm1434_vm10, %v8178_v60, %v8168_v63  ;;  %v1483_v0 = vsel %vm1434_vm10, %v8179_v52, %v8173_v17  ;;  %v10670_v52 = vpack.i.bf16 %v10660_v37, %v10533_v30  ;;  %v17445_v60 = vunpack.i.l.bf16 %v10477_v35 }
  0xfe   :  { %v10638_v22 = vpop.permute.xlu1 %8186  ;;  %v10640_v50 = vpop.permute.xlu0 %8181  ;;  %v6795_v45 = vpack.c.bf16 %v1483_v0, %v1467_v59  ;;  %v17446_v20 = vunpack.i.l.bf16 %v10155_v46 }
  0xff   :  { %v17025_v14 = vunpack.i.h.bf16 %v10638_v22  ;;  %v8188_v7 = vunpack.i.l.bf16 %v10638_v22  ;;  %v17026_v41 = vunpack.i.h.bf16 %v10640_v50  ;;  %v8183_v31 = vunpack.i.l.bf16 %v10640_v50 }
 0x100   :  { %564 = vrot.lane.b32.xlu1 %v10232_v49, %s9717_s22  ;;  %6796 = vmatpush1.bf16.msra.mxu0 %v6795_v45  ;;  %v10679_v59 = vsel %vm511_vm5, %v17446_v20, %v17445_v60 }
 0x101   :  { %8426 = vrot.lane.b32.xlu0 %v8425_v39, %s9727_s15  ;;  %v1500_v63 = vsel %vm1434_vm10, %v8183_v31, %v17026_v41  ;;  %v1516_v17 = vsel %vm1434_vm10, %v8188_v7, %v17025_v14  ;;  %v17449_v14 = vunpack.i.l.bf16 %v10479_v36  ;;  %v17450_v41 = vunpack.i.l.bf16 %v10157_v48 }
 0x102   :  { %v10662_v34 = vpop.permute.xlu1 %558  ;;  %v10664_v11 = vpop.permute.xlu0 %556  ;;  %v6797_v49 = vpack.c.bf16 %v1516_v17, %v1500_v63  ;;  %v17451_v48 = vunpack.i.h.bf16 %v10274_v44  ;;  %v8450_v19 = vpack.i.bf16 %v10493_v21, %v10679_v59 }
 0x103   :  { %v10694_v46 = vsel %vm444_vm6, %v17450_v41, %v17449_v14  ;;  %v17452_v41 = vunpack.i.h.bf16 %v10286_v54  ;;  %v10728_v54 = vld [vmem:[%s16964_s0 + $0x40] sm:$0xff] }
 0x104   :  { %8431 = vrot.lane.b32.xlu1 %v10066_v10, %s9721_s27  ;;  %6798 = vmatprep.subr.bf16.mxu0 %v6797_v49  ;;  %v8445_v44 = vpack.i.bf16 %v10500_v47, %v10694_v46 }
 0x105   :  { %566 = vrot.lane.b32.xlu0 %v10451_v15, %s9717_s22 }
 0x106   :  { %v10681_v0 = vpop.permute.xlu1 %8196  ;;  %v10683_v39 = vpop.permute.xlu0 %8191 }
 0x107   :  { %17447 = vst [vmem:[#allocation20_spill] sm:$0xff] %v10681_v0  ;;  %17448 = vst [vmem:[#allocation21_spill] sm:$0xff] %v10683_v39  ;;  %v17029_v45 = vunpack.i.h.bf16 %v10681_v0  ;;  %v8198_v63 = vunpack.i.l.bf16 %v10681_v0  ;;  %v17032_v17 = vunpack.i.h.bf16 %v10683_v39  ;;  %v8193_v49 = vunpack.i.l.bf16 %v10683_v39 }
 0x108   :  { %8441 = vrot.lane.b32.xlu1 %v10670_v52, %s17040_s30  ;;  %s17499_s30 = smov 127  }
 0x109   :  { %v10701_v60 = vsel %vm779_vm12, %v8198_v63, %v17029_v45  ;;  %v10706_v20 = vsel %vm712_vm11, %v8193_v49, %v17032_v17  ;;  %8436 = vrot.lane.b32.xlu0 %v10066_v10, %s9722_s14  ;;  %v716_v14 = vsel %vm712_vm11, %v17451_v48, %v8193_v49  ;;  %v783_v2 = vsel %vm779_vm12, %v17452_v41, %v8198_v63 }
 0x10a   :  { %v10716_v4 = vpop.permute.xlu1 %8206  ;;  %v8202_v45 = vpop.permute.xlu0 %8201  ;;  %v6825_v39 = vpack.c.bf16 %v783_v2, %v716_v14  ;;  %v8460_v63 = vpack.i.bf16 %v10051_v27, %v10728_v54  ;;  %v17453_v2 = vpack.c.bf16 %v10308_v13, %v10294_v6  ;;  %v17456_v17 = vunpack.i.h.bf16 %v10325_v1 }
 0x10b   :  { %v8204_v0 = vunpack.i.h.bf16 %v8202_v45  ;;  %v8203_v10 = vunpack.i.l.bf16 %v8202_v45 }
 0x10c   :  { %8451 = vrot.lane.b32.xlu1 %v8450_v19, %s9727_s15  ;;  %6826 = vmatprep.subr.bf16.mxu1 %v6825_v39 }
 0x10d   :  { %8446 = vrot.lane.b32.xlu0 %v8445_v44, %s9727_s15  ;;  %6828 = vmatpush1.bf16.msra.mxu1 %v17453_v2  ;;  %v1499_v45 = vsel %vm1434_vm10, %v8203_v10, %v8183_v31  ;;  %v1515_v19 = vsel %vm1434_vm10, %v8204_v0, %v8188_v7 }
 0x10e   :  { %v10737_v49 = vpop.permute.xlu1 %8216  ;;  %v6799_v41 = vpack.c.bf16 %v1515_v19, %v1499_v45 }
 0x10f   :  { %v17034_v39 = vunpack.i.h.bf16 %v10737_v49  ;;  %v8218_v48 = vunpack.i.l.bf16 %v10737_v49  ;;  %v10742_v14 = vpop.permute.xlu0 %8211 }
 0x110   :  { %v17035_v27 = vunpack.i.h.bf16 %v10742_v14  ;;  %v8213_v44 = vunpack.i.l.bf16 %v10742_v14  ;;  %8461 = vrot.lane.b32.xlu1 %v8460_v63, %s17432_s28  ;;  %6800 = vmatpush1.bf16.msra.mxu0 %v6799_v41 }
 0x111   :  { %8456 = vrot.lane.b32.xlu0 %v8460_v63, %s9724_s21  ;;  %v1548_v6 = vsel %vm1434_vm10, %v8218_v48, %v17034_v39 }
 0x112   :  { %v10751_v13 = vpop.permute.xlu1 %8226  ;;  %v1532_v7 = vsel %vm1434_vm10, %v8213_v44, %v17035_v27  ;;  %v17459_v27 = vunpack.i.h.bf16 %v10327_v58 }
 0x113   :  { %17454 = vst [vmem:[#allocation22_spill] sm:$0xff] %v10751_v13  ;;  %v17036_v31 = vunpack.i.h.bf16 %v10751_v13  ;;  %v8228_v0 = vunpack.i.l.bf16 %v10751_v13  ;;  %v10758_v10 = vpop.permute.xlu0 %8221  ;;  %v6801_v2 = vpack.c.bf16 %v1548_v6, %v1532_v7 }
 0x114   :  { %v17042_v45 = vunpack.i.h.bf16 %v10758_v10  ;;  %v8223_v19 = vunpack.i.l.bf16 %v10758_v10  ;;  %8471 = vrot.lane.b32.xlu1 %v10670_v52, %s17417_s20 }
 0x115   :  { %v10767_v41 = vsel %vm913_vm14, %v8228_v0, %v17036_v31  ;;  %8466 = vrot.lane.b32.xlu0 %v10670_v52, %s17455_s29  ;;  %6802 = vmatprep.subr.bf16.mxu0 %v6801_v2  ;;  %v917_v6 = vsel %vm913_vm14, %v17456_v17, %v8228_v0  ;;  %v10791_v17 = vld [vmem:[%s16964_s0 + $0x70] sm:$0xff]  ;;  %v10809_v2 = vsel %vm578_vm8, %v10664_v11, %v10662_v34 }
 0x116   :  { %v10777_v7 = vsel %vm846_vm13, %v8223_v19, %v17042_v45  ;;  %v10779_v39 = vpop.permute.xlu1 %8236  ;;  %v850_v31 = vsel %vm846_vm13, %v17459_v27, %v8223_v19  ;;  %v8208_v19 = vunpack.i.l.bf16 %v10716_v4  ;;  %17462 = vst [vmem:[#allocation26_spill] sm:$0xff] %v10809_v2 }
 0x117   :  { %17457 = vst [vmem:[#allocation23_spill] sm:$0xff] %v10777_v7  ;;  %17458 = vst [vmem:[#allocation24_spill] sm:$0xff] %v10779_v39  ;;  %v8232_v47 = vpop.permute.xlu0 %8231  ;;  %v6829_v21 = vpack.c.bf16 %v917_v6, %v850_v31  ;;  %v17043_v58 = vunpack.i.h.bf16 %v10779_v39  ;;  %v8238_v27 = vunpack.i.l.bf16 %v10779_v39  ;;  %v17460_v31 = vpack.c.bf16 %v10354_v16, %v10349_v61 }
 0x118   :  { %v8234_v13 = vunpack.i.h.bf16 %v8232_v47  ;;  %v8233_v1 = vunpack.i.l.bf16 %v8232_v47  ;;  %8481 = vrot.lane.b32.xlu1 %v8460_v63, %s17055_s23  ;;  %s17523_s23 = smov 96  }
 0x119   :  { %8476 = vrot.lane.b32.xlu0 %v8460_v63, %s17057_s24  ;;  %6830 = vmatprep.subr.bf16.mxu1 %v6829_v21  ;;  %v17045_v21 = vunpack.i.h.bf16 %v10716_v4  ;;  %s18193_s24 = smov 94  }
 0x11a   :  { %6832 = vmatpush1.bf16.msra.mxu1 %v17460_v31  ;;  %v10798_v0 = vpop.permute.xlu1 %8246  ;;  %v1531_v47 = vsel %vm1434_vm10, %v8233_v1, %v8213_v44  ;;  %v1547_v63 = vsel %vm1434_vm10, %v8234_v13, %v8218_v48  ;;  %v10818_v48 = vsel %vm578_vm8, %v10210_v8, %v10664_v11  ;;  %v8490_v44 = vpack.i.bf16 %v10791_v17, %v10660_v37 }
 0x11b   :  { %v10804_v6 = vpop.permute.xlu0 %8241  ;;  %v6803_v45 = vpack.c.bf16 %v1547_v63, %v1531_v47  ;;  %v10827_v13 = vsel %vm17145_vm1, %v8238_v27, %v17043_v58  ;;  %v17465_v11 = vunpack.i.h.bf16 %v10284_v24  ;;  %v10856_v24 = vld [vmem:[%s16964_s0 + $0x38] sm:$0xff]  ;;  %v17467_v58 = vunpack.i.l.bf16 %v10798_v0 }
 0x11c   :  { %17461 = vst [vmem:[#allocation25_spill] sm:$0xff] %v10804_v6  ;;  %v17044_v61 = vunpack.i.h.bf16 %v10804_v6  ;;  %v8243_v16 = vunpack.i.l.bf16 %v10804_v6  ;;  %1412 = vrot.lane.b32.xlu1 %v10809_v2, %s9727_s15  ;;  %17463 = vst [vmem:[#allocation27_spill] sm:$0xff] %v10827_v13  ;;  %v17469_v2 = vunpack.i.h.bf16 %v10426_v3 }
 0x11d   :  { %1410 = vrot.lane.b32.xlu0 %v10818_v48, %s9727_s15  ;;  %6804 = vmatpush1.bf16.msra.mxu0 %v6803_v45  ;;  %v10838_v47 = vsel %vm109_vm0, %v17465_v11, %v8208_v19  ;;  %v10843_v45 = vsel %vm109_vm0, %v8208_v19, %v17045_v21  ;;  %v8495_v19 = vpack.i.bf16 %v10728_v54, %v10856_v24  ;;  %v17468_v21 = vunpack.i.h.bf16 %v10398_v42  ;;  %v9665_v42 = vld [vmem:[%s16964_s0 + $0x28] sm:$0xff] }
 0x11e   :  { %v10833_v31 = vsel %vm243_vm2, %v8243_v16, %v17044_v61  ;;  %v1403_v8 = vpop.permute.xlu1 %1402  ;;  %17466 = vst [vmem:[#allocation29_spill] sm:$0xff] %v10843_v45  ;;  %v8500_v61 = vpack.i.bf16 %v10843_v45, %v10838_v47  ;;  %v6853_v3 = vpack.c.bf16 %v10546_v26, %v9665_v42  ;;  %v17471_v26 = vpack.c.bf16 %v10456_v40, %v10442_v55 }
 0x11f   :  { %17464 = vst [vmem:[#allocation28_spill] sm:$0xff] %v10833_v31  ;;  %v10845_v63 = vpop.permute.xlu0 %8251 }
 0x120   :  { %v17072_v1 = vunpack.i.l.bf16 %v10845_v63  ;;  %8491 = vrot.lane.b32.xlu1 %v8490_v44, %s17053_s17  ;;  %v984_v44 = vsel %vm980_vm15, %v17468_v21, %v17467_v58  ;;  %v9666_v58 = vld [vmem:[%s16964_s0 + $0x20] sm:$0xff]  ;;  %s17509_s17 = smov 60  }
 0x121   :  { %8486 = vrot.lane.b32.xlu0 %v10670_v52, %s17051_s16  ;;  %v6855_v21 = vpack.c.bf16 %v10263_v33, %v9666_v58  ;;  %v6857_v33 = vpack.c.bf16 %v10564_v57, %v10573_v9  ;;  %s17522_s16 = smov 97  }
 0x122   :  { %v1401_v11 = vpop.permute.xlu1 %1400  ;;  %v1051_v39 = vsel %vm17059_vm9, %v17469_v2, %v17072_v1  ;;  %vm17473_vm9 = vcmask 588800  }
 0x123   :  { %v10872_v6 = vpop.permute.xlu0 %1404  ;;  %v6833_v7 = vpack.c.bf16 %v1051_v39, %v984_v44  ;;  %v1563_v54 = vsel %vm1434_vm10, %v1401_v11, %v1403_v8  ;;  %v10886_v39 = vld [vmem:[%s16965_s1] sm:$0xff] }
 0x124   :  { %8501 = vrot.lane.b32.xlu1 %v8500_v61, %s9727_s15  ;;  %v1564_v45 = vsel %vm1434_vm10, %v1403_v8, %v10872_v6  ;;  %v17470_v61 = vunpack.i.h.bf16 %v10356_v51  ;;  %v8134_v51 = vunpack.i.h.bf16 %v10446_v5 }
 0x125   :  { %8496 = vrot.lane.b32.xlu0 %v8495_v19, %s9727_s15  ;;  %1783 = vmatprep.subr.mxu0 %v1564_v45  ;;  %v17472_v19 = vunpack.i.h.bf16 %v10358_v56 }
 0x126   :  { %6834 = vmatprep.subr.bf16.mxu1 %v6833_v7  ;;  %1784 = vmatpush1.msra.mxu0 %v1563_v54  ;;  %v10888_v2 = vpop.permute.xlu1 %8261  ;;  %v10897_v8 = vsel %vm243_vm2, %v17470_v61, %v8243_v16 }
 0x127   :  { %6836 = vmatpush1.bf16.msra.mxu1 %v17471_v26  ;;  %v17069_v7 = vunpack.i.l.bf16 %v10888_v2  ;;  %v10903_v45 = vpop.permute.xlu0 %8256  ;;  %6854 = vmatprep.subr.bf16.mxu0 %v6853_v3  ;;  %v10908_v11 = vsel %vm17145_vm1, %v17472_v19, %v8238_v27  ;;  %v8520_v56 = vpack.i.bf16 %v10833_v31, %v10897_v8  ;;  %v17474_v3 = vunpack.i.l.bf16 %v10446_v5 }
 0x128   :  { %1800 = vmatmul.mubr.f32.vlgmr.msra.gmra.mrb[0].mxu0 %v10886_v39  ;;  %8511 = vrot.lane.b32.xlu1 %v10670_v52, %s17135_s19  ;;  %v8515_v16 = vpack.i.bf16 %v10827_v13, %v10908_v11  ;;  %v17062_v44 = vunpack.i.h.bf16 %v10903_v45  ;;  %v8258_v54 = vunpack.i.l.bf16 %v10903_v45  ;;  %v17476_v26 = vunpack.i.h.bf16 %v10578_v38 }
 0x129   :  { %6856 = vmatpush1.bf16.msra.mxu0 %v6855_v21  ;;  %8506 = vrot.lane.b32.xlu0 %v10670_v52, %s9715_s18  ;;  %v1120_v40 = vsel %vm1112_vm4, %v8134_v51, %v17069_v7  ;;  %v1119_v58 = vsel %vm1112_vm4, %v17474_v3, %v8134_v51  ;;  %v17475_v21 = vpack.c.bf16 %v10141_v25, %v10146_v32  ;;  %v17477_v25 = vunpack.i.h.bf16 %v10444_v12 }
 0x12a   :  { %6858 = vmatprep.subr.bf16.mxu0 %v6857_v33  ;;  %v10918_v55 = vpop.permute.xlu1 %8271  ;;  %6287 = vmatprep.mubr.msk.f32.mxu0 %vm17473_vm9, %v10194_v53  ;;  %vm17496_vm9 = vcmask 752640  }
 0x12b   :  { %v17068_v57 = vunpack.i.h.bf16 %v10918_v55  ;;  %v8273_v9 = vunpack.i.l.bf16 %v10918_v55  ;;  %v10929_v27 = vpop.permute.xlu0 %8266 }
 0x12c   :  { %v17064_v42 = vunpack.i.h.bf16 %v10929_v27  ;;  %v8268_v53 = vunpack.i.l.bf16 %v10929_v27  ;;  %8521 = vrot.lane.b32.xlu1 %v8520_v56, %s9727_s15  ;;  %v8530_v56 = vpack.i.bf16 %v1120_v40, %v1119_v58  ;;  %v10971_v58 = vsel %vm377_vm3, %v8258_v54, %v17062_v44 }
 0x12d   :  { %6860 = vmatpush1.bf16.msra.mxu0 %v17475_v21  ;;  %8516 = vrot.lane.b32.xlu0 %v8515_v16, %s9727_s15  ;;  %v1454_v61 = vsel %vm1434_vm10, %v8273_v9, %v17068_v57  ;;  %v1453_v19 = vsel %vm1434_vm10, %v17476_v26, %v8273_v9  ;;  %v17478_v9 = vunpack.i.h.bf16 %v10424_v28  ;;  %v17481_v26 = vunpack.i.h.bf16 %v10479_v36 }
 0x12e   :  { %v10951_v33 = vpop.permute.xlu1 %8281  ;;  %v1438_v5 = vsel %vm1434_vm10, %v8268_v53, %v17064_v42  ;;  %v1437_v32 = vsel %vm1434_vm10, %v17477_v25, %v8268_v53  ;;  %v17483_v36 = vunpack.i.h.bf16 %v10608_v62  ;;  %v17497_v57 = vunpack.i.h.bf16 %v10742_v14 }
 0x12f   :  { %v17061_v51 = vunpack.i.h.bf16 %v10951_v33  ;;  %v8283_v16 = vunpack.i.l.bf16 %v10951_v33  ;;  %v10961_v3 = vpop.permute.xlu0 %8276  ;;  %v6837_v38 = vpack.c.bf16 %v1454_v61, %v1438_v5  ;;  %v6839_v21 = vpack.c.bf16 %v1453_v19, %v1437_v32 }
 0x130   :  { %v10966_v40 = vsel %vm377_vm3, %v17478_v9, %v8258_v54  ;;  %v17060_v12 = vunpack.i.h.bf16 %v10961_v3  ;;  %v8278_v53 = vunpack.i.l.bf16 %v10961_v3  ;;  %8531 = vrot.lane.b32.xlu1 %v8530_v56, %s9727_s15 }
 0x131   :  { %v10979_v61 = vsel %vm511_vm5, %v8283_v16, %v17061_v51  ;;  %8526 = vrot.lane.b32.xlu0 %v10475_v18, %s17075_s25  ;;  %6838 = vmatprep.subr.bf16.mxu1 %v6837_v38  ;;  %v8535_v32 = vpack.i.bf16 %v10971_v58, %v10966_v40 }
 0x132   :  { %17479 = vst [vmem:[#allocation30_spill] sm:$0xff] %v10979_v61  ;;  %v10986_v28 = vsel %vm444_vm6, %v8278_v53, %v17060_v12  ;;  %6840 = vmatpush1.bf16.msra.mxu1 %v6839_v21  ;;  %v10988_v54 = vpop.permute.xlu1 %8291  ;;  %v10993_v19 = vsel %vm444_vm6, %v17481_v26, %v8278_v53  ;;  %v17482_v53 = vunpack.i.h.bf16 %v10597_v23  ;;  %v17484_v23 = vunpack.i.h.bf16 %v10477_v35 }
 0x133   :  { %17480 = vst [vmem:[#allocation31_spill] sm:$0xff] %v10986_v28  ;;  %v17063_v56 = vunpack.i.h.bf16 %v10988_v54  ;;  %v8293_v5 = vunpack.i.l.bf16 %v10988_v54  ;;  %v10997_v25 = vpop.permute.xlu0 %8286  ;;  %v8540_v51 = vpack.i.bf16 %v10986_v28, %v10993_v19  ;;  %v17485_v35 = vunpack.i.h.bf16 %v10400_v29  ;;  %v11054_v29 = vld [vmem:[%s16964_s0 + $0x50] sm:$0xff] }
 0x134   :  { %v17067_v38 = vunpack.i.h.bf16 %v10997_v25  ;;  %v8288_v21 = vunpack.i.l.bf16 %v10997_v25  ;;  %568 = vrot.lane.b32.xlu1 %v10533_v30, %s9717_s22 }
 0x135   :  { %8536 = vrot.lane.b32.xlu0 %v8535_v32, %s9727_s15  ;;  %v1486_v9 = vsel %vm1434_vm10, %v8293_v5, %v17063_v56  ;;  %v1485_v26 = vsel %vm1434_vm10, %v17482_v53, %v8293_v5  ;;  %v11029_v5 = vsel %vm511_vm5, %v17484_v23, %v8283_v16  ;;  %v17487_v23 = vld [vmem:[#allocation12_spill] sm:$0xff] }
 0x136   :  { %v11014_v12 = vpop.permute.xlu1 %8301  ;;  %v1470_v30 = vsel %vm1434_vm10, %v8288_v21, %v17067_v38  ;;  %v1469_v32 = vsel %vm1434_vm10, %v17483_v36, %v8288_v21 }
 0x137   :  { %v11024_v44 = vpop.permute.xlu0 %8296  ;;  %v6841_v56 = vpack.c.bf16 %v1486_v9, %v1470_v30  ;;  %v6843_v42 = vpack.c.bf16 %v1485_v26, %v1469_v32  ;;  %v17065_v62 = vunpack.i.h.bf16 %v11014_v12  ;;  %v8303_v21 = vunpack.i.l.bf16 %v11014_v12  ;;  %v17486_v32 = vld [vmem:[#allocation9_spill] sm:$0xff] }
 0x138   :  { %v17071_v53 = vunpack.i.l.bf16 %v11024_v44  ;;  %8541 = vrot.lane.b32.xlu1 %v8540_v51, %s9727_s15  ;;  %v8545_v51 = vpack.i.bf16 %v10979_v61, %v11029_v5 }
 0x139   :  { %570 = vrot.lane.b32.xlu0 %v10660_v37, %s9717_s22  ;;  %6842 = vmatprep.subr.bf16.mxu1 %v6841_v56 }
 0x13a   :  { %6844 = vmatpush1.bf16.msra.mxu1 %v6843_v42  ;;  %v561_v36 = vpop.permute.xlu1 %560  ;;  %v316_v16 = vsel %vm17101_vm7, %v17485_v35, %v17071_v53  ;;  %v11058_v42 = vpack.i.bf16 %v10451_v15, %v11054_v29  ;;  %v17488_v35 = vpack.c.bf16 %v17486_v32, %v17487_v23 }
 0x13b   :  { %v11042_v9 = vpop.permute.xlu0 %8306  ;;  %v6861_v26 = vpack.c.bf16 %v10623_v43, %v316_v16  ;;  %v6865_v43 = vpack.c.bf16 %v10679_v59, %v10694_v46  ;;  %v1502_v16 = vsel %vm1434_vm10, %v8303_v21, %v17065_v62  ;;  %v17490_v59 = vunpack.i.h.bf16 %v10638_v22  ;;  %v17491_v22 = vld [vmem:[#allocation7_spill] sm:$0xff] }
 0x13c   :  { %v17066_v56 = vunpack.i.h.bf16 %v11042_v9  ;;  %v8308_v30 = vunpack.i.l.bf16 %v11042_v9  ;;  %8551 = vrot.lane.b32.xlu1 %v10475_v18, %s9720_s26 }
 0x13d   :  { %8546 = vrot.lane.b32.xlu0 %v8545_v51, %s9727_s15  ;;  %6862 = vmatprep.subr.bf16.mxu0 %v6861_v26  ;;  %v17489_v51 = vunpack.i.h.bf16 %v10640_v50  ;;  %v17492_v50 = vld [vmem:[#allocation6_spill] sm:$0xff] }
 0x13e   :  { %6864 = vmatpush1.bf16.msra.mxu0 %v17488_v35  ;;  %v11066_v18 = vpop.permute.xlu1 %8311  ;;  %v1518_v15 = vsel %vm1434_vm10, %v8308_v30, %v17066_v56  ;;  %v1517_v46 = vsel %vm1434_vm10, %v17490_v59, %v8308_v30 }
 0x13f   :  { %v1501_v26 = vsel %vm1434_vm10, %v17489_v51, %v8303_v21  ;;  %v11080_v32 = vpop.permute.xlu0 %562  ;;  %6866 = vmatprep.subr.bf16.mxu0 %v6865_v43  ;;  %v6845_v23 = vpack.c.bf16 %v1518_v15, %v1502_v16  ;;  %v17070_v62 = vunpack.i.h.bf16 %v11066_v18  ;;  %v8313_v56 = vunpack.i.l.bf16 %v11066_v18  ;;  %v11096_v43 = vld [vmem:[%s16964_s0 + $0x78] sm:$0xff] }
 0x140   :  { %v6847_v35 = vpack.c.bf16 %v1517_v46, %v1501_v26  ;;  %8561 = vrot.lane.b32.xlu1 %v11058_v42, %s9722_s14  ;;  %v17493_v21 = vpack.c.bf16 %v17491_v22, %v17492_v50  ;;  %v11103_v51 = vsel %vm578_vm8, %v561_v36, %v11080_v32  ;;  %v11109_v46 = vsel %vm578_vm8, %v10662_v34, %v561_v36  ;;  %v17494_v22 = vld [vmem:[#allocation16_spill] sm:$0xff] }
 0x141   :  { %8556 = vrot.lane.b32.xlu0 %v11058_v42, %s9721_s27  ;;  %6846 = vmatprep.subr.bf16.mxu1 %v6845_v23  ;;  %v11117_v23 = vpack.i.bf16 %v11096_v43, %v10791_v17  ;;  %v17495_v50 = vunpack.i.h.bf16 %v17494_v22  ;;  %v1533_v7 = vsel %vm1434_vm10, %v17497_v57, %v8313_v56  ;;  %v17502_v57 = vld [vmem:[#allocation17_spill] sm:$0xff] }
 0x142   :  { %6848 = vmatpush1.bf16.msra.mxu1 %v6847_v35  ;;  %6868 = vmatpush1.bf16.msra.mxu0 %v17493_v21  ;;  %v11091_v30 = vpop.permute.xlu1 %8321  ;;  %v1534_v35 = vsel %vm1434_vm10, %v8313_v56, %v17070_v62  ;;  %v17498_v62 = vunpack.i.h.bf16 %v10737_v49  ;;  %v17500_v49 = vld [vmem:[#allocation20_spill] sm:$0xff] }
 0x143   :  { %v17073_v16 = vunpack.i.l.bf16 %v11091_v30  ;;  %v11099_v15 = vpop.permute.xlu0 %8316  ;;  %v17501_v14 = vunpack.i.h.bf16 %v17500_v49 }
 0x144   :  { %v17080_v26 = vunpack.i.h.bf16 %v11099_v15  ;;  %v8318_v59 = vunpack.i.l.bf16 %v11099_v15  ;;  %1416 = vrot.lane.b32.xlu1 %v11103_v51, %s9727_s15 }
 0x145   :  { %1414 = vrot.lane.b32.xlu0 %v11109_v46, %s9727_s15  ;;  %v651_v34 = vsel %vm17496_vm9, %v17495_v50, %v17073_v16  ;;  %vm17511_vm9 = vcmask 588800  }
 0x146   :  { %v11127_v36 = vpop.permute.xlu1 %8331  ;;  %v1550_v21 = vsel %vm1434_vm10, %v8318_v59, %v17080_v26  ;;  %v6869_v38 = vpack.c.bf16 %v651_v34, %v10818_v48  ;;  %v1549_v53 = vsel %vm1434_vm10, %v17498_v62, %v8318_v59  ;;  %v17503_v62 = vld [vmem:[#allocation13_spill] sm:$0xff] }
 0x147   :  { %v17082_v22 = vunpack.i.l.bf16 %v11127_v36  ;;  %v11140_v1 = vpop.permute.xlu0 %8326  ;;  %v6849_v50 = vpack.c.bf16 %v1550_v21, %v1534_v35  ;;  %v6851_v16 = vpack.c.bf16 %v1549_v53, %v1533_v7  ;;  %v17504_v7 = vpack.c.bf16 %v17502_v57, %v17503_v62  ;;  %v17508_v57 = vld [vmem:[#allocation18_spill] sm:$0xff] }
 0x148   :  { %v17081_v28 = vunpack.i.l.bf16 %v11140_v1  ;;  %8571 = vrot.lane.b32.xlu1 %v11058_v42, %s9724_s21  ;;  %6870 = vmatprep.subr.bf16.mxu0 %v6869_v38  ;;  %v17505_v38 = vld [vmem:[#allocation21_spill] sm:$0xff] }
 0x149   :  { %8566 = vrot.lane.b32.xlu0 %v11117_v23, %s17499_s30  ;;  %6850 = vmatprep.subr.bf16.mxu1 %v6849_v50  ;;  %v785_v48 = vsel %vm779_vm12, %v17501_v14, %v17082_v22  ;;  %v17506_v56 = vunpack.i.h.bf16 %v17505_v38  ;;  %v6901_v50 = vpack.c.bf16 %v10838_v47, %v10856_v24  ;;  %v17507_v14 = vpack.c.bf16 %v10701_v60, %v10706_v20 }
 0x14a   :  { %6852 = vmatpush1.bf16.msra.mxu1 %v6851_v16  ;;  %6872 = vmatpush1.bf16.msra.mxu0 %v17504_v7  ;;  %v11155_v53 = vpop.permute.xlu1 %1408  ;;  %v6905_v47 = vpack.c.bf16 %v10897_v8, %v10908_v11  ;;  %v11197_v7 = vld [vmem:[%s16965_s1 + $0x8] sm:$0xff] }
 0x14b   :  { %v718_v59 = vsel %vm712_vm11, %v17506_v56, %v17081_v28  ;;  %v1407_v35 = vpop.permute.xlu0 %1406  ;;  %17510 = vst [vmem:[#allocation9_spill] sm:$0xff] %v11197_v7  ;;  %v17512_v56 = vmov 0.0   ;;  %v17531_v28 = vunpack.i.l.bf16 %v11024_v44 }
 0x14c   :  { %v6873_v34 = vpack.c.bf16 %v785_v48, %v718_v59  ;;  %8581 = vrot.lane.b32.xlu1 %v11117_v23, %s17455_s29  ;;  %v1566_v16 = vsel %vm1434_vm10, %v1407_v35, %v11155_v53  ;;  %v1565_v21 = vsel %vm1434_vm10, %v10872_v6, %v1407_v35  ;;  %v9668_v6 = vld [vmem:[%s16964_s0 + $0x30] sm:$0xff]  ;;  %v8610_v59 = vpack.i.bf16 %v17512_v56, %v11096_v43 }
 0x14d   :  { %8576 = vrot.lane.b32.xlu0 %v11058_v42, %s17432_s28  ;;  %1854 = vmatprep.subr.mxu1 %v1566_v16  ;;  %v6903_v62 = vpack.c.bf16 %v17508_v57, %v9668_v6  ;;  %v17513_v35 = vld [vmem:[#allocation10_spill] sm:$0xff]  ;;  %v17518_v6 = vunpack.i.h.bf16 %v10758_v10 }
 0x14e   :  { %6874 = vmatprep.subr.bf16.mxu0 %v6873_v34  ;;  %1855 = vmatpush1.msra.mxu1 %v1565_v21  ;;  %v11172_v49 = vpop.permute.xlu1 %8341  ;;  %v17514_v34 = vld [vmem:[#allocation11_spill] sm:$0xff]  ;;  %v17517_v21 = vunpack.i.h.bf16 %v10716_v4 }
 0x14f   :  { %6876 = vmatpush1.bf16.msra.mxu0 %v17507_v14  ;;  %v11177_v48 = vpop.permute.xlu0 %8336  ;;  %6902 = vmatprep.subr.bf16.mxu1 %v6901_v50  ;;  %v17079_v60 = vunpack.i.l.bf16 %v11172_v49  ;;  %v17515_v16 = vpack.c.bf16 %v17513_v35, %v17514_v34 }
 0x150   :  { %1871 = vmatmul.mubr.f32.vlgmr.msra.gmra.mrb[0].mxu1 %v10886_v39  ;;  %8591 = vrot.lane.b32.xlu1 %v11058_v42, %s17509_s17  ;;  %v8338_v20 = vunpack.i.l.bf16 %v11177_v48  ;;  %v17077_v8 = vunpack.i.h.bf16 %v11177_v48 }
 0x151   :  { %6904 = vmatpush1.bf16.msra.mxu1 %v6903_v62  ;;  %8586 = vrot.lane.b32.xlu0 %v11117_v23, %s17417_s20  ;;  %v852_v57 = vsel %vm846_vm13, %v17518_v6, %v17079_v60  ;;  %v17519_v62 = vld [vmem:[#allocation22_spill] sm:$0xff] }
 0x152   :  { %6906 = vmatprep.subr.bf16.mxu1 %v6905_v47  ;;  %v11192_v24 = vpop.permute.xlu1 %8351  ;;  %6288 = vmatprep.mubr.msk.f32.mxu1 %vm17511_vm9, %v11197_v7  ;;  %v11217_v50 = vsel %vm109_vm0, %v17517_v21, %v8338_v20  ;;  %v17520_v47 = vunpack.i.h.bf16 %v17519_v62  ;;  %v11234_v4 = vsel %vm109_vm0, %v8338_v20, %v17077_v8  ;;  %v8249_v21 = vunpack.i.h.bf16 %v10798_v0 }
 0x153   :  { %v11202_v11 = vpop.permute.xlu0 %8346  ;;  %17521 = vst [vmem:[#allocation12_spill] sm:$0xff] %v11234_v4  ;;  %v8353_v34 = vunpack.i.l.bf16 %v11192_v24  ;;  %v8299_v20 = vunpack.i.h.bf16 %v11024_v44  ;;  %v8620_v26 = vpack.i.bf16 %v11234_v4, %v11217_v50  ;;  %v17528_v8 = vunpack.i.l.bf16 %v10798_v0 }
 0x154   :  { %v17078_v38 = vunpack.i.l.bf16 %v11202_v11  ;;  %8601 = vrot.lane.b32.xlu1 %v10670_v52, %s17075_s25  ;;  %vm17530_vm9 = vcmask 261120   ;;  %s9732_s25 = smov 122  }
 0x155   :  { %6908 = vmatpush1.bf16.msra.mxu1 %v17515_v16  ;;  %8596 = vrot.lane.b32.xlu0 %v11058_v42, %s17516_s13  ;;  %v17084_v42 = vunpack.i.h.bf16 %v11192_v24  ;;  %v317_v61 = vsel %vm17101_vm7, %v17531_v28, %v8299_v20 }
 0x156   :  { %v11219_v14 = vpop.permute.xlu1 %8361  ;;  %v919_v35 = vsel %vm913_vm14, %v17520_v47, %v17078_v38  ;;  %v8254_v47 = vunpack.i.h.bf16 %v10845_v63  ;;  %v17524_v38 = vld [vmem:[#allocation23_spill] sm:$0xff] }
 0x157   :  { %v11238_v16 = vpop.permute.xlu0 %8356  ;;  %v6877_v10 = vpack.c.bf16 %v919_v35, %v852_v57  ;;  %v11251_v57 = vld [vmem:[%s16964_s0 + $0x48] sm:$0xff]  ;;  %v17525_v60 = vpack.c.bf16 %v10767_v41, %v17524_v38  ;;  %v985_v41 = vsel %vm980_vm15, %v17528_v8, %v8249_v21  ;;  %v17533_v38 = vunpack.i.l.bf16 %v11219_v14 }
 0x158   :  { %v17083_v6 = vunpack.i.h.bf16 %v11238_v16  ;;  %v8358_v62 = vunpack.i.l.bf16 %v11238_v16  ;;  %8611 = vrot.lane.b32.xlu1 %v8610_v59, %s17522_s16  ;;  %v8615_v35 = vpack.i.bf16 %v11054_v29, %v11251_v57  ;;  %v11271_v29 = vsel %vm17145_vm1, %v8353_v34, %v17084_v42 }
 0x159   :  { %8606 = vrot.lane.b32.xlu0 %v11117_v23, %s17523_s23  ;;  %6878 = vmatprep.subr.bf16.mxu0 %v6877_v10  ;;  %17527 = vst [vmem:[#allocation6_spill] sm:$0xff] %v11271_v29  ;;  %v17529_v42 = vunpack.i.l.bf16 %v10845_v63  ;;  %v986_v63 = vsel %vm980_vm15, %v8249_v21, %v17533_v38  ;;  %v17536_v21 = vld [vmem:[#allocation24_spill] sm:$0xff] }
 0x15a   :  { %v11259_v59 = vsel %vm243_vm2, %v8358_v62, %v17083_v6  ;;  %6880 = vmatpush1.bf16.msra.mxu0 %v17525_v60  ;;  %v11264_v10 = vpop.permute.xlu1 %8371  ;;  %v17537_v38 = vunpack.i.h.bf16 %v17536_v21  ;;  %v17539_v21 = vunpack.i.l.bf16 %v10888_v2 }
 0x15b   :  { %17526 = vst [vmem:[#allocation7_spill] sm:$0xff] %v11264_v10  ;;  %v8373_v22 = vunpack.i.l.bf16 %v11264_v10  ;;  %v11275_v6 = vpop.permute.xlu0 %8366  ;;  %v1052_v4 = vsel %vm17530_vm9, %v17529_v42, %v8254_v47  ;;  %v17532_v13 = vunpack.i.h.bf16 %v11264_v10  ;;  %v17534_v42 = vld [vmem:[#allocation25_spill] sm:$0xff] }
 0x15c   :  { %v17093_v60 = vunpack.i.l.bf16 %v11275_v6  ;;  %8621 = vrot.lane.b32.xlu1 %v8620_v26, %s9727_s15  ;;  %v17535_v10 = vunpack.i.h.bf16 %v17534_v42  ;;  %v11319_v7 = vsel %vm17145_vm1, %v17537_v38, %v8353_v34 }
 0x15d   :  { %v11293_v0 = vsel %vm17101_vm7, %v8373_v22, %v17532_v13  ;;  %8616 = vrot.lane.b32.xlu0 %v8615_v35, %s9727_s15  ;;  %v318_v26 = vsel %vm17101_vm7, %v8299_v20, %v8373_v22 }
 0x15e   :  { %v11297_v8 = vpop.permute.xlu1 %8381  ;;  %v1053_v44 = vsel %vm17530_vm9, %v8254_v47, %v17093_v60  ;;  %v6909_v28 = vpack.c.bf16 %v10966_v40, %v318_v26  ;;  %v11311_v35 = vsel %vm243_vm2, %v17535_v10, %v8358_v62  ;;  %v6883_v40 = vpack.c.bf16 %v1052_v4, %v985_v41  ;;  %v17538_v47 = vld [vmem:[#allocation19_spill] sm:$0xff] }
 0x15f   :  { %v17092_v22 = vunpack.i.l.bf16 %v11297_v8  ;;  %v11314_v20 = vpop.permute.xlu0 %8376  ;;  %v6881_v31 = vpack.c.bf16 %v1053_v44, %v986_v63  ;;  %v6911_v26 = vpack.c.bf16 %v17538_v47, %v317_v61  ;;  %v8264_v62 = vunpack.i.h.bf16 %v10888_v2 }
 0x160   :  { %8631 = vrot.lane.b32.xlu1 %v11117_v23, %s17135_s19  ;;  %6910 = vmatprep.subr.bf16.mxu1 %v6909_v28  ;;  %v6913_v10 = vpack.c.bf16 %v11029_v5, %v10993_v19  ;;  %v8640_v63 = vpack.i.bf16 %v11259_v59, %v11311_v35  ;;  %v17098_v19 = vunpack.i.h.bf16 %v11314_v20  ;;  %v8378_v5 = vunpack.i.l.bf16 %v11314_v20 }
 0x161   :  { %8626 = vrot.lane.b32.xlu0 %v11117_v23, %s9715_s18  ;;  %6882 = vmatprep.subr.bf16.mxu0 %v6881_v31  ;;  %v1122_v61 = vsel %vm1112_vm4, %v8264_v62, %v17092_v22  ;;  %v8635_v31 = vpack.i.bf16 %v11271_v29, %v11319_v7  ;;  %v1121_v38 = vsel %vm1112_vm4, %v17539_v21, %v8264_v62  ;;  %v17542_v22 = vld [vmem:[#allocation14_spill] sm:$0xff]  ;;  %vm17552_vm9 = vcmask 752640  }
 0x162   :  { %6884 = vmatpush1.bf16.msra.mxu0 %v6883_v40  ;;  %6912 = vmatpush1.bf16.msra.mxu1 %v6911_v26  ;;  %v11329_v34 = vpop.permute.xlu1 %8391  ;;  %v17540_v40 = vunpack.i.h.bf16 %v10918_v55  ;;  %v8650_v62 = vpack.i.bf16 %v1122_v61, %v1121_v38  ;;  %vm17554_vm7 = vmmov %vm17552_vm9  ;;  %v9728_v29 = vmov 0  }
 0x163   :  { %v17097_v4 = vunpack.i.h.bf16 %v11329_v34  ;;  %v8393_v41 = vunpack.i.l.bf16 %v11329_v34  ;;  %v11338_v44 = vpop.permute.xlu0 %8386  ;;  %6914 = vmatprep.subr.bf16.mxu1 %v6913_v10  ;;  %v17541_v10 = vunpack.i.h.bf16 %v10929_v27  ;;  %8860 = vset.pattern.permute.xlu1 %v9728_v29 }
 0x164   :  { %v17096_v28 = vunpack.i.h.bf16 %v11338_v44  ;;  %v8388_v42 = vunpack.i.l.bf16 %v11338_v44  ;;  %8641 = vrot.lane.b32.xlu1 %v8640_v63, %s9727_s15  ;;  %v17543_v63 = vld [vmem:[#allocation15_spill] sm:$0xff]  ;;  %9506 = vset.pattern.permute.xlu0 %v9728_v29 }
 0x165   :  { %v1455_v47 = vsel %vm1434_vm10, %v17540_v40, %v8393_v41  ;;  %8636 = vrot.lane.b32.xlu0 %v8635_v31, %s9727_s15  ;;  %v1456_v26 = vsel %vm1434_vm10, %v8393_v41, %v17097_v4  ;;  %v17544_v60 = vpack.c.bf16 %v17542_v22, %v17543_v63 }
 0x166   :  { %v1439_v13 = vsel %vm1434_vm10, %v17541_v10, %v8388_v42  ;;  %v11363_v2 = vpop.permute.xlu1 %8401  ;;  %v1440_v55 = vsel %vm1434_vm10, %v8388_v42, %v17096_v28  ;;  %v17545_v10 = vunpack.i.h.bf16 %v10903_v45  ;;  %v17550_v28 = vunpack.i.h.bf16 %v10997_v25 }
 0x167   :  { %6916 = vmatpush1.bf16.msra.mxu1 %v17544_v60  ;;  %v17095_v31 = vunpack.i.h.bf16 %v11363_v2  ;;  %v8403_v21 = vunpack.i.l.bf16 %v11363_v2  ;;  %v11370_v41 = vpop.permute.xlu0 %8396  ;;  %v6885_v27 = vpack.c.bf16 %v1456_v26, %v1440_v55  ;;  %v6887_v40 = vpack.c.bf16 %v1455_v47, %v1439_v13 }
 0x168   :  { %v11375_v22 = vsel %vm377_vm3, %v17545_v10, %v8378_v5  ;;  %v11380_v60 = vsel %vm377_vm3, %v8378_v5, %v17098_v19  ;;  %v17094_v61 = vunpack.i.h.bf16 %v11370_v41  ;;  %v8398_v42 = vunpack.i.l.bf16 %v11370_v41  ;;  %8651 = vrot.lane.b32.xlu1 %v8650_v62, %s9727_s15 }
 0x169   :  { %17546 = vst [vmem:[#allocation16_spill] sm:$0xff] %v11380_v60  ;;  %v11388_v13 = vsel %vm511_vm5, %v8403_v21, %v17095_v31  ;;  %8646 = vrot.lane.b32.xlu0 %v10670_v52, %s9720_s26  ;;  %6886 = vmatprep.subr.bf16.mxu0 %v6885_v27  ;;  %v8655_v63 = vpack.i.bf16 %v11380_v60, %v11375_v22  ;;  %v17549_v10 = vunpack.i.h.bf16 %v10988_v54  ;;  %v17551_v25 = vunpack.i.l.bf16 %v11091_v30 }
 0x16a   :  { %17547 = vst [vmem:[#allocation20_spill] sm:$0xff] %v11388_v13  ;;  %v11395_v45 = vsel %vm444_vm6, %v8398_v42, %v17094_v61  ;;  %6888 = vmatpush1.bf16.msra.mxu0 %v6887_v40  ;;  %v11397_v5 = vpop.permute.xlu1 %8411  ;;  %v8324_v40 = vunpack.i.h.bf16 %v11091_v30 }
 0x16b   :  { %17548 = vst [vmem:[#allocation17_spill] sm:$0xff] %v11395_v45  ;;  %v17100_v38 = vunpack.i.h.bf16 %v11397_v5  ;;  %v8413_v47 = vunpack.i.l.bf16 %v11397_v5  ;;  %v11401_v26 = vpop.permute.xlu0 %8406 }
 0x16c   :  { %v17105_v62 = vunpack.i.h.bf16 %v11401_v26  ;;  %v8408_v55 = vunpack.i.l.bf16 %v11401_v26  ;;  %572 = vrot.lane.b32.xlu1 %v10791_v17, %s9717_s22 }
 0x16d   :  { %v1487_v61 = vsel %vm1434_vm10, %v17549_v10, %v8413_v47  ;;  %8656 = vrot.lane.b32.xlu0 %v8655_v63, %s9727_s15  ;;  %v1488_v31 = vsel %vm1434_vm10, %v8413_v47, %v17100_v38  ;;  %v17553_v47 = vunpack.i.h.bf16 %v10951_v33 }
 0x16e   :  { %v1471_v4 = vsel %vm1434_vm10, %v17550_v28, %v8408_v55  ;;  %v11422_v17 = vpop.permute.xlu1 %8421  ;;  %v1472_v27 = vsel %vm1434_vm10, %v8408_v55, %v17105_v62  ;;  %v652_v28 = vsel %vm17552_vm9, %v17551_v25, %v8324_v40  ;;  %v17563_v62 = vunpack.i.h.bf16 %v11066_v18 }
 0x16f   :  { %v11427_v19 = vpop.permute.xlu0 %8416  ;;  %v6889_v54 = vpack.c.bf16 %v1488_v31, %v1472_v27  ;;  %v6891_v10 = vpack.c.bf16 %v1487_v61, %v1471_v4  ;;  %v11439_v38 = vsel %vm511_vm5, %v17553_v47, %v8403_v21  ;;  %v11446_v4 = vld [vmem:[%s16964_s0 + $0x60] sm:$0xff]  ;;  %v17104_v30 = vunpack.i.h.bf16 %v11422_v17 }
 0x170   :  { %v17102_v63 = vunpack.i.h.bf16 %v11427_v19  ;;  %v8418_v60 = vunpack.i.l.bf16 %v11427_v19  ;;  %8661 = vrot.lane.b32.xlu1 %v10670_v52, %s9721_s27  ;;  %v11450_v52 = vpack.i.bf16 %v10660_v37, %v11446_v4  ;;  %v8423_v33 = vunpack.i.l.bf16 %v11422_v17 }
 0x171   :  { %574 = vrot.lane.b32.xlu0 %v11096_v43, %s9717_s22  ;;  %6890 = vmatprep.subr.bf16.mxu0 %v6889_v54  ;;  %v17555_v54 = vunpack.i.h.bf16 %v10961_v3  ;;  %v17557_v3 = vunpack.i.h.bf16 %v11014_v12  ;;  %s17581_s22 = smov 124  }
 0x172   :  { %v11457_v31 = vsel %vm17552_vm9, %v8418_v60, %v17102_v63  ;;  %6892 = vmatpush1.bf16.msra.mxu0 %v6891_v10  ;;  %v11459_v21 = vpop.permute.xlu1 %564  ;;  %v653_v61 = vsel %vm17554_vm7, %v8324_v40, %v8418_v60  ;;  %v17556_v60 = vld [vmem:[#allocation26_spill] sm:$0xff]  ;;  %vm17570_vm7 = vcmask 261120  }
 0x173   :  { %v11462_v55 = vpop.permute.xlu0 %8426  ;;  %v6917_v27 = vpack.c.bf16 %v653_v61, %v11109_v46  ;;  %v11470_v25 = vsel %vm444_vm6, %v17555_v54, %v8398_v42  ;;  %v6919_v40 = vpack.c.bf16 %v652_v28, %v17556_v60  ;;  %v8675_v46 = vpack.i.bf16 %v11388_v13, %v11439_v38  ;;  %vm17573_vm9 = vmmov %vm17570_vm7 }
 0x174   :  { %v17103_v47 = vunpack.i.h.bf16 %v11462_v55  ;;  %v8428_v10 = vunpack.i.l.bf16 %v11462_v55  ;;  %107 = vrot.lane.b32.xlu1 %v17512_v56, %s17499_s30  ;;  %v1503_v42 = vsel %vm1434_vm10, %v17557_v3, %v8423_v33  ;;  %v17558_v61 = vunpack.i.h.bf16 %v11042_v9 }
 0x175   :  { %8666 = vrot.lane.b32.xlu0 %v11450_v52, %s9722_s14  ;;  %6918 = vmatprep.subr.bf16.mxu1 %v6917_v27  ;;  %v1504_v28 = vsel %vm1434_vm10, %v8423_v33, %v17104_v30  ;;  %v8670_v12 = vpack.i.bf16 %v11395_v45, %v11470_v25 }
 0x176   :  { %v1519_v54 = vsel %vm1434_vm10, %v17558_v61, %v8428_v10  ;;  %6920 = vmatpush1.bf16.msra.mxu1 %v6919_v40  ;;  %v11487_v37 = vpop.permute.xlu1 %8431  ;;  %v1520_v27 = vsel %vm1434_vm10, %v8428_v10, %v17103_v47  ;;  %v8334_v40 = vunpack.i.h.bf16 %v11127_v36  ;;  %v8329_v61 = vunpack.i.h.bf16 %v11140_v1 }
 0x177   :  { %v11495_v60 = vpop.permute.xlu0 %566  ;;  %v6893_v3 = vpack.c.bf16 %v1520_v27, %v1504_v28  ;;  %v6895_v9 = vpack.c.bf16 %v1519_v54, %v1503_v42  ;;  %v17107_v33 = vunpack.i.l.bf16 %v11487_v37  ;;  %v17560_v54 = vunpack.i.l.bf16 %v11140_v1 }
 0x178   :  { %8676 = vrot.lane.b32.xlu1 %v8675_v46, %s9727_s15  ;;  %v17559_v46 = vunpack.i.l.bf16 %v11127_v36  ;;  %v8344_v27 = vunpack.i.h.bf16 %v11172_v49 }
 0x179   :  { %8671 = vrot.lane.b32.xlu0 %v8670_v12, %s9727_s15  ;;  %6894 = vmatprep.subr.bf16.mxu0 %v6893_v3  ;;  %v719_v28 = vsel %vm712_vm11, %v17560_v54, %v8329_v61  ;;  %v720_v3 = vsel %vm712_vm11, %v8329_v61, %v17107_v33  ;;  %v17561_v33 = vunpack.i.h.bf16 %v11099_v15 }
 0x17a   :  { %6896 = vmatpush1.bf16.msra.mxu0 %v6895_v9  ;;  %v11504_v10 = vpop.permute.xlu1 %8441  ;;  %v786_v42 = vsel %vm779_vm12, %v17559_v46, %v8334_v40  ;;  %v8349_v9 = vunpack.i.h.bf16 %v11202_v11 }
 0x17b   :  { %v11506_v63 = vpop.permute.xlu0 %8436  ;;  %v6923_v61 = vpack.c.bf16 %v786_v42, %v719_v28 }
 0x17c   :  { %v17108_v47 = vunpack.i.l.bf16 %v11506_v63  ;;  %8686 = vrot.lane.b32.xlu1 %v11450_v52, %s17432_s28 }
 0x17d   :  { %8681 = vrot.lane.b32.xlu0 %v11450_v52, %s9724_s21 }
 0x17e   :  { %v11520_v12 = vpop.permute.xlu1 %8451  ;;  %v787_v36 = vsel %vm779_vm12, %v8334_v40, %v17108_v47 }
 0x17f   :  { %v17110_v1 = vunpack.i.h.bf16 %v11520_v12  ;;  %v8453_v46 = vunpack.i.l.bf16 %v11520_v12  ;;  %v11531_v54 = vpop.permute.xlu0 %8446  ;;  %v6921_v30 = vpack.c.bf16 %v787_v36, %v720_v3  ;;  %v17562_v36 = vunpack.i.l.bf16 %v11172_v49 }
 0x180   :  { %v8448_v45 = vunpack.i.l.bf16 %v11531_v54  ;;  %241 = vrot.lane.b32.xlu1 %v17512_v56, %s17417_s20 }
 0x181   :  { %v1551_v40 = vsel %vm1434_vm10, %v17561_v33, %v8453_v46  ;;  %174 = vrot.lane.b32.xlu0 %v17512_v56, %s17455_s29  ;;  %6922 = vmatprep.subr.bf16.mxu1 %v6921_v30  ;;  %v1552_v3 = vsel %vm1434_vm10, %v8453_v46, %v17110_v1  ;;  %v853_v47 = vsel %vm846_vm13, %v17562_v36, %v8344_v27  ;;  %v17564_v33 = vunpack.i.h.bf16 %v11531_v54 }
 0x182   :  { %v1535_v42 = vsel %vm1434_vm10, %v17563_v62, %v8448_v45  ;;  %6924 = vmatpush1.bf16.msra.mxu1 %v6923_v61  ;;  %v11551_v15 = vpop.permute.xlu1 %8461  ;;  %v17565_v30 = vunpack.i.l.bf16 %v11202_v11  ;;  %v11575_v62 = vsel %vm578_vm8, %v11080_v32, %v11459_v21  ;;  %v11594_v32 = vsel %vm578_vm8, %v11459_v21, %v11495_v60 }
 0x183   :  { %v1536_v28 = vsel %vm1434_vm10, %v8448_v45, %v17564_v33  ;;  %v17113_v46 = vunpack.i.l.bf16 %v11551_v15  ;;  %v11560_v49 = vpop.permute.xlu0 %8456  ;;  %v6899_v1 = vpack.c.bf16 %v1551_v40, %v1535_v42  ;;  %17567 = vst [vmem:[#allocation21_spill] sm:$0xff] %v11594_v32  ;;  %v8364_v21 = vunpack.i.h.bf16 %v11219_v14 }
 0x184   :  { %v920_v13 = vsel %vm913_vm14, %v17565_v30, %v8349_v9  ;;  %v6897_v36 = vpack.c.bf16 %v1552_v3, %v1536_v28  ;;  %v17112_v18 = vunpack.i.l.bf16 %v11560_v49  ;;  %8696 = vrot.lane.b32.xlu1 %v11450_v52, %s17516_s13  ;;  %v8369_v30 = vunpack.i.h.bf16 %v11275_v6 }
 0x185   :  { %8691 = vrot.lane.b32.xlu0 %v11450_v52, %s17509_s17  ;;  %v921_v11 = vsel %vm913_vm14, %v8349_v9, %v17113_v46  ;;  %v6927_v40 = vpack.c.bf16 %v920_v13, %v853_v47  ;;  %v11583_v52 = vld [vmem:[%s16964_s0 + $0x58] sm:$0xff]  ;;  %v17116_v47 = vunpack.i.h.bf16 %v11504_v10 }
 0x186   :  { %6898 = vmatprep.subr.bf16.mxu0 %v6897_v36  ;;  %v11570_v45 = vpop.permute.xlu1 %8471  ;;  %v854_v61 = vsel %vm846_vm13, %v8344_v27, %v17112_v18  ;;  %v8700_v9 = vpack.i.bf16 %v11446_v4, %v11583_v52  ;;  %v8443_v27 = vunpack.i.l.bf16 %v11504_v10  ;;  %v17569_v18 = vunpack.i.h.bf16 %v11177_v48 }
 0x187   :  { %6900 = vmatpush1.bf16.msra.mxu0 %v6899_v1  ;;  %17566 = vst [vmem:[#allocation13_spill] sm:$0xff] %v11570_v45  ;;  %v17111_v1 = vunpack.i.h.bf16 %v11570_v45  ;;  %v8473_v3 = vunpack.i.l.bf16 %v11570_v45  ;;  %v11589_v42 = vpop.permute.xlu0 %8466  ;;  %v6925_v13 = vpack.c.bf16 %v921_v11, %v854_v61  ;;  %v17575_v45 = vunpack.i.h.bf16 %v11192_v24 }
 0x188   :  { %v17114_v33 = vunpack.i.h.bf16 %v11589_v42  ;;  %v8468_v4 = vunpack.i.l.bf16 %v11589_v42  ;;  %1420 = vrot.lane.b32.xlu1 %v11594_v32, %s9727_s15  ;;  %v11629_v46 = vsel %vm109_vm0, %v8443_v27, %v17116_v47 }
 0x189   :  { %v11605_v28 = vsel %vm243_vm2, %v8473_v3, %v17111_v1  ;;  %1418 = vrot.lane.b32.xlu0 %v11575_v62, %s9727_s15  ;;  %6926 = vmatprep.subr.bf16.mxu1 %v6925_v13  ;;  %v11624_v13 = vsel %vm109_vm0, %v17569_v18, %v8443_v27  ;;  %v17571_v18 = vunpack.i.l.bf16 %v11219_v14  ;;  %v17572_v27 = vunpack.i.l.bf16 %v11275_v6 }
 0x18a   :  { %v11614_v36 = vsel %vm17145_vm1, %v8468_v4, %v17114_v33  ;;  %6928 = vmatpush1.bf16.msra.mxu1 %v6927_v40  ;;  %v11616_v11 = vpop.permute.xlu1 %8481  ;;  %v8705_v14 = vpack.i.bf16 %v11629_v46, %v11624_v13 }
 0x18b   :  { %17568 = vst [vmem:[#allocation18_spill] sm:$0xff] %v11616_v11  ;;  %v17120_v61 = vunpack.i.l.bf16 %v11616_v11  ;;  %v11619_v1 = vpop.permute.xlu0 %8476  ;;  %v987_v32 = vsel %vm980_vm15, %v17571_v18, %v8364_v21  ;;  %v1054_v47 = vsel %vm17573_vm9, %v17572_v27, %v8369_v30  ;;  %v11654_v11 = vsel %vm17145_vm1, %v17575_v45, %v8468_v4 }
 0x18c   :  { %8701 = vrot.lane.b32.xlu1 %v8700_v9, %s9727_s15  ;;  %v17574_v9 = vunpack.i.l.bf16 %v11619_v1  ;;  %v6931_v45 = vpack.c.bf16 %v1054_v47, %v987_v32  ;;  %v6949_v4 = vpack.c.bf16 %v11217_v50, %v11251_v57  ;;  %v8710_v29 = vpack.i.bf16 %v11614_v36, %v11654_v11  ;;  %v9673_v50 = vld [vmem:[%s16964_s0 + $0x40] sm:$0xff] }
 0x18d   :  { %375 = vrot.lane.b32.xlu0 %v17512_v56, %s17523_s23  ;;  %v1055_v48 = vsel %vm17570_vm7, %v8369_v30, %v17120_v61  ;;  %v17576_v30 = vunpack.i.h.bf16 %v11238_v16  ;;  %v17577_v57 = vld [vmem:[#allocation29_spill] sm:$0xff]  ;;  %v8384_v47 = vunpack.i.h.bf16 %v11297_v8  ;;  %vm17579_vm7 = vcmask 588800  }
 0x18e   :  { %v11646_v33 = vpop.permute.xlu1 %1412  ;;  %v988_v40 = vsel %vm980_vm15, %v8364_v21, %v17574_v9  ;;  %v6951_v32 = vpack.c.bf16 %v17577_v57, %v9673_v50  ;;  %v17583_v50 = vunpack.i.h.bf16 %v11329_v34  ;;  %vm17594_vm9 = vcmask 1014784  }
 0x18f   :  { %v1411_v61 = vpop.permute.xlu0 %1410  ;;  %v6929_v18 = vpack.c.bf16 %v1055_v48, %v988_v40  ;;  %v11674_v40 = vsel %vm243_vm2, %v17576_v30, %v8473_v3  ;;  %v6953_v3 = vpack.c.bf16 %v11311_v35, %v11319_v7 }
 0x190   :  { %442 = vrot.lane.b32.xlu1 %v17512_v56, %s9715_s18  ;;  %v1568_v6 = vsel %vm1434_vm10, %v1411_v61, %v11646_v33  ;;  %v1567_v24 = vsel %vm1434_vm10, %v11155_v53, %v1411_v61  ;;  %s9744_s18 = smov 19  }
 0x191   :  { %8706 = vrot.lane.b32.xlu0 %v8705_v14, %s9727_s15  ;;  %1925 = vmatprep.subr.mxu0 %v1568_v6  ;;  %v8715_v14 = vpack.i.bf16 %v11605_v28, %v11674_v40 }
 0x192   :  { %6930 = vmatprep.subr.bf16.mxu1 %v6929_v18  ;;  %1926 = vmatpush1.msra.mxu0 %v1567_v24  ;;  %v11667_v21 = vpop.permute.xlu1 %8491  ;;  %v17580_v18 = vunpack.i.h.bf16 %v11314_v20  ;;  %v17582_v20 = vunpack.i.l.bf16 %v11297_v8 }
 0x193   :  { %6932 = vmatpush1.bf16.msra.mxu1 %v6931_v45  ;;  %v17129_v53 = vunpack.i.l.bf16 %v11667_v21  ;;  %v11677_v61 = vpop.permute.xlu0 %8486  ;;  %6950 = vmatprep.subr.bf16.mxu0 %v6949_v4 }
 0x194   :  { %v17122_v48 = vunpack.i.h.bf16 %v11677_v61  ;;  %v8488_v16 = vunpack.i.l.bf16 %v11677_v61  ;;  %1942 = vmatmul.mubr.f32.vlgmr.msra.gmra.mrb[2].mxu0 %v10886_v39  ;;  %8711 = vrot.lane.b32.xlu1 %v8710_v29, %s9727_s15  ;;  %v17578_v39 = vld [vmem:[#allocation9_spill] sm:$0xff]  ;;  %v1123_v30 = vsel %vm1112_vm4, %v17582_v20, %v8384_v47 }
 0x195   :  { %6952 = vmatpush1.bf16.msra.mxu0 %v6951_v32  ;;  %509 = vrot.lane.b32.xlu0 %v17512_v56, %s17135_s19  ;;  %v1124_v27 = vsel %vm1112_vm4, %v8384_v47, %v17129_v53  ;;  %v17584_v32 = vld [vmem:[#allocation28_spill] sm:$0xff]  ;;  %s9733_s19 = smov 66  }
 0x196   :  { %6954 = vmatprep.subr.bf16.mxu0 %v6953_v3  ;;  %v11695_v9 = vpop.permute.xlu1 %8501  ;;  %6289 = vmatprep.mubr.msk.f32.mxu0 %vm17579_vm7, %v17578_v39  ;;  %v11704_v7 = vsel %vm377_vm3, %v17580_v18, %v8488_v16  ;;  %v11709_v35 = vsel %vm377_vm3, %v8488_v16, %v17122_v48  ;;  %v17585_v16 = vld [vmem:[#allocation27_spill] sm:$0xff]  ;;  %v8725_v47 = vpack.i.bf16 %v1124_v27, %v1123_v30  ;;  %v17588_v27 = vunpack.i.h.bf16 %v11363_v2 }
 0x197   :  { %v17126_v6 = vunpack.i.h.bf16 %v11695_v9  ;;  %v8503_v24 = vunpack.i.l.bf16 %v11695_v9  ;;  %v11713_v45 = vpop.permute.xlu0 %8496  ;;  %v17586_v3 = vpack.c.bf16 %v17584_v32, %v17585_v16  ;;  %v8730_v34 = vpack.i.bf16 %v11709_v35, %v11704_v7 }
 0x198   :  { %v17125_v4 = vunpack.i.h.bf16 %v11713_v45  ;;  %v8498_v29 = vunpack.i.l.bf16 %v11713_v45  ;;  %8721 = vrot.lane.b32.xlu1 %v11117_v23, %s17581_s22  ;;  %v17587_v23 = vunpack.i.h.bf16 %v11338_v44  ;;  %vm17604_vm7 = vcmask 752640  }
 0x199   :  { %v1457_v57 = vsel %vm1434_vm10, %v17583_v50, %v8503_v24  ;;  %6956 = vmatpush1.bf16.msra.mxu0 %v17586_v3  ;;  %8716 = vrot.lane.b32.xlu0 %v8715_v14, %s9727_s15  ;;  %v1458_v18 = vsel %vm1434_vm10, %v8503_v24, %v17126_v6 }
 0x19a   :  { %v1441_v8 = vsel %vm1434_vm10, %v17587_v23, %v8498_v29  ;;  %v11735_v48 = vpop.permute.xlu1 %8511  ;;  %v1442_v20 = vsel %vm1434_vm10, %v8498_v29, %v17125_v4 }
 0x19b   :  { %v17124_v14 = vunpack.i.h.bf16 %v11735_v48  ;;  %v8513_v50 = vunpack.i.l.bf16 %v11735_v48  ;;  %v11744_v32 = vpop.permute.xlu0 %8506  ;;  %v6933_v24 = vpack.c.bf16 %v1458_v18, %v1442_v20  ;;  %v6935_v44 = vpack.c.bf16 %v1457_v57, %v1441_v8 }
 0x19c   :  { %v17123_v16 = vunpack.i.h.bf16 %v11744_v32  ;;  %v8508_v3 = vunpack.i.l.bf16 %v11744_v32  ;;  %8731 = vrot.lane.b32.xlu1 %v8730_v34, %s9727_s15  ;;  %v17589_v57 = vunpack.i.h.bf16 %v11370_v41 }
 0x19d   :  { %v11752_v30 = vsel %vm511_vm5, %v17588_v27, %v8513_v50  ;;  %v11757_v29 = vsel %vm511_vm5, %v8513_v50, %v17124_v14  ;;  %8726 = vrot.lane.b32.xlu0 %v8725_v47, %s9727_s15  ;;  %6934 = vmatprep.subr.bf16.mxu1 %v6933_v24  ;;  %v17591_v14 = vunpack.i.h.bf16 %v11401_v26 }
 0x19e   :  { %v11763_v18 = vsel %vm444_vm6, %v17589_v57, %v8508_v3  ;;  %v11768_v2 = vsel %vm444_vm6, %v8508_v3, %v17123_v16  ;;  %6936 = vmatpush1.bf16.msra.mxu1 %v6935_v44  ;;  %v11770_v23 = vpop.permute.xlu1 %8521  ;;  %v8740_v8 = vpack.i.bf16 %v11757_v29, %v11752_v30  ;;  %v11786_v44 = vld [vmem:[%s16964_s0 + $0x70] sm:$0xff]  ;;  %v17590_v57 = vunpack.i.h.bf16 %v11397_v5 }
 0x19f   :  { %v11774_v34 = vpop.permute.xlu0 %8516  ;;  %v17128_v47 = vunpack.i.h.bf16 %v11770_v23  ;;  %v8523_v41 = vunpack.i.l.bf16 %v11770_v23  ;;  %v8735_v20 = vpack.i.bf16 %v11768_v2, %v11763_v18  ;;  %v11790_v3 = vpack.i.bf16 %v11096_v43, %v11786_v44 }
 0x1a0   :  { %v17127_v50 = vunpack.i.h.bf16 %v11774_v34  ;;  %v8518_v24 = vunpack.i.l.bf16 %v11774_v34  ;;  %8741 = vrot.lane.b32.xlu1 %v8740_v8, %s9727_s15 }
 0x1a1   :  { %v1489_v16 = vsel %vm1434_vm10, %v17590_v57, %v8523_v41  ;;  %8736 = vrot.lane.b32.xlu0 %v8735_v20, %s9727_s15  ;;  %v1490_v8 = vsel %vm1434_vm10, %v8523_v41, %v17128_v47 }
 0x1a2   :  { %v1473_v4 = vsel %vm1434_vm10, %v17591_v14, %v8518_v24  ;;  %v11804_v6 = vpop.permute.xlu1 %8531  ;;  %v1474_v43 = vsel %vm1434_vm10, %v8518_v24, %v17127_v50  ;;  %v17592_v24 = vld [vmem:[#allocation7_spill] sm:$0xff] }
 0x1a3   :  { %v11809_v27 = vpop.permute.xlu0 %8526  ;;  %v6937_v5 = vpack.c.bf16 %v1490_v8, %v1474_v43  ;;  %v6939_v57 = vpack.c.bf16 %v1489_v16, %v1473_v4  ;;  %v17131_v26 = vunpack.i.h.bf16 %v11804_v6  ;;  %v8533_v14 = vunpack.i.l.bf16 %v11804_v6 }
 0x1a4   :  { %v17132_v20 = vunpack.i.l.bf16 %v11809_v27  ;;  %8751 = vrot.lane.b32.xlu1 %v11790_v3, %s9721_s27  ;;  %v17593_v8 = vunpack.i.h.bf16 %v17592_v24  ;;  %v17595_v24 = vunpack.i.h.bf16 %v11422_v17 }
 0x1a5   :  { %8746 = vrot.lane.b32.xlu0 %v11790_v3, %s9720_s26  ;;  %6938 = vmatprep.subr.bf16.mxu1 %v6937_v5 }
 0x1a6   :  { %6940 = vmatpush1.bf16.msra.mxu1 %v6939_v57  ;;  %v569_v41 = vpop.permute.xlu1 %568  ;;  %v320_v4 = vsel %vm17594_vm9, %v17593_v8, %v17132_v20  ;;  %v6961_v57 = vpack.c.bf16 %v11439_v38, %v11470_v25  ;;  %vm17610_vm9 = vcmask 588800  }
 0x1a7   :  { %v11823_v16 = vpop.permute.xlu0 %8536  ;;  %v11827_v43 = vsel %vm578_vm8, %v11495_v60, %v569_v41  ;;  %v6957_v5 = vpack.c.bf16 %v11375_v22, %v320_v4  ;;  %v1505_v60 = vsel %vm1434_vm10, %v17595_v24, %v8533_v14  ;;  %v17596_v22 = vunpack.i.h.bf16 %v11462_v55 }
 0x1a8   :  { %v17130_v50 = vunpack.i.h.bf16 %v11823_v16  ;;  %v8538_v47 = vunpack.i.l.bf16 %v11823_v16  ;;  %1422 = vrot.lane.b32.xlu1 %v11827_v43, %s9727_s15  ;;  %v17597_v4 = vpack.c.bf16 %v10971_v58, %v11293_v0 }
 0x1a9   :  { %8756 = vrot.lane.b32.xlu0 %v11790_v3, %s9722_s14  ;;  %6958 = vmatprep.subr.bf16.mxu0 %v6957_v5  ;;  %v1506_v5 = vsel %vm1434_vm10, %v8533_v14, %v17131_v26  ;;  %v17600_v14 = vld [vmem:[#allocation31_spill] sm:$0xff] }
 0x1aa   :  { %v1521_v8 = vsel %vm1434_vm10, %v17596_v22, %v8538_v47  ;;  %6960 = vmatpush1.bf16.msra.mxu0 %v17597_v4  ;;  %v11847_v53 = vpop.permute.xlu1 %8541  ;;  %v1522_v38 = vsel %vm1434_vm10, %v8538_v47, %v17130_v50  ;;  %v17599_v47 = vld [vmem:[#allocation30_spill] sm:$0xff] }
 0x1ab   :  { %v11855_v17 = vpop.permute.xlu0 %570  ;;  %6962 = vmatprep.subr.bf16.mxu0 %v6961_v57  ;;  %v6941_v55 = vpack.c.bf16 %v1522_v38, %v1506_v5  ;;  %v6943_v25 = vpack.c.bf16 %v1521_v8, %v1505_v60  ;;  %v8543_v58 = vunpack.i.l.bf16 %v11847_v53  ;;  %v17134_v0 = vunpack.i.h.bf16 %v11847_v53 }
 0x1ac   :  { %v11859_v24 = vsel %vm578_vm8, %v569_v41, %v11855_v17  ;;  %8761 = vrot.lane.b32.xlu1 %v11790_v3, %s9724_s21  ;;  %v17601_v57 = vpack.c.bf16 %v17599_v47, %v17600_v14  ;;  %v8434_v5 = vunpack.i.h.bf16 %v11487_v37  ;;  %v8439_v38 = vunpack.i.h.bf16 %v11506_v63 }
 0x1ad   :  { %17598 = vst [vmem:[#allocation10_spill] sm:$0xff] %v11859_v24  ;;  %1424 = vrot.lane.b32.xlu0 %v11859_v24, %s9727_s15  ;;  %6942 = vmatprep.subr.bf16.mxu1 %v6941_v55  ;;  %v17602_v55 = vunpack.i.h.bf16 %v11531_v54  ;;  %v17603_v47 = vunpack.i.h.bf16 %v11427_v19  ;;  %v1538_v54 = vsel %vm1434_vm10, %v8543_v58, %v17134_v0 }
 0x1ae   :  { %6944 = vmatpush1.bf16.msra.mxu1 %v6943_v25  ;;  %6964 = vmatpush1.bf16.msra.mxu0 %v17601_v57  ;;  %v11870_v60 = vpop.permute.xlu1 %8551  ;;  %v17605_v57 = vunpack.i.h.bf16 %v11520_v12 }
 0x1af   :  { %v11872_v41 = vpop.permute.xlu0 %8546  ;;  %v17147_v22 = vunpack.i.l.bf16 %v11870_v60  ;;  %v1537_v25 = vsel %vm1434_vm10, %v17602_v55, %v8543_v58 }
 0x1b0   :  { %v17139_v8 = vunpack.i.h.bf16 %v11872_v41  ;;  %v8548_v4 = vunpack.i.l.bf16 %v11872_v41  ;;  %8771 = vrot.lane.b32.xlu1 %v11790_v3, %s17509_s17 }
 0x1b1   :  { %8766 = vrot.lane.b32.xlu0 %v11790_v3, %s17432_s28  ;;  %v655_v14 = vsel %vm17604_vm7, %v17603_v47, %v17147_v22  ;;  %vm17623_vm7 = vcmask 261120  }
 0x1b2   :  { %v1553_v50 = vsel %vm1434_vm10, %v17605_v57, %v8548_v4  ;;  %v11894_v26 = vpop.permute.xlu1 %8561  ;;  %v1554_v55 = vsel %vm1434_vm10, %v8548_v4, %v17139_v8  ;;  %v6965_v20 = vpack.c.bf16 %v655_v14, %v11575_v62  ;;  %v11914_v62 = vld [vmem:[%s16964_s0 + $0x68] sm:$0xff]  ;;  %v17606_v4 = vunpack.i.l.bf16 %v11487_v37 }
 0x1b3   :  { %v11903_v24 = vpop.permute.xlu0 %8556  ;;  %v17142_v19 = vunpack.i.l.bf16 %v11894_v26  ;;  %v6945_v47 = vpack.c.bf16 %v1554_v55, %v1538_v54  ;;  %v6947_v12 = vpack.c.bf16 %v1553_v50, %v1537_v25  ;;  %v8780_v58 = vpack.i.bf16 %v11786_v44, %v11914_v62 }
 0x1b4   :  { %v17143_v57 = vunpack.i.l.bf16 %v11903_v24  ;;  %308 = vrot.lane.b32.xlu1 %v17512_v56, %s17581_s22  ;;  %6966 = vmatprep.subr.bf16.mxu0 %v6965_v20  ;;  %v721_v20 = vsel %vm712_vm11, %v17606_v4, %v8434_v5  ;;  %v17607_v25 = vunpack.i.l.bf16 %v11506_v63  ;;  %v17608_v14 = vpack.c.bf16 %v11457_v31, %v11103_v51 }
 0x1b5   :  { %8776 = vrot.lane.b32.xlu0 %v11790_v3, %s17516_s13  ;;  %6946 = vmatprep.subr.bf16.mxu1 %v6945_v47  ;;  %v789_v50 = vsel %vm779_vm12, %v8439_v38, %v17142_v19  ;;  %v6997_v51 = vpack.c.bf16 %v11624_v13, %v11583_v52  ;;  %v8459_v4 = vunpack.i.h.bf16 %v11560_v49 }
 0x1b6   :  { %v788_v3 = vsel %vm779_vm12, %v17607_v25, %v8439_v38  ;;  %6948 = vmatpush1.bf16.msra.mxu1 %v6947_v12  ;;  %6968 = vmatpush1.bf16.msra.mxu0 %v17608_v14  ;;  %v11930_v54 = vpop.permute.xlu1 %1416  ;;  %v722_v55 = vsel %vm712_vm11, %v8434_v5, %v17143_v57  ;;  %v8464_v5 = vunpack.i.h.bf16 %v11551_v15  ;;  %v17611_v25 = vunpack.i.h.bf16 %v11504_v10 }
 0x1b7   :  { %v1415_v47 = vpop.permute.xlu0 %1414  ;;  %v6969_v0 = vpack.c.bf16 %v789_v50, %v722_v55  ;;  %v6971_v38 = vpack.c.bf16 %v788_v3, %v721_v20  ;;  %v7001_v20 = vpack.c.bf16 %v11674_v40, %v11654_v11  ;;  %v17626_v57 = vunpack.i.l.bf16 %v11619_v1 }
 0x1b8   :  { %v1570_v37 = vsel %vm1434_vm10, %v1415_v47, %v11930_v54  ;;  %v1569_v63 = vsel %vm1434_vm10, %v11646_v33, %v1415_v47  ;;  %v9676_v33 = vld [vmem:[%s16964_s0 + $0x50] sm:$0xff] }
 0x1b9   :  { %8781 = vrot.lane.b32.xlu0 %v8780_v58, %s9727_s15  ;;  %1996 = vmatprep.subr.mxu1 %v1570_v37  ;;  %v17609_v58 = vld [vmem:[#allocation12_spill] sm:$0xff]  ;;  %v17612_v37 = vunpack.i.l.bf16 %v11551_v15  ;;  %v17616_v15 = vld [vmem:[#allocation6_spill] sm:$0xff] }
 0x1ba   :  { %6970 = vmatprep.subr.bf16.mxu0 %v6969_v0  ;;  %1997 = vmatpush1.msra.mxu1 %v1569_v63  ;;  %v11942_v31 = vpop.permute.xlu1 %8571  ;;  %v6999_v50 = vpack.c.bf16 %v17609_v58, %v9676_v33  ;;  %v11957_v0 = vld [vmem:[%s16965_s1] sm:$0xff]  ;;  %v17614_v58 = vunpack.i.h.bf16 %v11589_v42 }
 0x1bb   :  { %6972 = vmatpush1.bf16.msra.mxu0 %v6971_v38  ;;  %v11945_v12 = vpop.permute.xlu0 %8566  ;;  %6998 = vmatprep.subr.bf16.mxu1 %v6997_v51  ;;  %v17138_v55 = vunpack.i.l.bf16 %v11942_v31  ;;  %v922_v63 = vsel %vm913_vm14, %v17612_v37, %v8464_v5  ;;  %v17613_v38 = vunpack.i.l.bf16 %v11560_v49 }
 0x1bc   :  { %v17144_v52 = vunpack.i.h.bf16 %v11945_v12  ;;  %v8568_v13 = vunpack.i.l.bf16 %v11945_v12  ;;  %2013 = vmatmul.mubr.f32.vlgmr.msra.gmra.mrb[2].mxu1 %v11957_v0 }
 0x1bd   :  { %7000 = vmatpush1.bf16.msra.mxu1 %v6999_v50  ;;  %6290 = vmatprep.mubr.msk.f32.mxu1 %vm17610_vm9, %v17578_v39  ;;  %v855_v51 = vsel %vm846_vm13, %v17613_v38, %v8459_v4  ;;  %v856_v42 = vsel %vm846_vm13, %v8459_v4, %v17138_v55  ;;  %v8479_v4 = vunpack.i.h.bf16 %v11619_v1  ;;  %v17619_v55 = vld [vmem:[#allocation13_spill] sm:$0xff]  ;;  %vm17625_vm9 = vcmask 1014784  }
 0x1be   :  { %v11967_v3 = vsel %vm109_vm0, %v17611_v25, %v8568_v13  ;;  %v11972_v14 = vsel %vm109_vm0, %v8568_v13, %v17144_v52  ;;  %7002 = vmatprep.subr.bf16.mxu1 %v7001_v20  ;;  %v11975_v47 = vpop.permute.xlu1 %8581  ;;  %v17617_v20 = vpack.c.bf16 %v11259_v59, %v17616_v15  ;;  %v6975_v59 = vpack.c.bf16 %v922_v63, %v855_v51 }
 0x1bf   :  { %v11977_v11 = vpop.permute.xlu0 %8576  ;;  %v17137_v40 = vunpack.i.h.bf16 %v11975_v47  ;;  %v8583_v39 = vunpack.i.l.bf16 %v11975_v47  ;;  %v8785_v10 = vpack.i.bf16 %v11972_v14, %v11967_v3  ;;  %v17620_v8 = vunpack.i.h.bf16 %v17619_v55 }
 0x1c0   :  { %v17140_v33 = vunpack.i.l.bf16 %v11977_v11  ;;  %v989_v52 = vsel %vm980_vm15, %v17626_v57, %v8479_v4 }
 0x1c1   :  { %v11993_v50 = vsel %vm17145_vm1, %v17614_v58, %v8583_v39  ;;  %v11998_v13 = vsel %vm17145_vm1, %v8583_v39, %v17137_v40  ;;  %7004 = vmatpush1.bf16.msra.mxu1 %v17617_v20  ;;  %8786 = vrot.lane.b32.xlu1 %v8785_v10, %s9727_s15  ;;  %v17618_v58 = vld [vmem:[#allocation18_spill] sm:$0xff]  ;;  %v8529_v10 = vunpack.i.h.bf16 %v11809_v27  ;;  %vm17629_vm1 = vcmask 261120  }
 0x1c2   :  { %17615 = vst [vmem:[#allocation11_spill] sm:$0xff] %v11998_v13  ;;  %v12004_v49 = vpop.permute.xlu1 %8591  ;;  %v8790_v25 = vpack.i.bf16 %v11998_v13, %v11993_v50  ;;  %v923_v39 = vsel %vm913_vm14, %v8464_v5, %v17140_v33  ;;  %v8484_v15 = vunpack.i.h.bf16 %v17618_v58  ;;  %v17622_v55 = vunpack.i.l.bf16 %v17618_v58 }
 0x1c3   :  { %v12014_v37 = vpop.permute.xlu0 %8586  ;;  %v6973_v38 = vpack.c.bf16 %v923_v39, %v856_v42  ;;  %v17150_v51 = vunpack.i.l.bf16 %v12004_v49  ;;  %v8494_v58 = vunpack.i.h.bf16 %v11667_v21 }
 0x1c4   :  { %v17141_v20 = vunpack.i.h.bf16 %v12014_v37  ;;  %v8588_v40 = vunpack.i.l.bf16 %v12014_v37  ;;  %8791 = vrot.lane.b32.xlu0 %v8790_v25, %s9727_s15  ;;  %v1056_v33 = vsel %vm17623_vm7, %v17622_v55, %v8484_v15  ;;  %vm17627_vm7 = vmmov %vm17625_vm9 }
 0x1c5   :  { %6974 = vmatprep.subr.bf16.mxu0 %v6973_v38  ;;  %v990_v19 = vsel %vm980_vm15, %v8479_v4, %v17150_v51  ;;  %v6979_v51 = vpack.c.bf16 %v1056_v33, %v989_v52 }
 0x1c6   :  { %v12025_v5 = vsel %vm243_vm2, %v17620_v8, %v8588_v40  ;;  %v12030_v63 = vsel %vm243_vm2, %v8588_v40, %v17141_v20  ;;  %6976 = vmatpush1.bf16.msra.mxu0 %v6975_v59  ;;  %v12033_v42 = vpop.permute.xlu1 %8601  ;;  %v17624_v40 = vunpack.i.l.bf16 %v11809_v27 }
 0x1c7   :  { %17621 = vst [vmem:[#allocation22_spill] sm:$0xff] %v12030_v63  ;;  %v12035_v39 = vpop.permute.xlu0 %8596  ;;  %v17146_v25 = vunpack.i.h.bf16 %v12033_v42  ;;  %v8603_v38 = vunpack.i.l.bf16 %v12033_v42  ;;  %v8795_v8 = vpack.i.bf16 %v12030_v63, %v12025_v5 }
 0x1c8   :  { %v321_v20 = vsel %vm17625_vm9, %v17624_v40, %v8529_v10  ;;  %v17156_v59 = vunpack.i.l.bf16 %v12035_v39  ;;  %643 = vrot.lane.b32.xlu0 %v17512_v56, %s9720_s26  ;;  %vm17628_vm9 = vmmov %vm17627_vm7  ;;  %s9738_s26 = smov 75  }
 0x1c9   :  { %v12059_v27 = vsel %vm17627_vm7, %v8603_v38, %v17146_v25  ;;  %8796 = vrot.lane.b32.xlu1 %v8795_v8, %s9727_s15  ;;  %v322_v55 = vsel %vm17628_vm9, %v8529_v10, %v8603_v38  ;;  %v17630_v38 = vld [vmem:[#allocation16_spill] sm:$0xff]  ;;  %vm17664_vm9 = vcmask 1031168  }
 0x1ca   :  { %v12063_v40 = vpop.permute.xlu1 %8611  ;;  %v1057_v1 = vsel %vm17629_vm1, %v8484_v15, %v17156_v59  ;;  %v7005_v57 = vpack.c.bf16 %v11704_v7, %v322_v55  ;;  %v7007_v13 = vpack.c.bf16 %v17630_v38, %v321_v20  ;;  %v7009_v15 = vpack.c.bf16 %v11752_v30, %v11763_v18 }
 0x1cb   :  { %v12074_v22 = vpop.permute.xlu0 %8606  ;;  %v17160_v8 = vunpack.i.l.bf16 %v12063_v40  ;;  %v6977_v10 = vpack.c.bf16 %v1057_v1, %v990_v19  ;;  %v17631_v55 = vunpack.i.l.bf16 %v11667_v21  ;;  %v17632_v20 = vunpack.i.h.bf16 %v11677_v61 }
 0x1cc   :  { %v17155_v63 = vunpack.i.h.bf16 %v12074_v22  ;;  %v8608_v4 = vunpack.i.l.bf16 %v12074_v22  ;;  %7006 = vmatprep.subr.bf16.mxu1 %v7005_v57  ;;  %vm17645_vm1 = vcmask 752640  }
 0x1cd   :  { %v1126_v7 = vsel %vm1112_vm4, %v8494_v58, %v17160_v8  ;;  %6978 = vmatprep.subr.bf16.mxu0 %v6977_v10  ;;  %7008 = vmatpush1.bf16.msra.mxu1 %v7007_v13  ;;  %v1125_v19 = vsel %vm1112_vm4, %v17631_v55, %v8494_v58  ;;  %v17633_v10 = vunpack.i.h.bf16 %v11695_v9  ;;  %v17636_v55 = vld [vmem:[#allocation17_spill] sm:$0xff]  ;;  %vm17646_vm7 = vmmov %vm17645_vm1 }
 0x1ce   :  { %v12091_v1 = vsel %vm377_vm3, %v17632_v20, %v8608_v4  ;;  %v12096_v52 = vsel %vm377_vm3, %v8608_v4, %v17155_v63  ;;  %6980 = vmatpush1.bf16.msra.mxu0 %v6979_v51  ;;  %v12098_v30 = vpop.permute.xlu1 %8621  ;;  %7010 = vmatprep.subr.bf16.mxu1 %v7009_v15  ;;  %v8800_v13 = vpack.i.bf16 %v1126_v7, %v1125_v19  ;;  %v17634_v4 = vunpack.i.h.bf16 %v11713_v45  ;;  %v17635_v7 = vld [vmem:[#allocation20_spill] sm:$0xff] }
 0x1cf   :  { %v12100_v18 = vpop.permute.xlu0 %8616  ;;  %v17152_v21 = vunpack.i.h.bf16 %v12098_v30  ;;  %v8623_v33 = vunpack.i.l.bf16 %v12098_v30  ;;  %v8805_v61 = vpack.i.bf16 %v12096_v52, %v12091_v1  ;;  %v17637_v19 = vpack.c.bf16 %v17635_v7, %v17636_v55 }
 0x1d0   :  { %v17153_v58 = vunpack.i.h.bf16 %v12100_v18  ;;  %v8618_v57 = vunpack.i.l.bf16 %v12100_v18  ;;  %8801 = vrot.lane.b32.xlu1 %v8800_v13, %s9727_s15  ;;  %v17638_v7 = vunpack.i.h.bf16 %v11735_v48 }
 0x1d1   :  { %v1459_v51 = vsel %vm1434_vm10, %v17633_v10, %v8623_v33  ;;  %8806 = vrot.lane.b32.xlu0 %v8805_v61, %s9727_s15  ;;  %v1460_v38 = vsel %vm1434_vm10, %v8623_v33, %v17152_v21  ;;  %7012 = vmatpush1.bf16.msra.mxu1 %v17637_v19 }
 0x1d2   :  { %v1443_v15 = vsel %vm1434_vm10, %v17634_v4, %v8618_v57  ;;  %v12122_v20 = vpop.permute.xlu1 %8631  ;;  %v1444_v9 = vsel %vm1434_vm10, %v8618_v57, %v17153_v58  ;;  %v8554_v58 = vunpack.i.h.bf16 %v11870_v60 }
 0x1d3   :  { %v12127_v13 = vpop.permute.xlu0 %8626  ;;  %v17151_v61 = vunpack.i.h.bf16 %v12122_v20  ;;  %v8633_v33 = vunpack.i.l.bf16 %v12122_v20  ;;  %v6981_v10 = vpack.c.bf16 %v1460_v38, %v1444_v9  ;;  %v6983_v45 = vpack.c.bf16 %v1459_v51, %v1443_v15 }
 0x1d4   :  { %v17154_v4 = vunpack.i.h.bf16 %v12127_v13  ;;  %v8628_v25 = vunpack.i.l.bf16 %v12127_v13  ;;  %710 = vrot.lane.b32.xlu1 %v17512_v56, %s9721_s27  ;;  %v17640_v51 = vunpack.i.h.bf16 %v11744_v32 }
 0x1d5   :  { %v12136_v55 = vsel %vm511_vm5, %v17638_v7, %v8633_v33  ;;  %v12141_v57 = vsel %vm511_vm5, %v8633_v33, %v17151_v61  ;;  %777 = vrot.lane.b32.xlu0 %v17512_v56, %s9722_s14  ;;  %6982 = vmatprep.subr.bf16.mxu0 %v6981_v10  ;;  %v17642_v61 = vunpack.i.h.bf16 %v11770_v23  ;;  %s9741_s14 = smov 47  }
 0x1d6   :  { %17639 = vst [vmem:[#allocation23_spill] sm:$0xff] %v12141_v57  ;;  %v12150_v38 = vsel %vm444_vm6, %v17640_v51, %v8628_v25  ;;  %v12155_v48 = vsel %vm444_vm6, %v8628_v25, %v17154_v4  ;;  %v12157_v15 = vpop.permute.xlu1 %8641  ;;  %v8815_v19 = vpack.i.bf16 %v12141_v57, %v12136_v55  ;;  %6984 = vmatpush1.bf16.msra.mxu0 %v6983_v45  ;;  %v17643_v4 = vunpack.i.h.bf16 %v11774_v34 }
 0x1d7   :  { %17641 = vst [vmem:[#allocation25_spill] sm:$0xff] %v12155_v48  ;;  %v12161_v9 = vpop.permute.xlu0 %8636  ;;  %v17157_v33 = vunpack.i.h.bf16 %v12157_v15  ;;  %v8643_v32 = vunpack.i.l.bf16 %v12157_v15  ;;  %v8810_v7 = vpack.i.bf16 %v12155_v48, %v12150_v38  ;;  %v17644_v34 = vunpack.i.l.bf16 %v11870_v60 }
 0x1d8   :  { %v17158_v51 = vunpack.i.h.bf16 %v12161_v9  ;;  %v8638_v25 = vunpack.i.l.bf16 %v12161_v9 }
 0x1d9   :  { %v1491_v45 = vsel %vm1434_vm10, %v17642_v61, %v8643_v32  ;;  %8811 = vrot.lane.b32.xlu1 %v8810_v7, %s9727_s15  ;;  %8816 = vrot.lane.b32.xlu0 %v8815_v19, %s9727_s15  ;;  %v1492_v21 = vsel %vm1434_vm10, %v8643_v32, %v17157_v33 }
 0x1da   :  { %v1475_v63 = vsel %vm1434_vm10, %v17643_v4, %v8638_v25  ;;  %v12183_v59 = vpop.permute.xlu1 %8651  ;;  %v1476_v23 = vsel %vm1434_vm10, %v8638_v25, %v17158_v51  ;;  %v656_v4 = vsel %vm17645_vm1, %v17644_v34, %v8554_v58  ;;  %v17648_v51 = vunpack.i.h.bf16 %v11804_v6 }
 0x1db   :  { %v12188_v61 = vpop.permute.xlu0 %8646  ;;  %v6985_v7 = vpack.c.bf16 %v1492_v21, %v1476_v23  ;;  %v6987_v19 = vpack.c.bf16 %v1491_v45, %v1475_v63  ;;  %v17161_v32 = vunpack.i.h.bf16 %v12183_v59  ;;  %v8653_v25 = vunpack.i.l.bf16 %v12183_v59 }
 0x1dc   :  { %v17159_v10 = vunpack.i.l.bf16 %v12188_v61 }
 0x1dd   :  { %844 = vrot.lane.b32.xlu1 %v17512_v56, %s9724_s21  ;;  %911 = vrot.lane.b32.xlu0 %v17512_v56, %s17432_s28  ;;  %s9742_s28 = smov 119  }
 0x1de   :  { %6986 = vmatprep.subr.bf16.mxu0 %v6985_v7  ;;  %v573_v33 = vpop.permute.xlu1 %572  ;;  %v657_v63 = vsel %vm17646_vm7, %v8554_v58, %v17159_v10  ;;  %v17647_v7 = vld [vmem:[#allocation21_spill] sm:$0xff]  ;;  %v1507_v58 = vsel %vm1434_vm10, %v17648_v51, %v8653_v25  ;;  %v1508_v10 = vsel %vm1434_vm10, %v8653_v25, %v17161_v32  ;;  %v8564_v25 = vunpack.i.h.bf16 %v11894_v26 }
 0x1df   :  { %6988 = vmatpush1.bf16.msra.mxu0 %v6987_v19  ;;  %v12203_v21 = vpop.permute.xlu0 %8656  ;;  %v7013_v45 = vpack.c.bf16 %v657_v63, %v11827_v43  ;;  %v7015_v34 = vpack.c.bf16 %v656_v4, %v17647_v7  ;;  %v17649_v19 = vunpack.i.h.bf16 %v11823_v16  ;;  %v12231_v16 = vsel %vm578_vm8, %v11855_v17, %v573_v33 }
 0x1e0   :  { %v17162_v23 = vunpack.i.h.bf16 %v12203_v21  ;;  %v8658_v60 = vunpack.i.l.bf16 %v12203_v21  ;;  %v8559_v7 = vunpack.i.h.bf16 %v11903_v24  ;;  %v17653_v32 = vunpack.i.l.bf16 %v11903_v24 }
 0x1e1   :  { %978 = vrot.lane.b32.xlu1 %v17512_v56, %s17509_s17  ;;  %1045 = vrot.lane.b32.xlu0 %v17512_v56, %s17516_s13  ;;  %vm17671_vm7 = vcmask 588800   ;;  %s9743_s13 = smov 44  }
 0x1e2   :  { %v1523_v43 = vsel %vm1434_vm10, %v17649_v19, %v8658_v60  ;;  %7014 = vmatprep.subr.bf16.mxu1 %v7013_v45  ;;  %v12219_v63 = vpop.permute.xlu1 %8661  ;;  %v1524_v8 = vsel %vm1434_vm10, %v8658_v60, %v17162_v23  ;;  %v17654_v23 = vunpack.i.l.bf16 %v11894_v26 }
 0x1e3   :  { %7016 = vmatpush1.bf16.msra.mxu1 %v7015_v34  ;;  %v12227_v4 = vpop.permute.xlu0 %574  ;;  %v6989_v6 = vpack.c.bf16 %v1524_v8, %v1508_v10  ;;  %v6991_v51 = vpack.c.bf16 %v1523_v43, %v1507_v58  ;;  %v12246_v8 = vld [vmem:[%s16964_s0 + $0x78] sm:$0xff]  ;;  %v17652_v34 = vunpack.i.h.bf16 %v11945_v12  ;;  %v17655_v12 = vunpack.i.l.bf16 %v12219_v63 }
 0x1e4   :  { %v12235_v45 = vsel %vm578_vm8, %v573_v33, %v12227_v4  ;;  %v8820_v17 = vpack.i.bf16 %v17512_v56, %v12246_v8 }
 0x1e5   :  { %17650 = vst [vmem:[#allocation24_spill] sm:$0xff] %v12235_v45  ;;  %1426 = vrot.lane.b32.xlu1 %v12231_v16, %s9727_s15  ;;  %1428 = vrot.lane.b32.xlu0 %v12235_v45, %s9727_s15  ;;  %v8574_v45 = vunpack.i.h.bf16 %v11942_v31 }
 0x1e6   :  { %6990 = vmatprep.subr.bf16.mxu0 %v6989_v6  ;;  %v12251_v10 = vpop.permute.xlu1 %107  ;;  %v723_v6 = vsel %vm712_vm11, %v17653_v32, %v8559_v7 }
 0x1e7   :  { %17651 = vst [vmem:[#allocation19_spill] sm:$0xff] %v12251_v10  ;;  %6992 = vmatpush1.bf16.msra.mxu0 %v6991_v51  ;;  %v12253_v60 = vpop.permute.xlu0 %8666  ;;  %v12259_v58 = vsel %vm109_vm0, %v17652_v34, %v12251_v10  ;;  %v790_v51 = vsel %vm779_vm12, %v17654_v23, %v8564_v25  ;;  %v724_v34 = vsel %vm712_vm11, %v8559_v7, %v17655_v12  ;;  %v8579_v7 = vunpack.i.h.bf16 %v11977_v11 }
 0x1e8   :  { %v17167_v19 = vunpack.i.l.bf16 %v12253_v60  ;;  %v8825_v43 = vpack.i.bf16 %v12251_v10, %v12259_v58  ;;  %v17656_v12 = vunpack.i.h.bf16 %v11872_v41 }
 0x1e9   :  { %8821 = vrot.lane.b32.xlu1 %v8820_v17, %s9727_s15 }
 0x1ea   :  { %v12271_v33 = vpop.permute.xlu1 %8676  ;;  %8826 = vrot.lane.b32.xlu0 %v8825_v43, %s9727_s15  ;;  %v791_v24 = vsel %vm779_vm12, %v8564_v25, %v17167_v19  ;;  %v7019_v43 = vpack.c.bf16 %v790_v51, %v723_v6 }
 0x1eb   :  { %v12280_v56 = vpop.permute.xlu0 %8671  ;;  %v8679_v26 = vunpack.i.h.bf16 %v12271_v33  ;;  %v8678_v32 = vunpack.i.l.bf16 %v12271_v33  ;;  %v7017_v23 = vpack.c.bf16 %v791_v24, %v724_v34  ;;  %v17657_v34 = vunpack.i.h.bf16 %v11847_v53 }
 0x1ec   :  { %v8673_v10 = vunpack.i.l.bf16 %v12280_v56  ;;  %v17658_v6 = vunpack.i.h.bf16 %v12280_v56 }
 0x1ed   :  { %v1555_v25 = vsel %vm1434_vm10, %v17656_v12, %v8678_v32  ;;  %7018 = vmatprep.subr.bf16.mxu1 %v7017_v23  ;;  %v1556_v19 = vsel %vm1434_vm10, %v8678_v32, %v8679_v26  ;;  %v17659_v32 = vunpack.i.l.bf16 %v11942_v31 }
 0x1ee   :  { %v1539_v24 = vsel %vm1434_vm10, %v17657_v34, %v8673_v10  ;;  %7020 = vmatpush1.bf16.msra.mxu1 %v7019_v43  ;;  %v12297_v17 = vpop.permute.xlu1 %8686  ;;  %v1540_v51 = vsel %vm1434_vm10, %v8673_v10, %v17658_v6  ;;  %v17660_v43 = vunpack.i.l.bf16 %v11977_v11  ;;  %v8614_v6 = vunpack.i.h.bf16 %v12063_v40 }
 0x1ef   :  { %v12302_v48 = vpop.permute.xlu0 %8681  ;;  %v17170_v41 = vunpack.i.l.bf16 %v12297_v17  ;;  %v6993_v23 = vpack.c.bf16 %v1556_v19, %v1540_v51  ;;  %v6995_v12 = vpack.c.bf16 %v1555_v25, %v1539_v24  ;;  %v857_v53 = vsel %vm846_vm13, %v17659_v32, %v8574_v45 }
 0x1f0   :  { %v8683_v57 = vunpack.i.l.bf16 %v12302_v48  ;;  %v924_v34 = vsel %vm913_vm14, %v17660_v43, %v8579_v7  ;;  %v17662_v24 = vunpack.i.h.bf16 %v12014_v37  ;;  %v8594_v43 = vunpack.i.h.bf16 %v12004_v49 }
 0x1f1   :  { %6994 = vmatprep.subr.bf16.mxu0 %v6993_v23  ;;  %v925_v10 = vsel %vm913_vm14, %v8579_v7, %v17170_v41  ;;  %v7023_v32 = vpack.c.bf16 %v924_v34, %v857_v53  ;;  %v17663_v7 = vunpack.i.h.bf16 %v11975_v47 }
 0x1f2   :  { %6996 = vmatpush1.bf16.msra.mxu0 %v6995_v12  ;;  %v242_v19 = vpop.permute.xlu1 %241  ;;  %v858_v25 = vsel %vm846_vm13, %v8574_v45, %v8683_v57  ;;  %v8599_v45 = vunpack.i.h.bf16 %v12035_v39 }
 0x1f3   :  { %v12319_v31 = vpop.permute.xlu0 %174  ;;  %v12324_v11 = vsel %vm243_vm2, %v17662_v24, %v242_v19  ;;  %v7021_v51 = vpack.c.bf16 %v925_v10, %v858_v25  ;;  %v17665_v24 = vunpack.i.l.bf16 %v12063_v40  ;;  %v17666_v25 = vunpack.i.l.bf16 %v12004_v49 }
 0x1f4   :  { %17661 = vst [vmem:[#allocation14_spill] sm:$0xff] %v12319_v31  ;;  %v8835_v23 = vpack.i.bf16 %v242_v19, %v12324_v11  ;;  %v12331_v12 = vsel %vm17664_vm9, %v17663_v7, %v12319_v31  ;;  %v17667_v40 = vunpack.i.l.bf16 %v12035_v39  ;;  %vm17693_vm9 = vmmov %vm17671_vm7 }
 0x1f5   :  { %7022 = vmatprep.subr.bf16.mxu1 %v7021_v51  ;;  %v8830_v37 = vpack.i.bf16 %v12319_v31, %v12331_v12  ;;  %v1127_v10 = vsel %vm1112_vm4, %v17665_v24, %v8614_v6  ;;  %v991_v51 = vsel %vm980_vm15, %v17666_v25, %v8594_v43  ;;  %vm17668_vm4 = vcmask 261120  }
 0x1f6   :  { %7024 = vmatpush1.bf16.msra.mxu1 %v7023_v32  ;;  %v12340_v53 = vpop.permute.xlu1 %8696  ;;  %8836 = vrot.lane.b32.xlu0 %v8835_v23, %s9727_s15  ;;  %v1058_v32 = vsel %vm17668_vm4, %v17667_v40, %v8599_v45  ;;  %v8840_v7 = vpack.i.bf16 %v8614_v6, %v1127_v10  ;;  %vm17669_vm1 = vmmov %vm17668_vm4 }
 0x1f7   :  { %v12343_v47 = vpop.permute.xlu0 %8691  ;;  %v8698_v34 = vunpack.i.l.bf16 %v12340_v53  ;;  %8831 = vrot.lane.b32.xlu1 %v8830_v37, %s9727_s15  ;;  %v7027_v10 = vpack.c.bf16 %v1058_v32, %v991_v51  ;;  %v12387_v51 = vld [vmem:[%s16965_s1 + $0x8] sm:$0xff]  ;;  %v17672_v32 = vunpack.i.h.bf16 %v12127_v13  ;;  %v17674_v13 = vunpack.i.h.bf16 %v12100_v18 }
 0x1f8   :  { %v8693_v19 = vunpack.i.l.bf16 %v12343_v47  ;;  %v17677_v18 = vunpack.i.h.bf16 %v12122_v20 }
 0x1f9   :  { %v1059_v23 = vsel %vm17669_vm1, %v8599_v45, %v8698_v34  ;;  %v7045_v45 = vpack.c.bf16 %v11967_v3, %v11914_v62 }
 0x1fa   :  { %v12357_v24 = vpop.permute.xlu1 %1420  ;;  %v992_v37 = vsel %vm980_vm15, %v8594_v43, %v8693_v19  ;;  %v9679_v43 = vld [vmem:[%s16964_s0 + $0x60] sm:$0xff]  ;;  %s9745_s0 = smov 69  }
 0x1fb   :  { %v1419_v41 = vpop.permute.xlu0 %1418  ;;  %8841 = vrot.lane.b32.xlu1 %v8840_v7, %s9727_s15  ;;  %v7025_v49 = vpack.c.bf16 %v1059_v23, %v992_v37  ;;  %v7047_v40 = vpack.c.bf16 %v11629_v46, %v9679_v43  ;;  %v17675_v43 = vunpack.i.h.bf16 %v12098_v30 }
 0x1fc   :  { %v1572_v39 = vsel %vm1434_vm10, %v1419_v41, %v12357_v24  ;;  %v1571_v6 = vsel %vm1434_vm10, %v11930_v54, %v1419_v41  ;;  %v7049_v54 = vpack.c.bf16 %v12025_v5, %v11993_v50  ;;  %v17670_v41 = vunpack.i.h.bf16 %v12074_v22 }
 0x1fd   :  { %2067 = vmatprep.subr.mxu0 %v1572_v39  ;;  %7026 = vmatprep.subr.bf16.mxu1 %v7025_v49 }
 0x1fe   :  { %2068 = vmatpush1.msra.mxu0 %v1571_v6  ;;  %7028 = vmatpush1.bf16.msra.mxu1 %v7027_v10  ;;  %v12369_v25 = vpop.permute.xlu1 %8701  ;;  %v17673_v6 = vpack.c.bf16 %v11605_v28, %v11614_v36  ;;  %v17676_v36 = vld [vmem:[#allocation8_spill] sm:$0xff] }
 0x1ff   :  { %v376_v7 = vpop.permute.xlu0 %375  ;;  %2084 = vmatmul.mubr.f32.vlgmr.msra.gmra.mrb[4].mxu0 %v11957_v0  ;;  %7046 = vmatprep.subr.bf16.mxu0 %v7045_v45  ;;  %v8704_v3 = vunpack.i.h.bf16 %v12369_v25  ;;  %v8703_v50 = vunpack.i.l.bf16 %v12369_v25 }
 0x200   :  { %v12381_v62 = vsel %vm377_vm3, %v17670_v41, %v376_v7  ;;  %7048 = vmatpush1.bf16.msra.mxu0 %v7047_v40  ;;  %6291 = vmatprep.mubr.msk.f32.mxu0 %vm17671_vm7, %v12387_v51  ;;  %vm17701_vm7 = vcmask 261120  }
 0x201   :  { %v8845_v46 = vpack.i.bf16 %v376_v7, %v12381_v62  ;;  %7050 = vmatprep.subr.bf16.mxu0 %v7049_v54  ;;  %v1446_v10 = vsel %vm1434_vm10, %v8703_v50, %v8704_v3  ;;  %v1445_v45 = vsel %vm1434_vm10, %v17674_v13, %v8703_v50  ;;  %v8039_v54 = vunpack.i.h.bf16 %v17676_v36  ;;  %v1725_v13 = vld [vmem:[%s16966_s2] sm:$0xff] }
 0x202   :  { %v443_v22 = vpop.permute.xlu1 %442 }
 0x203   :  { %v12393_v5 = vpop.permute.xlu0 %8706  ;;  %v12398_v23 = vsel %vm444_vm6, %v17672_v32, %v443_v22  ;;  %8846 = vrot.lane.b32.xlu0 %v8845_v46, %s9727_s15  ;;  %vm17688_vm6 = vcmask 752640  }
 0x204   :  { %v8709_v37 = vunpack.i.h.bf16 %v12393_v5  ;;  %v8708_v49 = vunpack.i.l.bf16 %v12393_v5  ;;  %v8850_v39 = vpack.i.bf16 %v443_v22, %v12398_v23  ;;  %7052 = vmatpush1.bf16.msra.mxu0 %v17673_v6 }
 0x206   :  { %v1461_v40 = vsel %vm1434_vm10, %v17675_v43, %v8708_v49  ;;  %v12416_v7 = vpop.permute.xlu1 %8711  ;;  %8851 = vrot.lane.b32.xlu1 %v8850_v39, %s9727_s15  ;;  %v1462_v28 = vsel %vm1434_vm10, %v8708_v49, %v8709_v37  ;;  %v12432_v39 = vsel %vm578_vm8, %v12227_v4, %v8039_v54  ;;  %v17678_v43 = vunpack.i.h.bf16 %v12161_v9  ;;  %vm17689_vm8 = vmmov %vm17688_vm6 }
 0x207   :  { %v510_v41 = vpop.permute.xlu0 %509  ;;  %v7029_v46 = vpack.c.bf16 %v1462_v28, %v1446_v10  ;;  %v7031_v22 = vpack.c.bf16 %v1461_v40, %v1445_v45  ;;  %v8713_v32 = vunpack.i.l.bf16 %v12416_v7  ;;  %v8714_v49 = vunpack.i.h.bf16 %v12416_v7 }
 0x208   :  { %v12426_v50 = vsel %vm511_vm5, %v17677_v18, %v510_v41  ;;  %v17679_v28 = vunpack.i.h.bf16 %v12033_v42  ;;  %vm17680_vm5 = vcmask 1014784  }
 0x209   :  { %v8855_v30 = vpack.i.bf16 %v510_v41, %v12426_v50  ;;  %7030 = vmatprep.subr.bf16.mxu1 %v7029_v46  ;;  %v1477_v40 = vsel %vm1434_vm10, %v17678_v43, %v8713_v32  ;;  %v17681_v41 = vunpack.i.h.bf16 %v12157_v15  ;;  %v1478_v18 = vsel %vm1434_vm10, %v8713_v32, %v8714_v49  ;;  %vm17696_vm4 = vmmov %vm17680_vm5 }
 0x20a   :  { %7032 = vmatpush1.bf16.msra.mxu1 %v7031_v22  ;;  %v12435_v6 = vpop.permute.xlu1 %8721  ;;  %1430 = vrot.lane.b32.xlu1 %v12432_v39, %s9727_s15  ;;  %vm17697_vm1 = vmmov %vm17696_vm4 }
 0x20b   :  { %v12439_v20 = vpop.permute.xlu0 %8716  ;;  %v8723_v10 = vunpack.i.l.bf16 %v12435_v6  ;;  %8856 = vrot.lane.b32.xlu0 %v8855_v30, %s9727_s15 }
 0x20c   :  { %v17171_v4 = vunpack.i.h.bf16 %v12439_v20  ;;  %v8718_v45 = vunpack.i.l.bf16 %v12439_v20 }
 0x20d   :  { %v324_v36 = vsel %vm17680_vm5, %v17679_v28, %v8723_v10  ;;  %vm17702_vm5 = vmmov %vm17701_vm7 }
 0x20e   :  { %v1493_v46 = vsel %vm1434_vm10, %v17681_v41, %v8718_v45  ;;  %v12459_v22 = vpop.permute.xlu1 %8731  ;;  %1728 = vperm.xlu1 %8860, %v1725_v13   ;;  %v1494_v9 = vsel %vm1434_vm10, %v8718_v45, %v17171_v4  ;;  %v7053_v30 = vpack.c.bf16 %v12091_v1, %v324_v36  ;;  %v7057_v45 = vpack.c.bf16 %v12136_v55, %v12150_v38  ;;  %v12477_v4 = vpop.f32.mrb[0].mxu0 }
 0x20f   :  { %v12468_v42 = vpop.permute.xlu0 %8726  ;;  %v8734_v43 = vunpack.i.h.bf16 %v12459_v22  ;;  %v8733_v15 = vunpack.i.l.bf16 %v12459_v22  ;;  %1432 = vrot.lane.b32.xlu0 %v8039_v54, %s9727_s15  ;;  %v7033_v28 = vpack.c.bf16 %v1494_v9, %v1478_v18  ;;  %v7035_v13 = vpack.c.bf16 %v1493_v46, %v1477_v40  ;;  %v12488_v46 = vpop.f32.mrb[1].mxu0 }
 0x210   :  { %v8729_v41 = vunpack.i.h.bf16 %v12468_v42  ;;  %v8728_v32 = vunpack.i.l.bf16 %v12468_v42  ;;  %7054 = vmatprep.subr.bf16.mxu0 %v7053_v30  ;;  %v17682_v1 = vunpack.i.h.bf16 %v12203_v21  ;;  %v17683_v54 = vpack.c.bf16 %v11709_v35, %v12059_v27 }
 0x211   :  { %7034 = vmatprep.subr.bf16.mxu1 %v7033_v28  ;;  %v1526_v40 = vsel %vm1434_vm10, %v8733_v15, %v8734_v43  ;;  %v17684_v18 = vunpack.i.h.bf16 %v12183_v59 }
 0x212   :  { %v1525_v36 = vsel %vm1434_vm10, %v17682_v1, %v8733_v15  ;;  %7056 = vmatpush1.bf16.msra.mxu0 %v17683_v54  ;;  %7036 = vmatpush1.bf16.msra.mxu1 %v7035_v13  ;;  %v12493_v38 = vpop.permute.xlu1 %8741  ;;  %v1510_v21 = vsel %vm1434_vm10, %v8728_v32, %v8729_v41  ;;  %v8649_v13 = vunpack.i.h.bf16 %v12188_v61 }
 0x213   :  { %v1509_v55 = vsel %vm1434_vm10, %v17684_v18, %v8728_v32  ;;  %7058 = vmatprep.subr.bf16.mxu0 %v7057_v45  ;;  %v12498_v35 = vpop.permute.xlu0 %8736  ;;  %v8744_v27 = vunpack.i.h.bf16 %v12493_v38  ;;  %v8743_v9 = vunpack.i.l.bf16 %v12493_v38  ;;  %v7037_v30 = vpack.c.bf16 %v1526_v40, %v1510_v21 }
 0x214   :  { %v7039_v15 = vpack.c.bf16 %v1525_v36, %v1509_v55  ;;  %v8739_v59 = vunpack.i.h.bf16 %v12498_v35  ;;  %v8738_v28 = vunpack.i.l.bf16 %v12498_v35  ;;  %v17685_v32 = vpack.c.bf16 %v11757_v29, %v11768_v2 }
 0x215   :  { %v1557_v45 = vsel %vm1434_vm10, %v8679_v26, %v8743_v9  ;;  %7038 = vmatprep.subr.bf16.mxu1 %v7037_v30  ;;  %v1558_v1 = vsel %vm1434_vm10, %v8743_v9, %v8744_v27  ;;  %v17686_v36 = vunpack.i.h.bf16 %v12280_v56  ;;  %v17687_v55 = vunpack.i.l.bf16 %v12188_v61 }
 0x216   :  { %7060 = vmatpush1.bf16.msra.mxu0 %v17685_v32  ;;  %7040 = vmatpush1.bf16.msra.mxu1 %v7039_v15  ;;  %v12517_v40 = vpop.permute.xlu1 %8751  ;;  %v1542_v33 = vsel %vm1434_vm10, %v8738_v28, %v8739_v59  ;;  %v8664_v56 = vunpack.i.h.bf16 %v12219_v63  ;;  %v8669_v9 = vunpack.i.h.bf16 %v12253_v60 }
 0x217   :  { %v1541_v54 = vsel %vm1434_vm10, %v17686_v36, %v8738_v28  ;;  %v12522_v26 = vpop.permute.xlu0 %8746  ;;  %v7041_v18 = vpack.c.bf16 %v1558_v1, %v1542_v33  ;;  %v658_v21 = vsel %vm17688_vm6, %v17687_v55, %v8649_v13  ;;  %v8753_v30 = vunpack.i.l.bf16 %v12517_v40  ;;  %v17690_v1 = vld [vmem:[#allocation10_spill] sm:$0xff] }
 0x218   :  { %v7043_v29 = vpack.c.bf16 %v1557_v45, %v1541_v54  ;;  %v8748_v2 = vunpack.i.l.bf16 %v12522_v26  ;;  %v7063_v36 = vpack.c.bf16 %v658_v21, %v17690_v1  ;;  %v17691_v54 = vunpack.i.l.bf16 %v12219_v63 }
 0x219   :  { %7042 = vmatprep.subr.bf16.mxu1 %v7041_v18  ;;  %v17692_v18 = vunpack.i.l.bf16 %v12253_v60  ;;  %v8689_v1 = vunpack.i.h.bf16 %v12297_v17  ;;  %v8754_v7 = vunpack.i.h.bf16 %v12517_v40 }
 0x21a   :  { %7044 = vmatpush1.bf16.msra.mxu1 %v7043_v29  ;;  %v1423_v15 = vpop.permute.xlu1 %1422  ;;  %v659_v28 = vsel %vm17689_vm8, %v8649_v13, %v8748_v2  ;;  %v725_v33 = vsel %vm712_vm11, %v17691_v54, %v8664_v56  ;;  %vm17706_vm8 = vmmov %vm17688_vm6 }
 0x21b   :  { %v12534_v45 = vpop.permute.xlu0 %8756  ;;  %v7061_v32 = vpack.c.bf16 %v659_v28, %v12231_v16  ;;  %v792_v29 = vsel %vm779_vm12, %v17692_v18, %v8669_v9  ;;  %v726_v16 = vsel %vm712_vm11, %v8664_v56, %v8753_v30  ;;  %v1573_v56 = vsel %vm1434_vm10, %v12357_v24, %v1423_v15 }
 0x21c   :  { %v8758_v61 = vunpack.i.l.bf16 %v12534_v45  ;;  %v7067_v28 = vpack.c.bf16 %v792_v29, %v725_v33  ;;  %v7095_v33 = vpack.c.bf16 %v11972_v14, %v11786_v44  ;;  %v8724_v18 = vunpack.i.h.bf16 %v12435_v6 }
 0x21d   :  { %7062 = vmatprep.subr.bf16.mxu0 %v7061_v32  ;;  %v8684_v32 = vunpack.i.h.bf16 %v12302_v48  ;;  %v7097_v24 = vpack.c.bf16 %v12324_v11, %v12331_v12  ;;  %v8694_v11 = vunpack.i.h.bf16 %v12343_v47  ;;  %v8699_v12 = vunpack.i.h.bf16 %v12340_v53 }
 0x21e   :  { %7064 = vmatpush1.bf16.msra.mxu0 %v7063_v36  ;;  %v12545_v55 = vpop.permute.xlu1 %8761  ;;  %v793_v13 = vsel %vm779_vm12, %v8669_v9, %v8758_v61  ;;  %v7093_v36 = vpack.c.bf16 %v12259_v58, %v12246_v8  ;;  %v325_v48 = vsel %vm17696_vm4, %v8723_v10, %v8724_v18  ;;  %vm2694_vm4 = vcmask 998400  }
 0x21f   :  { %v12553_v21 = vpop.permute.xlu0 %1424  ;;  %v7065_v63 = vpack.c.bf16 %v793_v13, %v726_v16  ;;  %v8763_v9 = vunpack.i.l.bf16 %v12545_v55  ;;  %v859_v44 = vsel %vm846_vm13, %v8683_v57, %v8684_v32  ;;  %v993_v6 = vsel %vm980_vm15, %v8693_v19, %v8694_v11 }
 0x220   :  { %v1574_v60 = vsel %vm1434_vm10, %v1423_v15, %v12553_v21  ;;  %v1060_v10 = vsel %vm17701_vm7, %v8698_v34, %v8699_v12  ;;  %v7105_v19 = vpack.c.bf16 %v12426_v50, %v12398_v23  ;;  %vm17728_vm7 = vmmov %vm17697_vm1 }
 0x221   :  { %2138 = vmatprep.subr.mxu1 %v1574_v60  ;;  %7066 = vmatprep.subr.bf16.mxu0 %v7065_v63  ;;  %v7075_v53 = vpack.c.bf16 %v1060_v10, %v993_v6 }
 0x222   :  { %2139 = vmatpush1.msra.mxu1 %v1573_v56  ;;  %7068 = vmatpush1.bf16.msra.mxu0 %v7067_v28  ;;  %v12564_v54 = vpop.permute.xlu1 %8771  ;;  %v17698_v56 = vld [vmem:[#allocation22_spill] sm:$0xff] }
 0x223   :  { %v12569_v29 = vpop.permute.xlu0 %8766  ;;  %2155 = vmatmul.mubr.f32.vlgmr.msra.gmra.mrb[4].mxu1 %v11957_v0  ;;  %7094 = vmatprep.subr.bf16.mxu1 %v7093_v36  ;;  %v12574_v8 = vpop.f32.mrb[0].mxu1  ;;  %v17694_v0 = vunpack.i.l.bf16 %v12297_v17  ;;  %v8773_v16 = vunpack.i.l.bf16 %v12564_v54  ;;  %v17699_v36 = vld [vmem:[#allocation11_spill] sm:$0xff] }
 0x224   :  { %v8768_v58 = vunpack.i.l.bf16 %v12569_v29  ;;  %7096 = vmatpush1.bf16.msra.mxu1 %v7095_v33  ;;  %6292 = vmatprep.mubr.msk.f32.mxu1 %vm17693_vm9, %v12387_v51  ;;  %v12579_v15 = vpop.f32.mrb[1].mxu1  ;;  %v860_v51 = vsel %vm846_vm13, %v8684_v32, %v8763_v9  ;;  %v17700_v33 = vpack.c.bf16 %v17698_v56, %v17699_v36 }
 0x225   :  { %v926_v14 = vsel %vm913_vm14, %v17694_v0, %v8689_v1  ;;  %7098 = vmatprep.subr.bf16.mxu1 %v7097_v24  ;;  %v17704_v0 = vld [vmem:[#allocation25_spill] sm:$0xff] }
 0x226   :  { %v12590_v13 = vpop.permute.xlu1 %308  ;;  %v927_v57 = vsel %vm913_vm14, %v8689_v1, %v8768_v58  ;;  %v7071_v32 = vpack.c.bf16 %v926_v14, %v859_v44  ;;  %v7103_v1 = vpack.c.bf16 %v12096_v52, %v325_v48  ;;  %v17703_v44 = vld [vmem:[#allocation23_spill] sm:$0xff] }
 0x227   :  { %17695 = vst [vmem:[#allocation15_spill] sm:$0xff] %v12590_v13  ;;  %v12601_v17 = vpop.permute.xlu0 %8776  ;;  %v7069_v63 = vpack.c.bf16 %v927_v57, %v860_v51  ;;  %v326_v60 = vsel %vm17697_vm1, %v8724_v18, %v12590_v13  ;;  %v994_v18 = vsel %vm980_vm15, %v8694_v11, %v8773_v16  ;;  %v17705_v14 = vpack.c.bf16 %v17703_v44, %v17704_v0 }
 0x228   :  { %v8778_v28 = vunpack.i.l.bf16 %v12601_v17  ;;  %7100 = vmatpush1.bf16.msra.mxu1 %v17700_v33  ;;  %v7101_v24 = vpack.c.bf16 %v12381_v62, %v326_v60  ;;  %v8749_v57 = vunpack.i.h.bf16 %v12522_v26  ;;  %v8779_v35 = vunpack.i.h.bf16 %v12601_v17 }
 0x229   :  { %7070 = vmatprep.subr.bf16.mxu0 %v7069_v63 }
 0x22a   :  { %7072 = vmatpush1.bf16.msra.mxu0 %v7071_v32  ;;  %7102 = vmatprep.subr.bf16.mxu1 %v7101_v24  ;;  %v1061_v62 = vsel %vm17702_vm5, %v8699_v12, %v8778_v28  ;;  %v660_v32 = vsel %vm17688_vm6, %v8748_v2, %v8749_v57  ;;  %vm3020_vm6 = vcmask 474112  }
 0x22b   :  { %v7073_v47 = vpack.c.bf16 %v1061_v62, %v994_v18  ;;  %v12625_v34 = vpop.permute.xlu0 %8781  ;;  %v17707_v18 = vld [vmem:[#allocation24_spill] sm:$0xff]  ;;  %v17708_v62 = vunpack.i.h.bf16 %v12439_v20 }
 0x22c   :  { %7104 = vmatpush1.bf16.msra.mxu1 %v7103_v1  ;;  %v8784_v52 = vunpack.i.h.bf16 %v12625_v34  ;;  %v8783_v11 = vunpack.i.l.bf16 %v12625_v34  ;;  %v7111_v26 = vpack.c.bf16 %v660_v32, %v17707_v18 }
 0x22d   :  { %7074 = vmatprep.subr.bf16.mxu0 %v7073_v47  ;;  %7106 = vmatprep.subr.bf16.mxu1 %v7105_v19 }
 0x22e   :  { %7076 = vmatpush1.bf16.msra.mxu0 %v7075_v53  ;;  %v1448_v50 = vsel %vm1434_vm10, %v8783_v11, %v8784_v52  ;;  %v1447_v48 = vsel %vm1434_vm10, %v8704_v3, %v8783_v11 }
 0x230   :  { %7108 = vmatpush1.bf16.msra.mxu1 %v17705_v14 }
 0x233   :  { %v12632_v12 = vpop.permute.xlu1 %8786 }
 0x234   :  { %v8789_v51 = vunpack.i.h.bf16 %v12632_v12  ;;  %v8788_v23 = vunpack.i.l.bf16 %v12632_v12 }
 0x236   :  { %v1463_v63 = vsel %vm1434_vm10, %v8709_v37, %v8788_v23  ;;  %v12646_v60 = vpop.permute.xlu0 %8791  ;;  %v1464_v56 = vsel %vm1434_vm10, %v8788_v23, %v8789_v51 }
 0x237   :  { %v7077_v36 = vpack.c.bf16 %v1464_v56, %v1448_v50  ;;  %v7079_v33 = vpack.c.bf16 %v1463_v63, %v1447_v48  ;;  %v8794_v25 = vunpack.i.h.bf16 %v12646_v60  ;;  %v8793_v3 = vunpack.i.l.bf16 %v12646_v60 }
 0x239   :  { %7078 = vmatprep.subr.bf16.mxu0 %v7077_v36  ;;  %v1479_v2 = vsel %vm1434_vm10, %v8714_v49, %v8793_v3  ;;  %v1480_v19 = vsel %vm1434_vm10, %v8793_v3, %v8794_v25  ;;  %v8759_v49 = vunpack.i.h.bf16 %v12534_v45  ;;  %v727_v36 = vsel %vm712_vm11, %v8753_v30, %v8754_v7 }
 0x23a   :  { %7080 = vmatpush1.bf16.msra.mxu0 %v7079_v33  ;;  %v644_v5 = vpop.permute.xlu0 %643  ;;  %v8769_v30 = vunpack.i.h.bf16 %v12569_v29 }
 0x23b   :  { %v12656_v37 = vpop.permute.xlu1 %8796  ;;  %v661_v24 = vsel %vm17706_vm8, %v8749_v57, %v644_v5  ;;  %v794_v42 = vsel %vm779_vm12, %v8758_v61, %v8759_v49  ;;  %v8764_v5 = vunpack.i.h.bf16 %v12545_v55  ;;  %vm3087_vm8 = vcmask 457728  }
 0x23c   :  { %v8799_v6 = vunpack.i.h.bf16 %v12656_v37  ;;  %v8798_v10 = vunpack.i.l.bf16 %v12656_v37  ;;  %v7109_v1 = vpack.c.bf16 %v661_v24, %v12432_v39  ;;  %v7115_v40 = vpack.c.bf16 %v794_v42, %v727_v36 }
 0x23e   :  { %v1495_v47 = vsel %vm1434_vm10, %v17708_v62, %v8798_v10  ;;  %7110 = vmatprep.subr.bf16.mxu1 %v7109_v1  ;;  %v1496_v53 = vsel %vm1434_vm10, %v8798_v10, %v8799_v6  ;;  %v8774_v62 = vunpack.i.h.bf16 %v12564_v54 }
 0x23f   :  { %7112 = vmatpush1.bf16.msra.mxu1 %v7111_v26  ;;  %v7081_v39 = vpack.c.bf16 %v1496_v53, %v1480_v19  ;;  %v7083_v44 = vpack.c.bf16 %v1495_v47, %v1479_v2  ;;  %v861_v2 = vsel %vm846_vm13, %v8763_v9, %v8764_v5  ;;  %v928_v9 = vsel %vm913_vm14, %v8768_v58, %v8769_v30 }
 0x240   :  { %v995_v29 = vsel %vm980_vm15, %v8773_v16, %v8774_v62 }
 0x241   :  { %7082 = vmatprep.subr.bf16.mxu0 %v7081_v39 }
 0x242   :  { %7084 = vmatpush1.bf16.msra.mxu0 %v7083_v44  ;;  %v12677_v20 = vpop.permute.xlu1 %8801 }
 0x243   :  { %v12679_v0 = vpop.permute.xlu0 %8806  ;;  %v8804_v14 = vunpack.i.h.bf16 %v12677_v20  ;;  %v8803_v11 = vunpack.i.l.bf16 %v12677_v20 }
 0x244   :  { %v8809_v23 = vunpack.i.h.bf16 %v12679_v0  ;;  %v8808_v50 = vunpack.i.l.bf16 %v12679_v0 }
 0x245   :  { %v1511_v57 = vsel %vm1434_vm10, %v8729_v41, %v8803_v11  ;;  %v1512_v63 = vsel %vm1434_vm10, %v8803_v11, %v8804_v14  ;;  %v7119_v11 = vpack.c.bf16 %v928_v9, %v861_v2 }
 0x246   :  { %v1527_v48 = vsel %vm1434_vm10, %v8734_v43, %v8808_v50  ;;  %v1528_v56 = vsel %vm1434_vm10, %v8808_v50, %v8809_v23  ;;  %v12703_v41 = vpop.permute.xlu1 %710 }
 0x247   :  { %17709 = vst [vmem:[#allocation26_spill] sm:$0xff] %v12703_v41  ;;  %v778_v22 = vpop.permute.xlu0 %777  ;;  %v7085_v43 = vpack.c.bf16 %v1528_v56, %v1512_v63  ;;  %v7087_v33 = vpack.c.bf16 %v1527_v48, %v1511_v57  ;;  %v728_v32 = vsel %vm712_vm11, %v8754_v7, %v12703_v41 }
 0x248   :  { %v795_v3 = vsel %vm779_vm12, %v8759_v49, %v778_v22  ;;  %vm17711_vm12 = vmmov %vm17702_vm5  ;;  %v12763_v22 = vld [vmem:[%s16965_s1] sm:$0xff]  ;;  %s9729_s1 = smov 58  }
 0x249   :  { %v7113_v24 = vpack.c.bf16 %v795_v3, %v728_v32  ;;  %7086 = vmatprep.subr.bf16.mxu0 %v7085_v43  ;;  %v1062_v58 = vsel %vm17711_vm12, %v8778_v28, %v8779_v35  ;;  %vm3155_vm12 = vcmask 539648  }
 0x24a   :  { %7088 = vmatpush1.bf16.msra.mxu0 %v7087_v33  ;;  %v7123_v36 = vpack.c.bf16 %v1062_v58, %v995_v29 }
 0x24b   :  { %v12710_v45 = vpop.permute.xlu1 %8811  ;;  %v12712_v61 = vpop.permute.xlu0 %8816  ;;  %7114 = vmatprep.subr.bf16.mxu1 %v7113_v24 }
 0x24c   :  { %v8814_v10 = vunpack.i.h.bf16 %v12710_v45  ;;  %v8813_v1 = vunpack.i.l.bf16 %v12710_v45  ;;  %v8819_v18 = vunpack.i.h.bf16 %v12712_v61  ;;  %v8818_v26 = vunpack.i.l.bf16 %v12712_v61  ;;  %7116 = vmatpush1.bf16.msra.mxu1 %v7115_v40 }
 0x24e   :  { %v1543_v47 = vsel %vm1434_vm10, %v8739_v59, %v8813_v1  ;;  %v1559_v19 = vsel %vm1434_vm10, %v8744_v27, %v8818_v26  ;;  %v1544_v53 = vsel %vm1434_vm10, %v8813_v1, %v8814_v10  ;;  %v1560_v55 = vsel %vm1434_vm10, %v8818_v26, %v8819_v18 }
 0x24f   :  { %v12738_v39 = vpop.permute.xlu1 %844  ;;  %v912_v59 = vpop.permute.xlu0 %911  ;;  %v7089_v38 = vpack.c.bf16 %v1560_v55, %v1544_v53  ;;  %v7091_v44 = vpack.c.bf16 %v1559_v19, %v1543_v47 }
 0x250   :  { %17710 = vst [vmem:[#allocation29_spill] sm:$0xff] %v12738_v39  ;;  %v862_v27 = vsel %vm846_vm13, %v8764_v5, %v12738_v39  ;;  %v929_v7 = vsel %vm913_vm14, %v8769_v30, %v912_v59  ;;  %vm17713_vm14 = vmmov %vm17702_vm5 }
 0x251   :  { %v7117_v49 = vpack.c.bf16 %v929_v7, %v862_v27  ;;  %7090 = vmatprep.subr.bf16.mxu0 %v7089_v38  ;;  %vm17729_vm5 = vmmov %vm17697_vm1 }
 0x252   :  { %7092 = vmatpush1.bf16.msra.mxu0 %v7091_v44 }
 0x253   :  { %v12749_v50 = vpop.permute.xlu1 %978  ;;  %v1046_v57 = vpop.permute.xlu0 %1045  ;;  %7118 = vmatprep.subr.bf16.mxu1 %v7117_v49 }
 0x254   :  { %17712 = vst [vmem:[#allocation9_spill] sm:$0xff] %v12749_v50  ;;  %v996_v48 = vsel %vm980_vm15, %v8774_v62, %v12749_v50  ;;  %v1063_v63 = vsel %vm17713_vm14, %v8779_v35, %v1046_v57  ;;  %7120 = vmatpush1.bf16.msra.mxu1 %v7119_v11 }
 0x255   :  { %v7121_v56 = vpack.c.bf16 %v1063_v63, %v996_v48 }
 0x257   :  { %v1427_v42 = vpop.permute.xlu1 %1426  ;;  %v12754_v54 = vpop.permute.xlu0 %1428  ;;  %7122 = vmatprep.subr.bf16.mxu1 %v7121_v56 }
 0x258   :  { %7124 = vmatpush1.bf16.msra.mxu1 %v7123_v36  ;;  %v1576_v16 = vsel %vm1434_vm10, %v1427_v42, %v12754_v54  ;;  %v1575_v17 = vsel %vm1434_vm10, %v12553_v21, %v1427_v42 }
 0x259   :  { %2209 = vmatprep.subr.mxu0 %v1576_v16 }
 0x25a   :  { %2210 = vmatpush1.msra.mxu0 %v1575_v17 }
 0x25b   :  { %v8822_v28 = vpop.permute.xlu1 %8821  ;;  %2226 = vmatmul.mubr.f32.vlgmr.msra.gmra.mrb[6].mxu0 %v12763_v22 }
 0x25c   :  { %v8824_v43 = vunpack.i.h.bf16 %v8822_v28  ;;  %v8823_v33 = vunpack.i.l.bf16 %v8822_v28  ;;  %v8827_v32 = vpop.permute.xlu0 %8826 }
 0x25d   :  { %v8829_v3 = vunpack.i.h.bf16 %v8827_v32  ;;  %v8828_v5 = vunpack.i.l.bf16 %v8827_v32 }
 0x25e   :  { %v1450_v24 = vsel %vm1434_vm10, %v8823_v33, %v8824_v43  ;;  %v1449_v21 = vsel %vm1434_vm10, %v8784_v52, %v8823_v33 }
 0x25f   :  { %v1465_v40 = vsel %vm1434_vm10, %v8789_v51, %v8828_v5  ;;  %v1466_v30 = vsel %vm1434_vm10, %v8828_v5, %v8829_v3 }
 0x260   :  { %v7125_v1 = vpack.c.bf16 %v1466_v30, %v1450_v24  ;;  %v7127_v26 = vpack.c.bf16 %v1465_v40, %v1449_v21 }
 0x262   :  { %7126 = vmatprep.subr.bf16.mxu1 %v7125_v1 }
 0x263   :  { %7128 = vmatpush1.bf16.msra.mxu1 %v7127_v26 }
 0x267   :  { %v12774_v2 = vpop.f32.mrb[2].mxu0 }
 0x268   :  { %v8837_v62 = vpop.permute.xlu0 %8836  ;;  %v12776_v47 = vpop.f32.mrb[3].mxu0 }
 0x269   :  { %v8832_v19 = vpop.permute.xlu1 %8831  ;;  %v8839_v53 = vunpack.i.h.bf16 %v8837_v62  ;;  %v8838_v34 = vunpack.i.l.bf16 %v8837_v62 }
 0x26a   :  { %v8834_v55 = vunpack.i.h.bf16 %v8832_v19  ;;  %v8833_v52 = vunpack.i.l.bf16 %v8832_v19 }
 0x26b   :  { %v1497_v12 = vsel %vm1434_vm10, %v8799_v6, %v8838_v34  ;;  %v1498_v51 = vsel %vm1434_vm10, %v8838_v34, %v8839_v53 }
 0x26c   :  { %v1481_v9 = vsel %vm1434_vm10, %v8794_v25, %v8833_v52  ;;  %v1482_v35 = vsel %vm1434_vm10, %v8833_v52, %v8834_v55 }
 0x26d   :  { %v7129_v59 = vpack.c.bf16 %v1498_v51, %v1482_v35  ;;  %v7131_v38 = vpack.c.bf16 %v1497_v12, %v1481_v9  ;;  %v8842_v44 = vpop.permute.xlu1 %8841 }
 0x26e   :  { %v8844_v27 = vunpack.i.h.bf16 %v8842_v44  ;;  %v8843_v7 = vunpack.i.l.bf16 %v8842_v44 }
 0x26f   :  { %7130 = vmatprep.subr.bf16.mxu1 %v7129_v59 }
 0x270   :  { %7132 = vmatpush1.bf16.msra.mxu1 %v7131_v38  ;;  %v1513_v6 = vsel %vm1434_vm10, %v8804_v14, %v8843_v7  ;;  %v1514_v25 = vsel %vm1434_vm10, %v8843_v7, %v8844_v27 }
 0x275   :  { %v8847_v49 = vpop.permute.xlu0 %8846 }
 0x276   :  { %v8849_v11 = vunpack.i.h.bf16 %v8847_v49  ;;  %v8848_v37 = vunpack.i.l.bf16 %v8847_v49 }
 0x278   :  { %v1529_v60 = vsel %vm1434_vm10, %v8809_v23, %v8848_v37  ;;  %v1530_v29 = vsel %vm1434_vm10, %v8848_v37, %v8849_v11  ;;  %v8852_v58 = vpop.permute.xlu1 %8851 }
 0x279   :  { %v7133_v57 = vpack.c.bf16 %v1530_v29, %v1514_v25  ;;  %v7135_v48 = vpack.c.bf16 %v1529_v60, %v1513_v6  ;;  %v8854_v63 = vunpack.i.h.bf16 %v8852_v58  ;;  %v8853_v56 = vunpack.i.l.bf16 %v8852_v58 }
 0x27b   :  { %7134 = vmatprep.subr.bf16.mxu1 %v7133_v57  ;;  %v1545_v0 = vsel %vm1434_vm10, %v8814_v10, %v8853_v56  ;;  %v1546_v23 = vsel %vm1434_vm10, %v8853_v56, %v8854_v63 }
 0x27c   :  { %7136 = vmatpush1.bf16.msra.mxu1 %v7135_v48  ;;  %v1431_v33 = vpop.permute.xlu1 %1430 }
 0x27d   :  { %v8857_v36 = vpop.permute.xlu0 %8856  ;;  %v1577_v45 = vsel %vm1434_vm10, %v12754_v54, %v1431_v33 }
 0x27e   :  { %v8859_v42 = vunpack.i.h.bf16 %v8857_v36  ;;  %v8858_v20 = vunpack.i.l.bf16 %v8857_v36 }
 0x280   :  { %v1561_v14 = vsel %vm1434_vm10, %v8819_v18, %v8858_v20  ;;  %v1562_v16 = vsel %vm1434_vm10, %v8858_v20, %v8859_v42 }
 0x281   :  { %v1433_v17 = vpop.permute.xlu0 %1432  ;;  %v7137_v28 = vpack.c.bf16 %v1562_v16, %v1546_v23  ;;  %v7139_v43 = vpack.c.bf16 %v1561_v14, %v1545_v0 }
 0x282   :  { %v1578_v32 = vsel %vm1434_vm10, %v1431_v33, %v1433_v17 }
 0x283   :  { %7138 = vmatprep.subr.bf16.mxu1 %v7137_v28 }
 0x284   :  { %7140 = vmatpush1.bf16.msra.mxu1 %v7139_v43 }
 0x285   :  { %2280 = vmatprep.subr.mxu1 %v1578_v32 }
 0x288   :  { %2281 = vmatpush1.msra.mxu1 %v1577_v45 }
 0x289   :  { %2297 = vmatmul.mubr.f32.vlgmr.msra.gmra.mrb[6].mxu1 %v12763_v22 }
 0x28d   :  { %v12806_v61 = vpop.permute.xlu1 %1728 }
 0x28e   :  { %v12810_v10 = vadd.f32 %v12579_v15, %v12806_v61  ;;  %v1802_v18 = vadd.f32 %v12477_v4, %v12806_v61  ;;  %v1804_v3 = vadd.f32 %v12488_v46, %v12806_v61  ;;  %v1873_v5 = vadd.f32 %v12574_v8, %v12806_v61  ;;  %v17714_v8 = vld [vmem:[#allocation19_spill] sm:$0xff] }
 0x28f   :  { %v2014_v24 = vpop.f32.mrb[2].mxu1  ;;  %v12825_v4 = vadd.f32 %v12774_v2, %v12806_v61  ;;  %v12829_v46 = vadd.f32 %v12776_v47, %v12806_v61  ;;  %v2416_v15 = vmax.f32 %v17714_v8, 0.0 }
 0x290   :  { %v2306_v54 = vmax.f32 %v12810_v10, 0.0  ;;  %v2303_v21 = vmax.f32 %v1802_v18, 0.0  ;;  %v2304_v22 = vmax.f32 %v1804_v3, 0.0  ;;  %v2305_v40 = vmax.f32 %v1873_v5, 0.0  ;;  %v2016_v30 = vpop.f32.mrb[3].mxu1 }
 0x291   :  { %v2307_v26 = vmax.f32 %v12825_v4, 0.0  ;;  %v2308_v62 = vmax.f32 %v12829_v46, 0.0  ;;  %v12837_v19 = vadd.f32 %v2014_v24, %v12806_v61  ;;  %v12847_v47 = vadd.f32 %v2016_v30, %v12806_v61 }
 0x292   :  { %v8861_v1 = vpack.i.bf16 %v2303_v21, %v2304_v22  ;;  %2341 = vrot.lane.b32.xlu1 %v2306_v54, %s17499_s30  ;;  %2339 = vrot.lane.b32.xlu0 %v2305_v40, %s17499_s30 }
 0x293   :  { %v2309_v2 = vmax.f32 %v12837_v19, 0.0  ;;  %v2310_v53 = vmax.f32 %v12847_v47, 0.0 }
 0x296   :  { %8862 = vrot.lane.b32.xlu1 %v8861_v1, %s17499_s30  ;;  %2466 = vrot.lane.b32.xlu0 %v2416_v15, %s17523_s23 }
 0x29a   :  { %2345 = vrot.lane.b32.xlu1 %v2308_v62, %s17499_s30  ;;  %2343 = vrot.lane.b32.xlu0 %v2307_v26, %s17499_s30 }
 0x29e   :  { %2347 = vrot.lane.b32.xlu0 %v2309_v2, %s17499_s30 }
 0x2a2   :  { %2349 = vrot.lane.b32.xlu0 %v2310_v53, %s17499_s30 }
 0x2d2   :  { %v2085_v34 = vpop.f32.mrb[4].mxu0 }
 0x2d3   :  { %v12857_v55 = vadd.f32 %v2085_v34, %v12806_v61  ;;  %v2087_v52 = vpop.f32.mrb[5].mxu0 }
 0x2d4   :  { %v12860_v12 = vadd.f32 %v2087_v52, %v12806_v61 }
 0x2d5   :  { %v2311_v51 = vmax.f32 %v12857_v55, 0.0 }
 0x2d6   :  { %v2312_v9 = vmax.f32 %v12860_v12, 0.0 }
 0x2d7   :  { %2351 = vrot.lane.b32.xlu1 %v2311_v51, %s17499_s30 }
 0x2d8   :  { %2353 = vrot.lane.b32.xlu0 %v2312_v9, %s17499_s30 }
 0x2f6   :  { %v2156_v35 = vpop.f32.mrb[4].mxu1 }
 0x2f7   :  { %v12871_v59 = vadd.f32 %v2156_v35, %v12806_v61  ;;  %v2158_v38 = vpop.f32.mrb[5].mxu1 }
 0x2f8   :  { %v12875_v27 = vadd.f32 %v2158_v38, %v12806_v61 }
 0x2f9   :  { %v2313_v44 = vmax.f32 %v12871_v59, 0.0 }
 0x2fa   :  { %v2314_v7 = vmax.f32 %v12875_v27, 0.0 }
 0x2fb   :  { %2355 = vrot.lane.b32.xlu1 %v2313_v44, %s17499_s30 }
 0x2ff   :  { %2357 = vrot.lane.b32.xlu1 %v2314_v7, %s17499_s30 }
 0x304   :  { %v2342_v49 = vpop.permute.xlu1 %2341  ;;  %v2340_v11 = vpop.permute.xlu0 %2339 }
 0x305   :  { %v2369_v37 = vsel %vm109_vm0, %v2340_v11, %v2342_v49 }
 0x306   :  { %v12885_v6 = vmax.f32 %v2305_v40, %v2369_v37 }
 0x308   :  { %v8863_v60 = vpop.permute.xlu1 %8862  ;;  %2438 = vrot.lane.b32.xlu0 %v12885_v6, %s17523_s23  ;;  %v12904_v16 = vpop.permute.xlu0 %2466 }
 0x309   :  { %v8865_v25 = vunpack.i.h.bf16 %v8863_v60  ;;  %v8864_v29 = vunpack.i.l.bf16 %v8863_v60 }
 0x30b   :  { %v2367_v58 = vsel %vm109_vm0, %v8865_v25, %v8864_v29  ;;  %v2368_v57 = vsel %vm109_vm0, %v8864_v29, %v2340_v11 }
 0x30c   :  { %v2399_v48 = vmax.f32 %v2303_v21, %v2367_v58  ;;  %v2400_v63 = vmax.f32 %v2304_v22, %v2368_v57  ;;  %v2344_v17 = vpop.permute.xlu0 %2343  ;;  %v2346_v28 = vpop.permute.xlu1 %2345 }
 0x30d   :  { %v2371_v5 = vsel %vm109_vm0, %v2344_v17, %v2346_v28  ;;  %v2370_v21 = vsel %vm109_vm0, %v2342_v49, %v2344_v17 }
 0x30e   :  { %v8866_v56 = vpack.i.bf16 %v2399_v48, %v2400_v63  ;;  %v12917_v40 = vmax.f32 %v2307_v26, %v2371_v5 }
 0x310   :  { %8867 = vrot.lane.b32.xlu0 %v8866_v56, %s17523_s23  ;;  %v2348_v33 = vpop.permute.xlu0 %2347 }
 0x311   :  { %v2372_v15 = vsel %vm109_vm0, %v2346_v28, %v2348_v33 }
 0x312   :  { %v12935_v26 = vmax.f32 %v2308_v62, %v2372_v15 }
 0x314   :  { %v2350_v30 = vpop.permute.xlu0 %2349 }
 0x315   :  { %v2373_v10 = vsel %vm109_vm0, %v2348_v33, %v2350_v30 }
 0x316   :  { %v12944_v34 = vmax.f32 %v2309_v2, %v2373_v10 }
 0x32e   :  { %v2227_v36 = vpop.f32.mrb[6].mxu0 }
 0x32f   :  { %v12893_v42 = vadd.f32 %v2227_v36, %v12806_v61  ;;  %v2229_v20 = vpop.f32.mrb[7].mxu0 }
 0x330   :  { %v12896_v0 = vadd.f32 %v2229_v20, %v12806_v61 }
 0x331   :  { %v2315_v14 = vmax.f32 %v12893_v42, 0.0 }
 0x332   :  { %v2316_v23 = vmax.f32 %v12896_v0, 0.0 }
 0x333   :  { %2359 = vrot.lane.b32.xlu0 %v2315_v14, %s17499_s30 }
 0x334   :  { %2361 = vrot.lane.b32.xlu1 %v2316_v23, %s17499_s30 }
 0x349   :  { %v2352_v22 = vpop.permute.xlu1 %2351 }
 0x34a   :  { %v2374_v1 = vsel %vm109_vm0, %v2350_v30, %v2352_v22 }
 0x34b   :  { %v12931_v4 = vmax.f32 %v2310_v53, %v2374_v1 }
 0x35c   :  { %v2298_v43 = vpop.f32.mrb[6].mxu1 }
 0x35d   :  { %v12907_v32 = vadd.f32 %v2298_v43, %v12806_v61  ;;  %v2300_v45 = vpop.f32.mrb[7].mxu1 }
 0x35e   :  { %v2301_v18 = vadd.f32 %v2300_v45, %v12806_v61  ;;  %v12921_v61 = vmax.f32 %v2306_v54, %v2370_v21  ;;  %v2354_v54 = vpop.permute.xlu0 %2353 }
 0x35f   :  { %v2317_v3 = vmax.f32 %v12907_v32, 0.0  ;;  %v2375_v47 = vsel %vm109_vm0, %v2352_v22, %v2354_v54 }
 0x360   :  { %v2318_v24 = vmax.f32 %v2301_v18, 0.0  ;;  %v12956_v52 = vmax.f32 %v2311_v51, %v2375_v47 }
 0x361   :  { %2363 = vrot.lane.b32.xlu0 %v2317_v3, %s17499_s30 }
 0x362   :  { %2365 = vrot.lane.b32.xlu1 %v2318_v24, %s17499_s30  ;;  %s9730_s30 = smov 120  }
 0x365   :  { %2442 = vrot.lane.b32.xlu0 %v12917_v40, %s17523_s23 }
 0x366   :  { %2440 = vrot.lane.b32.xlu1 %v12921_v61, %s17523_s23 }
 0x369   :  { %2448 = vrot.lane.b32.xlu0 %v12931_v4, %s17523_s23 }
 0x36a   :  { %2444 = vrot.lane.b32.xlu1 %v12935_v26, %s17523_s23 }
 0x36d   :  { %v2356_v53 = vpop.permute.xlu1 %2355 }
 0x36e   :  { %v2376_v46 = vsel %vm109_vm0, %v2354_v54, %v2356_v53  ;;  %2446 = vrot.lane.b32.xlu1 %v12944_v34, %s17523_s23 }
 0x36f   :  { %v12952_v62 = vmax.f32 %v2312_v9, %v2376_v46 }
 0x371   :  { %v2358_v35 = vpop.permute.xlu1 %2357  ;;  %2452 = vrot.lane.b32.xlu0 %v12952_v62, %s17523_s23 }
 0x372   :  { %v2377_v19 = vsel %vm109_vm0, %v2356_v53, %v2358_v35  ;;  %2450 = vrot.lane.b32.xlu1 %v12956_v52, %s17523_s23 }
 0x373   :  { %v12965_v2 = vmax.f32 %v2313_v44, %v2377_v19 }
 0x375   :  { %2454 = vrot.lane.b32.xlu0 %v12965_v2, %s17523_s23 }
 0x37a   :  { %v2439_v12 = vpop.permute.xlu0 %2438 }
 0x382   :  { %v8868_v55 = vpop.permute.xlu0 %8867 }
 0x383   :  { %v8870_v51 = vunpack.i.h.bf16 %v8868_v55  ;;  %v8869_v9 = vunpack.i.l.bf16 %v8868_v55 }
 0x385   :  { %v2468_v38 = vsel %vm377_vm3, %v8870_v51, %v8869_v9  ;;  %v2469_v49 = vsel %vm377_vm3, %v8869_v9, %v2439_v12 }
 0x386   :  { %v12971_v11 = vmax.f32 %v2399_v48, %v2468_v38  ;;  %v12973_v37 = vmax.f32 %v2400_v63, %v2469_v49 }
 0x388   :  { %v8871_v59 = vpack.i.bf16 %v12971_v11, %v12973_v37 }
 0x38a   :  { %8872 = vrot.lane.b32.xlu0 %v8871_v59, %s9729_s1 }
 0x3a5   :  { %v2360_v44 = vpop.permute.xlu0 %2359 }
 0x3a6   :  { %v2378_v60 = vsel %vm109_vm0, %v2358_v35, %v2360_v44  ;;  %v2362_v25 = vpop.permute.xlu1 %2361 }
 0x3a7   :  { %v12981_v29 = vmax.f32 %v2314_v7, %v2378_v60  ;;  %v2379_v58 = vsel %vm109_vm0, %v2360_v44, %v2362_v25 }
 0x3a8   :  { %v12984_v57 = vmax.f32 %v2315_v14, %v2379_v58 }
 0x3a9   :  { %2456 = vrot.lane.b32.xlu1 %v12981_v29, %s17523_s23 }
 0x3aa   :  { %2458 = vrot.lane.b32.xlu0 %v12984_v57, %s17523_s23 }
 0x3d3   :  { %v2364_v48 = vpop.permute.xlu0 %2363 }
 0x3d4   :  { %v2380_v63 = vsel %vm109_vm0, %v2362_v25, %v2364_v48  ;;  %v2366_v56 = vpop.permute.xlu1 %2365 }
 0x3d5   :  { %v12993_v36 = vmax.f32 %v2316_v23, %v2380_v63  ;;  %v2382_v27 = vsel %vm109_vm0, %v2366_v56, %v17714_v8  ;;  %v2381_v7 = vsel %vm109_vm0, %v2364_v48, %v2366_v56  ;;  %vm17725_vm0 = vcmask 1031168  }
 0x3d6   :  { %v12998_v42 = vmax.f32 %v2318_v24, %v2382_v27  ;;  %v13004_v14 = vmax.f32 %v2317_v3, %v2381_v7  ;;  %vm17726_vm10 = vmmov %vm17725_vm0 }
 0x3d7   :  { %2460 = vrot.lane.b32.xlu1 %v12993_v36, %s17523_s23  ;;  %v2443_v17 = vpop.permute.xlu0 %2442  ;;  %vm17727_vm9 = vmmov %vm17725_vm0 }
 0x3d8   :  { %v2441_v20 = vpop.permute.xlu1 %2440  ;;  %2464 = vrot.lane.b32.xlu0 %v12998_v42, %s17523_s23  ;;  %vm17733_vm14 = vmmov %vm17725_vm0 }
 0x3d9   :  { %v2470_v0 = vsel %vm377_vm3, %v2439_v12, %v2441_v20  ;;  %v2471_v33 = vsel %vm377_vm3, %v2441_v20, %v2443_v17 }
 0x3da   :  { %v13008_v23 = vmax.f32 %v12885_v6, %v2470_v0  ;;  %v13025_v45 = vmax.f32 %v12921_v61, %v2471_v33 }
 0x3db   :  { %2462 = vrot.lane.b32.xlu1 %v13004_v14, %s17523_s23  ;;  %s9731_s23 = smov 56   ;;  %v2449_v61 = vpop.permute.xlu0 %2448 }
 0x3dc   :  { %v2445_v8 = vpop.permute.xlu1 %2444  ;;  %2990 = vrot.lane.b32.xlu0 %v13008_v23, %s9729_s1  ;;  %v8876_v28 = vpack.i.bf16 %v13008_v23, %v12973_v37  ;;  %v8886_v18 = vpack.i.bf16 %v13025_v45, %v13008_v23 }
 0x3dd   :  { %v2472_v43 = vsel %vm377_vm3, %v2443_v17, %v2445_v8 }
 0x3de   :  { %v13019_v32 = vmax.f32 %v12917_v40, %v2472_v43  ;;  %v8971_v40 = vpack.i.bf16 %v13025_v45, %v12971_v11 }
 0x3df   :  { %8877 = vrot.lane.b32.xlu1 %v8876_v28, %s9730_s30 }
 0x3e0   :  { %v8891_v6 = vpack.i.bf16 %v12973_v37, %v13019_v32  ;;  %v2447_v3 = vpop.permute.xlu1 %2446 }
 0x3e1   :  { %v2473_v5 = vsel %vm377_vm3, %v2445_v8, %v2447_v3  ;;  %v2474_v1 = vsel %vm377_vm3, %v2447_v3, %v2449_v61 }
 0x3e2   :  { %8892 = vrot.lane.b32.xlu0 %v8891_v6, %s17455_s29  ;;  %v13039_v24 = vmax.f32 %v12935_v26, %v2473_v5  ;;  %v13070_v26 = vmax.f32 %v12944_v34, %v2474_v1 }
 0x3e3   :  { %8882 = vrot.lane.b32.xlu1 %v8876_v28, %s9731_s23  ;;  %v2453_v10 = vpop.permute.xlu0 %2452 }
 0x3e4   :  { %17715 = vst [vmem:[#allocation28_spill] sm:$0xff] %v13039_v24  ;;  %v8931_v21 = vpack.i.bf16 %v13039_v24, %v13019_v32  ;;  %v8966_v22 = vpack.i.bf16 %v13039_v24, %v12971_v11  ;;  %v2451_v30 = vpop.permute.xlu1 %2450  ;;  %17716 = vst [vmem:[#allocation27_spill] sm:$0xff] %v13070_v26 }
 0x3e5   :  { %v2475_v15 = vsel %vm377_vm3, %v2449_v61, %v2451_v30 }
 0x3e6   :  { %8902 = vrot.lane.b32.xlu0 %v8891_v6, %s17581_s22  ;;  %v13073_v54 = vmax.f32 %v12931_v4, %v2475_v15  ;;  %v2476_v4 = vsel %vm377_vm3, %v2451_v30, %v2453_v10 }
 0x3e7   :  { %8887 = vrot.lane.b32.xlu1 %v8886_v18, %s17455_s29  ;;  %v2455_v53 = vpop.permute.xlu0 %2454  ;;  %v13091_v35 = vmax.f32 %v12956_v52, %v2476_v4 }
 0x3e8   :  { %17717 = vst [vmem:[#allocation7_spill] sm:$0xff] %v13073_v54  ;;  %v9006_v47 = vpack.i.bf16 %v13073_v54, %v13070_v26  ;;  %v2477_v34 = vsel %vm377_vm3, %v2453_v10, %v2455_v53 }
 0x3e9   :  { %v13088_v46 = vmax.f32 %v12952_v62, %v2477_v34  ;;  %17719 = vst [vmem:[#allocation31_spill] sm:$0xff] %v13091_v35  ;;  %v9061_v9 = vpack.i.bf16 %v13091_v35, %v13073_v54 }
 0x3ea   :  { %8912 = vrot.lane.b32.xlu0 %v8891_v6, %s9732_s25 }
 0x3eb   :  { %8897 = vrot.lane.b32.xlu1 %v8886_v18, %s17581_s22  ;;  %17718 = vst [vmem:[#allocation30_spill] sm:$0xff] %v13088_v46  ;;  %v13097_v19 = vpack.i.bf16 %v13088_v46, %v13091_v35 }
 0x3ee   :  { %8917 = vrot.lane.b32.xlu0 %v8886_v18, %s9721_s27 }
 0x3ef   :  { %8907 = vrot.lane.b32.xlu1 %v8886_v18, %s9732_s25 }
 0x3f2   :  { %8927 = vrot.lane.b32.xlu0 %v8886_v18, %s9733_s19 }
 0x3f3   :  { %8922 = vrot.lane.b32.xlu1 %v8891_v6, %s9721_s27 }
 0x3f6   :  { %8937 = vrot.lane.b32.xlu0 %v8886_v18, %s9724_s21 }
 0x3f7   :  { %8932 = vrot.lane.b32.xlu1 %v8931_v21, %s9733_s19 }
 0x3fa   :  { %8947 = vrot.lane.b32.xlu0 %v8886_v18, %s17509_s17 }
 0x3fb   :  { %8942 = vrot.lane.b32.xlu1 %v8891_v6, %s9724_s21 }
 0x3fc   :  { %v13106_v62 = vpop.permute.xlu0 %8872 }
 0x3fe   :  { %2994 = vrot.lane.b32.xlu0 %v13019_v32, %s9729_s1 }
 0x3ff   :  { %8952 = vrot.lane.b32.xlu1 %v8891_v6, %s17509_s17 }
 0x402   :  { %8967 = vrot.lane.b32.xlu0 %v8966_v22, %s9732_s25 }
 0x403   :  { %2992 = vrot.lane.b32.xlu1 %v13025_v45, %s9729_s1 }
 0x406   :  { %8972 = vrot.lane.b32.xlu0 %v8971_v40, %s9730_s30 }
 0x407   :  { %8957 = vrot.lane.b32.xlu1 %v8966_v22, %s17455_s29 }
 0x40a   :  { %8982 = vrot.lane.b32.xlu0 %v8966_v22, %s9724_s21 }
 0x40b   :  { %8962 = vrot.lane.b32.xlu1 %v8966_v22, %s17581_s22 }
 0x40e   :  { %8992 = vrot.lane.b32.xlu0 %v8971_v40, %s9731_s23 }
 0x40f   :  { %8977 = vrot.lane.b32.xlu1 %v8966_v22, %s9721_s27 }
 0x412   :  { %9002 = vrot.lane.b32.xlu0 %v8931_v21, %s9731_s23 }
 0x413   :  { %8987 = vrot.lane.b32.xlu1 %v8966_v22, %s17509_s17 }
 0x416   :  { %2998 = vrot.lane.b32.xlu0 %v13070_v26, %s9729_s1 }
 0x417   :  { %2996 = vrot.lane.b32.xlu1 %v13039_v24, %s9729_s1 }
 0x41a   :  { %9007 = vrot.lane.b32.xlu0 %v9006_v47, %s17455_s29 }
 0x41b   :  { %8997 = vrot.lane.b32.xlu1 %v8931_v21, %s9730_s30  ;;  %v2457_v52 = vpop.permute.xlu1 %2456 }
 0x41c   :  { %v2459_v12 = vpop.permute.xlu0 %2458  ;;  %v2478_v55 = vsel %vm377_vm3, %v2455_v53, %v2457_v52 }
 0x41d   :  { %v2479_v51 = vsel %vm377_vm3, %v2457_v52, %v2459_v12  ;;  %v13123_v38 = vmax.f32 %v12965_v2, %v2478_v55 }
 0x41e   :  { %9017 = vrot.lane.b32.xlu0 %v9006_v47, %s9732_s25  ;;  %v13126_v49 = vmax.f32 %v12981_v29, %v2479_v51 }
 0x41f   :  { %9012 = vrot.lane.b32.xlu1 %v9006_v47, %s17581_s22  ;;  %17720 = vst [vmem:[#allocation12_spill] sm:$0xff] %v13123_v38  ;;  %v9081_v2 = vpack.i.bf16 %v13123_v38, %v13088_v46 }
 0x420   :  { %17721 = vst [vmem:[#allocation6_spill] sm:$0xff] %v13126_v49  ;;  %v13134_v59 = vpack.i.bf16 %v13126_v49, %v13123_v38 }
 0x422   :  { %9022 = vrot.lane.b32.xlu0 %v9006_v47, %s9721_s27 }
 0x423   :  { %9027 = vrot.lane.b32.xlu1 %v9006_v47, %s9733_s19 }
 0x426   :  { %9042 = vrot.lane.b32.xlu0 %v13097_v19, %s17581_s22 }
 0x427   :  { %9032 = vrot.lane.b32.xlu1 %v9006_v47, %s17509_s17 }
 0x42a   :  { %9052 = vrot.lane.b32.xlu0 %v13097_v19, %s9721_s27 }
 0x42b   :  { %9037 = vrot.lane.b32.xlu1 %v13097_v19, %s17455_s29 }
 0x42e   :  { %9067 = vrot.lane.b32.xlu0 %v13097_v19, %s17509_s17 }
 0x42f   :  { %9047 = vrot.lane.b32.xlu1 %v13097_v19, %s9732_s25 }
 0x432   :  { %3002 = vrot.lane.b32.xlu0 %v13091_v35, %s9729_s1 }
 0x433   :  { %9057 = vrot.lane.b32.xlu1 %v13097_v19, %s9733_s19 }
 0x436   :  { %9072 = vrot.lane.b32.xlu0 %v9006_v47, %s9730_s30 }
 0x437   :  { %9062 = vrot.lane.b32.xlu1 %v9061_v9, %s9724_s21 }
 0x43a   :  { %3004 = vrot.lane.b32.xlu0 %v13088_v46, %s9729_s1 }
 0x43b   :  { %3000 = vrot.lane.b32.xlu1 %v13073_v54, %s9729_s1 }
 0x43e   :  { %9092 = vrot.lane.b32.xlu0 %v13134_v59, %s17581_s22 }
 0x43f   :  { %9077 = vrot.lane.b32.xlu1 %v9006_v47, %s9731_s23 }
 0x442   :  { %9107 = vrot.lane.b32.xlu0 %v13134_v59, %s9733_s19 }
 0x443   :  { %9082 = vrot.lane.b32.xlu1 %v9081_v2, %s9724_s21 }
 0x446   :  { %9112 = vrot.lane.b32.xlu0 %v13134_v59, %s17509_s17 }
 0x447   :  { %3006 = vrot.lane.b32.xlu1 %v13123_v38, %s9729_s1 }
 0x449   :  { %v2461_v44 = vpop.permute.xlu1 %2460 }
 0x44a   :  { %v13148_v60 = vpop.permute.xlu0 %2464  ;;  %v2480_v25 = vsel %vm377_vm3, %v2459_v12, %v2461_v44 }
 0x44b   :  { %9087 = vrot.lane.b32.xlu1 %v13134_v59, %s17455_s29  ;;  %v13158_v48 = vmax.f32 %v12984_v57, %v2480_v25 }
 0x44d   :  { %v13153_v29 = vpop.permute.xlu1 %2462  ;;  %17722 = vst [vmem:[#allocation18_spill] sm:$0xff] %v13158_v48 }
 0x44e   :  { %v2481_v58 = vsel %vm377_vm3, %v2461_v44, %v13153_v29  ;;  %v13165_v56 = vpop.permute.xlu0 %2990 }
 0x44f   :  { %v13161_v63 = vmax.f32 %v12993_v36, %v2481_v58  ;;  %9097 = vrot.lane.b32.xlu1 %v13134_v59, %s9732_s25 }
 0x451   :  { %17723 = vst [vmem:[#allocation13_spill] sm:$0xff] %v13161_v63  ;;  %v13167_v27 = vpop.permute.xlu1 %8877  ;;  %v13171_v7 = vpack.i.bf16 %v13161_v63, %v13158_v48 }
 0x452   :  { %v17734_v41 = vunpack.i.h.bf16 %v13167_v27 }
 0x453   :  { %17724 = vst [vmem:[#allocation16_spill] sm:$0xff] %v13171_v7  ;;  %9117 = vrot.lane.b32.xlu0 %v13171_v7, %s17455_s29  ;;  %9102 = vrot.lane.b32.xlu1 %v13134_v59, %s9721_s27 }
 0x454   :  { %v13177_v57 = vpop.permute.xlu0 %8892 }
 0x455   :  { %v13179_v36 = vpop.permute.xlu1 %8882  ;;  %v17178_v17 = vunpack.i.h.bf16 %v13177_v57  ;;  %v17174_v8 = vunpack.i.l.bf16 %v13177_v57 }
 0x456   :  { %v17735_v38 = vunpack.i.h.bf16 %v13179_v36  ;;  %v17736_v46 = vunpack.i.l.bf16 %v13179_v36 }
 0x457   :  { %9127 = vrot.lane.b32.xlu0 %v13171_v7, %s9732_s25  ;;  %9122 = vrot.lane.b32.xlu1 %v13171_v7, %s17581_s22 }
 0x458   :  { %v13185_v20 = vpop.permute.xlu0 %8902  ;;  %v13368_v35 = vsel %vm3087_vm8, %v17736_v46, %v17735_v38 }
 0x459   :  { %v8888_v0 = vpop.permute.xlu1 %8887  ;;  %v17172_v53 = vunpack.i.l.bf16 %v13185_v20 }
 0x45a   :  { %v8890_v28 = vunpack.i.h.bf16 %v8888_v0  ;;  %v8889_v43 = vunpack.i.l.bf16 %v8888_v0 }
 0x45b   :  { %9137 = vrot.lane.b32.xlu0 %v13171_v7, %s9733_s19  ;;  %9132 = vrot.lane.b32.xlu1 %v13171_v7, %s9721_s27 }
 0x45c   :  { %v2566_v33 = vsel %vm17725_vm0, %v8889_v43, %v8890_v28  ;;  %v13194_v6 = vpop.permute.xlu0 %8912  ;;  %v13199_v18 = vsel %vm17726_vm10, %v17178_v17, %v8889_v43  ;;  %v13204_v3 = vsel %vm17727_vm9, %v8890_v28, %v17174_v8  ;;  %vm17740_vm0 = vmmov %vm17697_vm1  ;;  %vm17754_vm10 = vcmask 588800  }
 0x45d   :  { %v8898_v5 = vpop.permute.xlu1 %8897  ;;  %v13208_v21 = vpack.c.bf16 %v13199_v18, %v12973_v37  ;;  %v13212_v22 = vpack.c.bf16 %v13204_v3, %v13025_v45  ;;  %v13215_v40 = vpack.c.bf16 %v2566_v33, %v13008_v23  ;;  %v17176_v37 = vunpack.i.h.bf16 %v13185_v20  ;;  %vm17755_vm9 = vmmov %vm17754_vm10 }
 0x45e   :  { %v8899_v30 = vunpack.i.l.bf16 %v8898_v5  ;;  %v8900_v61 = vunpack.i.h.bf16 %v8898_v5  ;;  %v17177_v23 = vunpack.i.h.bf16 %v13194_v6  ;;  %v17173_v15 = vunpack.i.l.bf16 %v13194_v6 }
 0x45f   :  { %3394 = vrot.lane.b32.xlu0 %v13165_v56, %s9724_s21  ;;  %7142 = vmatprep.subr.bf16.mxu0 %v13208_v21 }
 0x460   :  { %7190 = vmatprep.subr.bf16.mxu1 %v13212_v22  ;;  %v13221_v1 = vpop.permute.xlu0 %8917  ;;  %v13231_v34 = vsel %vm17697_vm1, %v17176_v37, %v8899_v30  ;;  %v13241_v12 = vsel %vm17728_vm7, %v8899_v30, %v8900_v61  ;;  %v13262_v58 = vsel %vm17729_vm5, %v8900_v61, %v17172_v53  ;;  %v9156_v61 = vpack.i.bf16 %v2566_v33, %v13070_v26  ;;  %vm17756_vm1 = vmmov %vm17740_vm0 }
 0x461   :  { %7192 = vmatpush1.bf16.msra.mxu1 %v13215_v40  ;;  %v8908_v45 = vpop.permute.xlu1 %8907  ;;  %v13252_v9 = vunpack.i.l.bf16 %v13221_v1  ;;  %v9161_v53 = vpack.i.bf16 %v13158_v48, %v13126_v49  ;;  %vm17757_vm7 = vmmov %vm17740_vm0 }
 0x462   :  { %v8910_v10 = vunpack.i.h.bf16 %v8908_v45  ;;  %v8909_v47 = vunpack.i.l.bf16 %v8908_v45  ;;  %vm17762_vm5 = vmmov %vm17733_vm14 }
 0x464   :  { %v13236_v4 = vsel %vm2694_vm4, %v17177_v23, %v8909_v47  ;;  %v13238_v52 = vpop.permute.xlu0 %8927  ;;  %v13244_v55 = vsel %vm2694_vm4, %v8909_v47, %v8910_v10  ;;  %v13249_v51 = vsel %vm2694_vm4, %v8910_v10, %v17173_v15  ;;  %v2482_v15 = vsel %vm377_vm3, %v13153_v29, %v13148_v60 }
 0x465   :  { %v17175_v2 = vunpack.i.l.bf16 %v13238_v52  ;;  %v13255_v44 = vpop.permute.xlu1 %8922  ;;  %v9151_v25 = vpack.i.bf16 %v13236_v4, %v13231_v34  ;;  %v13266_v0 = vpack.c.bf16 %v13249_v51, %v13262_v58  ;;  %v13270_v28 = vpack.c.bf16 %v13244_v55, %v13241_v12 }
 0x466   :  { %v17190_v23 = vunpack.i.l.bf16 %v13106_v62  ;;  %v8930_v54 = vunpack.i.h.bf16 %v13238_v52 }
 0x467   :  { %v9141_v43 = vpack.i.bf16 %v13252_v9, %v17175_v2  ;;  %9152 = vrot.lane.b32.xlu0 %v9151_v25, %s9724_s21  ;;  %7194 = vmatprep.subr.bf16.mxu1 %v13266_v0  ;;  %v13316_v2 = vmax.f32 %v13004_v14, %v2482_v15 }
 0x468   :  { %v13277_v5 = vpop.permute.xlu0 %8937  ;;  %7196 = vmatpush1.bf16.msra.mxu1 %v13270_v28 }
 0x469   :  { %v13280_v30 = vpop.permute.xlu1 %8932  ;;  %9142 = vrot.lane.b32.xlu1 %v9141_v43, %s9724_s21  ;;  %v13288_v10 = vunpack.i.l.bf16 %v13277_v5  ;;  %17730 = vst [vmem:[#allocation20_spill] sm:$0xff] %v13316_v2 }
 0x46b   :  { %9157 = vrot.lane.b32.xlu0 %v9156_v61, %s9724_s21 }
 0x46c   :  { %v13285_v45 = vpop.permute.xlu0 %8947 }
 0x46d   :  { %v13291_v47 = vunpack.i.l.bf16 %v13285_v45  ;;  %v13293_v25 = vpop.permute.xlu1 %8942 }
 0x46f   :  { %9162 = vrot.lane.b32.xlu0 %v9161_v53, %s9724_s21  ;;  %v9146_v33 = vpack.i.bf16 %v13291_v47, %v13288_v10  ;;  %v2483_v53 = vsel %vm377_vm3, %v13148_v60, %v12904_v16  ;;  %v8879_v16 = vunpack.i.l.bf16 %v13167_v27  ;;  %vm17410_vm3 = vcmask 982016  }
 0x470   :  { %v13300_v43 = vpop.permute.xlu0 %2994  ;;  %v13323_v29 = vmax.f32 %v12998_v42, %v2483_v53  ;;  %v8920_v53 = vunpack.i.h.bf16 %v13221_v1  ;;  %v8925_v60 = vunpack.i.h.bf16 %v13255_v44  ;;  %v17732_v1 = vunpack.i.h.bf16 %v13177_v57 }
 0x471   :  { %v13302_v61 = vpop.permute.xlu1 %8952  ;;  %9147 = vrot.lane.b32.xlu1 %v9146_v33, %s9724_s21  ;;  %v2763_v33 = vsel %vm17410_vm3, %v8879_v16, %v17734_v41 }
 0x472   :  { %17731 = vst [vmem:[#allocation17_spill] sm:$0xff] %v13323_v29  ;;  %v13340_v42 = vpack.i.bf16 %v13323_v29, %v13316_v2  ;;  %v13382_v31 = vsel %vm712_vm11, %v13252_v9, %v8920_v53  ;;  %v8955_v46 = vunpack.i.h.bf16 %v13302_v61  ;;  %v8954_v26 = vunpack.i.l.bf16 %v13302_v61 }
 0x473   :  { %9172 = vrot.lane.b32.xlu0 %v13097_v19, %s9730_s30 }
 0x474   :  { %v13313_v8 = vpop.permute.xlu0 %8967 }
 0x475   :  { %v13318_v37 = vpop.permute.xlu1 %2992  ;;  %9167 = vrot.lane.b32.xlu1 %v13171_v7, %s17509_s17  ;;  %v8969_v50 = vunpack.i.l.bf16 %v13313_v8 }
 0x477   :  { %3010 = vrot.lane.b32.xlu0 %v13158_v48, %s9729_s1  ;;  %v13352_v48 = vsel %vm3020_vm6, %v17190_v23, %v13165_v56  ;;  %v9191_v23 = vpack.i.bf16 %v13199_v18, %v13204_v3  ;;  %v13388_v18 = vpack.c.bf16 %v13236_v4, %v13231_v34  ;;  %v17737_v3 = vunpack.i.l.bf16 %v13255_v44 }
 0x478   :  { %v13331_v15 = vpop.permute.xlu0 %8972  ;;  %v17738_v34 = vunpack.i.h.bf16 %v13194_v6 }
 0x479   :  { %v13334_v17 = vpop.permute.xlu1 %8957  ;;  %3008 = vrot.lane.b32.xlu1 %v13126_v49, %s9729_s1 }
 0x47a   :  { %v8959_v14 = vunpack.i.l.bf16 %v13334_v17  ;;  %v2695_v4 = vsel %vm2694_vm4, %v8969_v50, %v17738_v34 }
 0x47b   :  { %9182 = vrot.lane.b32.xlu0 %v13340_v42, %s17455_s29 }
 0x47c   :  { %v2564_v49 = vsel %vm17733_vm14, %v8959_v14, %v17732_v1  ;;  %v13358_v39 = vpop.permute.xlu0 %8982  ;;  %v9196_v14 = vpack.i.bf16 %v13262_v58, %v13241_v12  ;;  %v13393_v12 = vsel %vm712_vm11, %v8920_v53, %v17737_v3  ;;  %v9201_v58 = vpack.i.bf16 %v13249_v51, %v13244_v55  ;;  %vm17765_vm14 = vmmov %vm17740_vm0 }
 0x47d   :  { %v13375_v1 = vpop.permute.xlu1 %8962  ;;  %9177 = vrot.lane.b32.xlu1 %v13097_v19, %s9731_s23  ;;  %v7143_v41 = vpack.c.bf16 %v2564_v49, %v12971_v11  ;;  %v8945_v11 = vunpack.i.h.bf16 %v13293_v25  ;;  %v2827_v49 = vsel %vm712_vm11, %v8925_v60, %v13252_v9  ;;  %v8974_v53 = vunpack.i.l.bf16 %v13331_v15 }
 0x47e   :  { %v8964_v38 = vunpack.i.l.bf16 %v13375_v1  ;;  %v17739_v3 = vunpack.i.h.bf16 %v13185_v20  ;;  %v8940_v55 = vunpack.i.h.bf16 %v13277_v5  ;;  %v8944_v51 = vunpack.i.l.bf16 %v13293_v25 }
 0x47f   :  { %7144 = vmatpush1.bf16.msra.mxu0 %v7143_v41  ;;  %9192 = vrot.lane.b32.xlu0 %v9191_v23, %s9724_s21  ;;  %v17741_v23 = vunpack.i.l.bf16 %v13238_v52  ;;  %v13422_v34 = vpack.c.bf16 %v2827_v49, %v2763_v33  ;;  %v2955_v52 = vsel %vm980_vm15, %v8955_v46, %v13291_v47  ;;  %v17742_v5 = vunpack.i.l.bf16 %v13280_v30 }
 0x480   :  { %v2628_v19 = vsel %vm17740_vm0, %v8964_v38, %v17739_v3  ;;  %v13409_v13 = vpop.permute.xlu0 %8992  ;;  %7146 = vmatprep.subr.bf16.mxu0 %v13388_v18  ;;  %v9211_v3 = vpack.i.bf16 %v13393_v12, %v13382_v31  ;;  %v13436_v33 = vsel %vm846_vm13, %v8945_v11, %v13288_v10  ;;  %v8875_v49 = vunpack.i.h.bf16 %v13106_v62  ;;  %vm17767_vm0 = vmmov %vm17762_vm5 }
 0x481   :  { %v3156_v9 = vsel %vm3155_vm12, %v17741_v23, %v8930_v54  ;;  %v13417_v41 = vpop.permute.xlu1 %8977  ;;  %9187 = vrot.lane.b32.xlu1 %v13340_v42, %s17581_s22  ;;  %v7147_v50 = vpack.c.bf16 %v2695_v4, %v2628_v19  ;;  %v3157_v25 = vsel %vm3155_vm12, %v8930_v54, %v17742_v5  ;;  %v8950_v23 = vunpack.i.h.bf16 %v13285_v45  ;;  %s9737_s22 = smov 100  }
 0x482   :  { %v8979_v38 = vunpack.i.l.bf16 %v13417_v41  ;;  %v2762_v19 = vsel %vm17410_vm3, %v8974_v53, %v8879_v16  ;;  %v8984_v4 = vunpack.i.l.bf16 %v13358_v39  ;;  %v13446_v45 = vsel %vm846_vm13, %v8940_v55, %v8944_v51 }
 0x483   :  { %7148 = vmatpush1.bf16.msra.mxu0 %v7147_v50  ;;  %9202 = vrot.lane.b32.xlu0 %v9201_v58, %s9724_s21  ;;  %17744 = vst [vmem:[#allocation8_spill] sm:$0xff] %v13446_v45  ;;  %v8994_v61 = vunpack.i.l.bf16 %v13409_v13  ;;  %v7153_v53 = vpack.c.bf16 %v2955_v52, %v13436_v33  ;;  %v13460_v24 = vsel %vm846_vm13, %v13288_v10, %v8940_v55 }
 0x484   :  { %v2826_v29 = vsel %vm712_vm11, %v8979_v38, %v8925_v60  ;;  %v13442_v54 = vpop.permute.xlu0 %9002  ;;  %7150 = vmatprep.subr.bf16.mxu0 %v13422_v34  ;;  %v13463_v7 = vsel %vm980_vm15, %v8950_v23, %v8954_v26 }
 0x485   :  { %17743 = vst [vmem:[#allocation21_spill] sm:$0xff] %v13442_v54  ;;  %v13449_v58 = vpop.permute.xlu1 %8987  ;;  %9197 = vrot.lane.b32.xlu1 %v9196_v14, %s9724_s21  ;;  %v7151_v16 = vpack.c.bf16 %v2826_v29, %v2762_v19  ;;  %v17202_v50 = vunpack.i.h.bf16 %v13442_v54  ;;  %v9206_v29 = vpack.i.bf16 %v3157_v25, %v3156_v9  ;;  %v17745_v14 = vunpack.i.h.bf16 %v13358_v39 }
 0x486   :  { %v8990_v38 = vunpack.i.h.bf16 %v13449_v58  ;;  %v8989_v5 = vunpack.i.l.bf16 %v13449_v58  ;;  %v2890_v19 = vsel %vm846_vm13, %v8984_v4, %v8945_v11  ;;  %v7157_v11 = vpack.c.bf16 %v13368_v35, %v13352_v48 }
 0x487   :  { %7152 = vmatpush1.bf16.msra.mxu0 %v7151_v16  ;;  %9212 = vrot.lane.b32.xlu0 %v9211_v3, %s9724_s21  ;;  %v13469_v52 = vsel %vm846_vm13, %v8944_v51, %v17745_v14  ;;  %v9216_v51 = vpack.i.bf16 %v13446_v45, %v13460_v24  ;;  %v17748_v3 = vunpack.i.l.bf16 %v13179_v36  ;;  %v17750_v35 = vunpack.i.l.bf16 %v13442_v54 }
 0x488   :  { %17746 = vst [vmem:[#allocation10_spill] sm:$0xff] %v13469_v52  ;;  %v13475_v60 = vsel %vm980_vm15, %v8954_v26, %v8990_v38  ;;  %v2954_v10 = vsel %vm980_vm15, %v8989_v5, %v8955_v46  ;;  %v13478_v55 = vpop.permute.xlu0 %2998  ;;  %7154 = vmatprep.subr.bf16.mxu0 %v7153_v53  ;;  %v13491_v46 = vsel %vm980_vm15, %v13291_v47, %v8950_v23  ;;  %v8975_v5 = vunpack.i.h.bf16 %v13331_v15 }
 0x489   :  { %17747 = vst [vmem:[#allocation22_spill] sm:$0xff] %v13475_v60  ;;  %v13480_v16 = vpop.permute.xlu1 %2996  ;;  %9207 = vrot.lane.b32.xlu1 %v9206_v29, %s9724_s21  ;;  %v7155_v9 = vpack.c.bf16 %v2954_v10, %v2890_v19  ;;  %v3088_v25 = vsel %vm3087_vm8, %v8994_v61, %v17748_v3  ;;  %v13506_v48 = vsel %vm3087_vm8, %v17750_v35, %v17202_v50  ;;  %v17752_v61 = vunpack.i.l.bf16 %v13106_v62 }
 0x48a   :  { %v13499_v4 = vsel %vm3020_vm6, %v13300_v43, %v13480_v16  ;;  %17751 = vst [vmem:[#allocation23_spill] sm:$0xff] %v13506_v48  ;;  %v9221_v47 = vpack.i.bf16 %v13463_v7, %v13491_v46  ;;  %v17753_v62 = vunpack.i.h.bf16 %v13167_v27  ;;  %v8965_v35 = vunpack.i.h.bf16 %v13375_v1 }
 0x48b   :  { %17749 = vst [vmem:[#allocation11_spill] sm:$0xff] %v13499_v4  ;;  %7156 = vmatpush1.bf16.msra.mxu0 %v7155_v9  ;;  %9217 = vrot.lane.b32.xlu0 %v9216_v51, %s9724_s21  ;;  %v3021_v53 = vsel %vm3020_vm6, %v8875_v49, %v17752_v61  ;;  %v13526_v9 = vsel %vm3020_vm6, %v13165_v56, %v13318_v37  ;;  %v13542_v56 = vld [vmem:[%s16967_s3 + $0x8] sm:$0xff]  ;;  %v8995_v61 = vunpack.i.h.bf16 %v13409_v13 }
 0x48c   :  { %v13517_v29 = vpop.permute.xlu0 %9007  ;;  %7158 = vmatprep.subr.bf16.mxu0 %v7157_v11  ;;  %v7159_v19 = vpack.c.bf16 %v3088_v25, %v3021_v53  ;;  %v2764_v15 = vsel %vm17410_vm3, %v17753_v62, %v8975_v5  ;;  %v8970_v11 = vunpack.i.h.bf16 %v13313_v8  ;;  %6293 = vmatprep.mubr.msk.f32.mxu0 %vm17754_vm10, %v13542_v56  ;;  %vm17769_vm10 = vmmov %vm17756_vm1 }
 0x48d   :  { %v13519_v14 = vpop.permute.xlu1 %8997  ;;  %9222 = vrot.lane.b32.xlu1 %v9221_v47, %s9724_s21  ;;  %6295 = vmatprep.mubr.msk.f32.mxu1 %vm17755_vm9, %v13542_v56  ;;  %v7169_v1 = vpack.c.bf16 %v13382_v31, %v2764_v15  ;;  %v17758_v15 = vunpack.i.l.bf16 %v13442_v54  ;;  %vm17770_vm9 = vmmov %vm17756_vm1 }
 0x48e   :  { %v8999_v10 = vunpack.i.l.bf16 %v13519_v14 }
 0x48f   :  { %3396 = vrot.lane.b32.xlu0 %v13526_v9, %s9724_s21  ;;  %7160 = vmatpush1.bf16.msra.mxu0 %v7159_v19  ;;  %v7201_v19 = vpack.c.bf16 %v13463_v7, %v13446_v45 }
 0x490   :  { %v13533_v49 = vpop.permute.xlu0 %9017  ;;  %7162 = vmatprep.subr.bf16.mxu0 %v13215_v40  ;;  %v2765_v51 = vsel %vm17410_vm3, %v8975_v5, %v8999_v10 }
 0x491   :  { %v9020_v3 = vunpack.i.h.bf16 %v13533_v49  ;;  %v9019_v27 = vunpack.i.l.bf16 %v13533_v49  ;;  %v13547_v25 = vpop.permute.xlu1 %9012  ;;  %9232 = vrot.lane.b32.xlu1 %v13134_v59, %s9730_s30  ;;  %v13552_v40 = vpack.c.bf16 %v13393_v12, %v2765_v51  ;;  %v3091_v51 = vsel %vm3087_vm8, %v8995_v61, %v17758_v15 }
 0x492   :  { %v9015_v47 = vunpack.i.h.bf16 %v13547_v25  ;;  %v9014_v8 = vunpack.i.l.bf16 %v13547_v25 }
 0x493   :  { %v2700_v53 = vsel %vm2694_vm4, %v8970_v11, %v9019_v27  ;;  %v13566_v12 = vsel %vm2694_vm4, %v9019_v27, %v9020_v3  ;;  %9227 = vrot.lane.b32.xlu0 %v13340_v42, %s9732_s25  ;;  %7164 = vmatpush1.bf16.msra.mxu0 %v13208_v21  ;;  %v8960_v21 = vunpack.i.h.bf16 %v13334_v17  ;;  %v7203_v17 = vpack.c.bf16 %v13491_v46, %v13460_v24 }
 0x494   :  { %v13575_v5 = vsel %vm17756_vm1, %v9014_v8, %v9015_v47  ;;  %7198 = vmatprep.subr.bf16.mxu1 %v13552_v40  ;;  %v13578_v13 = vpop.permute.xlu0 %9022  ;;  %7166 = vmatprep.subr.bf16.mxu0 %v13270_v28  ;;  %v13584_v62 = vsel %vm17757_vm7, %v8965_v35, %v9014_v8  ;;  %v3024_v27 = vsel %vm3020_vm6, %v13318_v37, %v13300_v43  ;;  %v17760_v8 = vunpack.i.h.bf16 %v13179_v36  ;;  %vm17783_vm7 = vmmov %vm17756_vm1 }
 0x495   :  { %7200 = vmatpush1.bf16.msra.mxu1 %v7169_v1  ;;  %v13587_v31 = vpop.permute.xlu1 %9027  ;;  %9242 = vrot.lane.b32.xlu1 %v13340_v42, %s9733_s19  ;;  %v13595_v28 = vpack.c.bf16 %v2700_v53, %v13584_v62  ;;  %v13599_v7 = vpack.c.bf16 %v13566_v12, %v13575_v5  ;;  %v7205_v23 = vpack.c.bf16 %v3091_v51, %v3024_v27  ;;  %v8935_v36 = vunpack.i.h.bf16 %v13280_v30 }
 0x496   :  { %7202 = vmatprep.subr.bf16.mxu1 %v7201_v19  ;;  %v3090_v19 = vsel %vm3087_vm8, %v17760_v8, %v8995_v61  ;;  %v17208_v50 = vunpack.i.l.bf16 %v13587_v31  ;;  %v17763_v37 = vunpack.i.l.bf16 %v13194_v6 }
 0x497   :  { %17759 = vst [vmem:[#allocation25_spill] sm:$0xff] %v13599_v7  ;;  %9237 = vrot.lane.b32.xlu0 %v13340_v42, %s9721_s27  ;;  %7168 = vmatpush1.bf16.msra.mxu0 %v13388_v18  ;;  %v17761_v18 = vunpack.i.l.bf16 %v13177_v57  ;;  %v7207_v61 = vpack.c.bf16 %v3090_v19, %v13526_v9  ;;  %v9246_v57 = vpack.i.bf16 %v13316_v2, %v13161_v63 }
 0x498   :  { %v13612_v15 = vpop.permute.xlu0 %9042  ;;  %7170 = vmatprep.subr.bf16.mxu0 %v7169_v1  ;;  %v2699_v43 = vsel %vm2694_vm4, %v17763_v37, %v8970_v11  ;;  %v17209_v1 = vunpack.i.l.bf16 %v13517_v29  ;;  %v17764_v11 = vunpack.i.l.bf16 %v13185_v20  ;;  %v3159_v8 = vsel %vm3155_vm12, %v8935_v36, %v17208_v50 }
 0x499   :  { %7204 = vmatpush1.bf16.msra.mxu1 %v7203_v17  ;;  %v13614_v26 = vpop.permute.xlu1 %9032  ;;  %3398 = vrot.lane.b32.xlu1 %v3024_v27, %s9724_s21  ;;  %v2568_v46 = vsel %vm17762_vm5, %v17761_v18, %v8960_v21  ;;  %v8980_v27 = vunpack.i.h.bf16 %v13417_v41  ;;  %v9044_v41 = vunpack.i.l.bf16 %v13612_v15  ;;  %vm17787_vm5 = vmmov %vm17767_vm0 }
 0x49a   :  { %7206 = vmatprep.subr.bf16.mxu1 %v7205_v23  ;;  %v9000_v23 = vunpack.i.h.bf16 %v13519_v14  ;;  %v13636_v6 = vpack.c.bf16 %v2568_v46, %v13019_v32  ;;  %v2632_v9 = vsel %vm17765_vm14, %v17764_v11, %v8965_v35  ;;  %v9034_v19 = vunpack.i.l.bf16 %v13614_v26  ;;  %vm17791_vm14 = vmmov %vm17767_vm0 }
 0x49b   :  { %9252 = vrot.lane.b32.xlu0 %v13340_v42, %s17509_s17  ;;  %7172 = vmatpush1.bf16.msra.mxu0 %v13422_v34  ;;  %v9266_v34 = vpack.i.bf16 %v2700_v53, %v2699_v43  ;;  %v17766_v32 = vunpack.i.l.bf16 %v13280_v30  ;;  %v13654_v35 = vpack.c.bf16 %v2699_v43, %v2632_v9  ;;  %v17211_v53 = vunpack.i.h.bf16 %v13612_v15  ;;  %s9739_s17 = smov 22  }
 0x49c   :  { %v13633_v51 = vpop.permute.xlu0 %9052  ;;  %v13661_v18 = vsel %vm17767_vm0, %v8960_v21, %v17209_v1  ;;  %v2766_v30 = vsel %vm17410_vm3, %v8999_v10, %v9000_v23  ;;  %v13678_v21 = vsel %vm980_vm15, %v8990_v38, %v9034_v19  ;;  %v2635_v38 = vsel %vm17769_vm10, %v9015_v47, %v9044_v41  ;;  %vm17793_vm0 = vmmov %vm17756_vm1 }
 0x49d   :  { %7208 = vmatpush1.bf16.msra.mxu1 %v7207_v61  ;;  %v13641_v17 = vpop.permute.xlu1 %9037  ;;  %9247 = vrot.lane.b32.xlu1 %v9246_v57, %s9724_s21  ;;  %v3158_v20 = vsel %vm3155_vm12, %v17766_v32, %v8935_v36  ;;  %v9024_v57 = vunpack.i.l.bf16 %v13578_v13  ;;  %v9256_v11 = vpack.i.bf16 %v13661_v18, %v2568_v46  ;;  %v9291_v47 = vpack.i.bf16 %v13678_v21, %v13475_v60  ;;  %vm17794_vm10 = vmmov %vm17793_vm0 }
 0x49e   :  { %7210 = vmatprep.subr.bf16.mxu1 %v13636_v6  ;;  %v9271_v43 = vpack.i.bf16 %v3159_v8, %v3158_v20  ;;  %v9261_v32 = vpack.i.bf16 %v13584_v62, %v2632_v9 }
 0x49f   :  { %9267 = vrot.lane.b32.xlu0 %v9266_v34, %s9724_s21  ;;  %v13697_v34 = vsel %vm17770_vm9, %v9044_v41, %v17211_v53  ;;  %vm17802_vm9 = vmmov %vm17787_vm5 }
 0x4a0   :  { %v13663_v37 = vpop.permute.xlu0 %9067 }
 0x4a1   :  { %7212 = vmatpush1.bf16.msra.mxu1 %v13212_v22  ;;  %v13669_v36 = vpop.permute.xlu1 %9047  ;;  %3400 = vrot.lane.b32.xlu1 %v13499_v4, %s9724_s21  ;;  %v17768_v22 = vunpack.i.l.bf16 %v13255_v44 }
 0x4a2   :  { %v17210_v61 = vunpack.i.h.bf16 %v13669_v36  ;;  %v9049_v14 = vunpack.i.l.bf16 %v13669_v36  ;;  %7214 = vmatprep.subr.bf16.mxu1 %v13654_v35 }
 0x4a3   :  { %v2830_v10 = vsel %vm712_vm11, %v17768_v22, %v8980_v27  ;;  %9272 = vrot.lane.b32.xlu0 %v9271_v43, %s9724_s21  ;;  %v13738_v43 = vsel %vm3020_vm6, %v13480_v16, %v13478_v55  ;;  %v9025_v16 = vunpack.i.h.bf16 %v13578_v13  ;;  %v9035_v13 = vunpack.i.h.bf16 %v13614_v26 }
 0x4a4   :  { %v13689_v58 = vpack.c.bf16 %v2830_v10, %v2766_v30  ;;  %v13702_v44 = vsel %vm2694_vm4, %v9020_v3, %v9049_v14  ;;  %v13707_v46 = vsel %vm2694_vm4, %v9049_v14, %v17210_v61  ;;  %v13709_v8 = vpop.permute.xlu0 %3002  ;;  %17774 = vst [vmem:[#allocation33_spill] sm:$0xff] %v13738_v43  ;;  %v17206_v14 = vunpack.i.l.bf16 %v13633_v51 }
 0x4a5   :  { %7216 = vmatpush1.bf16.msra.mxu1 %v13266_v0  ;;  %v13712_v25 = vpop.permute.xlu1 %9057  ;;  %9257 = vrot.lane.b32.xlu1 %v9256_v11, %s9724_s21  ;;  %v13718_v49 = vpack.c.bf16 %v13702_v44, %v2635_v38  ;;  %v13722_v3 = vpack.c.bf16 %v13707_v46, %v13697_v34  ;;  %v2831_v0 = vsel %vm712_vm11, %v8980_v27, %v9024_v57  ;;  %v9040_v61 = vunpack.i.h.bf16 %v13641_v17 }
 0x4a6   :  { %7218 = vmatprep.subr.bf16.mxu1 %v13689_v58  ;;  %v9276_v62 = vpack.i.bf16 %v2831_v0, %v2830_v10  ;;  %v9301_v11 = vpack.i.bf16 %v2635_v38, %v13575_v5 }
 0x4a7   :  { %17771 = vst [vmem:[#allocation24_spill] sm:$0xff] %v13718_v49  ;;  %17772 = vst [vmem:[#allocation19_spill] sm:$0xff] %v13722_v3  ;;  %9292 = vrot.lane.b32.xlu0 %v9291_v47, %s9724_s21  ;;  %v17207_v47 = vunpack.i.l.bf16 %v13663_v37 }
 0x4a8   :  { %v13728_v20 = vpop.permute.xlu0 %9072 }
 0x4a9   :  { %17773 = vst [vmem:[#allocation32_spill] sm:$0xff] %v13728_v20  ;;  %v17203_v41 = vunpack.i.l.bf16 %v13728_v20  ;;  %7220 = vmatpush1.bf16.msra.mxu1 %v13552_v40  ;;  %v13732_v30 = vpop.permute.xlu1 %9062  ;;  %9262 = vrot.lane.b32.xlu1 %v9261_v32, %s9724_s21 }
 0x4ab   :  { %3402 = vrot.lane.b32.xlu0 %v13738_v43, %s9724_s21  ;;  %v2767_v9 = vsel %vm17410_vm3, %v9000_v23, %v17203_v41  ;;  %v13762_v23 = vsel %vm712_vm11, %v9025_v16, %v17206_v14 }
 0x4ac   :  { %v13745_v27 = vpack.c.bf16 %v2831_v0, %v2767_v9  ;;  %v13751_v22 = vpop.permute.xlu0 %3004  ;;  %17775 = vst [vmem:[#allocation34_spill] sm:$0xff] %v13762_v23 }
 0x4ad   :  { %v13747_v40 = vpop.permute.xlu1 %3000  ;;  %9277 = vrot.lane.b32.xlu1 %v9276_v62, %s9724_s21  ;;  %v13769_v62 = vsel %vm712_vm11, %v9024_v57, %v9025_v16 }
 0x4ae   :  { %17776 = vst [vmem:[#allocation35_spill] sm:$0xff] %v13769_v62  ;;  %v13775_v5 = vsel %vm3020_vm6, %v13478_v55, %v13747_v40  ;;  %v9316_v57 = vpack.i.bf16 %v13762_v23, %v13769_v62  ;;  %v13793_v55 = vsel %vm980_vm15, %v9035_v13, %v17207_v47 }
 0x4af   :  { %3012 = vrot.lane.b32.xlu0 %v13161_v63, %s9729_s1  ;;  %17777 = vst [vmem:[#allocation36_spill] sm:$0xff] %v13775_v5  ;;  %17779 = vst [vmem:[#allocation38_spill] sm:$0xff] %v13793_v55  ;;  %v17782_v63 = vunpack.i.h.bf16 %v13612_v15 }
 0x4b0   :  { %v9093_v9 = vpop.permute.xlu0 %9092 }
 0x4b1   :  { %v13756_v10 = vpop.permute.xlu1 %9077  ;;  %v9094_v47 = vunpack.i.l.bf16 %v9093_v9 }
 0x4b2   :  { %v17204_v32 = vunpack.i.h.bf16 %v13756_v10  ;;  %v17205_v0 = vunpack.i.l.bf16 %v13756_v10 }
 0x4b3   :  { %9302 = vrot.lane.b32.xlu0 %v9301_v11, %s9724_s21  ;;  %v13799_v11 = vsel %vm980_vm15, %v9034_v19, %v9035_v13  ;;  %v13822_v3 = vsel %vm17756_vm1, %v17782_v63, %v9094_v47  ;;  %vm17805_vm1 = vmmov %vm17787_vm5 }
 0x4b4   :  { %v13782_v38 = vsel %vm3087_vm8, %v17205_v0, %v17204_v32  ;;  %17780 = vst [vmem:[#allocation39_spill] sm:$0xff] %v13799_v11  ;;  %v9326_v0 = vpack.i.bf16 %v13793_v55, %v13799_v11  ;;  %v13805_v14 = vpop.permute.xlu0 %9107 }
 0x4b5   :  { %17778 = vst [vmem:[#allocation37_spill] sm:$0xff] %v13782_v38  ;;  %v13784_v41 = vpop.permute.xlu1 %9082 }
 0x4b7   :  { %9317 = vrot.lane.b32.xlu0 %v9316_v57, %s9724_s21  ;;  %v9095_v57 = vunpack.i.h.bf16 %v9093_v9 }
 0x4b8   :  { %v13812_v26 = vpop.permute.xlu0 %9112 }
 0x4b9   :  { %v13801_v32 = vpop.permute.xlu1 %3006  ;;  %v13825_v9 = vsel %vm17783_vm7, %v9094_v47, %v9095_v57  ;;  %vm17809_vm7 = vmmov %vm17805_vm1 }
 0x4bb   :  { %9327 = vrot.lane.b32.xlu0 %v9326_v0, %s9724_s21  ;;  %v17781_v0 = vmov 0.0  }
 0x4bd   :  { %v13808_v16 = vpop.permute.xlu1 %9087 }
 0x4be   :  { %v9089_v13 = vunpack.i.l.bf16 %v13808_v16 }
 0x4bf   :  { %3404 = vrot.lane.b32.xlu0 %v13775_v5, %s9724_s21  ;;  %v17784_v5 = vunpack.i.h.bf16 %v13669_v36  ;;  %v17789_v36 = vld [vmem:[#allocation16_spill] sm:$0xff] }
 0x4c0   :  { %v13845_v15 = vsel %vm17787_vm5, %v9040_v61, %v9089_v13  ;;  %vm17813_vm5 = vmmov %vm17805_vm1 }
 0x4c1   :  { %v9098_v19 = vpop.permute.xlu1 %9097  ;;  %17788 = vst [vmem:[#allocation42_spill] sm:$0xff] %v13845_v15 }
 0x4c2   :  { %v9100_v50 = vunpack.i.h.bf16 %v9098_v19  ;;  %v9099_v1 = vunpack.i.l.bf16 %v9098_v19 }
 0x4c3   :  { %2692 = vrot.lane.b32.xlu0 %v17781_v0, %s9732_s25 }
 0x4c4   :  { %v2704_v38 = vsel %vm2694_vm4, %v17784_v5, %v9099_v1  ;;  %v13831_v19 = vsel %vm2694_vm4, %v9099_v1, %v9100_v50  ;;  %v17790_v1 = vunpack.i.l.bf16 %v13641_v17 }
 0x4c5   :  { %v13833_v11 = vpop.permute.xlu1 %9102  ;;  %v13835_v53 = vpop.permute.xlu0 %9117  ;;  %v13838_v55 = vpack.c.bf16 %v2704_v38, %v13822_v3  ;;  %v13842_v63 = vpack.c.bf16 %v13831_v19, %v13825_v9  ;;  %v9346_v48 = vpack.i.bf16 %v2704_v38, %v13707_v46  ;;  %v17233_v38 = vunpack.i.h.bf16 %v13732_v30 }
 0x4c6   :  { %v13852_v47 = vsel %vm17791_vm14, %v17790_v1, %v9040_v61  ;;  %v9060_v61 = vunpack.i.h.bf16 %v13712_v25  ;;  %v17249_v45 = vunpack.i.h.bf16 %v13833_v11  ;;  %vm17817_vm14 = vmmov %vm17805_vm1 }
 0x4c7   :  { %17785 = vst [vmem:[#allocation40_spill] sm:$0xff] %v13838_v55  ;;  %17786 = vst [vmem:[#allocation41_spill] sm:$0xff] %v13842_v63  ;;  %9332 = vrot.lane.b32.xlu0 %v17789_v36, %s9730_s30  ;;  %v9336_v63 = vpack.i.bf16 %v13845_v15, %v13852_v47 }
 0x4c8   :  { %17792 = vst [vmem:[#allocation43_spill] sm:$0xff] %v13852_v47 }
 0x4c9   :  { %v13855_v23 = vpop.permute.xlu1 %9122  ;;  %v13857_v55 = vpop.permute.xlu0 %9127 }
 0x4ca   :  { %v17228_v49 = vunpack.i.h.bf16 %v13855_v23  ;;  %v9124_v62 = vunpack.i.l.bf16 %v13855_v23  ;;  %v17231_v36 = vunpack.i.h.bf16 %v13857_v55  ;;  %v9129_v7 = vunpack.i.l.bf16 %v13857_v55 }
 0x4cb   :  { %9337 = vrot.lane.b32.xlu0 %v9336_v63, %s9724_s21 }
 0x4cc   :  { %v2639_v5 = vsel %vm17793_vm0, %v9095_v57, %v9124_v62  ;;  %v13872_v15 = vsel %vm17794_vm10, %v9124_v62, %v17228_v49  ;;  %v13875_v47 = vsel %vm2694_vm4, %v9100_v50, %v9129_v7  ;;  %v13880_v4 = vsel %vm2694_vm4, %v9129_v7, %v17231_v36  ;;  %vm17821_vm0 = vmmov %vm17805_vm1 }
 0x4cd   :  { %17795 = vst [vmem:[#allocation44_spill] sm:$0xff] %v13875_v47  ;;  %v13884_v1 = vpack.c.bf16 %v13875_v47, %v2639_v5  ;;  %v13888_v57 = vpack.c.bf16 %v13880_v4, %v13872_v15  ;;  %v17798_v62 = vunpack.i.l.bf16 %v13805_v14  ;;  %v9085_v50 = vunpack.i.h.bf16 %v13784_v41  ;;  %v13895_v20 = vpop.permute.xlu0 %9137 }
 0x4ce   :  { %v9084_v49 = vunpack.i.l.bf16 %v13784_v41  ;;  %v17799_v7 = vunpack.i.l.bf16 %v13712_v25 }
 0x4cf   :  { %17796 = vst [vmem:[#allocation45_spill] sm:$0xff] %v13884_v1  ;;  %17797 = vst [vmem:[#allocation46_spill] sm:$0xff] %v13888_v57  ;;  %v3163_v63 = vsel %vm3155_vm12, %v9060_v61, %v17798_v62  ;;  %9347 = vrot.lane.b32.xlu0 %v9346_v48, %s9724_s21 }
 0x4d0   :  { %v3162_v46 = vsel %vm3155_vm12, %v17799_v7, %v9060_v61  ;;  %v13905_v57 = vsel %vm846_vm13, %v17233_v38, %v9084_v49  ;;  %v13908_v62 = vsel %vm846_vm13, %v9084_v49, %v9085_v50  ;;  %v13919_v7 = vpop.permute.xlu1 %9132  ;;  %v9090_v49 = vunpack.i.h.bf16 %v13808_v16 }
 0x4d1   :  { %v9351_v36 = vpack.i.bf16 %v3163_v63, %v3162_v46  ;;  %17800 = vst [vmem:[#allocation47_spill] sm:$0xff] %v13905_v57  ;;  %17801 = vst [vmem:[#allocation48_spill] sm:$0xff] %v13908_v62  ;;  %v13911_v41 = vpop.permute.xlu0 %3394  ;;  %v9361_v48 = vpack.i.bf16 %v13908_v62, %v13905_v57  ;;  %v9119_v63 = vunpack.i.l.bf16 %v13835_v53  ;;  %v17807_v16 = vunpack.i.h.bf16 %v13358_v39 }
 0x4d2   :  { %v13940_v62 = vsel %vm17805_vm1, %v9089_v13, %v9090_v49  ;;  %vm17845_vm1 = vcmask 588800  }
 0x4d3   :  { %9352 = vrot.lane.b32.xlu0 %v9351_v36, %s9724_s21  ;;  %v13927_v36 = vsel %vm17802_vm9, %v9090_v49, %v9119_v63  ;;  %17806 = vst [vmem:[#allocation51_spill] sm:$0xff] %v13940_v62  ;;  %v9381_v49 = vpack.i.bf16 %v13831_v19, %v2639_v5  ;;  %v9120_v19 = vunpack.i.h.bf16 %v13835_v53  ;;  %v17814_v5 = vunpack.i.l.bf16 %v13919_v7  ;;  %vm17831_vm9 = vmmov %vm17794_vm10 }
 0x4d4   :  { %17803 = vst [vmem:[#allocation49_spill] sm:$0xff] %v13927_v36  ;;  %v9371_v43 = vpack.i.bf16 %v13927_v36, %v13940_v62 }
 0x4d7   :  { %9362 = vrot.lane.b32.xlu0 %v9361_v48, %s9724_s21  ;;  %v13933_v48 = vsel %vm3020_vm6, %v13751_v22, %v13801_v32 }
 0x4d8   :  { %17804 = vst [vmem:[#allocation50_spill] sm:$0xff] %v13933_v48 }
 0x4d9   :  { %v13916_v61 = vpop.permute.xlu0 %9152 }
 0x4db   :  { %3018 = vrot.lane.b32.xlu0 %v17781_v0, %s9729_s1  ;;  %v13935_v1 = vpop.permute.xlu1 %9142 }
 0x4dd   :  { %v13924_v46 = vpop.permute.xlu0 %9157 }
 0x4de   :  { %v9159_v38 = vunpack.i.l.bf16 %v13924_v46 }
 0x4df   :  { %3410 = vrot.lane.b32.xlu0 %v13933_v48, %s9724_s21  ;;  %v9010_v48 = vunpack.i.h.bf16 %v13517_v29 }
 0x4e0   :  { %v13945_v57 = vsel %vm846_vm13, %v17807_v16, %v9159_v38  ;;  %v17808_v16 = vunpack.i.l.bf16 %v13641_v17  ;;  %v17251_v17 = vunpack.i.h.bf16 %v13812_v26 }
 0x4e1   :  { %v13947_v47 = vpop.permute.xlu0 %9162  ;;  %v9281_v60 = vpack.i.bf16 %v13945_v57, %v13469_v52 }
 0x4e2   :  { %v13966_v36 = vsel %vm17809_vm7, %v9010_v48, %v17808_v16  ;;  %v17810_v62 = vunpack.i.l.bf16 %v13947_v47  ;;  %v9030_v16 = vunpack.i.h.bf16 %v13587_v31  ;;  %vm17855_vm7 = vmmov %vm17821_vm0 }
 0x4e3   :  { %v13955_v54 = vpop.permute.xlu1 %9147  ;;  %9282 = vrot.lane.b32.xlu1 %v9281_v60, %s9724_s21  ;;  %9372 = vrot.lane.b32.xlu0 %v9371_v43, %s9724_s21  ;;  %v17812_v60 = vunpack.i.l.bf16 %v13517_v29  ;;  %v13991_v29 = vsel %vm712_vm11, %v17249_v45, %v17814_v5  ;;  %v9306_v45 = vpack.i.bf16 %v13702_v44, %v13566_v12  ;;  %v9064_v12 = vunpack.i.l.bf16 %v13732_v30 }
 0x4e4   :  { %v13972_v52 = vsel %vm846_vm13, %v9085_v50, %v17810_v62  ;;  %17815 = vst [vmem:[#allocation53_spill] sm:$0xff] %v13991_v29 }
 0x4e5   :  { %v13960_v13 = vpop.permute.xlu0 %9172  ;;  %17811 = vst [vmem:[#allocation52_spill] sm:$0xff] %v13972_v52  ;;  %v13977_v43 = vsel %vm17813_vm5, %v17812_v60, %v9010_v48  ;;  %v9396_v48 = vpack.i.bf16 %v13972_v52, %v13991_v29  ;;  %v14013_v60 = vsel %vm17817_vm14, %v9119_v63, %v9120_v19  ;;  %v17820_v63 = vunpack.i.l.bf16 %v13587_v31  ;;  %vm17857_vm5 = vmmov %vm17845_vm1 }
 0x4e6   :  { %17818 = vst [vmem:[#allocation55_spill] sm:$0xff] %v14013_v60  ;;  %vm17897_vm14 = vmmov %vm17831_vm9 }
 0x4e7   :  { %v13979_v39 = vpop.permute.xlu1 %9167  ;;  %9287 = vrot.lane.b32.xlu1 %v13134_v59, %s9731_s23  ;;  %9382 = vrot.lane.b32.xlu0 %v9381_v49, %s9724_s21  ;;  %v9296_v59 = vpack.i.bf16 %v13966_v36, %v13977_v43  ;;  %v3160_v52 = vsel %vm3155_vm12, %v17820_v63, %v9030_v16 }
 0x4e8   :  { %v17250_v50 = vunpack.i.l.bf16 %v13979_v39 }
 0x4e9   :  { %v13994_v62 = vpop.permute.xlu0 %3010 }
 0x4ea   :  { %v14005_v53 = vsel %vm980_vm15, %v17251_v17, %v17250_v50  ;;  %v17819_v17 = vunpack.i.l.bf16 %v13712_v25  ;;  %v9160_v25 = vunpack.i.h.bf16 %v13924_v46 }
 0x4eb   :  { %17816 = vst [vmem:[#allocation54_spill] sm:$0xff] %v14005_v53  ;;  %v14007_v49 = vpop.permute.xlu1 %3008  ;;  %9297 = vrot.lane.b32.xlu1 %v9296_v59, %s9724_s21  ;;  %9397 = vrot.lane.b32.xlu0 %v9396_v48, %s9724_s21  ;;  %v9406_v50 = vpack.i.bf16 %v14013_v60, %v14005_v53 }
 0x4ec   :  { %v3161_v29 = vsel %vm3155_vm12, %v9030_v16, %v17819_v17 }
 0x4ed   :  { %v14015_v5 = vpop.permute.xlu0 %9182  ;;  %v9311_v60 = vpack.i.bf16 %v3161_v29, %v3160_v52  ;;  %v17823_v52 = vunpack.i.h.bf16 %v13732_v30 }
 0x4ee   :  { %v17256_v59 = vunpack.i.l.bf16 %v14015_v5 }
 0x4ef   :  { %v14025_v48 = vpop.permute.xlu1 %9177  ;;  %9307 = vrot.lane.b32.xlu1 %v9306_v45, %s9724_s21  ;;  %9407 = vrot.lane.b32.xlu0 %v9406_v50, %s9724_s21  ;;  %v14044_v50 = vsel %vm846_vm13, %v9159_v38, %v9064_v12  ;;  %v14061_v38 = vsel %vm846_vm13, %v9064_v12, %v17823_v52  ;;  %v9155_v52 = vunpack.i.h.bf16 %v13916_v61 }
 0x4f0   :  { %v14036_v44 = vsel %vm17821_vm0, %v9120_v19, %v17256_v59  ;;  %v14051_v19 = vsel %vm3020_vm6, %v13801_v32, %v14007_v49  ;;  %17824 = vst [vmem:[#allocation57_spill] sm:$0xff] %v14061_v38 }
 0x4f1   :  { %v14039_v17 = vpop.permute.xlu0 %9192  ;;  %17822 = vst [vmem:[#allocation56_spill] sm:$0xff] %v14051_v19 }
 0x4f2   :  { %v9195_v31 = vunpack.i.h.bf16 %v14039_v17  ;;  %v17258_v16 = vunpack.i.l.bf16 %v14039_v17 }
 0x4f3   :  { %v14053_v63 = vpop.permute.xlu1 %9187  ;;  %9312 = vrot.lane.b32.xlu1 %v9311_v60, %s9724_s21  ;;  %3412 = vrot.lane.b32.xlu0 %v14051_v19, %s9724_s21  ;;  %v9321_v60 = vpack.i.bf16 %v14061_v38, %v14044_v50 }
 0x4f4   :  { %v3426_v46 = vsel %vm846_vm13, %v9195_v31, %v9160_v25  ;;  %v3427_v29 = vsel %vm846_vm13, %v9160_v25, %v17258_v16  ;;  %v17259_v32 = vunpack.i.l.bf16 %v14053_v63  ;;  %v9154_v25 = vunpack.i.l.bf16 %v13916_v61 }
 0x4f5   :  { %v14068_v45 = vpop.permute.xlu0 %9202  ;;  %v7173_v59 = vpack.c.bf16 %v3427_v29, %v13460_v24  ;;  %v7175_v30 = vpack.c.bf16 %v3426_v46, %v13436_v33  ;;  %v17825_v33 = vunpack.i.h.bf16 %v13855_v23 }
 0x4f6   :  { %v17260_v12 = vunpack.i.h.bf16 %v14068_v45  ;;  %v9204_v31 = vunpack.i.l.bf16 %v14068_v45 }
 0x4f7   :  { %v14077_v19 = vpop.permute.xlu1 %9197  ;;  %9322 = vrot.lane.b32.xlu1 %v9321_v60, %s9724_s21  ;;  %9417 = vrot.lane.b32.xlu0 %v13340_v42, %s9730_s30  ;;  %v14090_v46 = vsel %vm17794_vm10, %v17825_v33, %v17259_v32  ;;  %v14098_v42 = vsel %vm3020_vm6, %v13747_v40, %v13709_v8  ;;  %vm17913_vm10 = vmmov %vm17845_vm1 }
 0x4f8   :  { %v17261_v16 = vunpack.i.h.bf16 %v14077_v19  ;;  %v9199_v24 = vunpack.i.l.bf16 %v14077_v19  ;;  %7174 = vmatprep.subr.bf16.mxu0 %v7173_v59  ;;  %v3458_v29 = vsel %vm846_vm13, %v9155_v52, %v9204_v31  ;;  %17826 = vst [vmem:[#allocation58_spill] sm:$0xff] %v14098_v42  ;;  %v3459_v61 = vsel %vm846_vm13, %v9204_v31, %v17260_v12 }
 0x4f9   :  { %7176 = vmatpush1.bf16.msra.mxu0 %v7175_v30  ;;  %v14093_v60 = vpop.permute.xlu0 %9212  ;;  %v9145_v52 = vunpack.i.h.bf16 %v13935_v1  ;;  %v9426_v53 = vpack.i.bf16 %v13880_v4, %v14090_v46 }
 0x4fa   :  { %v3442_v59 = vsel %vm846_vm13, %v9154_v25, %v9199_v24  ;;  %v9214_v33 = vunpack.i.l.bf16 %v14093_v60  ;;  %v3443_v30 = vsel %vm846_vm13, %v9199_v24, %v17261_v16  ;;  %v9144_v25 = vunpack.i.l.bf16 %v13935_v1 }
 0x4fb   :  { %v14110_v32 = vpop.permute.xlu1 %9207  ;;  %3406 = vrot.lane.b32.xlu1 %v14098_v42, %s9724_s21  ;;  %3081 = vrot.lane.b32.xlu0 %v13316_v2, %s9731_s23  ;;  %v7177_v40 = vpack.c.bf16 %v3459_v61, %v3443_v30  ;;  %v7179_v31 = vpack.c.bf16 %v3458_v29, %v3442_v59  ;;  %v17827_v42 = vunpack.i.h.bf16 %v14093_v60 }
 0x4fc   :  { %v17266_v12 = vunpack.i.h.bf16 %v14110_v32  ;;  %v9209_v23 = vunpack.i.l.bf16 %v14110_v32  ;;  %v3490_v24 = vsel %vm846_vm13, %v9145_v52, %v9214_v33  ;;  %v9149_v52 = vunpack.i.l.bf16 %v13955_v54 }
 0x4fd   :  { %v14120_v16 = vpop.permute.xlu0 %9217  ;;  %7178 = vmatprep.subr.bf16.mxu0 %v7177_v40  ;;  %v3491_v38 = vsel %vm846_vm13, %v9214_v33, %v17827_v42  ;;  %v9150_v33 = vunpack.i.h.bf16 %v13955_v54 }
 0x4fe   :  { %v3474_v29 = vsel %vm846_vm13, %v9144_v25, %v9209_v23  ;;  %v17267_v1 = vunpack.i.h.bf16 %v14120_v16  ;;  %v9219_v61 = vunpack.i.l.bf16 %v14120_v16  ;;  %7180 = vmatpush1.bf16.msra.mxu0 %v7179_v31  ;;  %v3475_v59 = vsel %vm846_vm13, %v9209_v23, %v17266_v12 }
 0x4ff   :  { %v14133_v30 = vpop.permute.xlu1 %9222  ;;  %3014 = vrot.lane.b32.xlu1 %v13316_v2, %s9729_s1  ;;  %9427 = vrot.lane.b32.xlu0 %v9426_v53, %s9724_s21  ;;  %v7181_v4 = vpack.c.bf16 %v3491_v38, %v3475_v59  ;;  %v7183_v42 = vpack.c.bf16 %v3490_v24, %v3474_v29  ;;  %v17270_v59 = vunpack.i.h.bf16 %v14053_v63  ;;  %v17848_v2 = vunpack.i.h.bf16 %v13947_v47 }
 0x500   :  { %v17268_v40 = vunpack.i.h.bf16 %v14133_v30  ;;  %v9224_v31 = vunpack.i.l.bf16 %v14133_v30  ;;  %v3505_v23 = vsel %vm846_vm13, %v9149_v52, %v9219_v61  ;;  %v3506_v53 = vsel %vm846_vm13, %v9219_v61, %v17267_v1 }
 0x501   :  { %v3397_v25 = vpop.permute.xlu0 %3396  ;;  %7182 = vmatprep.subr.bf16.mxu0 %v7181_v4  ;;  %v14163_v52 = vsel %vm3020_vm6, %v13709_v8, %v13751_v22 }
 0x502   :  { %v3520_v12 = vsel %vm846_vm13, %v9150_v33, %v9224_v31  ;;  %7184 = vmatpush1.bf16.msra.mxu0 %v7183_v42  ;;  %v3521_v38 = vsel %vm846_vm13, %v9224_v31, %v17268_v40  ;;  %v17271_v42 = vunpack.i.l.bf16 %v13833_v11  ;;  %17829 = vst [vmem:[#allocation60_spill] sm:$0xff] %v14163_v52 }
 0x503   :  { %v14150_v54 = vpop.permute.xlu1 %9232  ;;  %3153 = vrot.lane.b32.xlu1 %v17781_v0, %s9733_s19  ;;  %v7185_v24 = vpack.c.bf16 %v3521_v38, %v3506_v53  ;;  %v7187_v29 = vpack.c.bf16 %v3520_v12, %v3505_v23  ;;  %v9055_v12 = vunpack.i.h.bf16 %v13633_v51  ;;  %v17830_v23 = vunpack.i.l.bf16 %v14053_v63 }
 0x504   :  { %17828 = vst [vmem:[#allocation59_spill] sm:$0xff] %v14150_v54  ;;  %v17832_v38 = vunpack.i.h.bf16 %v13857_v55 }
 0x505   :  { %v14155_v4 = vpop.permute.xlu0 %9227  ;;  %7186 = vmatprep.subr.bf16.mxu0 %v7185_v24  ;;  %v14175_v53 = vsel %vm17831_vm9, %v17830_v23, %v17270_v59  ;;  %v3535_v59 = vsel %vm846_vm13, %v13911_v41, %v3397_v25  ;;  %v17840_v23 = vld [vmem:[#allocation28_spill] sm:$0xff]  ;;  %vm17918_vm9 = vmmov %vm17845_vm1 }
 0x506   :  { %v17269_v61 = vunpack.i.h.bf16 %v14155_v4  ;;  %v9229_v33 = vunpack.i.l.bf16 %v14155_v4  ;;  %7188 = vmatpush1.bf16.msra.mxu0 %v7187_v29  ;;  %v9341_v29 = vpack.i.bf16 %v13822_v3, %v13697_v34  ;;  %v17837_v34 = vunpack.i.l.bf16 %v13633_v51  ;;  %v14229_v51 = vld [vmem:[%s16967_s3] sm:$0xff]  ;;  %v14240_v41 = vld [vmem:[%s16967_s3 + $0x18] sm:$0xff] }
 0x507   :  { %v14165_v31 = vpop.permute.xlu1 %9242  ;;  %3408 = vrot.lane.b32.xlu1 %v14163_v52, %s9724_s21 }
 0x508   :  { %v14180_v24 = vsel %vm2694_vm4, %v17832_v38, %v9229_v33  ;;  %v14185_v8 = vsel %vm2694_vm4, %v9229_v33, %v17269_v61  ;;  %v14203_v33 = vsel %vm712_vm11, %v9055_v12, %v17271_v42  ;;  %v9070_v38 = vunpack.i.h.bf16 %v13663_v37 }
 0x509   :  { %17833 = vst [vmem:[#allocation61_spill] sm:$0xff] %v14185_v8  ;;  %v14187_v22 = vpop.permute.xlu0 %9237  ;;  %v14193_v1 = vpack.c.bf16 %v14180_v24, %v14090_v46  ;;  %v14197_v55 = vpack.c.bf16 %v14185_v8, %v14175_v53  ;;  %17836 = vst [vmem:[#allocation64_spill] sm:$0xff] %v14203_v33  ;;  %v14212_v3 = vsel %vm712_vm11, %v17837_v34, %v9055_v12  ;;  %v17841_v12 = vunpack.i.l.bf16 %v13812_v26 }
 0x50a   :  { %17838 = vst [vmem:[#allocation65_spill] sm:$0xff] %v14212_v3  ;;  %v9356_v42 = vpack.i.bf16 %v14203_v33, %v14212_v3 }
 0x50b   :  { %17834 = vst [vmem:[#allocation62_spill] sm:$0xff] %v14193_v1  ;;  %17835 = vst [vmem:[#allocation63_spill] sm:$0xff] %v14197_v55  ;;  %v14206_v40 = vpop.permute.xlu1 %3398  ;;  %9342 = vrot.lane.b32.xlu1 %v9341_v29, %s9724_s21  ;;  %v14224_v29 = vpack.c.bf16 %v13661_v18, %v17840_v23  ;;  %v14234_v34 = vsel %vm980_vm15, %v9070_v38, %v17841_v12  ;;  %v17843_v18 = vunpack.i.l.bf16 %v13663_v37  ;;  %v17276_v12 = vunpack.i.h.bf16 %v13919_v7 }
 0x50c   :  { %v3536_v46 = vsel %vm846_vm13, %v3397_v25, %v14206_v40  ;;  %17842 = vst [vmem:[#allocation28_spill] sm:$0xff] %v14234_v34 }
 0x50d   :  { %v14216_v61 = vpop.permute.xlu0 %9252  ;;  %3749 = vmatprep.subr.mxu0 %v3536_v46  ;;  %v14245_v25 = vsel %vm980_vm15, %v17843_v18, %v9070_v38 }
 0x50e   :  { %17839 = vst [vmem:[#allocation66_spill] sm:$0xff] %v14216_v61  ;;  %3750 = vmatpush1.msra.mxu0 %v3535_v59  ;;  %17844 = vst [vmem:[#allocation67_spill] sm:$0xff] %v14245_v25  ;;  %v9366_v38 = vpack.i.bf16 %v14234_v34, %v14245_v25  ;;  %v17846_v59 = vunpack.i.l.bf16 %v14187_v22  ;;  %v17850_v18 = vunpack.i.l.bf16 %v14216_v61  ;;  %v17862_v61 = vunpack.i.l.bf16 %v14039_v17  ;;  %v17872_v17 = vld [vmem:[#allocation44_spill] sm:$0xff] }
 0x50f   :  { %v14247_v23 = vpop.permute.xlu1 %9247  ;;  %9357 = vrot.lane.b32.xlu1 %v9356_v42, %s9724_s21  ;;  %7238 = vmatprep.subr.bf16.mxu0 %v14224_v29  ;;  %v14266_v42 = vld [vmem:[%s16967_s3 + $0x10] sm:$0xff] }
 0x510   :  { %v17277_v55 = vunpack.i.l.bf16 %v14247_v23  ;;  %3766 = vmatmul.mubr.f32.vlgmr.msra.gmra.mrb[8].mxu0 %v14229_v51 }
 0x511   :  { %7240 = vmatpush1.bf16.msra.mxu0 %v13636_v6  ;;  %v14257_v37 = vpop.permute.xlu0 %9267  ;;  %6294 = vmatprep.mubr.msk.f32.mxu0 %vm17845_vm1, %v14240_v41  ;;  %v14275_v6 = vsel %vm712_vm11, %v17276_v12, %v17846_v59  ;;  %v17851_v59 = vunpack.i.h.bf16 %v13979_v39 }
 0x512   :  { %17847 = vst [vmem:[#allocation68_spill] sm:$0xff] %v14275_v6  ;;  %v14282_v1 = vsel %vm846_vm13, %v17848_v2, %v17277_v55  ;;  %7242 = vmatprep.subr.bf16.mxu0 %v13595_v28  ;;  %v17854_v55 = vunpack.i.l.bf16 %v14015_v5 }
 0x513   :  { %17849 = vst [vmem:[#allocation69_spill] sm:$0xff] %v14282_v1  ;;  %v14285_v52 = vpop.permute.xlu1 %3400  ;;  %9367 = vrot.lane.b32.xlu1 %v9366_v38, %s9724_s21  ;;  %v9441_v46 = vpack.i.bf16 %v14282_v1, %v14275_v6  ;;  %v14295_v12 = vsel %vm980_vm15, %v17851_v59, %v17850_v18  ;;  %v17853_v38 = vunpack.i.h.bf16 %v14015_v5  ;;  %v17858_v18 = vld [vmem:[#allocation17_spill] sm:$0xff]  ;;  %v9110_v59 = vunpack.i.h.bf16 %v13805_v14 }
 0x514   :  { %17852 = vst [vmem:[#allocation70_spill] sm:$0xff] %v14295_v12  ;;  %3772 = vmatmul.mubr.f32.gmra.mrb[10].mxu0 %v14266_v42  ;;  %v17859_v6 = vunpack.i.l.bf16 %v13756_v10 }
 0x515   :  { %7244 = vmatpush1.bf16.msra.mxu0 %v13654_v35  ;;  %v14299_v2 = vpop.permute.xlu0 %9272  ;;  %9442 = vrot.lane.b32.xlu0 %v9441_v46, %s9724_s21  ;;  %v14307_v1 = vsel %vm17855_vm7, %v17854_v55, %v17853_v38  ;;  %v7249_v38 = vpack.c.bf16 %v13678_v21, %v13945_v57  ;;  %vm17989_vm7 = vmmov %vm17845_vm1 }
 0x516   :  { %17856 = vst [vmem:[#allocation71_spill] sm:$0xff] %v14307_v1  ;;  %7246 = vmatprep.subr.bf16.mxu0 %v13745_v27  ;;  %6297 = vmatprep.mubr.msk.f32.mxu0 %vm17857_vm5, %v13542_v56  ;;  %v9451_v46 = vpack.i.bf16 %v14307_v1, %v14295_v12  ;;  %v9269_v56 = vunpack.i.l.bf16 %v14257_v37  ;;  %v9376_v1 = vpack.i.bf16 %v13825_v9, %v17858_v18  ;;  %v17860_v12 = vld [vmem:[#allocation21_spill] sm:$0xff]  ;;  %vm18003_vm5 = vmmov %vm17845_vm1 }
 0x517   :  { %3016 = vrot.lane.b32.xlu1 %v17858_v18, %s9729_s1  ;;  %v14314_v35 = vpop.permute.xlu1 %9257  ;;  %v17861_v34 = vunpack.i.h.bf16 %v17860_v12  ;;  %v17864_v18 = vld [vmem:[#allocation10_spill] sm:$0xff]  ;;  %v17865_v12 = vld [vmem:[#allocation8_spill] sm:$0xff] }
 0x518   :  { %v9259_v55 = vunpack.i.l.bf16 %v14314_v35 }
 0x519   :  { %7248 = vmatpush1.bf16.msra.mxu0 %v13689_v58  ;;  %v14326_v25 = vpop.permute.xlu0 %9292  ;;  %9452 = vrot.lane.b32.xlu0 %v9451_v46, %s9724_s21  ;;  %v3093_v33 = vsel %vm3087_vm8, %v17861_v34, %v17859_v6  ;;  %v17863_v58 = vunpack.i.h.bf16 %v14314_v35  ;;  %v17866_v34 = vunpack.i.l.bf16 %v13805_v14 }
 0x51a   :  { %v3428_v3 = vsel %vm846_vm13, %v17862_v61, %v9259_v55  ;;  %7250 = vmatprep.subr.bf16.mxu0 %v7249_v38  ;;  %v17867_v38 = vld [vmem:[#allocation33_spill] sm:$0xff] }
 0x51b   :  { %v3429_v46 = vsel %vm846_vm13, %v9259_v55, %v17863_v58  ;;  %9377 = vrot.lane.b32.xlu1 %v9376_v1, %s9724_s21  ;;  %v14344_v9 = vpop.permute.xlu1 %9262  ;;  %v7223_v0 = vpack.c.bf16 %v3428_v3, %v17865_v12  ;;  %v3164_v6 = vsel %vm3155_vm12, %v17866_v34, %v9110_v59  ;;  %v7253_v21 = vpack.c.bf16 %v3093_v33, %v17867_v38  ;;  %v17870_v12 = vld [vmem:[#allocation22_spill] sm:$0xff] }
 0x51c   :  { %v7221_v8 = vpack.c.bf16 %v3429_v46, %v17864_v18  ;;  %v9264_v61 = vunpack.i.l.bf16 %v14344_v9  ;;  %v17868_v55 = vunpack.i.l.bf16 %v13895_v20  ;;  %v17869_v58 = vunpack.i.h.bf16 %v14068_v45 }
 0x51d   :  { %v9274_v3 = vunpack.i.l.bf16 %v14299_v2  ;;  %v17871_v14 = vpack.c.bf16 %v17870_v12, %v17864_v18  ;;  %v14364_v34 = vpop.permute.xlu0 %3402  ;;  %v9386_v54 = vpack.i.bf16 %v3164_v6, %v17872_v17  ;;  %v17295_v33 = vunpack.i.h.bf16 %v14299_v2 }
 0x51e   :  { %v3165_v1 = vsel %vm3155_vm12, %v9110_v59, %v17868_v55  ;;  %v3460_v46 = vsel %vm846_vm13, %v17869_v58, %v9269_v56  ;;  %7222 = vmatprep.subr.bf16.mxu1 %v7221_v8  ;;  %v17873_v38 = vunpack.i.h.bf16 %v14077_v19  ;;  %v17874_v45 = vunpack.i.h.bf16 %v14344_v9 }
 0x51f   :  { %7252 = vmatpush1.bf16.msra.mxu0 %v17871_v14  ;;  %7224 = vmatpush1.bf16.msra.mxu1 %v7223_v0  ;;  %v17875_v18 = vunpack.i.h.bf16 %v14257_v37  ;;  %v14378_v8 = vpop.permute.xlu1 %9277  ;;  %v17876_v19 = vunpack.i.h.bf16 %v13833_v11  ;;  %v17877_v12 = vunpack.i.l.bf16 %v13833_v11  ;;  %v17878_v14 = vld [vmem:[#allocation27_spill] sm:$0xff]  ;;  %v17882_v11 = vunpack.i.h.bf16 %v14110_v32 }
 0x520   :  { %v3444_v59 = vsel %vm846_vm13, %v17873_v38, %v9264_v61  ;;  %7254 = vmatprep.subr.bf16.mxu0 %v7253_v21  ;;  %v3445_v55 = vsel %vm846_vm13, %v9264_v61, %v17874_v45  ;;  %9387 = vrot.lane.b32.xlu1 %v9386_v54, %s9724_s21  ;;  %v9280_v21 = vunpack.i.h.bf16 %v14378_v8  ;;  %v9279_v61 = vunpack.i.l.bf16 %v14378_v8  ;;  %v17879_v54 = vld [vmem:[#allocation32_spill] sm:$0xff] }
 0x521   :  { %v3461_v58 = vsel %vm846_vm13, %v9269_v56, %v17875_v18  ;;  %v7227_v17 = vpack.c.bf16 %v3460_v46, %v3444_v59  ;;  %v14385_v0 = vsel %vm712_vm11, %v17877_v12, %v17876_v19  ;;  %v14391_v56 = vpack.c.bf16 %v13977_v43, %v17878_v14  ;;  %v17883_v18 = vld [vmem:[#allocation23_spill] sm:$0xff]  ;;  %v14407_v12 = vpop.permute.xlu0 %3012 }
 0x522   :  { %v7225_v6 = vpack.c.bf16 %v3461_v58, %v3445_v55  ;;  %v9075_v38 = vunpack.i.h.bf16 %v17879_v54  ;;  %v17880_v45 = vunpack.i.h.bf16 %v13947_v47  ;;  %v17881_v46 = vunpack.i.l.bf16 %v13947_v47  ;;  %v17884_v58 = vld [vmem:[#allocation11_spill] sm:$0xff] }
 0x523   :  { %v3476_v55 = vsel %vm846_vm13, %v17882_v11, %v9274_v3  ;;  %v17885_v19 = vpack.c.bf16 %v17883_v18, %v17884_v58  ;;  %v9391_v43 = vpack.i.bf16 %v14385_v0, %v3165_v1  ;;  %v17886_v14 = vunpack.i.h.bf16 %v14093_v60  ;;  %v17890_v18 = vld [vmem:[#allocation25_spill] sm:$0xff] }
 0x524   :  { %v14399_v59 = vsel %vm846_vm13, %v17881_v46, %v17880_v45  ;;  %7226 = vmatprep.subr.bf16.mxu1 %v7225_v6  ;;  %v3477_v32 = vsel %vm846_vm13, %v9274_v3, %v17295_v33  ;;  %v3493_v45 = vsel %vm846_vm13, %v9279_v61, %v9280_v21  ;;  %v17887_v1 = vunpack.i.h.bf16 %v13812_v26 }
 0x525   :  { %7256 = vmatpush1.bf16.msra.mxu0 %v17885_v19  ;;  %v3492_v47 = vsel %vm846_vm13, %v17886_v14, %v9279_v61  ;;  %7228 = vmatpush1.bf16.msra.mxu1 %v7227_v17  ;;  %v7229_v6 = vpack.c.bf16 %v3493_v45, %v3477_v32  ;;  %v17888_v60 = vunpack.i.l.bf16 %v13812_v26  ;;  %v14429_v17 = vpop.permute.xlu0 %9302  ;;  %v17889_v61 = vunpack.i.l.bf16 %v17879_v54  ;;  %v17891_v26 = vld [vmem:[#allocation35_spill] sm:$0xff]  ;;  %v17892_v19 = vld [vmem:[#allocation16_spill] sm:$0xff] }
 0x526   :  { %7258 = vmatprep.subr.bf16.mxu0 %v14391_v56  ;;  %9392 = vrot.lane.b32.xlu1 %v9391_v43, %s9724_s21  ;;  %v7231_v46 = vpack.c.bf16 %v3492_v47, %v3476_v55  ;;  %v14455_v14 = vsel %vm3020_vm6, %v14007_v49, %v13994_v62  ;;  %v9244_v32 = vunpack.i.l.bf16 %v14165_v31  ;;  %v17894_v45 = vunpack.i.l.bf16 %v13895_v20 }
 0x527   :  { %v14426_v11 = vsel %vm980_vm15, %v17888_v60, %v17887_v1  ;;  %7230 = vmatprep.subr.bf16.mxu1 %v7229_v6  ;;  %v2768_v55 = vsel %vm17410_vm3, %v17889_v61, %v9075_v38  ;;  %v17895_v1 = vld [vmem:[#allocation15_spill] sm:$0xff]  ;;  %v17896_v60 = vunpack.i.h.bf16 %v14053_v63  ;;  %v17901_v63 = vunpack.i.l.bf16 %v13919_v7 }
 0x528   :  { %v9401_v3 = vpack.i.bf16 %v14426_v11, %v14399_v59  ;;  %v14441_v58 = vpack.c.bf16 %v17891_v26, %v2768_v55  ;;  %v17293_v55 = vunpack.i.h.bf16 %v14247_v23  ;;  %v17916_v54 = vunpack.i.h.bf16 %v14257_v37 }
 0x529   :  { %7260 = vmatpush1.bf16.msra.mxu0 %v14224_v29  ;;  %7232 = vmatpush1.bf16.msra.mxu1 %v7231_v46  ;;  %v14444_v29 = vpop.permute.xlu0 %9317  ;;  %v17307_v37 = vunpack.i.l.bf16 %v14025_v48 }
 0x52a   :  { %7262 = vmatprep.subr.bf16.mxu0 %v17890_v18  ;;  %9402 = vrot.lane.b32.xlu1 %v9401_v3, %s9724_s21  ;;  %v14477_v3 = vsel %vm17897_vm14, %v17896_v60, %v17895_v1  ;;  %v14518_v60 = vsel %vm3020_vm6, %v13994_v62, %v14407_v12  ;;  %vm18018_vm14 = vmmov %vm17845_vm1 }
 0x52b   :  { %17905 = vst [vmem:[#allocation10_spill] sm:$0xff] %v14518_v60 }
 0x52d   :  { %7264 = vmatpush1.bf16.msra.mxu0 %v13595_v28  ;;  %v14450_v43 = vpop.permute.xlu0 %9327  ;;  %v9140_v28 = vunpack.i.h.bf16 %v13895_v20 }
 0x52e   :  { %7266 = vmatprep.subr.bf16.mxu0 %v14441_v58  ;;  %9412 = vrot.lane.b32.xlu1 %v17892_v19, %s9731_s23 }
 0x52f   :  { %v3166_v6 = vsel %vm3155_vm12, %v17894_v45, %v9140_v28  ;;  %v3167_v61 = vsel %vm3155_vm12, %v9140_v28, %v9244_v32  ;;  %v17903_v45 = vunpack.i.h.bf16 %v13979_v39 }
 0x530   :  { %v9431_v46 = vpack.i.bf16 %v3166_v6, %v14180_v24  ;;  %v17900_v24 = vunpack.i.h.bf16 %v13919_v7  ;;  %v17904_v6 = vunpack.i.l.bf16 %v13979_v39 }
 0x531   :  { %7268 = vmatpush1.bf16.msra.mxu0 %v13745_v27  ;;  %v14460_v47 = vpop.permute.xlu0 %3404  ;;  %v17893_v27 = vpack.i.bf16 %v13872_v15, %v14036_v44  ;;  %v17898_v15 = vunpack.i.h.bf16 %v14155_v4  ;;  %v17902_v4 = vunpack.i.l.bf16 %v14247_v23 }
 0x532   :  { %3414 = vrot.lane.b32.xlu1 %v14455_v14, %s9724_s21  ;;  %v14494_v19 = vsel %vm712_vm11, %v17901_v63, %v17900_v24  ;;  %v14510_v7 = vsel %vm980_vm15, %v17904_v6, %v17903_v45  ;;  %v17294_v24 = vunpack.i.h.bf16 %v14165_v31 }
 0x533   :  { %v9436_v28 = vpack.i.bf16 %v14494_v19, %v3167_v61  ;;  %v17906_v61 = vld [vmem:[#allocation14_spill] sm:$0xff] }
 0x534   :  { %v3168_v62 = vsel %vm3155_vm12, %v9244_v32, %v17294_v24  ;;  %v17910_v32 = vunpack.i.h.bf16 %v14120_v16  ;;  %v3538_v16 = vsel %vm846_vm13, %v14285_v52, %v14364_v34 }
 0x535   :  { %v14470_v49 = vpop.permute.xlu0 %2692 }
 0x536   :  { %9422 = vrot.lane.b32.xlu1 %v17893_v27, %s9724_s21  ;;  %v2710_v20 = vsel %vm2694_vm4, %v17898_v15, %v14470_v49  ;;  %v14502_v27 = vsel %vm846_vm13, %v17902_v4, %v17293_v55  ;;  %v17907_v15 = vunpack.i.h.bf16 %v14015_v5  ;;  %v17297_v4 = vunpack.i.h.bf16 %v14326_v25 }
 0x537   :  { %v14487_v26 = vpack.c.bf16 %v2710_v20, %v14477_v3  ;;  %v9294_v5 = vunpack.i.l.bf16 %v14326_v25 }
 0x538   :  { %v14526_v39 = vsel %vm17821_vm0, %v17907_v15, %v17906_v61  ;;  %v17909_v15 = vunpack.i.h.bf16 %v14133_v30  ;;  %vm18020_vm0 = vmmov %vm17845_vm1 }
 0x539   :  { %17899 = vst [vmem:[#allocation21_spill] sm:$0xff] %v14487_v26  ;;  %17908 = vst [vmem:[#allocation8_spill] sm:$0xff] %v14526_v39  ;;  %v9456_v63 = vpack.i.bf16 %v14175_v53, %v14526_v39  ;;  %v14542_v53 = vpop.permute.xlu0 %9332 }
 0x53a   :  { %9432 = vrot.lane.b32.xlu1 %v9431_v46, %s9724_s21  ;;  %v9446_v46 = vpack.i.bf16 %v14510_v7, %v14502_v27 }
 0x53d   :  { %v14561_v30 = vpop.permute.xlu0 %9337 }
 0x53e   :  { %9437 = vrot.lane.b32.xlu1 %v9436_v28, %s9724_s21  ;;  %v9466_v28 = vpack.i.bf16 %v3168_v62, %v2710_v20 }
 0x542   :  { %9447 = vrot.lane.b32.xlu1 %v9446_v46, %s9724_s21 }
 0x546   :  { %3416 = vrot.lane.b32.xlu1 %v14518_v60, %s9724_s21 }
 0x54a   :  { %9457 = vrot.lane.b32.xlu1 %v9456_v63, %s9724_s21  ;;  %v3522_v63 = vsel %vm846_vm13, %v17909_v15, %v9294_v5 }
 0x54e   :  { %9467 = vrot.lane.b32.xlu1 %v9466_v28, %s9724_s21  ;;  %v3523_v28 = vsel %vm846_vm13, %v9294_v5, %v17297_v4 }
 0x555   :  { %v14538_v45 = vpop.permute.xlu1 %9282 }
 0x556   :  { %v17296_v6 = vunpack.i.h.bf16 %v14538_v45  ;;  %v9284_v46 = vunpack.i.l.bf16 %v14538_v45 }
 0x558   :  { %v3507_v20 = vsel %vm846_vm13, %v17910_v32, %v9284_v46  ;;  %v3508_v62 = vsel %vm846_vm13, %v9284_v46, %v17296_v6  ;;  %v17299_v46 = vunpack.i.l.bf16 %v13960_v13 }
 0x559   :  { %v14556_v55 = vpop.permute.xlu1 %9287  ;;  %v7233_v24 = vpack.c.bf16 %v3523_v28, %v3508_v62  ;;  %v7235_v33 = vpack.c.bf16 %v3522_v63, %v3507_v20  ;;  %v17301_v20 = vunpack.i.h.bf16 %v14429_v17  ;;  %v9304_v62 = vunpack.i.l.bf16 %v14429_v17 }
 0x55a   :  { %v17912_v28 = vunpack.i.h.bf16 %v14314_v35  ;;  %v17953_v26 = vunpack.i.l.bf16 %v14556_v55 }
 0x55b   :  { %7234 = vmatprep.subr.bf16.mxu1 %v7233_v24  ;;  %v3537_v24 = vsel %vm846_vm13, %v14206_v40, %v14285_v52 }
 0x55c   :  { %7236 = vmatpush1.bf16.msra.mxu1 %v7235_v33  ;;  %v17911_v33 = vld [vmem:[#allocation7_spill] sm:$0xff] }
 0x55d   :  { %v14563_v15 = vpop.permute.xlu1 %9297  ;;  %3826 = vmatprep.subr.mxu1 %v3538_v16  ;;  %v14573_v63 = vpack.c.bf16 %v13966_v36, %v17911_v33  ;;  %v17914_v33 = vld [vmem:[#allocation24_spill] sm:$0xff] }
 0x55e   :  { %v17298_v32 = vunpack.i.h.bf16 %v14563_v15  ;;  %v9299_v5 = vunpack.i.l.bf16 %v14563_v15 }
 0x560   :  { %v3430_v16 = vsel %vm846_vm13, %v17912_v28, %v9299_v5  ;;  %3827 = vmatpush1.msra.mxu1 %v3537_v24  ;;  %v3431_v6 = vsel %vm846_vm13, %v9299_v5, %v17298_v32  ;;  %v2769_v5 = vsel %vm17410_vm3, %v9075_v38, %v17299_v46  ;;  %v17917_v24 = vld [vmem:[#allocation34_spill] sm:$0xff] }
 0x561   :  { %v14583_v4 = vpop.permute.xlu1 %9307  ;;  %3843 = vmatmul.mubr.f32.vlgmr.msra.gmra.mrb[8].mxu1 %v14229_v51  ;;  %7286 = vmatprep.subr.bf16.mxu1 %v14573_v63  ;;  %v7269_v36 = vpack.c.bf16 %v3431_v6, %v14044_v50  ;;  %v7271_v40 = vpack.c.bf16 %v3430_v16, %v13945_v57  ;;  %v9319_v6 = vunpack.i.l.bf16 %v14444_v29  ;;  %v14601_v57 = vpop.permute.xlu0 %9347  ;;  %v3447_v16 = vsel %vm846_vm13, %v9304_v62, %v17301_v20 }
 0x562   :  { %v17300_v52 = vunpack.i.h.bf16 %v14583_v4  ;;  %v9309_v35 = vunpack.i.l.bf16 %v14583_v4  ;;  %7288 = vmatpush1.bf16.msra.mxu1 %v14391_v56  ;;  %6296 = vmatprep.mubr.msk.f32.mxu1 %vm17913_vm10, %v14240_v41  ;;  %v17915_v56 = vunpack.i.h.bf16 %v14344_v9  ;;  %v14619_v9 = vpack.c.bf16 %v17917_v24, %v2769_v5  ;;  %vm18025_vm10 = vmmov %vm18020_vm0 }
 0x563   :  { %7270 = vmatprep.subr.bf16.mxu0 %v7269_v36  ;;  %7290 = vmatprep.subr.bf16.mxu1 %v17914_v33  ;;  %v9329_v24 = vunpack.i.l.bf16 %v14450_v43 }
 0x564   :  { %v3446_v28 = vsel %vm846_vm13, %v17915_v56, %v9304_v62  ;;  %v3462_v38 = vsel %vm846_vm13, %v17916_v54, %v9309_v35  ;;  %7272 = vmatpush1.bf16.msra.mxu0 %v7271_v40  ;;  %v3463_v32 = vsel %vm846_vm13, %v9309_v35, %v17300_v52  ;;  %v14629_v62 = vld [vmem:[%s16967_s3 + $0x8] sm:$0xff]  ;;  %v17919_v35 = vunpack.i.h.bf16 %v14444_v29 }
 0x565   :  { %v14616_v36 = vpop.permute.xlu1 %9312  ;;  %v7273_v46 = vpack.c.bf16 %v3463_v32, %v3447_v16  ;;  %v7275_v56 = vpack.c.bf16 %v3462_v38, %v3446_v28  ;;  %3849 = vmatmul.mubr.f32.gmra.mrb[10].mxu1 %v14266_v42  ;;  %v3494_v32 = vsel %vm846_vm13, %v9280_v21, %v9319_v6  ;;  %v17920_v28 = vunpack.i.h.bf16 %v14299_v2  ;;  %v14648_v21 = vpop.permute.xlu0 %9352  ;;  %v17921_v52 = vld [vmem:[#allocation57_spill] sm:$0xff] }
 0x566   :  { %v17305_v40 = vunpack.i.h.bf16 %v14616_v36  ;;  %v9314_v54 = vunpack.i.l.bf16 %v14616_v36  ;;  %7292 = vmatpush1.bf16.msra.mxu1 %v17890_v18  ;;  %6299 = vmatprep.mubr.msk.f32.mxu1 %vm17918_vm9, %v14629_v62  ;;  %v3495_v5 = vsel %vm846_vm13, %v9319_v6, %v17919_v35  ;;  %v17922_v6 = vld [vmem:[#allocation38_spill] sm:$0xff] }
 0x567   :  { %7274 = vmatprep.subr.bf16.mxu0 %v7273_v46  ;;  %7294 = vmatprep.subr.bf16.mxu1 %v14619_v9  ;;  %v7297_v35 = vpack.c.bf16 %v17922_v6, %v17921_v52 }
 0x568   :  { %v3478_v38 = vsel %vm846_vm13, %v17920_v28, %v9314_v54  ;;  %7276 = vmatpush1.bf16.msra.mxu0 %v7275_v56  ;;  %v3479_v8 = vsel %vm846_vm13, %v9314_v54, %v17305_v40  ;;  %v17923_v56 = vunpack.i.h.bf16 %v13756_v10 }
 0x569   :  { %v14650_v46 = vpop.permute.xlu1 %9322  ;;  %v7277_v16 = vpack.c.bf16 %v3495_v5, %v3479_v8  ;;  %v7279_v20 = vpack.c.bf16 %v3494_v32, %v3478_v38  ;;  %v17924_v5 = vld [vmem:[#allocation39_spill] sm:$0xff]  ;;  %v17925_v8 = vunpack.i.h.bf16 %v14326_v25  ;;  %v17926_v38 = vunpack.i.h.bf16 %v14538_v45 }
 0x56a   :  { %v17303_v18 = vunpack.i.h.bf16 %v14650_v46  ;;  %v9324_v2 = vunpack.i.l.bf16 %v14650_v46  ;;  %7296 = vmatpush1.bf16.msra.mxu1 %v14441_v58  ;;  %v3095_v54 = vsel %vm3087_vm8, %v17923_v56, %v17307_v37  ;;  %v7299_v28 = vpack.c.bf16 %v17924_v5, %v14044_v50  ;;  %v17928_v56 = vld [vmem:[#allocation58_spill] sm:$0xff] }
 0x56b   :  { %7278 = vmatprep.subr.bf16.mxu0 %v7277_v16  ;;  %7298 = vmatprep.subr.bf16.mxu1 %v7297_v35  ;;  %v3524_v32 = vsel %vm846_vm13, %v17925_v8, %v9329_v24  ;;  %v17927_v58 = vunpack.i.h.bf16 %v14450_v43  ;;  %v7301_v25 = vpack.c.bf16 %v3095_v54, %v17928_v56  ;;  %v14679_v8 = vpop.permute.xlu0 %9362  ;;  %v17302_v54 = vunpack.i.h.bf16 %v14187_v22 }
 0x56c   :  { %v3509_v6 = vsel %vm846_vm13, %v17926_v38, %v9324_v2  ;;  %7280 = vmatpush1.bf16.msra.mxu0 %v7279_v20  ;;  %v3510_v10 = vsel %vm846_vm13, %v9324_v2, %v17303_v18  ;;  %v9175_v20 = vunpack.i.h.bf16 %v13960_v13  ;;  %v17930_v38 = vld [vmem:[#allocation43_spill] sm:$0xff]  ;;  %v3539_v56 = vsel %vm846_vm13, %v14364_v34, %v14460_v47 }
 0x56d   :  { %v3525_v16 = vsel %vm846_vm13, %v9329_v24, %v17927_v58  ;;  %v14676_v35 = vpop.permute.xlu1 %3406  ;;  %v7283_v5 = vpack.c.bf16 %v3524_v32, %v3509_v6  ;;  %v17929_v24 = vld [vmem:[#allocation31_spill] sm:$0xff]  ;;  %v17932_v32 = vld [vmem:[#allocation36_spill] sm:$0xff]  ;;  %v9339_v34 = vunpack.i.l.bf16 %v14561_v30 }
 0x56e   :  { %v7281_v50 = vpack.c.bf16 %v3525_v16, %v3510_v10  ;;  %7300 = vmatpush1.bf16.msra.mxu1 %v7299_v28  ;;  %v3540_v45 = vsel %vm846_vm13, %v14460_v47, %v14676_v35  ;;  %v7305_v10 = vpack.c.bf16 %v17930_v38, %v17929_v24  ;;  %v17931_v28 = vld [vmem:[#allocation37_spill] sm:$0xff]  ;;  %v17935_v16 = vld [vmem:[#allocation59_spill] sm:$0xff]  ;;  %v17939_v47 = vunpack.i.h.bf16 %v14165_v31 }
 0x56f   :  { %7302 = vmatprep.subr.bf16.mxu1 %v7301_v25  ;;  %v17933_v6 = vpack.c.bf16 %v17931_v28, %v17932_v32  ;;  %v17936_v25 = vld [vmem:[#allocation30_spill] sm:$0xff]  ;;  %v14708_v24 = vpop.permute.xlu0 %3018  ;;  %v17306_v32 = vunpack.i.h.bf16 %v14561_v30 }
 0x570   :  { %7282 = vmatprep.subr.bf16.mxu0 %v7281_v50  ;;  %v17304_v50 = vunpack.i.l.bf16 %v17935_v16 }
 0x571   :  { %7284 = vmatpush1.bf16.msra.mxu0 %v7283_v5  ;;  %v14685_v2 = vpop.permute.xlu1 %3014  ;;  %v17937_v5 = vld [vmem:[#allocation42_spill] sm:$0xff] }
 0x572   :  { %3903 = vmatprep.subr.mxu0 %v3540_v45  ;;  %7304 = vmatpush1.bf16.msra.mxu1 %v17933_v6  ;;  %v14696_v58 = vsel %vm3020_vm6, %v14407_v12, %v14685_v2  ;;  %v14706_v45 = vpack.c.bf16 %v17937_v5, %v17936_v25  ;;  %v17938_v12 = vunpack.i.l.bf16 %v13960_v13  ;;  %v17942_v5 = vmov 0.0  }
 0x573   :  { %17934 = vst [vmem:[#allocation33_spill] sm:$0xff] %v14696_v58  ;;  %3418 = vrot.lane.b32.xlu0 %v14696_v58, %s9724_s21  ;;  %7306 = vmatprep.subr.bf16.mxu1 %v7305_v10  ;;  %v2771_v31 = vsel %vm17410_vm3, %v9175_v20, %v17304_v50  ;;  %v14757_v40 = vpop.permute.xlu0 %3410 }
 0x574   :  { %v2770_v28 = vsel %vm17410_vm3, %v17938_v12, %v9175_v20  ;;  %v17943_v12 = vld [vmem:[#allocation19_spill] sm:$0xff]  ;;  %v17948_v20 = vld [vmem:[#allocation64_spill] sm:$0xff] }
 0x575   :  { %3904 = vmatpush1.msra.mxu0 %v3539_v56  ;;  %v14710_v38 = vpop.permute.xlu1 %3153  ;;  %v17940_v56 = vunpack.i.l.bf16 %v14187_v22  ;;  %v14752_v50 = vpack.c.bf16 %v17948_v20, %v2771_v31  ;;  %v17951_v20 = vld [vmem:[#allocation48_spill] sm:$0xff] }
 0x576   :  { %3920 = vmatmul.mubr.f32.vlgmr.msra.gmra.mrb[12].mxu0 %v14229_v51  ;;  %7334 = vmatprep.subr.bf16.mxu0 %v14706_v45  ;;  %v3169_v6 = vsel %vm3155_vm12, %v17939_v47, %v14710_v38  ;;  %v17944_v47 = vld [vmem:[#allocation40_spill] sm:$0xff]  ;;  %vm17945_vm12 = vmmov %vm17845_vm1 }
 0x577   :  { %v14728_v25 = vsel %vm712_vm11, %v17940_v56, %v17302_v54  ;;  %7308 = vmatpush1.bf16.msra.mxu1 %v14573_v63  ;;  %7336 = vmatpush1.bf16.msra.mxu0 %v7305_v10  ;;  %v17946_v63 = vld [vmem:[#allocation61_spill] sm:$0xff]  ;;  %v14794_v60 = vpop.permute.xlu0 %9372 }
 0x578   :  { %17941 = vst [vmem:[#allocation22_spill] sm:$0xff] %v14728_v25  ;;  %v9471_v13 = vpack.i.bf16 %v14728_v25, %v3169_v6  ;;  %2759 = vrot.lane.b32.xlu0 %v17942_v5, %s9730_s30  ;;  %7310 = vmatprep.subr.bf16.mxu1 %v17943_v12  ;;  %v9461_v10 = vpack.i.bf16 %v17946_v63, %v14477_v3  ;;  %v17947_v6 = vld [vmem:[#allocation65_spill] sm:$0xff]  ;;  %v9180_v3 = vunpack.i.h.bf16 %v14025_v48 }
 0x579   :  { %7338 = vmatprep.subr.bf16.mxu0 %v17944_v47  ;;  %6298 = vmatprep.mubr.msk.f32.mxu0 %vm17945_vm12, %v14240_v41  ;;  %v14741_v56 = vpop.permute.xlu1 %3408  ;;  %v7313_v54 = vpack.c.bf16 %v17947_v6, %v2770_v28  ;;  %v17950_v6 = vld [vmem:[#allocation47_spill] sm:$0xff]  ;;  %v17955_v28 = vunpack.i.l.bf16 %v14025_v48 }
 0x57a   :  { %9472 = vrot.lane.b32.xlu1 %v9471_v13, %s9724_s21  ;;  %3926 = vmatmul.mubr.f32.gmra.mrb[14].mxu0 %v14266_v42  ;;  %v3433_v13 = vsel %vm846_vm13, %v9339_v34, %v17306_v32  ;;  %v17952_v32 = vld [vmem:[#allocation28_spill] sm:$0xff] }
 0x57b   :  { %7312 = vmatpush1.bf16.msra.mxu1 %v17914_v33  ;;  %7340 = vmatpush1.bf16.msra.mxu0 %v17943_v12  ;;  %v9349_v33 = vunpack.i.l.bf16 %v14601_v57  ;;  %v17949_v12 = vunpack.i.h.bf16 %v14563_v15  ;;  %v7345_v37 = vpack.c.bf16 %v17952_v32, %v17951_v20  ;;  %v3097_v15 = vsel %vm3087_vm8, %v9180_v3, %v17953_v26 }
 0x57c   :  { %9462 = vrot.lane.b32.xlu0 %v9461_v10, %s9724_s21  ;;  %7314 = vmatprep.subr.bf16.mxu1 %v7313_v54  ;;  %v7317_v10 = vpack.c.bf16 %v3433_v13, %v17950_v6  ;;  %v17954_v13 = vld [vmem:[#allocation67_spill] sm:$0xff]  ;;  %v3096_v39 = vsel %vm3087_vm8, %v17955_v28, %v9180_v3  ;;  %v17957_v26 = vunpack.i.h.bf16 %v14601_v57  ;;  %v17959_v3 = vld [vmem:[#allocation50_spill] sm:$0xff] }
 0x57d   :  { %7342 = vmatprep.subr.bf16.mxu0 %v14752_v50  ;;  %6301 = vmatprep.mubr.msk.f32.mxu0 %vm17845_vm1, %v14629_v62  ;;  %v3432_v31 = vsel %vm846_vm13, %v17949_v12, %v9339_v34  ;;  %v14769_v63 = vpop.permute.xlu1 %9342  ;;  %v9354_v12 = vunpack.i.l.bf16 %v14648_v21  ;;  %v7347_v32 = vpack.c.bf16 %v17954_v13, %v17950_v6  ;;  %v7349_v28 = vpack.c.bf16 %v3097_v15, %v17959_v3  ;;  %v17960_v13 = vld [vmem:[#allocation60_spill] sm:$0xff] }
 0x57e   :  { %v9344_v18 = vunpack.i.l.bf16 %v14769_v63  ;;  %v3465_v34 = vsel %vm846_vm13, %v9349_v33, %v17957_v26  ;;  %v17961_v26 = vunpack.i.h.bf16 %v14583_v4  ;;  %v9364_v15 = vunpack.i.l.bf16 %v14679_v8 }
 0x57f   :  { %7316 = vmatpush1.bf16.msra.mxu1 %v14619_v9  ;;  %7344 = vmatpush1.bf16.msra.mxu0 %v7313_v54  ;;  %v7319_v9 = vpack.c.bf16 %v3432_v31, %v17921_v52  ;;  %v17956_v54 = vunpack.i.h.bf16 %v14769_v63 }
 0x580   :  { %7318 = vmatprep.subr.bf16.mxu1 %v7317_v10  ;;  %7346 = vmatprep.subr.bf16.mxu0 %v7345_v37  ;;  %v17958_v37 = vunpack.i.h.bf16 %v14429_v17  ;;  %v3464_v58 = vsel %vm846_vm13, %v17961_v26, %v9349_v33  ;;  %v17962_v17 = vunpack.i.h.bf16 %v14648_v21 }
 0x581   :  { %v3449_v25 = vsel %vm846_vm13, %v9344_v18, %v17956_v54  ;;  %v14799_v10 = vpop.permute.xlu1 %9357  ;;  %v7351_v54 = vpack.c.bf16 %v3096_v39, %v17960_v13  ;;  %v17963_v39 = vunpack.i.h.bf16 %v14444_v29  ;;  %v17966_v29 = vunpack.i.h.bf16 %v14616_v36 }
 0x582   :  { %v3448_v6 = vsel %vm846_vm13, %v17958_v37, %v9344_v18  ;;  %v7321_v48 = vpack.c.bf16 %v3465_v34, %v3449_v25  ;;  %v17316_v52 = vunpack.i.h.bf16 %v14799_v10  ;;  %v9359_v31 = vunpack.i.l.bf16 %v14799_v10  ;;  %v17964_v37 = vld [vmem:[#allocation12_spill] sm:$0xff] }
 0x583   :  { %7320 = vmatpush1.bf16.msra.mxu1 %v7319_v9  ;;  %7348 = vmatpush1.bf16.msra.mxu0 %v7347_v32  ;;  %v3481_v18 = vsel %vm846_vm13, %v9354_v12, %v17962_v17  ;;  %v17314_v25 = vunpack.i.h.bf16 %v14679_v8  ;;  %v7323_v34 = vpack.c.bf16 %v3464_v58, %v3448_v6  ;;  %v14828_v6 = vpop.permute.xlu0 %9382 }
 0x584   :  { %7322 = vmatprep.subr.bf16.mxu1 %v7321_v48  ;;  %7350 = vmatprep.subr.bf16.mxu0 %v7349_v28  ;;  %v3497_v32 = vsel %vm846_vm13, %v9359_v31, %v17316_v52  ;;  %v3496_v4 = vsel %vm846_vm13, %v17963_v39, %v9359_v31  ;;  %v17965_v48 = vld [vmem:[#allocation51_spill] sm:$0xff]  ;;  %v9235_v28 = vunpack.i.h.bf16 %v17935_v16  ;;  %v3480_v31 = vsel %vm846_vm13, %v17966_v29, %v9354_v12  ;;  %v17971_v29 = vld [vmem:[#allocation41_spill] sm:$0xff] }
 0x585   :  { %v14819_v33 = vpop.permute.xlu1 %9367  ;;  %v7325_v9 = vpack.c.bf16 %v3497_v32, %v3481_v18  ;;  %v14823_v3 = vpack.c.bf16 %v17965_v48, %v17964_v37  ;;  %v7327_v26 = vpack.c.bf16 %v3496_v4, %v3480_v31  ;;  %v3512_v17 = vsel %vm846_vm13, %v9364_v15, %v17314_v25  ;;  %v17969_v37 = vld [vmem:[#allocation66_spill] sm:$0xff] }
 0x586   :  { %v17315_v13 = vunpack.i.h.bf16 %v14819_v33  ;;  %v9369_v58 = vunpack.i.l.bf16 %v14819_v33  ;;  %v17313_v12 = vunpack.i.h.bf16 %v14794_v60  ;;  %v9374_v39 = vunpack.i.l.bf16 %v14794_v60 }
 0x587   :  { %7324 = vmatpush1.bf16.msra.mxu1 %v7323_v34  ;;  %7352 = vmatpush1.bf16.msra.mxu0 %v7351_v54  ;;  %v17967_v54 = vunpack.i.h.bf16 %v14450_v43  ;;  %v17968_v4 = vunpack.i.l.bf16 %v17935_v16  ;;  %v9255_v43 = vunpack.i.h.bf16 %v17969_v37  ;;  %v17970_v48 = vunpack.i.h.bf16 %v14650_v46 }
 0x588   :  { %7326 = vmatprep.subr.bf16.mxu1 %v7325_v9  ;;  %7354 = vmatprep.subr.bf16.mxu0 %v14823_v3  ;;  %v3527_v18 = vsel %vm846_vm13, %v9369_v58, %v17315_v13  ;;  %v3542_v46 = vsel %vm846_vm13, %v14741_v56, %v14757_v40  ;;  %v17981_v13 = vld [vmem:[#allocation9_spill] sm:$0xff] }
 0x589   :  { %v3526_v34 = vsel %vm846_vm13, %v17967_v54, %v9369_v58  ;;  %v14843_v32 = vpop.permute.xlu1 %3016  ;;  %v7329_v36 = vpack.c.bf16 %v3527_v18, %v3512_v17  ;;  %v2772_v9 = vsel %vm17410_vm3, %v17968_v4, %v9235_v28  ;;  %v3511_v58 = vsel %vm846_vm13, %v17970_v48, %v9364_v15  ;;  %v14858_v17 = vpop.permute.xlu0 %9397  ;;  %v17972_v54 = vld [vmem:[#allocation26_spill] sm:$0xff] }
 0x58a   :  { %v7331_v31 = vpack.c.bf16 %v3526_v34, %v3511_v58  ;;  %v3435_v15 = vsel %vm846_vm13, %v9374_v39, %v17313_v12  ;;  %v17973_v34 = vunpack.i.h.bf16 %v14187_v22  ;;  %v17976_v22 = vunpack.i.h.bf16 %v14247_v23  ;;  %v17978_v23 = vld [vmem:[#allocation52_spill] sm:$0xff]  ;;  %v17979_v12 = vld [vmem:[#allocation6_spill] sm:$0xff] }
 0x58b   :  { %7328 = vmatpush1.bf16.msra.mxu1 %v7327_v26  ;;  %7356 = vmatpush1.bf16.msra.mxu0 %v14706_v45  ;;  %v14861_v45 = vpack.c.bf16 %v14385_v0, %v2772_v9  ;;  %v17974_v0 = vunpack.i.l.bf16 %v17969_v37  ;;  %v17975_v9 = vunpack.i.h.bf16 %v14561_v30  ;;  %v14921_v52 = vsel %vm980_vm15, %v9255_v43, %v17981_v13 }
 0x58c   :  { %7330 = vmatprep.subr.bf16.mxu1 %v7329_v36  ;;  %7358 = vmatprep.subr.bf16.mxu0 %v17971_v29  ;;  %v14874_v36 = vsel %vm712_vm11, %v17973_v34, %v17972_v54  ;;  %v17977_v34 = vld [vmem:[#allocation29_spill] sm:$0xff] }
 0x58d   :  { %v9378_v26 = vpop.permute.xlu1 %9377  ;;  %v14879_v4 = vsel %vm980_vm15, %v17974_v0, %v9255_v43  ;;  %v3434_v48 = vsel %vm846_vm13, %v17975_v9, %v9374_v39  ;;  %v9385_v9 = vunpack.i.h.bf16 %v14828_v6  ;;  %vm17984_vm15 = vmmov %vm17845_vm1 }
 0x58e   :  { %v9379_v18 = vunpack.i.l.bf16 %v9378_v26  ;;  %v9380_v58 = vunpack.i.h.bf16 %v9378_v26  ;;  %v7365_v26 = vpack.c.bf16 %v3435_v15, %v17978_v23  ;;  %v17980_v15 = vld [vmem:[#allocation49_spill] sm:$0xff] }
 0x58f   :  { %7332 = vmatpush1.bf16.msra.mxu1 %v7331_v31  ;;  %7360 = vmatpush1.bf16.msra.mxu0 %v17944_v47  ;;  %v9334_v47 = vunpack.i.l.bf16 %v14542_v53  ;;  %v14917_v25 = vpack.c.bf16 %v17980_v15, %v17979_v12 }
 0x590   :  { %3980 = vmatprep.subr.mxu1 %v3542_v46  ;;  %7362 = vmatprep.subr.bf16.mxu0 %v14861_v45  ;;  %v14889_v31 = vsel %vm846_vm13, %v17976_v22, %v9379_v18  ;;  %v14893_v37 = vsel %vm846_vm13, %v9379_v18, %v17977_v34  ;;  %v3541_v46 = vsel %vm846_vm13, %v14676_v35, %v14741_v56  ;;  %v17318_v22 = vunpack.i.l.bf16 %v14828_v6  ;;  %v14911_v56 = vpop.permute.xlu0 %9407 }
 0x591   :  { %v9476_v30 = vpack.i.bf16 %v14889_v31, %v14874_v36  ;;  %v9481_v39 = vpack.i.bf16 %v14879_v4, %v14893_v37  ;;  %v7367_v35 = vpack.c.bf16 %v3434_v48, %v17951_v20  ;;  %v2773_v48 = vsel %vm17410_vm3, %v9235_v28, %v9334_v47 }
 0x592   :  { %v14895_v0 = vpop.permute.xlu1 %9387 }
 0x593   :  { %v17317_v18 = vunpack.i.l.bf16 %v14895_v0  ;;  %3981 = vmatpush1.msra.mxu1 %v3541_v46  ;;  %7364 = vmatpush1.bf16.msra.mxu0 %v14752_v50  ;;  %v17982_v46 = vld [vmem:[#allocation17_spill] sm:$0xff] }
 0x594   :  { %9477 = vrot.lane.b32.xlu0 %v9476_v30, %s9724_s21  ;;  %9482 = vrot.lane.b32.xlu1 %v9481_v39, %s9724_s21  ;;  %v9486_v50 = vpack.i.bf16 %v17942_v5, %v17982_v46  ;;  %v3451_v30 = vsel %vm846_vm13, %v9380_v58, %v17318_v22  ;;  %v17983_v39 = vunpack.i.h.bf16 %v14769_v63  ;;  %v9390_v63 = vunpack.i.h.bf16 %v14895_v0  ;;  %v3413_v28 = vpop.permute.xlu0 %3412 }
 0x595   :  { %3997 = vmatmul.mubr.f32.vlgmr.msra.gmra.mrb[12].mxu1 %v14229_v51  ;;  %7366 = vmatprep.subr.bf16.mxu0 %v7365_v26  ;;  %v3467_v12 = vsel %vm846_vm13, %v9385_v9, %v17317_v18  ;;  %v9399_v26 = vunpack.i.l.bf16 %v14858_v17  ;;  %v17985_v18 = vunpack.i.h.bf16 %v14601_v57 }
 0x596   :  { %v3450_v43 = vsel %vm846_vm13, %v17983_v39, %v9380_v58  ;;  %7382 = vmatprep.subr.bf16.mxu1 %v14917_v25  ;;  %6300 = vmatprep.mubr.msk.f32.mxu1 %vm17984_vm15, %v14240_v41  ;;  %v7369_v20 = vpack.c.bf16 %v3467_v12, %v3451_v30  ;;  %v17986_v12 = vld [vmem:[#allocation45_spill] sm:$0xff] }
 0x597   :  { %7384 = vmatpush1.bf16.msra.mxu1 %v14823_v3  ;;  %7368 = vmatpush1.bf16.msra.mxu0 %v7367_v35  ;;  %v3466_v30 = vsel %vm846_vm13, %v17985_v18, %v9385_v9  ;;  %v17987_v9 = vunpack.i.h.bf16 %v14799_v10 }
 0x598   :  { %v14937_v15 = vpop.permute.xlu1 %9392  ;;  %7386 = vmatprep.subr.bf16.mxu1 %v17986_v12  ;;  %3390 = vrot.lane.b32.xlu0 %v14921_v52, %s9724_s21  ;;  %v7371_v16 = vpack.c.bf16 %v3466_v30, %v3450_v43  ;;  %v9400_v30 = vunpack.i.h.bf16 %v14858_v17 }
 0x599   :  { %v9395_v58 = vunpack.i.h.bf16 %v14937_v15  ;;  %v17319_v39 = vunpack.i.l.bf16 %v14937_v15  ;;  %9487 = vrot.lane.b32.xlu1 %v9486_v50, %s9731_s23  ;;  %4003 = vmatmul.mubr.f32.gmra.mrb[14].mxu1 %v14266_v42  ;;  %v17988_v50 = vld [vmem:[#allocation53_spill] sm:$0xff]  ;;  %v18013_v17 = vunpack.i.l.bf16 %v14937_v15  ;;  %s9748_s23 = smov [#allocation3]  }
 0x59a   :  { %7370 = vmatprep.subr.bf16.mxu0 %v7369_v20  ;;  %v14971_v22 = vpack.c.bf16 %v17988_v50, %v2773_v48  ;;  %6303 = vmatprep.mubr.msk.f32.mxu1 %vm17989_vm7, %v14629_v62  ;;  %v14982_v20 = vsel %vm3020_vm6, %v14685_v2, %v14843_v32  ;;  %v9409_v48 = vunpack.i.l.bf16 %v14911_v56 }
 0x59b   :  { %v3483_v3 = vsel %vm846_vm13, %v9390_v63, %v17319_v39  ;;  %v3499_v57 = vsel %vm846_vm13, %v9395_v58, %v9399_v26  ;;  %v3498_v18 = vsel %vm846_vm13, %v17987_v9, %v9395_v58  ;;  %7388 = vmatpush1.bf16.msra.mxu1 %v17971_v29  ;;  %7372 = vmatpush1.bf16.msra.mxu0 %v7371_v16  ;;  %v17990_v58 = vunpack.i.h.bf16 %v14648_v21 }
 0x59c   :  { %v14968_v35 = vpop.permute.xlu1 %9402  ;;  %v7373_v43 = vpack.c.bf16 %v3499_v57, %v3483_v3  ;;  %7390 = vmatprep.subr.bf16.mxu1 %v14971_v22  ;;  %3420 = vrot.lane.b32.xlu0 %v14982_v20, %s9724_s21  ;;  %v14994_v29 = vsel %vm3020_vm6, %v14843_v32, %v14708_v24  ;;  %v17991_v16 = vunpack.i.h.bf16 %v14819_v33  ;;  %v17992_v32 = vld [vmem:[#allocation54_spill] sm:$0xff]  ;;  %vm17999_vm6 = vmmov %vm17845_vm1 }
 0x59d   :  { %v9405_v39 = vunpack.i.h.bf16 %v14968_v35  ;;  %v17320_v10 = vunpack.i.l.bf16 %v14968_v35  ;;  %v3482_v3 = vsel %vm846_vm13, %v17990_v58, %v9390_v63  ;;  %3422 = vrot.lane.b32.xlu1 %v14994_v29, %s9724_s21  ;;  %v9290_v63 = vunpack.i.h.bf16 %v14556_v55 }
 0x59e   :  { %7374 = vmatprep.subr.bf16.mxu0 %v7373_v43  ;;  %v7375_v2 = vpack.c.bf16 %v3498_v18, %v3482_v3  ;;  %v7393_v50 = vpack.c.bf16 %v17992_v32, %v14399_v59  ;;  %v9491_v18 = vpack.i.bf16 %v14470_v49, %v17895_v1  ;;  %v17993_v3 = vunpack.i.h.bf16 %v14679_v8 }
 0x59f   :  { %v3514_v21 = vsel %vm846_vm13, %v9400_v30, %v17320_v10  ;;  %v3528_v57 = vsel %vm846_vm13, %v17991_v16, %v9405_v39  ;;  %v3529_v43 = vsel %vm846_vm13, %v9405_v39, %v9409_v48  ;;  %7392 = vmatpush1.bf16.msra.mxu1 %v14861_v45  ;;  %v15019_v10 = vpop.permute.xlu0 %9417  ;;  %v7395_v45 = vpack.c.bf16 %v14426_v11, %v17978_v23 }
 0x5a0   :  { %v15005_v9 = vpop.permute.xlu1 %9412  ;;  %7376 = vmatpush1.bf16.msra.mxu0 %v7375_v2  ;;  %v7377_v33 = vpack.c.bf16 %v3529_v43, %v3514_v21  ;;  %v3513_v16 = vsel %vm846_vm13, %v17993_v3, %v9400_v30  ;;  %7394 = vmatprep.subr.bf16.mxu1 %v7393_v50  ;;  %v17994_v8 = vunpack.i.l.bf16 %v14556_v55  ;;  %v9496_v21 = vpack.i.bf16 %v17972_v54, %v14710_v38  ;;  %v17995_v55 = vld [vmem:[#allocation56_spill] sm:$0xff] }
 0x5a1   :  { %v9414_v58 = vunpack.i.l.bf16 %v15005_v9  ;;  %3200 = vrot.lane.b32.xlu0 %v17906_v61, %s9724_s21  ;;  %9492 = vrot.lane.b32.xlu1 %v9491_v18, %s9724_s21  ;;  %v7379_v39 = vpack.c.bf16 %v3528_v57, %v3513_v16  ;;  %v9501_v43 = vpack.i.bf16 %v17981_v13, %v17977_v34  ;;  %v3543_v23 = vsel %vm846_vm13, %v14757_v40, %v3413_v28  ;;  %v17996_v13 = vld [vmem:[#allocation18_spill] sm:$0xff]  ;;  %v17997_v57 = vld [vmem:[#allocation55_spill] sm:$0xff]  ;;  %v17998_v40 = vld [vmem:[#allocation13_spill] sm:$0xff] }
 0x5a2   :  { %7378 = vmatprep.subr.bf16.mxu0 %v7377_v33  ;;  %v3098_v30 = vsel %vm3087_vm8, %v17994_v8, %v9290_v63  ;;  %v7401_v18 = vpack.c.bf16 %v17997_v57, %v17996_v13  ;;  %v3683_v33 = vld [vmem:[%s16968_s4] sm:$0xff]  ;;  %v9335_v3 = vunpack.i.h.bf16 %v14542_v53  ;;  %v9419_v16 = vunpack.i.l.bf16 %v15019_v10  ;;  %v18001_v8 = vld [vmem:[#allocation62_spill] sm:$0xff] }
 0x5a3   :  { %v3099_v2 = vsel %vm3087_vm8, %v9290_v63, %v9414_v58  ;;  %7396 = vmatpush1.bf16.msra.mxu1 %v7395_v45  ;;  %v7399_v38 = vpack.c.bf16 %v3098_v30, %v17995_v55  ;;  %v9410_v30 = vunpack.i.h.bf16 %v14911_v56  ;;  %v18005_v57 = vld [vmem:[#allocation69_spill] sm:$0xff] }
 0x5a4   :  { %v15034_v32 = vpop.permute.xlu1 %3414  ;;  %v7397_v50 = vpack.c.bf16 %v3099_v2, %v14455_v14  ;;  %7380 = vmatpush1.bf16.msra.mxu0 %v7379_v39  ;;  %v15046_v14 = vpop.permute.xlu0 %3081  ;;  %v3684_v39 = vld [vmem:[%s16968_s4 + $0x8] sm:$0xff]  ;;  %s6277_s4 = sshll.u32 %s9748_s23, 4  ;;  %s6278_s4 = int_to_ptr.vmem [resolvable:$true] %s6277_s4 }
 0x5a5   :  { %v3544_v11 = vsel %vm846_vm13, %v3413_v28, %v15034_v32  ;;  %9497 = vrot.lane.b32.xlu0 %v9496_v21, %s9724_s21  ;;  %9502 = vrot.lane.b32.xlu1 %v9501_v43, %s9724_s21  ;;  %v15061_v28 = vpack.c.bf16 %v14036_v44, %v17998_v40  ;;  %v2774_v44 = vsel %vm17410_vm3, %v9334_v47, %v9335_v3  ;;  %v18002_v47 = vld [vmem:[#allocation68_spill] sm:$0xff]  ;;  %p9691_p1 = scmp.lt.s32.totalorder %s6278_s4, %s6278_s4 }
 0x5a6   :  { %4057 = vmatprep.subr.mxu0 %v3544_v11  ;;  %7398 = vmatprep.subr.bf16.mxu1 %v7397_v50  ;;  %v7409_v53 = vpack.c.bf16 %v14494_v19, %v2774_v44  ;;  %v9415_v50 = vunpack.i.h.bf16 %v15005_v9 }
 0x5a7   :  { %7400 = vmatpush1.bf16.msra.mxu1 %v7399_v38  ;;  %v18004_v38 = vunpack.i.h.bf16 %v14794_v60 }
 0x5a8   :  { %v15048_v63 = vpop.permute.xlu1 %9422  ;;  %4058 = vmatpush1.msra.mxu0 %v3543_v23  ;;  %7402 = vmatprep.subr.bf16.mxu1 %v7401_v18  ;;  %v15080_v2 = vpop.permute.xlu0 %9427  ;;  %v3101_v44 = vsel %vm3087_vm8, %v9415_v50, %v15046_v14 }
 0x5a9   :  { %3424 = vrot.lane.b32.xlu0 %v14708_v24, %s9724_s21  ;;  %3687 = vperm.xlu1 %8860, %v3683_v33   ;;  %v9424_v24 = vunpack.i.l.bf16 %v15048_v63  ;;  %v9430_v19 = vunpack.i.h.bf16 %v15080_v2  ;;  %v9425_v55 = vunpack.i.h.bf16 %v15048_v63  ;;  %v3436_v23 = vsel %vm846_vm13, %v18004_v38, %v9410_v30  ;;  %v18006_v33 = vld [vmem:[#allocation70_spill] sm:$0xff] }
 0x5aa   :  { %4074 = vmatmul.mubr.f32.vlgmr.msra.gmra.mrb[16].mxu0 %v14229_v51  ;;  %7430 = vmatprep.subr.bf16.mxu0 %v15061_v28  ;;  %v2775_v51 = vsel %vm17410_vm3, %v9335_v3, %v9419_v16  ;;  %v7441_v3 = vpack.c.bf16 %v18006_v33, %v14502_v27  ;;  %v18007_v38 = vunpack.i.l.bf16 %v14828_v6 }
 0x5ab   :  { %6302 = vmatprep.mubr.msk.f32.mxu0 %vm17999_vm6, %v14240_v41  ;;  %7404 = vmatpush1.bf16.msra.mxu1 %v14917_v25  ;;  %v18000_v41 = vld [vmem:[#allocation46_spill] sm:$0xff]  ;;  %v15090_v21 = vpack.c.bf16 %v18002_v47, %v2775_v51  ;;  %v7443_v51 = vpack.c.bf16 %v14510_v7, %v18005_v57 }
 0x5ac   :  { %v15065_v45 = vpop.permute.xlu1 %9432  ;;  %7432 = vmatpush1.bf16.msra.mxu0 %v7401_v18  ;;  %7406 = vmatprep.subr.bf16.mxu1 %v18000_v41  ;;  %v15101_v11 = vpop.permute.xlu0 %9442  ;;  %v3452_v7 = vsel %vm846_vm13, %v18007_v38, %v9425_v55 }
 0x5ad   :  { %7434 = vmatprep.subr.bf16.mxu0 %v18001_v8  ;;  %3692 = vperm.xlu0 %9506, %v3684_v39   ;;  %v17321_v43 = vunpack.i.l.bf16 %v15065_v45  ;;  %v9435_v47 = vunpack.i.h.bf16 %v15065_v45 }
 0x5ae   :  { %4080 = vmatmul.mubr.f32.gmra.mrb[18].mxu0 %v14266_v42  ;;  %v3437_v42 = vsel %vm846_vm13, %v9410_v30, %v9424_v24  ;;  %v9444_v30 = vunpack.i.l.bf16 %v15101_v11 }
 0x5af   :  { %6305 = vmatprep.mubr.msk.f32.mxu0 %vm18003_vm5, %v14629_v62  ;;  %7408 = vmatpush1.bf16.msra.mxu1 %v17986_v12  ;;  %v17322_v12 = vunpack.i.l.bf16 %v15080_v2  ;;  %v7413_v18 = vpack.c.bf16 %v3437_v42, %v18005_v57  ;;  %v3469_v60 = vsel %vm846_vm13, %v9430_v19, %v17321_v43  ;;  %v3100_v42 = vsel %vm3087_vm8, %v9414_v58, %v9415_v50  ;;  %v18012_v43 = vld [vmem:[#allocation71_spill] sm:$0xff] }
 0x5b0   :  { %v15086_v25 = vpop.permute.xlu1 %9437  ;;  %7436 = vmatpush1.bf16.msra.mxu0 %v18000_v41  ;;  %7410 = vmatprep.subr.bf16.mxu1 %v7409_v53  ;;  %v7415_v41 = vpack.c.bf16 %v3436_v23, %v14399_v59  ;;  %v18008_v23 = vld [vmem:[#allocation33_spill] sm:$0xff]  ;;  %v18009_v58 = vunpack.i.l.bf16 %v14895_v0  ;;  %v9420_v0 = vunpack.i.h.bf16 %v15019_v10 }
 0x5b1   :  { %7438 = vmatprep.subr.bf16.mxu0 %v15090_v21  ;;  %v9440_v40 = vunpack.i.h.bf16 %v15086_v25  ;;  %v9439_v39 = vunpack.i.l.bf16 %v15086_v25  ;;  %v18021_v25 = vunpack.i.l.bf16 %v15080_v2 }
 0x5b2   :  { %v3468_v50 = vsel %vm846_vm13, %v18009_v58, %v9430_v19  ;;  %v2776_v15 = vsel %vm17410_vm3, %v9419_v16, %v9420_v0 }
 0x5b3   :  { %7412 = vmatpush1.bf16.msra.mxu1 %v14971_v22  ;;  %v3453_v22 = vsel %vm846_vm13, %v9425_v55, %v17322_v12  ;;  %v3485_v9 = vsel %vm846_vm13, %v9435_v47, %v9439_v39  ;;  %v3501_v6 = vsel %vm846_vm13, %v9440_v40, %v9444_v30  ;;  %v9445_v55 = vunpack.i.h.bf16 %v15101_v11 }
 0x5b4   :  { %v15110_v13 = vpop.permute.xlu1 %9447  ;;  %7440 = vmatpush1.bf16.msra.mxu0 %v7409_v53  ;;  %7414 = vmatprep.subr.bf16.mxu1 %v7413_v18  ;;  %v15131_v53 = vpop.permute.xlu0 %9452  ;;  %v7417_v59 = vpack.c.bf16 %v3469_v60, %v3453_v22  ;;  %v7445_v18 = vpack.c.bf16 %v3101_v44, %v18008_v23  ;;  %v18010_v44 = vld [vmem:[#allocation10_spill] sm:$0xff]  ;;  %v3500_v22 = vsel %vm846_vm13, %v9399_v26, %v9440_v40  ;;  %v18011_v23 = vld [vmem:[#allocation20_spill] sm:$0xff]  ;;  %v18022_v11 = vunpack.i.l.bf16 %v15065_v45 }
 0x5b5   :  { %7442 = vmatprep.subr.bf16.mxu0 %v7441_v3  ;;  %v9450_v33 = vunpack.i.h.bf16 %v15110_v13  ;;  %v9449_v3 = vunpack.i.l.bf16 %v15110_v13  ;;  %v9454_v60 = vunpack.i.l.bf16 %v15131_v53  ;;  %v7421_v38 = vpack.c.bf16 %v3501_v6, %v3485_v9  ;;  %v18015_v6 = vld [vmem:[#allocation63_spill] sm:$0xff] }
 0x5b6   :  { %v7449_v12 = vpack.c.bf16 %v18012_v43, %v18011_v23  ;;  %v3484_v26 = vsel %vm846_vm13, %v18013_v17, %v9435_v47  ;;  %v18014_v47 = vunpack.i.l.bf16 %v14968_v35  ;;  %v9455_v56 = vunpack.i.h.bf16 %v15131_v53 }
 0x5b7   :  { %7416 = vmatpush1.bf16.msra.mxu1 %v7415_v41  ;;  %v7419_v41 = vpack.c.bf16 %v3468_v50, %v3452_v7  ;;  %v3516_v19 = vsel %vm846_vm13, %v9445_v55, %v9449_v3  ;;  %v7423_v43 = vpack.c.bf16 %v3500_v22, %v3484_v26  ;;  %v3530_v7 = vsel %vm846_vm13, %v9409_v48, %v9450_v33 }
 0x5b8   :  { %v3417_v57 = vpop.permute.xlu1 %3416  ;;  %7444 = vmatpush1.bf16.msra.mxu0 %v7443_v51  ;;  %7418 = vmatprep.subr.bf16.mxu1 %v7417_v59  ;;  %v7447_v51 = vpack.c.bf16 %v3100_v42, %v18010_v44  ;;  %v3531_v42 = vsel %vm846_vm13, %v9450_v33, %v9454_v60  ;;  %v3515_v9 = vsel %vm846_vm13, %v18014_v47, %v9445_v55  ;;  %v18016_v33 = vld [vmem:[#allocation22_spill] sm:$0xff] }
 0x5b9   :  { %7446 = vmatprep.subr.bf16.mxu0 %v7445_v18  ;;  %v7425_v59 = vpack.c.bf16 %v3531_v42, %v3516_v19  ;;  %v7427_v48 = vpack.c.bf16 %v3530_v7, %v3515_v9  ;;  %v7457_v58 = vpack.c.bf16 %v18016_v33, %v2776_v15  ;;  %v3438_v35 = vsel %vm846_vm13, %v9424_v24, %v9455_v56  ;;  %v18019_v19 = vld [vmem:[#allocation21_spill] sm:$0xff] }
 0x5ba   :  { %v3545_v63 = vsel %vm846_vm13, %v15034_v32, %v3417_v57  ;;  %v18023_v45 = vpack.c.bf16 %v14879_v4, %v14889_v31 }
 0x5bb   :  { %7420 = vmatpush1.bf16.msra.mxu1 %v7419_v41 }
 0x5bc   :  { %7448 = vmatpush1.bf16.msra.mxu0 %v7447_v51  ;;  %v15169_v40 = vpop.permute.xlu1 %9457  ;;  %7422 = vmatprep.subr.bf16.mxu1 %v7421_v38  ;;  %v15220_v38 = vld [vmem:[%s16967_s3] sm:$0xff] }
 0x5bd   :  { %7450 = vmatprep.subr.bf16.mxu0 %v7449_v12  ;;  %v9459_v18 = vunpack.i.l.bf16 %v15169_v40  ;;  %v9460_v42 = vunpack.i.h.bf16 %v15169_v40 }
 0x5bf   :  { %7424 = vmatpush1.bf16.msra.mxu1 %v7423_v43  ;;  %v3439_v10 = vsel %vm846_vm13, %v9455_v56, %v9459_v18  ;;  %v15248_v43 = vld [vmem:[%s16967_s3 + $0x10] sm:$0xff] }
 0x5c0   :  { %7452 = vmatpush1.bf16.msra.mxu0 %v15061_v28  ;;  %7426 = vmatprep.subr.bf16.mxu1 %v7425_v59  ;;  %v7461_v16 = vpack.c.bf16 %v3439_v10, %v14889_v31  ;;  %v7463_v28 = vpack.c.bf16 %v3438_v35, %v14502_v27  ;;  %v15205_v24 = vpop.permute.xlu1 %9467 }
 0x5c1   :  { %7454 = vmatprep.subr.bf16.mxu0 %v18015_v6  ;;  %v9470_v32 = vunpack.i.h.bf16 %v15205_v24  ;;  %v9469_v26 = vunpack.i.l.bf16 %v15205_v24 }
 0x5c3   :  { %7428 = vmatpush1.bf16.msra.mxu1 %v7427_v48  ;;  %v3486_v7 = vsel %vm846_vm13, %v9439_v39, %v9470_v32  ;;  %v3454_v39 = vsel %vm846_vm13, %v18021_v25, %v9460_v42  ;;  %v7489_v48 = vpack.c.bf16 %v14921_v52, %v14893_v37 }
 0x5c4   :  { %7456 = vmatpush1.bf16.msra.mxu0 %v18001_v8 }
 0x5c5   :  { %7458 = vmatprep.subr.bf16.mxu0 %v7457_v58 }
 0x5c8   :  { %7460 = vmatpush1.bf16.msra.mxu0 %v15090_v21  ;;  %v18017_v21 = vld [vmem:[#allocation8_spill] sm:$0xff] }
 0x5c9   :  { %7462 = vmatprep.subr.bf16.mxu0 %v7461_v16  ;;  %v15209_v51 = vpack.c.bf16 %v18017_v21, %v17982_v46 }
 0x5cc   :  { %7464 = vmatpush1.bf16.msra.mxu0 %v7463_v28 }
 0x5e3   :  { %v15195_v50 = vpop.f32.mrb[8].mxu0 }
 0x5e4   :  { %v15197_v8 = vpop.f32.mrb[9].mxu0 }
 0x5e5   :  { %v15199_v55 = vpop.permute.xlu0 %3418 }
 0x5e6   :  { %v3546_v44 = vsel %vm846_vm13, %v3417_v57, %v15199_v55  ;;  %v15230_v57 = vld [vmem:[%s16967_s3 + $0x18] sm:$0xff]  ;;  %s9740_s3 = smov 72  }
 0x5e7   :  { %4134 = vmatprep.subr.mxu1 %v3546_v44  ;;  %v15211_v27 = vpop.f32.mrb[10].mxu0 }
 0x5e8   :  { %4135 = vmatpush1.msra.mxu1 %v3545_v63  ;;  %v15213_v41 = vpop.f32.mrb[11].mxu0 }
 0x5e9   :  { %4151 = vmatmul.mubr.f32.vlgmr.msra.gmra.mrb[16].mxu1 %v15220_v38  ;;  %7478 = vmatprep.subr.bf16.mxu1 %v15209_v51 }
 0x5ea   :  { %v15215_v22 = vpop.permute.xlu0 %2759  ;;  %7480 = vmatpush1.bf16.msra.mxu1 %v7449_v12  ;;  %6304 = vmatprep.mubr.msk.f32.mxu1 %vm18018_vm14, %v15230_v57 }
 0x5eb   :  { %v2777_v46 = vsel %vm17410_vm3, %v9420_v0, %v15215_v22  ;;  %7482 = vmatprep.subr.bf16.mxu1 %v18019_v19  ;;  %vm5303_vm3 = vcmask 1041336  }
 0x5ec   :  { %v15234_v23 = vpop.permute.xlu1 %9472  ;;  %v15241_v12 = vpack.c.bf16 %v14874_v36, %v2777_v46 }
 0x5ed   :  { %v9475_v17 = vunpack.i.h.bf16 %v15234_v23  ;;  %4157 = vmatmul.mubr.f32.gmra.mrb[18].mxu1 %v15248_v43  ;;  %v9474_v2 = vunpack.i.l.bf16 %v15234_v23 }
 0x5ee   :  { %v15243_v0 = vpop.permute.xlu0 %9462  ;;  %7484 = vmatpush1.bf16.msra.mxu1 %v18015_v6  ;;  %6307 = vmatprep.mubr.msk.f32.mxu1 %vm18020_vm0, %v14629_v62 }
 0x5ef   :  { %v3502_v59 = vsel %vm846_vm13, %v9444_v30, %v9475_v17  ;;  %v9465_v36 = vunpack.i.h.bf16 %v15243_v0  ;;  %v9464_v15 = vunpack.i.l.bf16 %v15243_v0  ;;  %7486 = vmatprep.subr.bf16.mxu1 %v15241_v12  ;;  %v3487_v28 = vsel %vm846_vm13, %v9470_v32, %v9474_v2 }
 0x5f0   :  { %v7471_v47 = vpack.c.bf16 %v3502_v59, %v3486_v7 }
 0x5f1   :  { %v3470_v30 = vsel %vm846_vm13, %v18022_v11, %v9465_v36  ;;  %v3455_v9 = vsel %vm846_vm13, %v9460_v42, %v9464_v15  ;;  %v3471_v6 = vsel %vm846_vm13, %v9465_v36, %v9469_v26 }
 0x5f2   :  { %v7467_v62 = vpack.c.bf16 %v3470_v30, %v3454_v39  ;;  %v7465_v56 = vpack.c.bf16 %v3471_v6, %v3455_v9  ;;  %7488 = vmatpush1.bf16.msra.mxu1 %v7457_v58  ;;  %v7505_v30 = vpack.c.bf16 %v17972_v54, %v15215_v22 }
 0x5f3   :  { %7490 = vmatprep.subr.bf16.mxu1 %v7489_v48 }
 0x5f4   :  { %7466 = vmatprep.subr.bf16.mxu0 %v7465_v56 }
 0x5f5   :  { %7468 = vmatpush1.bf16.msra.mxu0 %v7467_v62 }
 0x5f6   :  { %7492 = vmatpush1.bf16.msra.mxu1 %v18023_v45 }
 0x606   :  { %v15281_v33 = vpop.permute.xlu0 %9477  ;;  %v15283_v10 = vpop.permute.xlu1 %9482 }
 0x607   :  { %v9480_v35 = vunpack.i.h.bf16 %v15281_v33  ;;  %v9479_v16 = vunpack.i.l.bf16 %v15281_v33  ;;  %v9484_v52 = vunpack.i.l.bf16 %v15283_v10  ;;  %v9485_v58 = vunpack.i.h.bf16 %v15283_v10 }
 0x609   :  { %v3503_v4 = vsel %vm846_vm13, %v9475_v17, %v9479_v16  ;;  %v3517_v63 = vsel %vm846_vm13, %v9449_v3, %v9480_v35  ;;  %v3518_v21 = vsel %vm846_vm13, %v9480_v35, %v9484_v52  ;;  %v3532_v32 = vsel %vm846_vm13, %v9454_v60, %v9485_v58 }
 0x60a   :  { %v15295_v31 = vpop.permute.xlu0 %3390  ;;  %v7469_v44 = vpack.c.bf16 %v3503_v4, %v3487_v28  ;;  %v7475_v25 = vpack.c.bf16 %v3532_v32, %v3517_v63 }
 0x60b   :  { %v3533_v46 = vsel %vm846_vm13, %v9485_v58, %v15295_v31  ;;  %v9488_v42 = vpop.permute.xlu1 %9487 }
 0x60c   :  { %v7473_v17 = vpack.c.bf16 %v3533_v46, %v3518_v21  ;;  %v9490_v7 = vunpack.i.h.bf16 %v9488_v42  ;;  %v9489_v59 = vunpack.i.l.bf16 %v9488_v42  ;;  %7470 = vmatprep.subr.bf16.mxu0 %v7469_v44 }
 0x60d   :  { %7472 = vmatpush1.bf16.msra.mxu0 %v7471_v47  ;;  %v7497_v47 = vpack.c.bf16 %v17906_v61, %v17942_v5  ;;  %v4799_v5 = vld [vmem:[%s16969_s5 + $0x1f0] sm:$0xff] }
 0x60e   :  { %v3102_v13 = vsel %vm3087_vm8, %v15046_v14, %v9489_v59  ;;  %v3421_v3 = vpop.permute.xlu0 %3420  ;;  %7474 = vmatprep.subr.bf16.mxu0 %v7473_v17  ;;  %v3103_v36 = vsel %vm3087_vm8, %v9489_v59, %v9490_v7  ;;  %vm18024_vm8 = vmmov %vm18020_vm0 }
 0x60f   :  { %v7495_v39 = vpack.c.bf16 %v3102_v13, %v14982_v20  ;;  %v3423_v11 = vpop.permute.xlu1 %3422  ;;  %v7493_v53 = vpack.c.bf16 %v3103_v36, %v14994_v29  ;;  %v3547_v14 = vsel %vm846_vm13, %v15199_v55, %v3421_v3  ;;  %v7501_v20 = vpack.c.bf16 %v14470_v49, %v17895_v1 }
 0x610   :  { %v3548_v60 = vsel %vm846_vm13, %v3421_v3, %v3423_v11 }
 0x611   :  { %7494 = vmatprep.subr.bf16.mxu1 %v7493_v53  ;;  %7476 = vmatpush1.bf16.msra.mxu0 %v7475_v25 }
 0x612   :  { %7496 = vmatpush1.bf16.msra.mxu1 %v7495_v39  ;;  %4211 = vmatprep.subr.mxu0 %v3548_v60 }
 0x613   :  { %7498 = vmatprep.subr.bf16.mxu1 %v7497_v47  ;;  %v3201_v29 = vpop.permute.xlu0 %3200  ;;  %v9493_v9 = vpop.permute.xlu1 %9492 }
 0x614   :  { %v9494_v55 = vunpack.i.l.bf16 %v9493_v9  ;;  %v3440_v49 = vsel %vm846_vm13, %v9459_v18, %v3201_v29  ;;  %v7509_v1 = vpack.c.bf16 %v3201_v29, %v17977_v34 }
 0x615   :  { %4212 = vmatpush1.msra.mxu0 %v3547_v14  ;;  %v7511_v54 = vpack.c.bf16 %v3440_v49, %v14893_v37 }
 0x616   :  { %7500 = vmatpush1.bf16.msra.mxu1 %v15209_v51  ;;  %4228 = vmatmul.mubr.f32.vlgmr.msra.gmra.mrb[20].mxu0 %v15220_v38  ;;  %v9495_v51 = vunpack.i.h.bf16 %v9493_v9  ;;  %v3456_v22 = vsel %vm846_vm13, %v9464_v15, %v9494_v55 }
 0x617   :  { %7502 = vmatprep.subr.bf16.mxu1 %v7501_v20  ;;  %6306 = vmatprep.mubr.msk.f32.mxu0 %vm18024_vm8, %v15230_v57  ;;  %v9498_v6 = vpop.permute.xlu0 %9497  ;;  %v9503_v56 = vpop.permute.xlu1 %9502 }
 0x618   :  { %v7513_v40 = vpack.c.bf16 %v9495_v51, %v9494_v55  ;;  %v9500_v62 = vunpack.i.h.bf16 %v9498_v6  ;;  %v9499_v18 = vunpack.i.l.bf16 %v9498_v6  ;;  %v9505_v48 = vunpack.i.h.bf16 %v9503_v56 }
 0x619   :  { %v9504_v24 = vunpack.i.l.bf16 %v9503_v56 }
 0x61a   :  { %7504 = vmatpush1.bf16.msra.mxu1 %v18019_v19  ;;  %4234 = vmatmul.mubr.f32.gmra.mrb[22].mxu0 %v15248_v43  ;;  %v3472_v19 = vsel %vm846_vm13, %v9469_v26, %v9495_v51  ;;  %v3488_v37 = vsel %vm846_vm13, %v9474_v2, %v9499_v18  ;;  %v7517_v0 = vpack.c.bf16 %v9500_v62, %v9499_v18 }
 0x61b   :  { %7506 = vmatprep.subr.bf16.mxu1 %v7505_v30  ;;  %v7515_v34 = vpack.c.bf16 %v3472_v19, %v3456_v22  ;;  %v3534_v15 = vsel %vm846_vm13, %v15295_v31, %v9505_v48  ;;  %v3519_v45 = vsel %vm846_vm13, %v9484_v52, %v9504_v24  ;;  %v7521_v35 = vpack.c.bf16 %v9505_v48, %v9504_v24  ;;  %v3425_v2 = vpop.permute.xlu0 %3424 }
 0x61c   :  { %v7523_v23 = vpack.c.bf16 %v3534_v15, %v3519_v45  ;;  %v3549_v33 = vsel %vm846_vm13, %v3423_v11, %v3425_v2 }
 0x61e   :  { %7508 = vmatpush1.bf16.msra.mxu1 %v15241_v12  ;;  %v3504_v12 = vsel %vm846_vm13, %v9479_v16, %v9500_v62  ;;  %vm18027_vm13 = vcmask 1031168  }
 0x61f   :  { %7510 = vmatprep.subr.bf16.mxu1 %v7509_v1  ;;  %v7519_v26 = vpack.c.bf16 %v3504_v12, %v3488_v37  ;;  %vm18031_vm9 = vmmov %vm18027_vm13 }
 0x620   :  { %vm18043_vm12 = vmmov %vm18031_vm9 }
 0x621   :  { %vm18048_vm1 = vmmov %vm18031_vm9 }
 0x622   :  { %7512 = vmatpush1.bf16.msra.mxu1 %v7511_v54  ;;  %vm18049_vm15 = vmmov %vm18048_vm1 }
 0x623   :  { %7514 = vmatprep.subr.bf16.mxu1 %v7513_v40  ;;  %vm18053_vm7 = vmmov %vm18048_vm1 }
 0x624   :  { %vm18054_vm6 = vmmov %vm18048_vm1 }
 0x625   :  { %vm18059_vm5 = vmmov %vm18048_vm1 }
 0x626   :  { %7516 = vmatpush1.bf16.msra.mxu1 %v7515_v34  ;;  %vm18060_vm14 = vmmov %vm18048_vm1 }
 0x627   :  { %7518 = vmatprep.subr.bf16.mxu1 %v7517_v0  ;;  %vm18064_vm0 = vmmov %vm18048_vm1 }
 0x628   :  { %v15352_v16 = vpop.permute.xlu1 %3687  ;;  %vm18066_vm8 = vmmov %vm18064_vm0 }
 0x629   :  { %v15357_v58 = vadd.f32 %v15197_v8, %v15352_v16  ;;  %v15374_v44 = vadd.f32 %v15195_v50, %v15352_v16 }
 0x62a   :  { %7520 = vmatpush1.bf16.msra.mxu1 %v7519_v26 }
 0x62b   :  { %7522 = vmatprep.subr.bf16.mxu1 %v7521_v35  ;;  %v17340_v32 = vmax.f32 %v15374_v44, 0.0 }
 0x62c   :  { %v15361_v52 = vpop.permute.xlu0 %3692 }
 0x62d   :  { %v15404_v13 = vadd.f32 %v15211_v27, %v15361_v52 }
 0x62e   :  { %7524 = vmatpush1.bf16.msra.mxu1 %v7523_v23 }
 0x62f   :  { %4288 = vmatprep.subr.mxu1 %v3425_v2  ;;  %v17335_v47 = vmax.f32 %v15404_v13, 0.0 }
 0x632   :  { %4289 = vmatpush1.msra.mxu1 %v3549_v33 }
 0x633   :  { %4305 = vmatmul.mubr.f32.vlgmr.msra.gmra.mrb[20].mxu1 %v15220_v38  ;;  %v4318_v38 = vmax.f32 %v15357_v58, 0.0  ;;  %v4796_v58 = vld [vmem:[%s16969_s5 + $0x1d8] sm:$0xff] }
 0x634   :  { %6308 = vmatprep.mubr.msk.f32.mxu1 %vm18025_vm10, %v15230_v57  ;;  %v3844_v10 = vpop.f32.mrb[8].mxu1  ;;  %v15378_v57 = vadd.f32 %v15213_v41, %v15361_v52  ;;  %vm18069_vm10 = vmmov %vm18064_vm0 }
 0x635   :  { %v15364_v28 = vadd.f32 %v3844_v10, %v15352_v16  ;;  %v3846_v4 = vpop.f32.mrb[9].mxu1 }
 0x636   :  { %v15367_v31 = vadd.f32 %v3846_v4, %v15352_v16  ;;  %v17336_v50 = vmax.f32 %v15378_v57, 0.0 }
 0x637   :  { %4311 = vmatmul.mubr.f32.gmra.mrb[22].mxu1 %v15248_v43  ;;  %v4319_v8 = vmax.f32 %v15364_v28, 0.0  ;;  %v4779_v28 = vld [vmem:[%s16969_s5 + $0x150] sm:$0xff] }
 0x638   :  { %v3850_v63 = vpop.f32.mrb[10].mxu1  ;;  %v17339_v43 = vmax.f32 %v15367_v31, 0.0 }
 0x639   :  { %v9507_v21 = vpack.i.bf16 %v4319_v8, %v4318_v38  ;;  %v15386_v46 = vadd.f32 %v3850_v63, %v15361_v52  ;;  %v3852_v42 = vpop.f32.mrb[11].mxu1 }
 0x63a   :  { %v9512_v17 = vpack.i.bf16 %v17340_v32, %v17339_v43  ;;  %v15407_v3 = vadd.f32 %v3852_v42, %v15361_v52 }
 0x63b   :  { %9508 = vrot.lane.b32.xlu1 %v9507_v21, %s17455_s29  ;;  %v17337_v41 = vmax.f32 %v15386_v46, 0.0 }
 0x63c   :  { %v17334_v27 = vmax.f32 %v15407_v3, 0.0 }
 0x63d   :  { %v9522_v7 = vpack.i.bf16 %v17337_v41, %v17336_v50 }
 0x63e   :  { %v9527_v55 = vpack.i.bf16 %v17335_v47, %v17334_v27  ;;  %v4763_v27 = vld [vmem:[%s16969_s5 + $0xd0] sm:$0xff] }
 0x63f   :  { %9513 = vrot.lane.b32.xlu1 %v9512_v17, %s17455_s29 }
 0x643   :  { %9523 = vrot.lane.b32.xlu1 %v9522_v7, %s17455_s29  ;;  %v4753_v7 = vld [vmem:[%s16969_s5 + $0x80] sm:$0xff] }
 0x649   :  { %v3921_v59 = vpop.f32.mrb[12].mxu0 }
 0x64a   :  { %v15410_v36 = vadd.f32 %v3921_v59, %v15352_v16  ;;  %v3923_v25 = vpop.f32.mrb[13].mxu0  ;;  %v4754_v59 = vld [vmem:[%s16969_s5 + $0x88] sm:$0xff] }
 0x64b   :  { %v15413_v39 = vadd.f32 %v3923_v25, %v15352_v16  ;;  %v4737_v25 = vld [vmem:[%s16969_s5] sm:$0xff] }
 0x64c   :  { %v17338_v11 = vmax.f32 %v15410_v36, 0.0 }
 0x64d   :  { %v17333_v53 = vmax.f32 %v15413_v39, 0.0  ;;  %v3927_v60 = vpop.f32.mrb[14].mxu0 }
 0x64e   :  { %v15420_v14 = vadd.f32 %v3927_v60, %v15361_v52  ;;  %v3929_v20 = vpop.f32.mrb[15].mxu0  ;;  %v15503_v60 = vpack.c.bf16 %v4754_v59, %v4753_v7  ;;  %v4771_v7 = vld [vmem:[%s16969_s5 + $0x110] sm:$0xff] }
 0x64f   :  { %v9517_v29 = vpack.i.bf16 %v17333_v53, %v17338_v11  ;;  %v15427_v30 = vadd.f32 %v3929_v20, %v15361_v52  ;;  %v4738_v20 = vld [vmem:[%s16969_s5 + $0x8] sm:$0xff] }
 0x650   :  { %v17332_v9 = vmax.f32 %v15420_v14, 0.0  ;;  %7526 = vmatprep.subr.bf16.mxu0 %v15503_v60 }
 0x651   :  { %v17329_v49 = vmax.f32 %v15427_v30, 0.0  ;;  %9518 = vrot.lane.b32.xlu0 %v9517_v29, %s17455_s29  ;;  %v4785_v29 = vld [vmem:[%s16969_s5 + $0x180] sm:$0xff] }
 0x653   :  { %v9532_v1 = vpack.i.bf16 %v17329_v49, %v17332_v9  ;;  %v4746_v49 = vld [vmem:[%s16969_s5 + $0x48] sm:$0xff] }
 0x655   :  { %9528 = vrot.lane.b32.xlu0 %v9527_v55, %s17455_s29  ;;  %9533 = vrot.lane.b32.xlu1 %v9532_v1, %s17455_s29  ;;  %v4786_v55 = vld [vmem:[%s16969_s5 + $0x188] sm:$0xff]  ;;  %v15514_v1 = vpack.c.bf16 %v4738_v20, %v4737_v25  ;;  %v4772_v25 = vld [vmem:[%s16969_s5 + $0x118] sm:$0xff] }
 0x656   :  { %v4757_v20 = vld [vmem:[%s16969_s5 + $0xa0] sm:$0xff] }
 0x657   :  { %7528 = vmatpush3.bf16.msra.mxu0 %v15514_v1 }
 0x668   :  { %v3998_v51 = vpop.f32.mrb[12].mxu1 }
 0x669   :  { %v15443_v6 = vadd.f32 %v3998_v51, %v15352_v16  ;;  %v4000_v54 = vpop.f32.mrb[13].mxu1  ;;  %v15516_v51 = vpack.c.bf16 %v4786_v55, %v4785_v29  ;;  %v4758_v29 = vld [vmem:[%s16969_s5 + $0xa8] sm:$0xff]  ;;  %v15567_v55 = vpack.c.bf16 %v4772_v25, %v4771_v7  ;;  %v4759_v25 = vld [vmem:[%s16969_s5 + $0xb0] sm:$0xff] }
 0x66a   :  { %v15446_v22 = vadd.f32 %v4000_v54, %v15352_v16  ;;  %v4769_v54 = vld [vmem:[%s16969_s5 + $0x100] sm:$0xff]  ;;  %v4774_v7 = vld [vmem:[%s16969_s5 + $0x128] sm:$0xff] }
 0x66b   :  { %v17331_v19 = vmax.f32 %v15443_v6, 0.0  ;;  %7558 = vmatprep.subr.bf16.mxu1 %v15516_v51 }
 0x66c   :  { %v17330_v40 = vmax.f32 %v15446_v22, 0.0  ;;  %v4004_v62 = vpop.f32.mrb[14].mxu1 }
 0x66d   :  { %v15451_v18 = vadd.f32 %v4004_v62, %v15361_v52  ;;  %v4006_v56 = vpop.f32.mrb[15].mxu1  ;;  %v4770_v62 = vld [vmem:[%s16969_s5 + $0x108] sm:$0xff] }
 0x66e   :  { %v9537_v34 = vpack.i.bf16 %v17330_v40, %v17331_v19  ;;  %v15458_v48 = vadd.f32 %v4006_v56, %v15361_v52  ;;  %v4755_v56 = vld [vmem:[%s16969_s5 + $0x90] sm:$0xff]  ;;  %v4793_v40 = vld [vmem:[%s16969_s5 + $0x1c0] sm:$0xff]  ;;  %v4794_v19 = vld [vmem:[%s16969_s5 + $0x1c8] sm:$0xff] }
 0x66f   :  { %v17328_v37 = vmax.f32 %v15451_v18, 0.0  ;;  %v15670_v53 = vpack.c.bf16 %v4794_v19, %v4793_v40  ;;  %v4764_v19 = vld [vmem:[%s16969_s5 + $0xd8] sm:$0xff]  ;;  %v4747_v40 = vld [vmem:[%s16969_s5 + $0x50] sm:$0xff] }
 0x670   :  { %v17326_v12 = vmax.f32 %v15458_v48, 0.0  ;;  %9538 = vrot.lane.b32.xlu0 %v9537_v34, %s17455_s29  ;;  %v15528_v34 = vpack.c.bf16 %v4770_v62, %v4769_v54  ;;  %v15569_v54 = vpack.c.bf16 %v4758_v29, %v4757_v20  ;;  %v4741_v62 = vld [vmem:[%s16969_s5 + $0x20] sm:$0xff] }
 0x671   :  { %18030 = vst [vmem:[#allocation23_spill] sm:$0xff] %v15670_v53 }
 0x672   :  { %v9547_v0 = vpack.i.bf16 %v17326_v12, %v17328_v37  ;;  %7560 = vmatpush3.bf16.msra.mxu1 %v15528_v34  ;;  %v4775_v12 = vld [vmem:[%s16969_s5 + $0x130] sm:$0xff] }
 0x674   :  { %9548 = vrot.lane.b32.xlu0 %v9547_v0, %s17455_s29  ;;  %v4756_v0 = vld [vmem:[%s16969_s5 + $0x98] sm:$0xff] }
 0x67d   :  { %v4075_v24 = vpop.f32.mrb[16].mxu0 }
 0x67e   :  { %v15469_v26 = vadd.f32 %v4075_v24, %v15352_v16  ;;  %v4077_v15 = vpop.f32.mrb[17].mxu0  ;;  %v4739_v24 = vld [vmem:[%s16969_s5 + $0x10] sm:$0xff] }
 0x67f   :  { %v15472_v45 = vadd.f32 %v4077_v15, %v15352_v16  ;;  %v4740_v15 = vld [vmem:[%s16969_s5 + $0x18] sm:$0xff] }
 0x680   :  { %v17327_v35 = vmax.f32 %v15469_v26, 0.0 }
 0x681   :  { %v17324_v23 = vmax.f32 %v15472_v45, 0.0  ;;  %v4081_v2 = vpop.f32.mrb[18].mxu0 }
 0x682   :  { %v15477_v33 = vadd.f32 %v4081_v2, %v15361_v52  ;;  %v4083_v10 = vpop.f32.mrb[19].mxu0  ;;  %v15541_v2 = vpack.c.bf16 %v4756_v0, %v4755_v56  ;;  %v4742_v56 = vld [vmem:[%s16969_s5 + $0x28] sm:$0xff]  ;;  %v4789_v0 = vld [vmem:[%s16969_s5 + $0x1a0] sm:$0xff] }
 0x683   :  { %v9542_v4 = vpack.i.bf16 %v17324_v23, %v17327_v35  ;;  %v15484_v63 = vadd.f32 %v4083_v10, %v15361_v52  ;;  %v15543_v10 = vpack.c.bf16 %v4740_v15, %v4739_v24  ;;  %v4790_v24 = vld [vmem:[%s16969_s5 + $0x1a8] sm:$0xff]  ;;  %v15585_v15 = vpack.c.bf16 %v4742_v56, %v4741_v62  ;;  %v4760_v62 = vld [vmem:[%s16969_s5 + $0xb8] sm:$0xff]  ;;  %v4743_v56 = vld [vmem:[%s16969_s5 + $0x30] sm:$0xff] }
 0x684   :  { %v17325_v21 = vmax.f32 %v15477_v33, 0.0  ;;  %7530 = vmatprep.subr.bf16.mxu0 %v15541_v2  ;;  %v15617_v23 = vpack.c.bf16 %v4760_v62, %v4759_v25  ;;  %v4776_v25 = vld [vmem:[%s16969_s5 + $0x138] sm:$0xff] }
 0x685   :  { %v17323_v42 = vmax.f32 %v15484_v63, 0.0  ;;  %9543 = vrot.lane.b32.xlu1 %v9542_v4, %s17455_s29  ;;  %v4787_v4 = vld [vmem:[%s16969_s5 + $0x190] sm:$0xff]  ;;  %7532 = vmatpush3.bf16.msra.mxu0 %v15543_v10  ;;  %v15637_v62 = vpack.c.bf16 %v4776_v25, %v4775_v12 }
 0x686   :  { %7534 = vmatprep.subr.bf16.mxu0 %v15569_v54 }
 0x687   :  { %v9552_v17 = vpack.i.bf16 %v17323_v42, %v17325_v21  ;;  %v4792_v21 = vld [vmem:[%s16969_s5 + $0x1b8] sm:$0xff]  ;;  %18026 = vst [vmem:[#allocation44_spill] sm:$0xff] %v15637_v62 }
 0x689   :  { %9553 = vrot.lane.b32.xlu0 %v9552_v17, %s17455_s29  ;;  %v4788_v17 = vld [vmem:[%s16969_s5 + $0x198] sm:$0xff]  ;;  %7536 = vmatpush3.bf16.msra.mxu0 %v15585_v15 }
 0x68a   :  { %v15555_v59 = vpack.c.bf16 %v4788_v17, %v4787_v4  ;;  %v15587_v4 = vpack.c.bf16 %v4790_v24, %v4789_v0  ;;  %v4773_v17 = vld [vmem:[%s16969_s5 + $0x120] sm:$0xff]  ;;  %v4744_v0 = vld [vmem:[%s16969_s5 + $0x38] sm:$0xff]  ;;  %7538 = vmatprep.subr.bf16.mxu0 %v15617_v23 }
 0x68b   :  { %v15604_v29 = vpack.c.bf16 %v4774_v7, %v4773_v17  ;;  %v15619_v17 = vpack.c.bf16 %v4744_v0, %v4743_v56  ;;  %v4791_v7 = vld [vmem:[%s16969_s5 + $0x1b0] sm:$0xff]  ;;  %v4761_v0 = vld [vmem:[%s16969_s5 + $0xc0] sm:$0xff] }
 0x68c   :  { %7562 = vmatprep.subr.bf16.mxu1 %v15555_v59  ;;  %v15631_v35 = vpack.c.bf16 %v4792_v21, %v4791_v7  ;;  %v4762_v21 = vld [vmem:[%s16969_s5 + $0xc8] sm:$0xff]  ;;  %v4745_v7 = vld [vmem:[%s16969_s5 + $0x40] sm:$0xff] }
 0x68d   :  { %7564 = vmatpush3.bf16.msra.mxu1 %v15567_v55  ;;  %7540 = vmatpush3.bf16.msra.mxu0 %v15619_v17  ;;  %v15656_v37 = vpack.c.bf16 %v4762_v21, %v4761_v0  ;;  %v15668_v9 = vpack.c.bf16 %v4746_v49, %v4745_v7  ;;  %v4777_v0 = vld [vmem:[%s16969_s5 + $0x140] sm:$0xff]  ;;  %v4778_v21 = vld [vmem:[%s16969_s5 + $0x148] sm:$0xff]  ;;  %v4748_v7 = vld [vmem:[%s16969_s5 + $0x58] sm:$0xff] }
 0x68e   :  { %7566 = vmatprep.subr.bf16.mxu1 %v15587_v4  ;;  %v15685_v49 = vpack.c.bf16 %v4778_v21, %v4777_v0  ;;  %v15706_v0 = vpack.c.bf16 %v4764_v19, %v4763_v27  ;;  %v4795_v21 = vld [vmem:[%s16969_s5 + $0x1d0] sm:$0xff]  ;;  %v4765_v27 = vld [vmem:[%s16969_s5 + $0xe0] sm:$0xff] }
 0x68f   :  { %18028 = vst [vmem:[#allocation27_spill] sm:$0xff] %v15656_v37  ;;  %18029 = vst [vmem:[#allocation32_spill] sm:$0xff] %v15668_v9  ;;  %7542 = vmatprep.subr.bf16.mxu0 %v15656_v37 }
 0x690   :  { %18032 = vst [vmem:[#allocation11_spill] sm:$0xff] %v15685_v49  ;;  %18033 = vst [vmem:[#allocation25_spill] sm:$0xff] %v15706_v0 }
 0x691   :  { %7568 = vmatpush3.bf16.msra.mxu1 %v15604_v29  ;;  %7544 = vmatpush3.bf16.msra.mxu0 %v15668_v9  ;;  %v18061_v9 = vmax.f32 %v15404_v13, 0.0 }
 0x692   :  { %7570 = vmatprep.subr.bf16.mxu1 %v15631_v35  ;;  %7546 = vmatprep.subr.bf16.mxu0 %v15706_v0 }
 0x695   :  { %7572 = vmatpush3.bf16.msra.mxu1 %v15637_v62 }
 0x696   :  { %7574 = vmatprep.subr.bf16.mxu1 %v15670_v53 }
 0x699   :  { %7576 = vmatpush3.bf16.msra.mxu1 %v15685_v49 }
 0x6ad   :  { %v15602_v20 = vpop.permute.xlu1 %9508 }
 0x6ae   :  { %v9511_v24 = vunpack.i.h.bf16 %v15602_v20  ;;  %v17342_v42 = vunpack.i.l.bf16 %v15602_v20 }
 0x6b0   :  { %v4446_v12 = vsel %vm18027_vm13, %v17342_v42, %v9511_v24  ;;  %v4752_v42 = vld [vmem:[%s16969_s5 + $0x78] sm:$0xff]  ;;  %vm18070_vm13 = vmmov %vm18064_vm0 }
 0x6b1   :  { %v15639_v56 = vpop.permute.xlu1 %9513  ;;  %v15698_v50 = vmax.f32 %v4318_v38, %v4446_v12  ;;  %v15717_v38 = vpack.c.bf16 %v4748_v7, %v4747_v40  ;;  %v4766_v12 = vld [vmem:[%s16969_s5 + $0xe8] sm:$0xff] }
 0x6b2   :  { %v17341_v25 = vunpack.i.l.bf16 %v15639_v56  ;;  %v15736_v7 = vpack.c.bf16 %v4766_v12, %v4765_v27  ;;  %v4798_v27 = vld [vmem:[%s16969_s5 + $0x1e8] sm:$0xff]  ;;  %v4781_v12 = vld [vmem:[%s16969_s5 + $0x160] sm:$0xff] }
 0x6b3   :  { %18034 = vst [vmem:[#allocation35_spill] sm:$0xff] %v15717_v38  ;;  %7548 = vmatpush3.bf16.msra.mxu0 %v15717_v38  ;;  %v4784_v38 = vld [vmem:[%s16969_s5 + $0x178] sm:$0xff] }
 0x6b4   :  { %v4447_v47 = vsel %vm18031_vm9, %v9511_v24, %v17341_v25  ;;  %18037 = vst [vmem:[#allocation14_spill] sm:$0xff] %v15736_v7  ;;  %7550 = vmatprep.subr.bf16.mxu0 %v15736_v7  ;;  %v4767_v25 = vld [vmem:[%s16969_s5 + $0xf0] sm:$0xff]  ;;  %vm18073_vm9 = vmmov %vm18064_vm0 }
 0x6b5   :  { %v15702_v24 = vmax.f32 %v4319_v8, %v4447_v47  ;;  %v15719_v8 = vpack.c.bf16 %v4796_v58, %v4795_v21  ;;  %v4780_v47 = vld [vmem:[%s16969_s5 + $0x158] sm:$0xff]  ;;  %v4749_v21 = vld [vmem:[%s16969_s5 + $0x60] sm:$0xff]  ;;  %v4750_v58 = vld [vmem:[%s16969_s5 + $0x68] sm:$0xff] }
 0x6b6   :  { %v15734_v40 = vpack.c.bf16 %v4780_v47, %v4779_v28  ;;  %v4797_v28 = vld [vmem:[%s16969_s5 + $0x1e0] sm:$0xff]  ;;  %v15752_v47 = vpack.c.bf16 %v4750_v58, %v4749_v21  ;;  %v9516_v21 = vunpack.i.h.bf16 %v15639_v56  ;;  %v4783_v7 = vld [vmem:[%s16969_s5 + $0x170] sm:$0xff] }
 0x6b7   :  { %18035 = vst [vmem:[#allocation16_spill] sm:$0xff] %v15719_v8  ;;  %v9557_v19 = vpack.i.bf16 %v15702_v24, %v15698_v50  ;;  %7578 = vmatprep.subr.bf16.mxu1 %v15719_v8  ;;  %v15763_v11 = vpack.c.bf16 %v4798_v27, %v4797_v28  ;;  %v4768_v28 = vld [vmem:[%s16969_s5 + $0xf8] sm:$0xff]  ;;  %v4751_v27 = vld [vmem:[%s16969_s5 + $0x70] sm:$0xff] }
 0x6b8   :  { %18036 = vst [vmem:[#allocation15_spill] sm:$0xff] %v15734_v40  ;;  %7580 = vmatpush3.bf16.msra.mxu1 %v15734_v40  ;;  %18038 = vst [vmem:[#allocation7_spill] sm:$0xff] %v15752_v47  ;;  %7552 = vmatpush3.bf16.msra.mxu0 %v15752_v47 }
 0x6b9   :  { %9558 = vrot.lane.b32.xlu1 %v9557_v19, %s9721_s27  ;;  %v4782_v19 = vld [vmem:[%s16969_s5 + $0x168] sm:$0xff]  ;;  %18039 = vst [vmem:[#allocation24_spill] sm:$0xff] %v15763_v11  ;;  %7582 = vmatprep.subr.bf16.mxu1 %v15763_v11  ;;  %v18042_v11 = vunpack.i.l.bf16 %v15602_v20 }
 0x6ba   :  { %v15765_v43 = vpack.c.bf16 %v4782_v19, %v4781_v12  ;;  %v15780_v19 = vpack.c.bf16 %v4768_v28, %v4767_v25  ;;  %v15796_v25 = vpack.c.bf16 %v4752_v42, %v4751_v27  ;;  %v15812_v42 = vpack.c.bf16 %v4784_v38, %v4783_v7 }
 0x6bb   :  { %v4445_v47 = vsel %vm18043_vm12, %v9516_v21, %v18042_v11  ;;  %v18050_v38 = vmax.f32 %v15374_v44, 0.0  ;;  %vm18074_vm12 = vmmov %vm18064_vm0 }
 0x6bc   :  { %v4152_v41 = vpop.f32.mrb[16].mxu1  ;;  %18040 = vst [vmem:[#allocation34_spill] sm:$0xff] %v15765_v43  ;;  %7584 = vmatpush3.bf16.msra.mxu1 %v15765_v43  ;;  %18041 = vst [vmem:[#allocation57_spill] sm:$0xff] %v15780_v19  ;;  %v4800_v43 = vld [vmem:[%s16969_s5 + $0x1f8] sm:$0xff]  ;;  %7554 = vmatprep.subr.bf16.mxu0 %v15780_v19  ;;  %v9524_v19 = vpop.permute.xlu1 %9523 }
 0x6bd   :  { %v4154_v32 = vpop.f32.mrb[17].mxu1  ;;  %18044 = vst [vmem:[#allocation38_spill] sm:$0xff] %v15796_v25  ;;  %v15798_v28 = vpack.c.bf16 %v4800_v43, %v4799_v5  ;;  %v15807_v8 = vadd.f32 %v4152_v41, %v15352_v16  ;;  %18046 = vst [vmem:[#allocation58_spill] sm:$0xff] %v15812_v42  ;;  %7556 = vmatpush3.bf16.msra.mxu0 %v15796_v25  ;;  %v18047_v43 = vunpack.i.l.bf16 %v15639_v56 }
 0x6be   :  { %v15815_v5 = vadd.f32 %v4154_v32, %v15352_v16  ;;  %v15828_v7 = vmax.f32 %v18050_v38, %v4445_v47  ;;  %v18051_v32 = vmax.f32 %v15367_v31, 0.0  ;;  %v9526_v47 = vunpack.i.h.bf16 %v9524_v19  ;;  %v4817_v38 = vld [vmem:[%s16969_s5 + $0x280] sm:$0xff] }
 0x6bf   :  { %18045 = vst [vmem:[#allocation39_spill] sm:$0xff] %v15798_v28  ;;  %7586 = vmatprep.subr.bf16.mxu1 %v15798_v28  ;;  %v18052_v28 = vmax.f32 %v15410_v36, 0.0 }
 0x6c0   :  { %v4158_v58 = vpop.f32.mrb[18].mxu1  ;;  %7588 = vmatpush3.bf16.msra.mxu1 %v15812_v42  ;;  %v18056_v42 = vmax.f32 %v15386_v46, 0.0 }
 0x6c1   :  { %v4160_v12 = vpop.f32.mrb[19].mxu1 }
 0x6c2   :  { %v15844_v44 = vadd.f32 %v4160_v12, %v15361_v52 }
 0x6c3   :  { %v15794_v40 = vpop.permute.xlu0 %9518 }
 0x6c4   :  { %v17354_v20 = vunpack.i.h.bf16 %v15794_v40  ;;  %v9520_v11 = vunpack.i.l.bf16 %v15794_v40  ;;  %v17360_v12 = vmax.f32 %v15844_v44, 0.0 }
 0x6c6   :  { %v4448_v41 = vsel %vm18048_vm1, %v18047_v43, %v9520_v11  ;;  %v4449_v21 = vsel %vm18049_vm15, %v9520_v11, %v17354_v20  ;;  %v17356_v43 = vmax.f32 %v15807_v8, 0.0  ;;  %v17355_v11 = vmax.f32 %v15815_v5, 0.0  ;;  %vm18075_vm1 = vmmov %vm18064_vm0 }
 0x6c7   :  { %v15832_v27 = vmax.f32 %v18051_v32, %v4448_v41  ;;  %v15836_v25 = vmax.f32 %v18052_v28, %v4449_v21  ;;  %v9529_v56 = vpop.permute.xlu0 %9528  ;;  %v15841_v20 = vadd.f32 %v4158_v58, %v15361_v52  ;;  %v9525_v28 = vunpack.i.l.bf16 %v9524_v19  ;;  %v4818_v19 = vld [vmem:[%s16969_s5 + $0x288] sm:$0xff]  ;;  %v9534_v46 = vpop.permute.xlu1 %9533  ;;  %vm18083_vm15 = vmmov %vm18064_vm0 }
 0x6c8   :  { %v9530_v36 = vunpack.i.l.bf16 %v9529_v56  ;;  %v9567_v58 = vpack.i.bf16 %v17355_v11, %v17356_v43  ;;  %v4849_v11 = vld [vmem:[%s16969_s5 + $0x380] sm:$0xff] }
 0x6c9   :  { %4583 = vrot.lane.b32.xlu0 %v15836_v25, %s9721_s27  ;;  %v9562_v31 = vpack.i.bf16 %v15832_v27, %v15828_v7  ;;  %v17361_v41 = vmax.f32 %v15841_v20, 0.0  ;;  %v4462_v32 = vsel %vm18054_vm6, %v9525_v28, %v9526_v47  ;;  %vm18094_vm6 = vmmov %vm18064_vm0 }
 0x6ca   :  { %v4463_v21 = vsel %vm18053_vm7, %v9526_v47, %v9530_v36  ;;  %vm18084_vm7 = vmmov %vm18064_vm0 }
 0x6cb   :  { %9563 = vrot.lane.b32.xlu1 %v9562_v31, %s9721_s27  ;;  %v15866_v31 = vpack.c.bf16 %v4818_v19, %v4817_v38  ;;  %v9577_v43 = vpack.i.bf16 %v17360_v12, %v17361_v41  ;;  %v15880_v49 = vmax.f32 %v18056_v42, %v4463_v21  ;;  %v18058_v38 = vmax.f32 %v15378_v57, 0.0 }
 0x6cc   :  { %v9531_v42 = vunpack.i.h.bf16 %v9529_v56  ;;  %v9535_v21 = vunpack.i.l.bf16 %v9534_v46  ;;  %v9536_v56 = vunpack.i.h.bf16 %v9534_v46  ;;  %v18063_v46 = vunpack.i.h.bf16 %v15794_v40 }
 0x6cd   :  { %18055 = vst [vmem:[#allocation31_spill] sm:$0xff] %v15866_v31  ;;  %7590 = vmatprep.subr.bf16.mxu0 %v15866_v31  ;;  %v15887_v19 = vmax.f32 %v18058_v38, %v4462_v32 }
 0x6ce   :  { %v4464_v38 = vsel %vm18060_vm14, %v9530_v36, %v9535_v21  ;;  %vm18102_vm14 = vmmov %vm18064_vm0 }
 0x6cf   :  { %9568 = vrot.lane.b32.xlu1 %v9567_v58, %s17455_s29  ;;  %v4850_v58 = vld [vmem:[%s16969_s5 + $0x388] sm:$0xff]  ;;  %v9582_v0 = vpack.i.bf16 %v15880_v49, %v15887_v19 }
 0x6d0   :  { %v15882_v47 = vpack.c.bf16 %v4850_v58, %v4849_v11 }
 0x6d2   :  { %18057 = vst [vmem:[#allocation43_spill] sm:$0xff] %v15882_v47  ;;  %7622 = vmatprep.subr.bf16.mxu1 %v15882_v47 }
 0x6d3   :  { %9578 = vrot.lane.b32.xlu1 %v9577_v43, %s17455_s29  ;;  %v4461_v43 = vsel %vm18059_vm5, %v9531_v42, %v9525_v28  ;;  %vm18095_vm5 = vmmov %vm18064_vm0 }
 0x6d4   :  { %v15906_v53 = vmax.f32 %v18061_v9, %v4461_v43  ;;  %v4465_v9 = vsel %vm18066_vm8, %v9535_v21, %v9536_v56  ;;  %vm18118_vm8 = vmmov %vm18064_vm0 }
 0x6d7   :  { %9583 = vrot.lane.b32.xlu1 %v9582_v0, %s9721_s27 }
 0x6e2   :  { %v9539_v11 = vpop.permute.xlu0 %9538 }
 0x6e3   :  { %v9540_v41 = vunpack.i.l.bf16 %v9539_v11 }
 0x6e6   :  { %v9549_v21 = vpop.permute.xlu0 %9548 }
 0x6e9   :  { %v4229_v58 = vpop.f32.mrb[20].mxu0 }
 0x6ea   :  { %v15895_v12 = vadd.f32 %v4229_v58, %v15352_v16  ;;  %v4231_v57 = vpop.f32.mrb[21].mxu0  ;;  %v18062_v58 = vmax.f32 %v15407_v3, 0.0 }
 0x6eb   :  { %v15898_v32 = vadd.f32 %v4231_v57, %v15352_v16  ;;  %v4450_v57 = vsel %vm18064_vm0, %v18063_v46, %v9540_v41  ;;  %v18068_v46 = vmax.f32 %v15420_v14, 0.0 }
 0x6ec   :  { %v17370_v47 = vmax.f32 %v15895_v12, 0.0  ;;  %v15910_v62 = vmax.f32 %v18062_v58, %v4464_v38  ;;  %v9541_v38 = vunpack.i.h.bf16 %v9539_v11 }
 0x6ed   :  { %v17367_v0 = vmax.f32 %v15898_v32, 0.0  ;;  %v4235_v31 = vpop.f32.mrb[22].mxu0 }
 0x6ee   :  { %v15917_v28 = vadd.f32 %v4235_v31, %v15361_v52  ;;  %v4237_v42 = vpop.f32.mrb[23].mxu0  ;;  %v18067_v31 = vmax.f32 %v15413_v39, 0.0  ;;  %v9592_v40 = vpack.i.bf16 %v15910_v62, %v15906_v53  ;;  %v4451_v39 = vsel %vm18069_vm10, %v9540_v41, %v9541_v38  ;;  %vm18119_vm10 = vmmov %vm18064_vm0 }
 0x6ef   :  { %v9572_v36 = vpack.i.bf16 %v17367_v0, %v17370_v47  ;;  %v15923_v13 = vadd.f32 %v4237_v42, %v15361_v52  ;;  %v9551_v0 = vunpack.i.h.bf16 %v9549_v21 }
 0x6f0   :  { %v17369_v3 = vmax.f32 %v15917_v28, 0.0  ;;  %v15931_v58 = vmax.f32 %v18067_v31, %v4450_v57 }
 0x6f1   :  { %18065 = vst [vmem:[#allocation37_spill] sm:$0xff] %v15923_v13  ;;  %9573 = vrot.lane.b32.xlu0 %v9572_v36, %s17455_s29  ;;  %v17368_v43 = vmax.f32 %v15923_v13, 0.0  ;;  %v15941_v36 = vmax.f32 %v18068_v46, %v4465_v9 }
 0x6f3   :  { %v9587_v42 = vpack.i.bf16 %v17368_v43, %v17369_v3  ;;  %v9602_v31 = vpack.i.bf16 %v15931_v58, %v15941_v36  ;;  %v9550_v43 = vunpack.i.l.bf16 %v9549_v21 }
 0x6f5   :  { %9593 = vrot.lane.b32.xlu0 %v9592_v40, %s9721_s27  ;;  %9588 = vrot.lane.b32.xlu1 %v9587_v42, %s17455_s29  ;;  %v18071_v40 = vmax.f32 %v15443_v6, 0.0  ;;  %v18072_v42 = vmax.f32 %v15446_v22, 0.0  ;;  %v4466_v47 = vsel %vm18073_vm9, %v9536_v56, %v9550_v43  ;;  %v4467_v21 = vsel %vm18074_vm12, %v9550_v43, %v9551_v0  ;;  %vm18126_vm9 = vmmov %vm18064_vm0 }
 0x6f6   :  { %v18076_v6 = vmax.f32 %v15427_v30, 0.0  ;;  %v18077_v22 = vmax.f32 %v15451_v18, 0.0  ;;  %vm18130_vm12 = vmmov %vm18064_vm0 }
 0x6f7   :  { %v15944_v11 = vpop.permute.xlu1 %9543  ;;  %v15956_v46 = vmax.f32 %v18071_v40, %v4451_v39 }
 0x6f8   :  { %v9545_v57 = vunpack.i.l.bf16 %v15944_v11  ;;  %v17371_v14 = vunpack.i.h.bf16 %v15944_v11  ;;  %v15972_v39 = vmax.f32 %v18076_v6, %v4466_v47 }
 0x6f9   :  { %9603 = vrot.lane.b32.xlu0 %v9602_v31, %s9721_s27  ;;  %v15976_v31 = vmax.f32 %v18077_v22, %v4467_v21 }
 0x6fa   :  { %v4452_v9 = vsel %vm18070_vm13, %v9541_v38, %v9545_v57  ;;  %v4453_v38 = vsel %vm18075_vm1, %v9545_v57, %v17371_v14  ;;  %v18085_v14 = vmax.f32 %v15458_v48, 0.0  ;;  %vm18125_vm13 = vmmov %vm18064_vm0 }
 0x6fb   :  { %v15960_v41 = vmax.f32 %v18072_v42, %v4452_v9  ;;  %18078 = vst [vmem:[#allocation36_spill] sm:$0xff] %v15976_v31  ;;  %v18079_v9 = vmax.f32 %v15469_v26, 0.0  ;;  %v9617_v56 = vpack.i.bf16 %v15976_v31, %v15972_v39  ;;  %v15986_v43 = vpop.permute.xlu0 %9553  ;;  %vm18132_vm1 = vmmov %vm18064_vm0 }
 0x6fc   :  { %v17377_v26 = vunpack.i.h.bf16 %v15986_v43  ;;  %v9555_v57 = vunpack.i.l.bf16 %v15986_v43 }
 0x6fd   :  { %v9607_v3 = vpack.i.bf16 %v15960_v41, %v15956_v46  ;;  %v15980_v40 = vmax.f32 %v18079_v9, %v4453_v38 }
 0x6ff   :  { %9608 = vrot.lane.b32.xlu0 %v9607_v3, %s9721_s27  ;;  %18080 = vst [vmem:[#allocation59_spill] sm:$0xff] %v15980_v40 }
 0x703   :  { %4591 = vrot.lane.b32.xlu0 %v15980_v40, %s9721_s27 }
 0x706   :  { %v4306_v3 = vpop.f32.mrb[20].mxu1 }
 0x707   :  { %9618 = vrot.lane.b32.xlu0 %v9617_v56, %s9721_s27  ;;  %v15990_v30 = vadd.f32 %v4306_v3, %v15352_v16  ;;  %v4308_v18 = vpop.f32.mrb[21].mxu1  ;;  %v4468_v56 = vsel %vm18083_vm15, %v9551_v0, %v9555_v57  ;;  %v4469_v3 = vsel %vm18084_vm7, %v9555_v57, %v17377_v26  ;;  %vm18133_vm15 = vmmov %vm18064_vm0 }
 0x708   :  { %v15993_v47 = vadd.f32 %v4308_v18, %v15352_v16  ;;  %v16018_v40 = vmax.f32 %v18085_v14, %v4468_v56  ;;  %v4802_v56 = vld [vmem:[%s16969_s5 + $0x208] sm:$0xff]  ;;  %vm18139_vm7 = vmmov %vm18064_vm0 }
 0x709   :  { %v17373_v42 = vmax.f32 %v15990_v30, 0.0 }
 0x70a   :  { %v17376_v21 = vmax.f32 %v15993_v47, 0.0  ;;  %v4312_v38 = vpop.f32.mrb[22].mxu1  ;;  %18086 = vst [vmem:[#allocation19_spill] sm:$0xff] %v16018_v40 }
 0x70b   :  { %v16000_v6 = vadd.f32 %v4312_v38, %v15361_v52  ;;  %v4314_v22 = vpop.f32.mrb[23].mxu1 }
 0x70c   :  { %v9597_v9 = vpack.i.bf16 %v17376_v21, %v17373_v42  ;;  %v16007_v16 = vadd.f32 %v4314_v22, %v15361_v52  ;;  %v18087_v42 = vmax.f32 %v15477_v33, 0.0  ;;  %v4851_v21 = vld [vmem:[%s16969_s5 + $0x390] sm:$0xff] }
 0x70d   :  { %18081 = vst [vmem:[#allocation30_spill] sm:$0xff] %v16000_v6  ;;  %v17375_v18 = vmax.f32 %v16000_v6, 0.0 }
 0x70e   :  { %18082 = vst [vmem:[#allocation42_spill] sm:$0xff] %v16007_v16  ;;  %v17374_v38 = vmax.f32 %v16007_v16, 0.0  ;;  %9598 = vrot.lane.b32.xlu1 %v9597_v9, %s17455_s29  ;;  %v16022_v52 = vmax.f32 %v18087_v42, %v4469_v3  ;;  %v4801_v42 = vld [vmem:[%s16969_s5 + $0x200] sm:$0xff] }
 0x710   :  { %18088 = vst [vmem:[#allocation40_spill] sm:$0xff] %v16022_v52  ;;  %v9612_v0 = vpack.i.bf16 %v17374_v38, %v17375_v18  ;;  %v9622_v57 = vpack.i.bf16 %v16022_v52, %v16018_v40  ;;  %v16054_v18 = vpack.c.bf16 %v4802_v56, %v4801_v42 }
 0x712   :  { %9613 = vrot.lane.b32.xlu1 %v9612_v0, %s17455_s29  ;;  %v4833_v0 = vld [vmem:[%s16969_s5 + $0x300] sm:$0xff]  ;;  %18089 = vst [vmem:[#allocation61_spill] sm:$0xff] %v16054_v18 }
 0x716   :  { %9623 = vrot.lane.b32.xlu1 %v9622_v57, %s9721_s27  ;;  %v4834_v57 = vld [vmem:[%s16969_s5 + $0x308] sm:$0xff] }
 0x717   :  { %v16066_v40 = vpack.c.bf16 %v4834_v57, %v4833_v0  ;;  %v4854_v57 = vld [vmem:[%s16969_s5 + $0x3a8] sm:$0xff] }
 0x719   :  { %18090 = vst [vmem:[#allocation65_spill] sm:$0xff] %v16066_v40 }
 0x72b   :  { %v9559_v22 = vpop.permute.xlu1 %9558 }
 0x72c   :  { %v9561_v48 = vunpack.i.h.bf16 %v9559_v22  ;;  %v9560_v14 = vunpack.i.l.bf16 %v9559_v22 }
 0x72e   :  { %v4642_v9 = vsel %vm712_vm11, %v9560_v14, %v9561_v48 }
 0x72f   :  { %v4706_v33 = vmax.f32 %v15698_v50, %v4642_v9  ;;  %v4819_v9 = vld [vmem:[%s16969_s5 + $0x290] sm:$0xff] }
 0x731   :  { %4929 = vmatprep.mubr.f32.mxu0 %v4706_v33  ;;  %v4820_v33 = vld [vmem:[%s16969_s5 + $0x298] sm:$0xff] }
 0x732   :  { %v16073_v13 = vpack.c.bf16 %v4820_v33, %v4819_v9  ;;  %v18096_v33 = vmax.f32 %v15472_v45, 0.0  ;;  %v4806_v45 = vld [vmem:[%s16969_s5 + $0x228] sm:$0xff] }
 0x734   :  { %18091 = vst [vmem:[#allocation64_spill] sm:$0xff] %v16073_v13 }
 0x73b   :  { %v16052_v38 = vpop.permute.xlu0 %4583 }
 0x73d   :  { %v9564_v3 = vpop.permute.xlu1 %9563 }
 0x73e   :  { %v9566_v22 = vunpack.i.h.bf16 %v9564_v3  ;;  %v9565_v50 = vunpack.i.l.bf16 %v9564_v3  ;;  %v4852_v3 = vld [vmem:[%s16969_s5 + $0x398] sm:$0xff] }
 0x740   :  { %v4641_v26 = vsel %vm712_vm11, %v9565_v50, %v9560_v14  ;;  %v4643_v52 = vsel %vm712_vm11, %v9561_v48, %v9566_v22  ;;  %v4644_v31 = vsel %vm712_vm11, %v9566_v22, %v16052_v38  ;;  %v4803_v14 = vld [vmem:[%s16969_s5 + $0x210] sm:$0xff]  ;;  %v4804_v48 = vld [vmem:[%s16969_s5 + $0x218] sm:$0xff]  ;;  %v18093_v22 = vunpack.i.h.bf16 %v15944_v11 }
 0x741   :  { %v4705_v42 = vmax.f32 %v15828_v7, %v4641_v26  ;;  %v4707_v56 = vmax.f32 %v15702_v24, %v4643_v52  ;;  %v16070_v16 = vpop.permute.xlu1 %9568  ;;  %v4708_v6 = vmax.f32 %v15832_v27, %v4644_v31  ;;  %v16083_v26 = vpack.c.bf16 %v4852_v3, %v4851_v21  ;;  %v4835_v24 = vld [vmem:[%s16969_s5 + $0x310] sm:$0xff]  ;;  %v4836_v27 = vld [vmem:[%s16969_s5 + $0x318] sm:$0xff]  ;;  %v4821_v31 = vld [vmem:[%s16969_s5 + $0x2a0] sm:$0xff] }
 0x742   :  { %v17385_v0 = vunpack.i.h.bf16 %v16070_v16  ;;  %v9570_v7 = vunpack.i.l.bf16 %v16070_v16  ;;  %v4822_v52 = vld [vmem:[%s16969_s5 + $0x2a8] sm:$0xff]  ;;  %v4853_v21 = vld [vmem:[%s16969_s5 + $0x3a0] sm:$0xff]  ;;  %v16110_v9 = vpack.c.bf16 %v4804_v48, %v4803_v14 }
 0x743   :  { %18092 = vst [vmem:[#allocation47_spill] sm:$0xff] %v16083_v26  ;;  %4930 = vmatmul.mubr.f32.vlgmr.msra.gmra.mrb[24].mxu0 %v4705_v42  ;;  %5004 = vmatprep.mubr.f32.mxu1 %v4708_v6  ;;  %v18097_v42 = vmax.f32 %v15807_v8, 0.0  ;;  %v16135_v48 = vpack.c.bf16 %v4822_v52, %v4821_v31  ;;  %v4824_v31 = vld [vmem:[%s16969_s5 + $0x2b8] sm:$0xff]  ;;  %v4855_v52 = vld [vmem:[%s16969_s5 + $0x3b0] sm:$0xff] }
 0x744   :  { %v4454_v50 = vsel %vm18094_vm6, %v18093_v22, %v9570_v7  ;;  %v4455_v6 = vsel %vm18095_vm5, %v9570_v7, %v17385_v0  ;;  %5005 = vmatmul.mubr.f32.vlgmr.msra.gmra.mrb[24].mxu1 %v4707_v56  ;;  %7592 = vmatpush3.bf16.msra.mxu0 %v16054_v18  ;;  %v16124_v7 = vpack.c.bf16 %v4836_v27, %v4835_v24  ;;  %v4805_v56 = vld [vmem:[%s16969_s5 + $0x220] sm:$0xff]  ;;  %v4838_v27 = vld [vmem:[%s16969_s5 + $0x328] sm:$0xff]  ;;  %vm18140_vm6 = vmmov %vm18064_vm0 }
 0x745   :  { %v16114_v3 = vmax.f32 %v18096_v33, %v4454_v50  ;;  %v16118_v37 = vmax.f32 %v18097_v42, %v4455_v6  ;;  %v16120_v11 = vpop.permute.xlu1 %9578  ;;  %7624 = vmatpush3.bf16.msra.mxu1 %v16066_v40  ;;  %7594 = vmatprep.subr.bf16.mxu0 %v16073_v13  ;;  %v16137_v22 = vpack.c.bf16 %v4854_v57, %v4853_v21  ;;  %v4837_v24 = vld [vmem:[%s16969_s5 + $0x320] sm:$0xff]  ;;  %v4823_v50 = vld [vmem:[%s16969_s5 + $0x2b0] sm:$0xff]  ;;  %v4856_v21 = vld [vmem:[%s16969_s5 + $0x3b8] sm:$0xff]  ;;  %v18101_v57 = vunpack.i.h.bf16 %v15986_v43 }
 0x746   :  { %18099 = vst [vmem:[#allocation28_spill] sm:$0xff] %v16124_v7  ;;  %v17391_v8 = vunpack.i.h.bf16 %v16120_v11  ;;  %v9580_v14 = vunpack.i.l.bf16 %v16120_v11  ;;  %7626 = vmatprep.subr.bf16.mxu1 %v16083_v26  ;;  %v16166_v0 = vpack.c.bf16 %v4806_v45, %v4805_v56  ;;  %v18103_v26 = vmax.f32 %v15484_v63, 0.0  ;;  %v4807_v56 = vld [vmem:[%s16969_s5 + $0x230] sm:$0xff]  ;;  %v4808_v63 = vld [vmem:[%s16969_s5 + $0x238] sm:$0xff]  ;;  %vm18141_vm5 = vmmov %vm18064_vm0 }
 0x747   :  { %18098 = vst [vmem:[#allocation48_spill] sm:$0xff] %v16118_v37  ;;  %18100 = vst [vmem:[#allocation67_spill] sm:$0xff] %v16137_v22  ;;  %v9627_v6 = vpack.i.bf16 %v16118_v37, %v16114_v3  ;;  %v18104_v37 = vmax.f32 %v15841_v20, 0.0  ;;  %v16180_v43 = vpack.c.bf16 %v4838_v27, %v4837_v24  ;;  %v16195_v45 = vpack.c.bf16 %v4824_v31, %v4823_v50  ;;  %v4840_v24 = vld [vmem:[%s16969_s5 + $0x338] sm:$0xff]  ;;  %v4825_v27 = vld [vmem:[%s16969_s5 + $0x2c0] sm:$0xff] }
 0x748   :  { %v4470_v33 = vsel %vm18102_vm14, %v18101_v57, %v9580_v14  ;;  %v4471_v42 = vsel %vm18064_vm0, %v9580_v14, %v17391_v8  ;;  %7596 = vmatpush3.bf16.msra.mxu0 %v16110_v9  ;;  %v16197_v14 = vpack.c.bf16 %v4856_v21, %v4855_v52  ;;  %v4857_v50 = vld [vmem:[%s16969_s5 + $0x3c0] sm:$0xff]  ;;  %v4858_v31 = vld [vmem:[%s16969_s5 + $0x3c8] sm:$0xff]  ;;  %v16222_v21 = vpack.c.bf16 %v4808_v63, %v4807_v56 }
 0x749   :  { %v16170_v40 = vmax.f32 %v18103_v26, %v4470_v33  ;;  %v16174_v13 = vmax.f32 %v18104_v37, %v4471_v42  ;;  %v16176_v18 = vpop.permute.xlu1 %9583  ;;  %9628 = vrot.lane.b32.xlu0 %v9627_v6, %s9721_s27  ;;  %7628 = vmatpush3.bf16.msra.mxu1 %v16124_v7  ;;  %18106 = vst [vmem:[#allocation60_spill] sm:$0xff] %v16180_v43  ;;  %v4839_v37 = vld [vmem:[%s16969_s5 + $0x330] sm:$0xff]  ;;  %v4826_v6 = vld [vmem:[%s16969_s5 + $0x2c8] sm:$0xff]  ;;  %v4841_v56 = vld [vmem:[%s16969_s5 + $0x340] sm:$0xff]  ;;  %vm5180_vm14 = vcmask 401608   ;;  %vm5186_vm0 = vcmask 606608  }
 0x74a   :  { %v17393_v20 = vunpack.i.h.bf16 %v16176_v18  ;;  %v17394_v26 = vunpack.i.l.bf16 %v16176_v18  ;;  %7598 = vmatprep.subr.bf16.mxu0 %v16135_v48  ;;  %7630 = vmatprep.subr.bf16.mxu1 %v16137_v22  ;;  %18107 = vst [vmem:[#allocation12_spill] sm:$0xff] %v16197_v14  ;;  %v16227_v42 = vpack.c.bf16 %v4840_v24, %v4839_v37  ;;  %v16229_v8 = vpack.c.bf16 %v4826_v6, %v4825_v27  ;;  %v4809_v22 = vld [vmem:[%s16969_s5 + $0x240] sm:$0xff]  ;;  %v4842_v63 = vld [vmem:[%s16969_s5 + $0x348] sm:$0xff]  ;;  %v4827_v37 = vld [vmem:[%s16969_s5 + $0x2d0] sm:$0xff] }
 0x74b   :  { %18105 = vst [vmem:[#allocation50_spill] sm:$0xff] %v16174_v13  ;;  %v9637_v57 = vpack.i.bf16 %v16174_v13, %v16170_v40  ;;  %v4828_v24 = vld [vmem:[%s16969_s5 + $0x2d8] sm:$0xff]  ;;  %v4859_v27 = vld [vmem:[%s16969_s5 + $0x3d0] sm:$0xff]  ;;  %v18128_v13 = vmax.f32 %v15917_v28, 0.0 }
 0x74c   :  { %v4658_v52 = vsel %vm712_vm11, %v17394_v26, %v17393_v20  ;;  %7600 = vmatpush3.bf16.msra.mxu0 %v16166_v0  ;;  %18108 = vst [vmem:[#allocation51_spill] sm:$0xff] %v16227_v42  ;;  %v4810_v20 = vld [vmem:[%s16969_s5 + $0x248] sm:$0xff]  ;;  %v4860_v6 = vld [vmem:[%s16969_s5 + $0x3d8] sm:$0xff] }
 0x74d   :  { %9638 = vrot.lane.b32.xlu0 %v9637_v57, %s9721_s27  ;;  %v4722_v33 = vmax.f32 %v15887_v19, %v4658_v52  ;;  %7632 = vmatpush3.bf16.msra.mxu1 %v16180_v43  ;;  %v16242_v19 = vpack.c.bf16 %v4858_v31, %v4857_v50  ;;  %v16260_v57 = vpack.c.bf16 %v4810_v20, %v4809_v22  ;;  %v4811_v52 = vld [vmem:[%s16969_s5 + $0x250] sm:$0xff]  ;;  %v4816_v7 = vld [vmem:[%s16969_s5 + $0x278] sm:$0xff] }
 0x74e   :  { %7602 = vmatprep.subr.bf16.mxu0 %v16195_v45  ;;  %7634 = vmatprep.subr.bf16.mxu1 %v16197_v14  ;;  %v16264_v50 = vpack.c.bf16 %v4842_v63, %v4841_v56  ;;  %v16266_v31 = vpack.c.bf16 %v4828_v24, %v4827_v37  ;;  %v4843_v22 = vld [vmem:[%s16969_s5 + $0x350] sm:$0xff]  ;;  %v16278_v20 = vpack.c.bf16 %v4860_v6, %v4859_v27  ;;  %v4844_v56 = vld [vmem:[%s16969_s5 + $0x358] sm:$0xff]  ;;  %v4829_v63 = vld [vmem:[%s16969_s5 + $0x2e0] sm:$0xff] }
 0x74f   :  { %18109 = vst [vmem:[#allocation66_spill] sm:$0xff] %v16242_v19  ;;  %4934 = vmatprep.mubr.f32.mxu0 %v4722_v33  ;;  %v4812_v33 = vld [vmem:[%s16969_s5 + $0x258] sm:$0xff]  ;;  %v4830_v37 = vld [vmem:[%s16969_s5 + $0x2e8] sm:$0xff]  ;;  %v4861_v24 = vld [vmem:[%s16969_s5 + $0x3e0] sm:$0xff]  ;;  %v16300_v26 = vpack.c.bf16 %v4844_v56, %v4843_v22 }
 0x750   :  { %7604 = vmatpush3.bf16.msra.mxu0 %v16222_v21  ;;  %18110 = vst [vmem:[#allocation41_spill] sm:$0xff] %v16264_v50  ;;  %18111 = vst [vmem:[#allocation26_spill] sm:$0xff] %v16278_v20  ;;  %v4862_v27 = vld [vmem:[%s16969_s5 + $0x3e8] sm:$0xff]  ;;  %v16296_v6 = vpack.c.bf16 %v4812_v33, %v4811_v52  ;;  %v4845_v52 = vld [vmem:[%s16969_s5 + $0x360] sm:$0xff] }
 0x751   :  { %7636 = vmatpush3.bf16.msra.mxu1 %v16227_v42  ;;  %7606 = vmatprep.subr.bf16.mxu0 %v16229_v8  ;;  %18112 = vst [vmem:[#allocation29_spill] sm:$0xff] %v16300_v26  ;;  %v4813_v42 = vld [vmem:[%s16969_s5 + $0x260] sm:$0xff]  ;;  %v4814_v14 = vld [vmem:[%s16969_s5 + $0x268] sm:$0xff]  ;;  %v16314_v33 = vpack.c.bf16 %v4862_v27, %v4861_v24  ;;  %v4831_v56 = vld [vmem:[%s16969_s5 + $0x2f0] sm:$0xff] }
 0x752   :  { %7638 = vmatprep.subr.bf16.mxu1 %v16242_v19  ;;  %v16302_v19 = vpack.c.bf16 %v4830_v37, %v4829_v63  ;;  %v4846_v22 = vld [vmem:[%s16969_s5 + $0x368] sm:$0xff]  ;;  %v4832_v63 = vld [vmem:[%s16969_s5 + $0x2f8] sm:$0xff]  ;;  %v4863_v37 = vld [vmem:[%s16969_s5 + $0x3f0] sm:$0xff]  ;;  %v16332_v27 = vpack.c.bf16 %v4814_v14, %v4813_v42 }
 0x753   :  { %18113 = vst [vmem:[#allocation52_spill] sm:$0xff] %v16314_v33  ;;  %v4864_v24 = vld [vmem:[%s16969_s5 + $0x3f8] sm:$0xff]  ;;  %v4815_v43 = vld [vmem:[%s16969_s5 + $0x270] sm:$0xff] }
 0x754   :  { %7608 = vmatpush3.bf16.msra.mxu0 %v16260_v57  ;;  %v16347_v14 = vpack.c.bf16 %v4864_v24, %v4863_v37  ;;  %v4847_v42 = vld [vmem:[%s16969_s5 + $0x370] sm:$0xff]  ;;  %v18117_v37 = vunpack.i.h.bf16 %v16070_v16 }
 0x755   :  { %7640 = vmatpush3.bf16.msra.mxu1 %v16264_v50  ;;  %7610 = vmatprep.subr.bf16.mxu0 %v16266_v31  ;;  %v16338_v50 = vpack.c.bf16 %v4832_v63, %v4831_v56 }
 0x756   :  { %7642 = vmatprep.subr.bf16.mxu1 %v16278_v20  ;;  %v16336_v20 = vpack.c.bf16 %v4846_v22, %v4845_v52  ;;  %18115 = vst [vmem:[#allocation49_spill] sm:$0xff] %v16347_v14  ;;  %v4848_v52 = vld [vmem:[%s16969_s5 + $0x378] sm:$0xff]  ;;  %v16356_v22 = vpack.c.bf16 %v4816_v7, %v4815_v43  ;;  %s9735_s5 = smov 25  }
 0x757   :  { %v16360_v56 = vpack.c.bf16 %v4848_v52, %v4847_v42  ;;  %v18120_v52 = vmax.f32 %v15815_v5, 0.0  ;;  %v18123_v5 = vunpack.i.l.bf16 %v16176_v18 }
 0x758   :  { %7612 = vmatpush3.bf16.msra.mxu0 %v16296_v6  ;;  %18114 = vst [vmem:[#allocation6_spill] sm:$0xff] %v16336_v20 }
 0x759   :  { %7644 = vmatpush3.bf16.msra.mxu1 %v16300_v26  ;;  %7614 = vmatprep.subr.bf16.mxu0 %v16302_v19  ;;  %18116 = vst [vmem:[#allocation9_spill] sm:$0xff] %v16360_v56 }
 0x75a   :  { %7646 = vmatprep.subr.bf16.mxu1 %v16314_v33 }
 0x75c   :  { %7616 = vmatpush3.bf16.msra.mxu0 %v16332_v27 }
 0x75d   :  { %7648 = vmatpush3.bf16.msra.mxu1 %v16336_v20  ;;  %7618 = vmatprep.subr.bf16.mxu0 %v16338_v50 }
 0x75e   :  { %7650 = vmatprep.subr.bf16.mxu1 %v16347_v14 }
 0x760   :  { %7620 = vmatpush3.bf16.msra.mxu0 %v16356_v22 }
 0x761   :  { %7652 = vmatpush3.bf16.msra.mxu1 %v16360_v56  ;;  %7654 = vmatprep.subr.bf16.mxu0 %v15503_v60  ;;  %v18121_v60 = vmax.f32 %v15895_v12, 0.0  ;;  %v18124_v12 = vunpack.i.h.bf16 %v16120_v11 }
 0x762   :  { %7686 = vmatprep.subr.bf16.mxu1 %v15516_v51 }
 0x763   :  { %v16367_v63 = vpop.permute.xlu0 %9573 }
 0x764   :  { %v17407_v7 = vunpack.i.h.bf16 %v16367_v63  ;;  %v9575_v43 = vunpack.i.l.bf16 %v16367_v63 }
 0x766   :  { %v4456_v24 = vsel %vm18118_vm8, %v18117_v37, %v9575_v43  ;;  %v4457_v42 = vsel %vm18119_vm10, %v9575_v43, %v17407_v7  ;;  %v18127_v7 = vmax.f32 %v15844_v44, 0.0  ;;  %vm5215_vm8 = vcmask 1041384  }
 0x767   :  { %v16379_v56 = vmax.f32 %v18120_v52, %v4456_v24  ;;  %v16383_v51 = vmax.f32 %v18121_v60, %v4457_v42  ;;  %v9594_v14 = vpop.permute.xlu0 %9593  ;;  %v16385_v33 = vpop.permute.xlu1 %9588  ;;  %vm5216_vm10 = vcmask 174082  }
 0x768   :  { %v9595_v20 = vunpack.i.l.bf16 %v9594_v14  ;;  %v9596_v26 = vunpack.i.h.bf16 %v9594_v14  ;;  %v9591_v16 = vunpack.i.h.bf16 %v16385_v33  ;;  %v9590_v37 = vunpack.i.l.bf16 %v16385_v33 }
 0x769   :  { %18122 = vst [vmem:[#allocation17_spill] sm:$0xff] %v16383_v51  ;;  %v9632_v43 = vpack.i.bf16 %v16383_v51, %v16379_v56 }
 0x76a   :  { %v4657_v24 = vsel %vm712_vm11, %v9595_v20, %v18123_v5  ;;  %v4472_v42 = vsel %vm18125_vm13, %v18124_v12, %v9590_v37  ;;  %v4473_v52 = vsel %vm18126_vm9, %v9590_v37, %v9591_v16  ;;  %v18129_v5 = vunpack.i.h.bf16 %v16176_v18 }
 0x76b   :  { %v9604_v14 = vpop.permute.xlu0 %9603  ;;  %9633 = vrot.lane.b32.xlu1 %v9632_v43, %s9721_s27  ;;  %v4721_v60 = vmax.f32 %v15906_v53, %v4657_v24  ;;  %v16404_v51 = vmax.f32 %v18127_v7, %v4472_v42  ;;  %v16408_v20 = vmax.f32 %v18128_v13, %v4473_v52  ;;  %vm5193_vm13 = vcmask 811608  }
 0x76c   :  { %v9605_v11 = vunpack.i.l.bf16 %v9604_v14  ;;  %v4659_v12 = vsel %vm712_vm11, %v18129_v5, %v9596_v26  ;;  %v9606_v37 = vunpack.i.h.bf16 %v9604_v14  ;;  %vm5206_vm9 = vcmask 1016608  }
 0x76d   :  { %4935 = vmatmul.mubr.f32.gmra.mrb[26].mxu0 %v4721_v60  ;;  %v9642_v43 = vpack.i.bf16 %v16408_v20, %v16404_v51  ;;  %v4723_v28 = vmax.f32 %v15880_v49, %v4659_v12 }
 0x76e   :  { %v4660_v53 = vsel %vm712_vm11, %v9596_v26, %v9605_v11  ;;  %v4645_v18 = vsel %vm712_vm11, %v16052_v38, %v9606_v37 }
 0x76f   :  { %v4724_v44 = vmax.f32 %v15910_v62, %v4660_v53  ;;  %9643 = vrot.lane.b32.xlu1 %v9642_v43, %s9721_s27  ;;  %v4709_v26 = vmax.f32 %v15836_v25, %v4645_v18 }
 0x771   :  { %v9609_v7 = vpop.permute.xlu0 %9608  ;;  %5009 = vmatprep.mubr.f32.mxu1 %v4724_v44  ;;  %v18138_v44 = vld [vmem:[#allocation44_spill] sm:$0xff] }
 0x772   :  { %v9611_v13 = vunpack.i.h.bf16 %v9609_v7  ;;  %v9610_v24 = vunpack.i.l.bf16 %v9609_v7  ;;  %5010 = vmatmul.mubr.f32.gmra.mrb[26].mxu1 %v4723_v28  ;;  %v18142_v28 = vld [vmem:[#allocation23_spill] sm:$0xff] }
 0x774   :  { %v4646_v42 = vsel %vm712_vm11, %v9606_v37, %v9610_v24  ;;  %v4647_v52 = vsel %vm712_vm11, %v9610_v24, %v9611_v13 }
 0x775   :  { %v16423_v14 = vpop.permute.xlu0 %4591  ;;  %v4710_v62 = vmax.f32 %v15931_v58, %v4646_v42  ;;  %v4711_v5 = vmax.f32 %v15956_v46, %v4647_v52  ;;  %v18145_v42 = vld [vmem:[#allocation30_spill] sm:$0xff] }
 0x776   :  { %v4648_v49 = vsel %vm712_vm11, %v9611_v13, %v16423_v14  ;;  %v18143_v13 = vld [vmem:[#allocation37_spill] sm:$0xff]  ;;  %v18146_v52 = vmax.f32 %v18145_v42, 0.0 }
 0x777   :  { %v4712_v60 = vmax.f32 %v15960_v41, %v4648_v49  ;;  %5079 = vmatprep.mubr.f32.mxu0 %v4710_v62  ;;  %v18144_v24 = vmax.f32 %v18143_v13, 0.0  ;;  %v18148_v49 = vld [vmem:[#allocation42_spill] sm:$0xff] }
 0x778   :  { %5080 = vmatmul.mubr.f32.vlgmr.msra.gmra.mrb[28].mxu0 %v4709_v26 }
 0x779   :  { %v9619_v38 = vpop.permute.xlu0 %9618  ;;  %5154 = vmatprep.mubr.f32.mxu1 %v4712_v60  ;;  %7656 = vmatpush3.bf16.msra.mxu0 %v15514_v1  ;;  %v18149_v60 = vmax.f32 %v18148_v49, 0.0  ;;  %v18168_v49 = vld [vmem:[#allocation40_spill] sm:$0xff] }
 0x77a   :  { %v9621_v12 = vunpack.i.h.bf16 %v9619_v38  ;;  %v9620_v37 = vunpack.i.l.bf16 %v9619_v38  ;;  %5155 = vmatmul.mubr.f32.vlgmr.msra.gmra.mrb[28].mxu1 %v4711_v5  ;;  %7658 = vmatprep.subr.bf16.mxu0 %v15541_v2 }
 0x77b   :  { %7688 = vmatpush3.bf16.msra.mxu1 %v15528_v34 }
 0x77c   :  { %v4662_v25 = vsel %vm712_vm11, %v9620_v37, %v9621_v12  ;;  %v4661_v58 = vsel %vm712_vm11, %v9605_v11, %v9620_v37  ;;  %7690 = vmatprep.subr.bf16.mxu1 %v15555_v59  ;;  %v18131_v59 = vunpack.i.h.bf16 %v16367_v63  ;;  %v4541_v63 = vmax.f32 %v17906_v61, 0.0  ;;  %v18150_v37 = vld [vmem:[#allocation25_spill] sm:$0xff] }
 0x77d   :  { %v4726_v46 = vmax.f32 %v15972_v39, %v4662_v25  ;;  %v4725_v41 = vmax.f32 %v15941_v36, %v4661_v58  ;;  %7660 = vmatpush3.bf16.msra.mxu0 %v15543_v10  ;;  %v18135_v36 = vmax.f32 %v15898_v32, 0.0  ;;  %v18151_v25 = vld [vmem:[#allocation11_spill] sm:$0xff] }
 0x77e   :  { %7662 = vmatprep.subr.bf16.mxu0 %v15569_v54 }
 0x77f   :  { %5084 = vmatprep.mubr.f32.mxu0 %v4726_v46  ;;  %7692 = vmatpush3.bf16.msra.mxu1 %v15567_v55 }
 0x780   :  { %5085 = vmatmul.mubr.f32.gmra.mrb[30].mxu0 %v4725_v41  ;;  %7694 = vmatprep.subr.bf16.mxu1 %v15587_v4  ;;  %v9599_v1 = vpop.permute.xlu1 %9598  ;;  %v18134_v4 = vmax.f32 %v15993_v47, 0.0  ;;  %v18152_v41 = vld [vmem:[#allocation16_spill] sm:$0xff] }
 0x781   :  { %7664 = vmatpush3.bf16.msra.mxu0 %v15585_v15  ;;  %v9601_v34 = vunpack.i.h.bf16 %v9599_v1  ;;  %v9600_v2 = vunpack.i.l.bf16 %v9599_v1  ;;  %v18153_v1 = vld [vmem:[#allocation19_spill] sm:$0xff] }
 0x782   :  { %7666 = vmatprep.subr.bf16.mxu0 %v15617_v23 }
 0x783   :  { %7696 = vmatpush3.bf16.msra.mxu1 %v15604_v29  ;;  %v4460_v10 = vsel %vm18130_vm12, %v9601_v34, %v17906_v61  ;;  %v4458_v54 = vsel %vm18132_vm1, %v18131_v59, %v9600_v2  ;;  %v4459_v55 = vsel %vm18133_vm15, %v9600_v2, %v9601_v34  ;;  %v18136_v29 = vmax.f32 %v15990_v30, 0.0  ;;  %v18154_v2 = vld [vmem:[#allocation36_spill] sm:$0xff]  ;;  %v18155_v59 = vld [vmem:[#allocation35_spill] sm:$0xff]  ;;  %vm16607_vm12 = vmor %vm5216_vm10, %vm5215_vm8 }
 0x784   :  { %7698 = vmatprep.subr.bf16.mxu1 %v15631_v35  ;;  %v16455_v15 = vmax.f32 %v18134_v4, %v4460_v10  ;;  %v16459_v23 = vmax.f32 %v18135_v36, %v4458_v54  ;;  %v9614_v11 = vpop.permute.xlu1 %9613  ;;  %v18137_v35 = vld [vmem:[#allocation27_spill] sm:$0xff]  ;;  %v18156_v54 = vld [vmem:[#allocation14_spill] sm:$0xff]  ;;  %v18159_v4 = vld [vmem:[#allocation24_spill] sm:$0xff]  ;;  %vm5223_vm1 = vcmask 377008   ;;  %vm5230_vm15 = vcmask 582008  }
 0x785   :  { %v16463_v39 = vmax.f32 %v18136_v29, %v4459_v55  ;;  %7668 = vmatpush3.bf16.msra.mxu0 %v15619_v17  ;;  %v9616_v43 = vunpack.i.h.bf16 %v9614_v11  ;;  %v9615_v53 = vunpack.i.l.bf16 %v9614_v11  ;;  %v18157_v55 = vld [vmem:[#allocation15_spill] sm:$0xff]  ;;  %v18160_v36 = vld [vmem:[#allocation57_spill] sm:$0xff]  ;;  %v18161_v29 = vld [vmem:[#allocation34_spill] sm:$0xff]  ;;  %vm17413_vm10 = vcmask 352408  }
 0x786   :  { %7670 = vmatprep.subr.bf16.mxu0 %v18137_v35  ;;  %v9652_v47 = vpack.i.bf16 %v4541_v63, %v16455_v15  ;;  %v18162_v11 = vld [vmem:[#allocation38_spill] sm:$0xff]  ;;  %v18163_v63 = vld [vmem:[#allocation39_spill] sm:$0xff] }
 0x787   :  { %v9647_v32 = vpack.i.bf16 %v16463_v39, %v16459_v23  ;;  %7700 = vmatpush3.bf16.msra.mxu1 %v18138_v44  ;;  %v4476_v30 = vsel %vm18139_vm7, %v9616_v43, %v17906_v61  ;;  %v4474_v7 = vsel %vm18140_vm6, %v9591_v16, %v9615_v53  ;;  %v4475_v17 = vsel %vm18141_vm5, %v9615_v53, %v9616_v43  ;;  %v18147_v16 = vld [vmem:[#allocation32_spill] sm:$0xff]  ;;  %v18164_v43 = vld [vmem:[#allocation31_spill] sm:$0xff]  ;;  %v18165_v53 = vld [vmem:[#allocation58_spill] sm:$0xff] }
 0x788   :  { %7702 = vmatprep.subr.bf16.mxu1 %v18142_v28  ;;  %v16481_v18 = vmax.f32 %v18144_v24, %v4474_v7  ;;  %v16485_v62 = vmax.f32 %v18146_v52, %v4475_v17  ;;  %v9624_v26 = vpop.permute.xlu1 %9623  ;;  %9653 = vrot.lane.b32.xlu1 %v9652_v47, %s9721_s27  ;;  %v16492_v5 = vmax.f32 %v18149_v60, %v4476_v30  ;;  %v18166_v35 = vld [vmem:[#allocation43_spill] sm:$0xff]  ;;  %vm5243_vm7 = vcmask 787008  }
 0x789   :  { %9648 = vrot.lane.b32.xlu0 %v9647_v32, %s9721_s27  ;;  %v9626_v61 = vunpack.i.h.bf16 %v9624_v26  ;;  %v9625_v33 = vunpack.i.l.bf16 %v9624_v26  ;;  %7672 = vmatpush3.bf16.msra.mxu0 %v18147_v16  ;;  %v18167_v17 = vld [vmem:[#allocation59_spill] sm:$0xff]  ;;  %vm5258_vm6 = vcmask 1041360   ;;  %vm5259_vm5 = vcmask 149506  }
 0x78a   :  { %v9657_v38 = vpack.i.bf16 %v16485_v62, %v16481_v18  ;;  %7674 = vmatprep.subr.bf16.mxu0 %v18150_v37  ;;  %v18174_v37 = vld [vmem:[#allocation50_spill] sm:$0xff]  ;;  %vm16624_vm8 = vmor %vm5259_vm5, %vm5258_vm6  ;;  %vm17412_vm6 = vcmask 557408   ;;  %vm17411_vm5 = vcmask 762408  }
 0x78b   :  { %7704 = vmatpush3.bf16.msra.mxu1 %v18151_v25  ;;  %v4664_v58 = vsel %vm712_vm11, %v9625_v33, %v9626_v61  ;;  %v4663_v46 = vsel %vm712_vm11, %v9621_v12, %v9625_v33  ;;  %v18158_v12 = vld [vmem:[#allocation7_spill] sm:$0xff] }
 0x78c   :  { %7706 = vmatprep.subr.bf16.mxu1 %v18152_v41  ;;  %4639 = vrot.lane.b32.xlu1 %v16492_v5, %s9721_s27  ;;  %v4728_v34 = vmax.f32 %v18153_v1, %v4664_v58  ;;  %v4727_v10 = vmax.f32 %v18154_v2, %v4663_v46  ;;  %v18176_v58 = vld [vmem:[#allocation67_spill] sm:$0xff]  ;;  %v18177_v46 = vld [vmem:[#allocation60_spill] sm:$0xff]  ;;  %v18181_v2 = vld [vmem:[#allocation41_spill] sm:$0xff] }
 0x78d   :  { %9658 = vrot.lane.b32.xlu0 %v9657_v38, %s9721_s27  ;;  %7676 = vmatpush3.bf16.msra.mxu0 %v18155_v59  ;;  %v18170_v38 = vld [vmem:[#allocation64_spill] sm:$0xff]  ;;  %v18179_v1 = vld [vmem:[#allocation51_spill] sm:$0xff]  ;;  %s9736_s27 = smov 50  }
 0x78e   :  { %5159 = vmatprep.mubr.f32.mxu1 %v4728_v34  ;;  %7678 = vmatprep.subr.bf16.mxu0 %v18156_v54  ;;  %v18178_v41 = vld [vmem:[#allocation12_spill] sm:$0xff]  ;;  %v18180_v34 = vld [vmem:[#allocation66_spill] sm:$0xff] }
 0x78f   :  { %5160 = vmatmul.mubr.f32.gmra.mrb[30].mxu1 %v4727_v10  ;;  %v18183_v10 = vld [vmem:[#allocation29_spill] sm:$0xff] }
 0x790   :  { %7708 = vmatpush3.bf16.msra.mxu1 %v18157_v55 }
 0x791   :  { %7680 = vmatpush3.bf16.msra.mxu0 %v18158_v12  ;;  %7710 = vmatprep.subr.bf16.mxu1 %v18159_v4 }
 0x792   :  { %7682 = vmatprep.subr.bf16.mxu0 %v18160_v36 }
 0x794   :  { %7712 = vmatpush3.bf16.msra.mxu1 %v18161_v29  ;;  %v18184_v29 = vld [vmem:[#allocation52_spill] sm:$0xff] }
 0x795   :  { %7684 = vmatpush3.bf16.msra.mxu0 %v18162_v11  ;;  %7714 = vmatprep.subr.bf16.mxu1 %v18163_v63 }
 0x796   :  { %7718 = vmatprep.subr.bf16.mxu0 %v18164_v43 }
 0x798   :  { %7716 = vmatpush3.bf16.msra.mxu1 %v18165_v53  ;;  %v18185_v53 = vld [vmem:[#allocation17_spill] sm:$0xff] }
 0x799   :  { %7750 = vmatprep.subr.bf16.mxu1 %v18166_v35 }
 0x7bb   :  { %v9629_v47 = vpop.permute.xlu0 %9628 }
 0x7bc   :  { %v9631_v32 = vunpack.i.h.bf16 %v9629_v47  ;;  %v9630_v44 = vunpack.i.l.bf16 %v9629_v47  ;;  %v18186_v47 = vld [vmem:[#allocation6_spill] sm:$0xff] }
 0x7be   :  { %v4649_v30 = vsel %vm712_vm11, %v16423_v14, %v9630_v44  ;;  %v4650_v7 = vsel %vm712_vm11, %v9630_v44, %v9631_v32  ;;  %v18169_v14 = vld [vmem:[#allocation61_spill] sm:$0xff] }
 0x7bf   :  { %v4713_v28 = vmax.f32 %v18167_v17, %v4649_v30  ;;  %v9639_v13 = vpop.permute.xlu0 %9638  ;;  %v4714_v24 = vmax.f32 %v16114_v3, %v4650_v7 }
 0x7c0   :  { %v9641_v42 = vunpack.i.h.bf16 %v9639_v13  ;;  %v9640_v52 = vunpack.i.l.bf16 %v9639_v13  ;;  %v18187_v13 = vld [vmem:[#allocation49_spill] sm:$0xff] }
 0x7c1   :  { %5499 = vmatprep.mubr.f32.mxu0 %v4714_v24 }
 0x7c2   :  { %5500 = vmatmul.mubr.f32.vlgmr.msra.gmra.mrb[32].mxu0 %v4713_v28  ;;  %v4666_v26 = vsel %vm712_vm11, %v9640_v52, %v9641_v42  ;;  %v4665_v33 = vsel %vm712_vm11, %v9626_v61, %v9640_v52  ;;  %v18173_v61 = vld [vmem:[#allocation47_spill] sm:$0xff] }
 0x7c3   :  { %v4730_v16 = vmax.f32 %v16170_v40, %v4666_v26  ;;  %v4729_v60 = vmax.f32 %v18168_v49, %v4665_v33  ;;  %7720 = vmatpush3.bf16.msra.mxu0 %v18169_v14  ;;  %v18188_v33 = vld [vmem:[#allocation9_spill] sm:$0xff] }
 0x7c4   :  { %7722 = vmatprep.subr.bf16.mxu0 %v18170_v38 }
 0x7c5   :  { %5504 = vmatprep.mubr.f32.mxu0 %v4730_v16 }
 0x7c6   :  { %5505 = vmatmul.mubr.f32.gmra.mrb[34].mxu0 %v4729_v60 }
 0x7c7   :  { %7724 = vmatpush3.bf16.msra.mxu0 %v16110_v9 }
 0x7c8   :  { %7726 = vmatprep.subr.bf16.mxu0 %v16135_v48  ;;  %v18171_v48 = vld [vmem:[#allocation48_spill] sm:$0xff] }
 0x7cb   :  { %7728 = vmatpush3.bf16.msra.mxu0 %v16166_v0 }
 0x7cc   :  { %7730 = vmatprep.subr.bf16.mxu0 %v16195_v45 }
 0x7cf   :  { %7732 = vmatpush3.bf16.msra.mxu0 %v16222_v21 }
 0x7d0   :  { %7734 = vmatprep.subr.bf16.mxu0 %v16229_v8 }
 0x7d3   :  { %7736 = vmatpush3.bf16.msra.mxu0 %v16260_v57 }
 0x7d4   :  { %7738 = vmatprep.subr.bf16.mxu0 %v16266_v31 }
 0x7d7   :  { %7740 = vmatpush3.bf16.msra.mxu0 %v16296_v6  ;;  %v18172_v6 = vld [vmem:[#allocation65_spill] sm:$0xff] }
 0x7d8   :  { %7742 = vmatprep.subr.bf16.mxu0 %v16302_v19 }
 0x7db   :  { %7744 = vmatpush3.bf16.msra.mxu0 %v16332_v27 }
 0x7dc   :  { %7746 = vmatprep.subr.bf16.mxu0 %v16338_v50 }
 0x7dd   :  { %v9634_v40 = vpop.permute.xlu1 %9633 }
 0x7de   :  { %v9636_v0 = vunpack.i.h.bf16 %v9634_v40  ;;  %v9635_v9 = vunpack.i.l.bf16 %v9634_v40 }
 0x7df   :  { %7748 = vmatpush3.bf16.msra.mxu0 %v16356_v22 }
 0x7e0   :  { %v4651_v3 = vsel %vm712_vm11, %v9631_v32, %v9635_v9  ;;  %v4652_v8 = vsel %vm712_vm11, %v9635_v9, %v9636_v0 }
 0x7e1   :  { %v4715_v45 = vmax.f32 %v18171_v48, %v4651_v3  ;;  %v4716_v21 = vmax.f32 %v16379_v56, %v4652_v8  ;;  %v9644_v57 = vpop.permute.xlu1 %9643  ;;  %v18175_v56 = vld [vmem:[#allocation28_spill] sm:$0xff] }
 0x7e2   :  { %v9646_v31 = vunpack.i.h.bf16 %v9644_v57  ;;  %v9645_v19 = vunpack.i.l.bf16 %v9644_v57 }
 0x7e3   :  { %5574 = vmatprep.mubr.f32.mxu1 %v4716_v21  ;;  %v9734_v21 = vmov 1983009808  }
 0x7e4   :  { %5575 = vmatmul.mubr.f32.vlgmr.msra.gmra.mrb[32].mxu1 %v4715_v45  ;;  %v4668_v50 = vsel %vm712_vm11, %v9645_v19, %v9646_v31  ;;  %v4667_v27 = vsel %vm712_vm11, %v9641_v42, %v9645_v19  ;;  %v5169_v57 = vunpack.c.l.s4 %v9734_v21 }
 0x7e5   :  { %7752 = vmatpush3.bf16.msra.mxu1 %v18172_v6  ;;  %v4732_v22 = vmax.f32 %v16404_v51, %v4668_v50  ;;  %v4731_v25 = vmax.f32 %v18174_v37, %v4667_v27  ;;  %v18182_v51 = vld [vmem:[#allocation26_spill] sm:$0xff] }
 0x7e6   :  { %7754 = vmatprep.subr.bf16.mxu1 %v18173_v61 }
 0x7e7   :  { %5579 = vmatprep.mubr.f32.mxu1 %v4732_v22 }
 0x7e8   :  { %5580 = vmatmul.mubr.f32.gmra.mrb[34].mxu1 %v4731_v25 }
 0x7e9   :  { %7756 = vmatpush3.bf16.msra.mxu1 %v18175_v56 }
 0x7ea   :  { %7758 = vmatprep.subr.bf16.mxu1 %v18176_v58 }
 0x7ed   :  { %7760 = vmatpush3.bf16.msra.mxu1 %v18177_v46 }
 0x7ee   :  { %7762 = vmatprep.subr.bf16.mxu1 %v18178_v41 }
 0x7f1   :  { %7764 = vmatpush3.bf16.msra.mxu1 %v18179_v1 }
 0x7f2   :  { %7766 = vmatprep.subr.bf16.mxu1 %v18180_v34 }
 0x7f5   :  { %7768 = vmatpush3.bf16.msra.mxu1 %v18181_v2 }
 0x7f6   :  { %7770 = vmatprep.subr.bf16.mxu1 %v18182_v51 }
 0x7f9   :  { %7772 = vmatpush3.bf16.msra.mxu1 %v18183_v10 }
 0x7fa   :  { %v9654_v59 = vpop.permute.xlu1 %9653  ;;  %7774 = vmatprep.subr.bf16.mxu1 %v18184_v29 }
 0x7fb   :  { %v9649_v54 = vpop.permute.xlu0 %9648  ;;  %v9656_v55 = vunpack.i.h.bf16 %v9654_v59  ;;  %v9655_v12 = vunpack.i.l.bf16 %v9654_v59 }
 0x7fc   :  { %v9651_v4 = vunpack.i.h.bf16 %v9649_v54  ;;  %v9650_v36 = vunpack.i.l.bf16 %v9649_v54 }
 0x7fd   :  { %v4656_v43 = vsel %vm712_vm11, %v9655_v12, %v9656_v55  ;;  %7776 = vmatpush3.bf16.msra.mxu1 %v18186_v47 }
 0x7fe   :  { %v4653_v11 = vsel %vm712_vm11, %v9636_v0, %v9650_v36  ;;  %v4654_v63 = vsel %vm712_vm11, %v9650_v36, %v9651_v4  ;;  %v4640_v32 = vpop.permute.xlu1 %4639  ;;  %v4720_v7 = vmax.f32 %v16455_v15, %v4656_v43  ;;  %7778 = vmatprep.subr.bf16.mxu1 %v18187_v13  ;;  %v4655_v24 = vsel %vm712_vm11, %v9651_v4, %v9655_v12 }
 0x7ff   :  { %v4717_v35 = vmax.f32 %v18185_v53, %v4653_v11  ;;  %v9659_v44 = vpop.permute.xlu0 %9658  ;;  %v4718_v30 = vmax.f32 %v16459_v23, %v4654_v63  ;;  %v4672_v42 = vsel %vm712_vm11, %v4640_v32, %v9656_v55  ;;  %v4719_v16 = vmax.f32 %v16463_v39, %v4655_v24 }
 0x800   :  { %v9661_v17 = vunpack.i.h.bf16 %v9659_v44  ;;  %v9660_v28 = vunpack.i.l.bf16 %v9659_v44  ;;  %5724 = vmatprep.mubr.f32.mxu1 %v4720_v7  ;;  %v4736_v49 = vmax.f32 %v16492_v5, %v4672_v42 }
 0x801   :  { %5649 = vmatprep.mubr.f32.mxu0 %v4718_v30  ;;  %7780 = vmatpush3.bf16.msra.mxu1 %v18188_v33 }
 0x802   :  { %5650 = vmatmul.mubr.f32.vlgmr.msra.gmra.mrb[36].mxu0 %v4717_v35  ;;  %v4670_v52 = vsel %vm712_vm11, %v9660_v28, %v9661_v17  ;;  %v4669_v26 = vsel %vm712_vm11, %v9646_v31, %v9660_v28  ;;  %v4671_v60 = vsel %vm712_vm11, %v9661_v17, %v4640_v32  ;;  %v5171_v31 = vlaneseq }
 0x803   :  { %v4734_v23 = vmax.f32 %v16481_v18, %v4670_v52  ;;  %v4733_v15 = vmax.f32 %v16408_v20, %v4669_v26  ;;  %v4735_v14 = vmax.f32 %v16485_v62, %v4671_v60  ;;  %v5170_v62 = vunpack.c.0.s8 %v5169_v57 }
 0x804   :  { %5725 = vmatmul.mubr.f32.vlgmr.msra.gmra.mrb[36].mxu1 %v4719_v16  ;;  %v5172_v27 = vshrl.u32 %v5171_v31, 7  ;;  %vm5165_vm11 = vcmask 196608  }
 0x805   :  { %5654 = vmatprep.mubr.f32.mxu0 %v4734_v23  ;;  %5729 = vmatprep.mubr.f32.mxu1 %v4736_v49 }
 0x806   :  { %5655 = vmatmul.mubr.f32.gmra.mrb[38].mxu0 %v4733_v15  ;;  %v16581_v46 = vsub.s32 %v5170_v62, %v5172_v27 }
 0x808   :  { %5730 = vmatmul.mubr.f32.gmra.mrb[38].mxu1 %v4735_v14 }
 0x816   :  { %v6364_v38 = vpop.f32.mrb[24].mxu0 }
 0x817   :  { %v6365_v40 = vpop.f32.mrb[25].mxu0  ;;  %v6402_v0 = vpop.f32.mrb[24].mxu1 }
 0x818   :  { %v6366_v9 = vadd.f32 %v6365_v40, %v6364_v38  ;;  %v6403_v18 = vpop.f32.mrb[25].mxu1 }
 0x819   :  { %v6404_v3 = vadd.f32 %v6403_v18, %v6402_v0 }
 0x81b   :  { %v5007_v20 = vadd.f32 %v6404_v3, %v6366_v9 }
 0x840   :  { %v6367_v8 = vpop.f32.mrb[26].mxu0 }
 0x841   :  { %v6368_v39 = vpop.f32.mrb[27].mxu0 }
 0x842   :  { %v6369_v48 = vadd.f32 %v6368_v39, %v6367_v8 }
 0x845   :  { %v6405_v5 = vpop.f32.mrb[26].mxu1 }
 0x846   :  { %v6406_v45 = vpop.f32.mrb[27].mxu1 }
 0x847   :  { %v6407_v19 = vadd.f32 %v6406_v45, %v6405_v5 }
 0x849   :  { %v5012_v6 = vadd.f32 %v6407_v19, %v6369_v48 }
 0x84b   :  { %v6440_v50 = vpop.f32.mrb[28].mxu0 }
 0x84c   :  { %v6441_v22 = vpop.f32.mrb[29].mxu0 }
 0x84d   :  { %v6442_v61 = vadd.f32 %v6441_v22, %v6440_v50  ;;  %v6478_v37 = vpop.f32.mrb[28].mxu1 }
 0x84e   :  { %v6479_v25 = vpop.f32.mrb[29].mxu1 }
 0x84f   :  { %v5082_v56 = vadd.f32 %v6442_v61, %v5007_v20  ;;  %v6480_v58 = vadd.f32 %v6479_v25, %v6478_v37 }
 0x851   :  { %v5157_v41 = vadd.f32 %v6480_v58, %v5082_v56 }
 0x853   :  { %v5174_v1 = vrot.slane %v5157_v41, %v16581_v46  ;;  %v5195_v34 = vcombine.high %v5157_v41, %v5157_v41  ;;  %v6443_v2 = vpop.f32.mrb[30].mxu0  ;;  %5166 = vst.msk [vmem:[#allocation2] sm:$0x1] %vm5165_vm11, %v5157_v41 }
 0x854   :  { %v6444_v51 = vpop.f32.mrb[31].mxu0 }
 0x855   :  { %v5202_v10 = vrot.slane %v5195_v34, %v16581_v46  ;;  %v6445_v59 = vadd.f32 %v6444_v51, %v6443_v2  ;;  %v6309_v54 = vrot.slane %v5174_v1, 9  ;;  %v5182_v4 = vcombine.high %v5174_v1, %v5174_v1 }
 0x857   :  { %v5087_v55 = vadd.f32 %v6445_v59, %v5012_v6  ;;  %5177 = vrot.lane.b32.xlu0 %v6309_v54, %s9735_s5  ;;  %v6311_v12 = vrot.slane %v5202_v10, 9  ;;  %v6310_v36 = vrot.slane %v5182_v4, 9  ;;  %v5219_v43 = vcombine.high %v5202_v10, %v5202_v10 }
 0x859   :  { %5210 = vrot.lane.b32.xlu1 %v6311_v12, %s17417_s20  ;;  %v6312_v30 = vrot.slane %v5219_v43, 9 }
 0x85b   :  { %5183 = vrot.lane.b32.xlu0 %v5182_v4, %s9736_s27 }
 0x85f   :  { %5203 = vrot.lane.b32.xlu0 %v5202_v10, %s9737_s22 }
 0x862   :  { %v6481_v29 = vpop.f32.mrb[30].mxu1 }
 0x863   :  { %5190 = vrot.lane.b32.xlu0 %v6310_v36, %s9738_s26  ;;  %v6482_v11 = vpop.f32.mrb[31].mxu1 }
 0x864   :  { %v6483_v63 = vadd.f32 %v6482_v11, %v6481_v29 }
 0x866   :  { %v5162_v53 = vadd.f32 %v6483_v63, %v5087_v55 }
 0x867   :  { %5220 = vrot.lane.b32.xlu0 %v5219_v43, %s9739_s17 }
 0x868   :  { %v5239_v35 = vrot.slane %v5162_v53, %v16581_v46  ;;  %v5269_v47 = vcombine.high %v5162_v53, %v5162_v53 }
 0x86a   :  { %v5276_v32 = vrot.slane %v5269_v47, %v16581_v46  ;;  %v5252_v44 = vcombine.high %v5239_v35, %v5239_v35  ;;  %v6313_v28 = vrot.slane %v5239_v35, 9 }
 0x86b   :  { %5240 = vrot.lane.b32.xlu0 %v5239_v35, %s9740_s3 }
 0x86c   :  { %5253 = vrot.lane.b32.xlu1 %v5252_v44, %s9732_s25  ;;  %v16596_v7 = vcombine.high %v5276_v32, %v5276_v32  ;;  %v6314_v13 = vrot.slane %v5252_v44, 9  ;;  %v6315_v24 = vrot.slane %v5276_v32, 9 }
 0x86e   :  { %v6316_v17 = vrot.slane %v16596_v7, 9 }
 0x86f   :  { %5227 = vrot.lane.b32.xlu0 %v6312_v30, %s9741_s14 }
 0x870   :  { %5297 = vrot.lane.b32.xlu1 %v6316_v17, %s9742_s28 }
 0x873   :  { %5247 = vrot.lane.b32.xlu0 %v6313_v28, %s17522_s16  ;;  %v5887_v28 = vld [vmem:[%s16970_s6 + $0x100] sm:$0xff] }
 0x877   :  { %5277 = vrot.lane.b32.xlu0 %v5276_v32, %s9743_s13 }
 0x87b   :  { %5264 = vrot.lane.b32.xlu0 %v6314_v13, %s9744_s18  ;;  %v5888_v13 = vld [vmem:[%s16970_s6 + $0x108] sm:$0xff] }
 0x87f   :  { %5284 = vrot.lane.b32.xlu0 %v6315_v24, %s9745_s0  ;;  %v7814_v24 = vpack.c.bf16 %v5888_v13, %v5887_v28 }
 0x895   :  { %v6516_v42 = vpop.f32.mrb[32].mxu0 }
 0x896   :  { %v6517_v52 = vpop.f32.mrb[33].mxu0 }
 0x897   :  { %v6518_v26 = vadd.f32 %v6517_v52, %v6516_v42  ;;  %v5871_v42 = vld [vmem:[%s16970_s6 + $0x80] sm:$0xff] }
 0x898   :  { %v5855_v52 = vld [vmem:[%s16970_s6] sm:$0xff] }
 0x899   :  { %v6519_v33 = vpop.f32.mrb[34].mxu0 }
 0x89a   :  { %v6520_v23 = vpop.f32.mrb[35].mxu0 }
 0x89b   :  { %v6521_v15 = vadd.f32 %v6520_v23, %v6519_v33  ;;  %v5856_v23 = vld [vmem:[%s16970_s6 + $0x8] sm:$0xff] }
 0x8b7   :  { %v6554_v16 = vpop.f32.mrb[32].mxu1 }
 0x8b8   :  { %v6555_v49 = vpop.f32.mrb[33].mxu1 }
 0x8b9   :  { %v6556_v60 = vadd.f32 %v6555_v49, %v6554_v16  ;;  %v7783_v16 = vpack.c.bf16 %v5856_v23, %v5855_v52  ;;  %v5889_v49 = vld [vmem:[%s16970_s6 + $0x110] sm:$0xff]  ;;  %v5868_v23 = vld [vmem:[%s16970_s6 + $0x68] sm:$0xff] }
 0x8bb   :  { %v5577_v14 = vadd.f32 %v6556_v60, %v6518_v26  ;;  %v6557_v38 = vpop.f32.mrb[34].mxu1  ;;  %v9746_v26 = vmov 0.0|0.0   ;;  %v5890_v60 = vld [vmem:[%s16970_s6 + $0x118] sm:$0xff] }
 0x8bc   :  { %v6558_v40 = vpop.f32.mrb[35].mxu1  ;;  %7813 = vmatprep.subr.bf16.mxu1 %v9746_v26 }
 0x8bd   :  { %v6559_v0 = vadd.f32 %v6558_v40, %v6557_v38  ;;  %7815 = vmatpush1.bf16.msra.mxu1 %v7814_v24  ;;  %v7817_v38 = vpack.c.bf16 %v5890_v60, %v5889_v49  ;;  %v5874_v40 = vld [vmem:[%s16970_s6 + $0x98] sm:$0xff]  ;;  %v5899_v24 = vld [vmem:[%s16970_s6 + $0x160] sm:$0xff]  ;;  %v5885_v60 = vld [vmem:[%s16970_s6 + $0xf0] sm:$0xff] }
 0x8be   :  { %7816 = vmatprep.subr.bf16.mxu1 %v9746_v26  ;;  %v5902_v49 = vld [vmem:[%s16970_s6 + $0x178] sm:$0xff] }
 0x8bf   :  { %v5582_v9 = vadd.f32 %v6559_v0, %v6521_v15  ;;  %v5857_v0 = vld [vmem:[%s16970_s6 + $0x10] sm:$0xff] }
 0x8c1   :  { %7818 = vmatpush1.bf16.msra.mxu1 %v7817_v38  ;;  %v5886_v38 = vld [vmem:[%s16970_s6 + $0xf8] sm:$0xff] }
 0x8c2   :  { %7819 = vmatprep.subr.bf16.mxu1 %v9746_v26 }
 0x8c9   :  { %v5178_v18 = vpop.permute.xlu0 %5177 }
 0x8ca   :  { %5181 = vst.msk [vmem:[#allocation2] sm:$0x1] %vm5180_vm14, %v5178_v18 }
 0x8cb   :  { %v5211_v20 = vpop.permute.xlu1 %5210 }
 0x8cc   :  { %v5212_v39 = vrot.slane %v5211_v20, 6 }
 0x8cd   :  { %v5184_v3 = vpop.permute.xlu0 %5183 }
 0x8ce   :  { %5187 = vst.msk [vmem:[#allocation2] sm:$0x1] %vm5186_vm0, %v5184_v3  ;;  %v5213_v57 = vsel %vm243_vm2, %v5212_v39, %v5211_v20  ;;  %v5892_v39 = vld [vmem:[%s16970_s6 + $0x128] sm:$0xff] }
 0x8d1   :  { %v5204_v8 = vpop.permute.xlu0 %5203 }
 0x8d5   :  { %v6592_v48 = vpop.f32.mrb[36].mxu0  ;;  %v5191_v5 = vpop.permute.xlu0 %5190 }
 0x8d6   :  { %5194 = vst.msk [vmem:[#allocation2] sm:$0x1] %vm5193_vm13, %v5191_v5  ;;  %v6593_v21 = vpop.f32.mrb[37].mxu0 }
 0x8d7   :  { %5207 = vst.msk [vmem:[#allocation2] sm:$0x1] %vm5206_vm9, %v5204_v8  ;;  %v6594_v31 = vadd.f32 %v6593_v21, %v6592_v48  ;;  %v6630_v6 = vpop.f32.mrb[36].mxu1  ;;  %v5891_v8 = vld [vmem:[%s16970_s6 + $0x120] sm:$0xff]  ;;  %v5876_v21 = vld [vmem:[%s16970_s6 + $0xa8] sm:$0xff] }
 0x8d8   :  { %5218 = vst.msk [vmem:[#allocation2] sm:$0x5] %vm16607_vm12, %v5213_v57  ;;  %v6631_v62 = vpop.f32.mrb[37].mxu1  ;;  %v5875_v48 = vld [vmem:[%s16970_s6 + $0xa0] sm:$0xff]  ;;  %v7820_v5 = vpack.c.bf16 %v5892_v39, %v5891_v8  ;;  %v5904_v39 = vld [vmem:[%s16970_s6 + $0x188] sm:$0xff] }
 0x8d9   :  { %v5652_v19 = vadd.f32 %v6594_v31, %v5577_v14  ;;  %v6595_v50 = vpop.f32.mrb[38].mxu0  ;;  %v5221_v27 = vpop.permute.xlu0 %5220  ;;  %v6632_v22 = vadd.f32 %v6631_v62, %v6630_v6  ;;  %v5873_v14 = vld [vmem:[%s16970_s6 + $0x90] sm:$0xff]  ;;  %v5859_v57 = vld [vmem:[%s16970_s6 + $0x20] sm:$0xff]  ;;  %v5860_v31 = vld [vmem:[%s16970_s6 + $0x28] sm:$0xff]  ;;  %v7789_v6 = vpack.c.bf16 %v5876_v21, %v5875_v48 }
 0x8da   :  { %5224 = vst.msk [vmem:[#allocation2 + $0x2] sm:$0x1] %vm5223_vm1, %v5221_v27  ;;  %v6596_v61 = vpop.f32.mrb[39].mxu0  ;;  %v7785_v3 = vpack.c.bf16 %v5874_v40, %v5873_v14  ;;  %7821 = vmatpush1.bf16.msra.mxu1 %v7820_v5  ;;  %v5893_v62 = vld [vmem:[%s16970_s6 + $0x130] sm:$0xff]  ;;  %v5894_v27 = vld [vmem:[%s16970_s6 + $0x138] sm:$0xff]  ;;  %v5903_v8 = vld [vmem:[%s16970_s6 + $0x180] sm:$0xff] }
 0x8db   :  { %v6597_v37 = vadd.f32 %v6596_v61, %v6595_v50  ;;  %v5727_v25 = vadd.f32 %v6632_v22, %v5652_v19  ;;  %v6633_v56 = vpop.f32.mrb[38].mxu1  ;;  %v7791_v50 = vpack.c.bf16 %v5860_v31, %v5859_v57  ;;  %v5877_v22 = vld [vmem:[%s16970_s6 + $0xb0] sm:$0xff]  ;;  %v7823_v61 = vpack.c.bf16 %v5894_v27, %v5893_v62  ;;  %7822 = vmatprep.subr.bf16.mxu1 %v9746_v26 }
 0x8dc   :  { %v6634_v41 = vpop.f32.mrb[39].mxu1  ;;  %v7838_v48 = vpack.c.bf16 %v5904_v39, %v5903_v8  ;;  %v6177_v39 = vld [vmem:[%s16974_s10 + $0x20] sm:$0xff] }
 0x8dd   :  { %v5657_v58 = vadd.f32 %v6597_v37, %v5582_v9  ;;  %v5241_v1 = vpop.permute.xlu0 %5240  ;;  %v5743_v34 = vrot.slane %v5727_v25, %v16581_v46  ;;  %v5761_v2 = vcombine.high %v5727_v25, %v5727_v25  ;;  %5735 = vst.msk [vmem:[#allocation2 + $0x1] sm:$0x1] %vm5165_vm11, %v5727_v25  ;;  %v6635_v51 = vadd.f32 %v6634_v41, %v6633_v56  ;;  %v5858_v9 = vld [vmem:[%s16970_s6 + $0x18] sm:$0xff]  ;;  %v5861_v25 = vld [vmem:[%s16970_s6 + $0x30] sm:$0xff] }
 0x8de   :  { %v5254_v10 = vpop.permute.xlu1 %5253  ;;  %vm17414_vm11 = vcmask 992008   ;;  %v7787_v20 = vpack.c.bf16 %v5858_v9, %v5857_v0  ;;  %v5878_v37 = vld [vmem:[%s16970_s6 + $0xb8] sm:$0xff]  ;;  %7824 = vmatpush1.bf16.msra.mxu1 %v7823_v61  ;;  %v7809_v0 = vpack.c.bf16 %v5886_v38, %v5885_v60  ;;  %v5869_v9 = vld [vmem:[%s16970_s6 + $0x70] sm:$0xff]  ;;  %v6090_v60 = vld [vmem:[%s16972_s8 + $0x68] sm:$0xff]  ;;  %v18200_v38 = vmov 0.0  }
 0x8df   :  { %v5732_v59 = vadd.f32 %v6635_v51, %v5657_v58  ;;  %v6317_v54 = vrot.slane %v5743_v34, 9  ;;  %v5750_v55 = vcombine.high %v5743_v34, %v5743_v34  ;;  %v5768_v12 = vrot.slane %v5761_v2, %v16581_v46  ;;  %v5862_v56 = vld [vmem:[%s16970_s6 + $0x38] sm:$0xff]  ;;  %7825 = vmatprep.subr.bf16.mxu1 %v9746_v26  ;;  %v5895_v34 = vld [vmem:[%s16970_s6 + $0x140] sm:$0xff]  ;;  %v5896_v2 = vld [vmem:[%s16970_s6 + $0x148] sm:$0xff] }
 0x8e0   :  { %v5255_v36 = vrot.slane %v5254_v10, 6  ;;  %v7793_v58 = vpack.c.bf16 %v5878_v37, %v5877_v22  ;;  %v7795_v41 = vpack.c.bf16 %v5862_v56, %v5861_v25  ;;  %v7826_v51 = vpack.c.bf16 %v5896_v2, %v5895_v34 }
 0x8e1   :  { %v5228_v4 = vpop.permute.xlu0 %5227  ;;  %5746 = vrot.lane.b32.xlu1 %v6317_v54, %s9735_s5  ;;  %5751 = vrot.lane.b32.xlu0 %v5750_v55, %s9736_s27  ;;  %v5781_v29 = vcombine.high %v5768_v12, %v5768_v12  ;;  %v5823_v11 = vcombine.high %v5732_v59, %v5732_v59  ;;  %v6319_v32 = vrot.slane %v5768_v12, 9  ;;  %v6318_v30 = vrot.slane %v5750_v55, 9  ;;  %v5863_v54 = vld [vmem:[%s16970_s6 + $0x40] sm:$0xff] }
 0x8e2   :  { %5231 = vst.msk [vmem:[#allocation2 + $0x2] sm:$0x1] %vm5230_vm15, %v5228_v4  ;;  %v5256_v35 = vsel %vm2694_vm4, %v5255_v36, %v5254_v10  ;;  %v5799_v18 = vrot.slane %v5732_v59, %v16581_v46  ;;  %v5879_v10 = vld [vmem:[%s16970_s6 + $0xc0] sm:$0xff]  ;;  %v5880_v59 = vld [vmem:[%s16970_s6 + $0xc8] sm:$0xff]  ;;  %7827 = vmatpush1.bf16.msra.mxu1 %v7826_v51  ;;  %v5298_v5 = vpop.permute.xlu1 %5297 }
 0x8e3   :  { %5244 = vst.msk [vmem:[#allocation2 + $0x2] sm:$0x1] %vm5243_vm7, %v5241_v1  ;;  %v6320_v63 = vrot.slane %v5781_v29, 9  ;;  %v16635_v47 = vrot.slane %v5823_v11, %v16581_v46  ;;  %v5864_v4 = vld [vmem:[%s16970_s6 + $0x48] sm:$0xff]  ;;  %v5898_v11 = vld [vmem:[%s16970_s6 + $0x158] sm:$0xff]  ;;  %7828 = vmatprep.subr.bf16.mxu1 %v9746_v26  ;;  %v5299_v62 = vrot.slane %v5298_v5, 6 }
 0x8e4   :  { %v5810_v19 = vcombine.high %v5799_v18, %v5799_v18  ;;  %v6321_v1 = vrot.slane %v5799_v18, 9  ;;  %v7799_v36 = vpack.c.bf16 %v5864_v4, %v5863_v54  ;;  %v6077_v4 = vld [vmem:[%s16972_s8] sm:$0xff] }
 0x8e5   :  { %v5248_v53 = vpop.permute.xlu0 %5247  ;;  %5769 = vrot.lane.b32.xlu1 %v5768_v12, %s9737_s22  ;;  %5788 = vrot.lane.b32.xlu0 %v6320_v63, %s9741_s14  ;;  %v7797_v12 = vpack.c.bf16 %v5880_v59, %v5879_v10  ;;  %v5881_v63 = vld [vmem:[%s16970_s6 + $0xd0] sm:$0xff] }
 0x8e6   :  { %5251 = vst.msk [vmem:[#allocation2 + $0x2] sm:$0x1] %vm17414_vm11, %v5248_v53  ;;  %v6322_v55 = vrot.slane %v5810_v19, 9 }
 0x8e7   :  { %5261 = vst.msk [vmem:[#allocation2 + $0x2] sm:$0x5] %vm16624_vm8, %v5256_v35  ;;  %v5882_v35 = vld [vmem:[%s16970_s6 + $0xd8] sm:$0xff] }
 0x8e8   :  { %v7801_v28 = vpack.c.bf16 %v5882_v35, %v5881_v63 }
 0x8e9   :  { %v5278_v44 = vpop.permute.xlu0 %5277  ;;  %5775 = vrot.lane.b32.xlu1 %v6319_v32, %s17417_s20  ;;  %5831 = vrot.lane.b32.xlu0 %v16635_v47, %s9743_s13  ;;  %v5865_v32 = vld [vmem:[%s16970_s6 + $0x50] sm:$0xff] }
 0x8ed   :  { %v5265_v17 = vpop.permute.xlu0 %5264  ;;  %5757 = vrot.lane.b32.xlu1 %v6318_v30, %s9738_s26  ;;  %5290 = vrot.lane.b32.xlu0 %v16596_v7, %s18193_s24  ;;  %v5872_v7 = vld [vmem:[%s16970_s6 + $0x88] sm:$0xff]  ;;  %v6323_v30 = vrot.slane %v16635_v47, 9 }
 0x8ee   :  { %5268 = vst.msk [vmem:[#allocation2 + $0x4] sm:$0x1] %vm17413_vm10, %v5265_v17  ;;  %v7781_v33 = vpack.c.bf16 %v5872_v7, %v5871_v42  ;;  %v5841_v17 = vcombine.high %v16635_v47, %v16635_v47  ;;  %v5900_v42 = vld [vmem:[%s16970_s6 + $0x168] sm:$0xff]  ;;  %v5883_v7 = vld [vmem:[%s16970_s6 + $0xe0] sm:$0xff]  ;;  %vm5293_vm10 = vcmask 967408  }
 0x8ef   :  { %5281 = vst.msk [vmem:[#allocation2 + $0x4] sm:$0x1] %vm17412_vm6, %v5278_v44  ;;  %v5866_v44 = vld [vmem:[%s16970_s6 + $0x58] sm:$0xff]  ;;  %v7832_v52 = vpack.c.bf16 %v5900_v42, %v5899_v24  ;;  %v5884_v47 = vld [vmem:[%s16970_s6 + $0xe8] sm:$0xff]  ;;  %vm5300_vm6 = vcmask 973824   ;;  %v6083_v24 = vld [vmem:[%s16972_s8 + $0x30] sm:$0xff] }
 0x8f0   :  { %7782 = vmatprep.subr.bf16.mxu0 %v7781_v33  ;;  %v7803_v13 = vpack.c.bf16 %v5866_v44, %v5865_v32  ;;  %v5867_v33 = vld [vmem:[%s16970_s6 + $0x60] sm:$0xff]  ;;  %v6324_v40 = vrot.slane %v5841_v17, 9  ;;  %v5301_v25 = vsel %vm5300_vm6, %v5299_v62, %v5298_v5  ;;  %v6079_v32 = vld [vmem:[%s16972_s8 + $0x10] sm:$0xff]  ;;  %v6080_v44 = vld [vmem:[%s16972_s8 + $0x18] sm:$0xff] }
 0x8f1   :  { %v5285_v15 = vpop.permute.xlu0 %5284  ;;  %5782 = vrot.lane.b32.xlu1 %v5781_v29, %s9739_s17  ;;  %7784 = vmatpush3.bf16.msra.mxu0 %v7783_v16  ;;  %v5897_v29 = vld [vmem:[%s16970_s6 + $0x150] sm:$0xff]  ;;  %v7807_v14 = vpack.c.bf16 %v5868_v23, %v5867_v33  ;;  %v6084_v42 = vld [vmem:[%s16972_s8 + $0x38] sm:$0xff] }
 0x8f2   :  { %5288 = vst.msk [vmem:[#allocation2 + $0x4] sm:$0x1] %vm17411_vm5, %v5285_v15  ;;  %7786 = vmatprep.subr.bf16.mxu0 %v7785_v3  ;;  %v7829_v53 = vpack.c.bf16 %v5898_v11, %v5897_v29  ;;  %v7805_v15 = vpack.c.bf16 %v5884_v47, %v5883_v7  ;;  %v5901_v16 = vld [vmem:[%s16970_s6 + $0x170] sm:$0xff]  ;;  %vm5304_vm5 = vcmask 124930   ;;  %v7850_v7 = vpack.c.bf16 %v6084_v42, %v6083_v24  ;;  %v6086_v47 = vld [vmem:[%s16972_s8 + $0x48] sm:$0xff] }
 0x8f3   :  { %v7835_v3 = vpack.c.bf16 %v5902_v49, %v5901_v16  ;;  %vm16821_vm11 = vmor %vm5304_vm5, %vm5303_vm3  ;;  %vm18197_vm3 = vcmask 352408   ;;  %v6087_v23 = vld [vmem:[%s16972_s8 + $0x50] sm:$0xff]  ;;  %v6089_v49 = vld [vmem:[%s16972_s8 + $0x60] sm:$0xff] }
 0x8f4   :  { %7830 = vmatpush1.bf16.msra.mxu1 %v7829_v53 }
 0x8f5   :  { %5800 = vrot.lane.b32.xlu1 %v5799_v18, %s9740_s3  ;;  %7788 = vmatpush3.bf16.msra.mxu0 %v7787_v20  ;;  %v5870_v18 = vld [vmem:[%s16970_s6 + $0x78] sm:$0xff] }
 0x8f6   :  { %7790 = vmatprep.subr.bf16.mxu0 %v7789_v6  ;;  %7831 = vmatprep.subr.bf16.mxu1 %v9746_v26  ;;  %v7811_v20 = vpack.c.bf16 %v5870_v18, %v5869_v9  ;;  %v6174_v9 = vld [vmem:[%s16974_s10 + $0x8] sm:$0xff]  ;;  %v6175_v18 = vld [vmem:[%s16974_s10 + $0x10] sm:$0xff] }
 0x8f8   :  { %7833 = vmatpush1.bf16.msra.mxu1 %v7832_v52  ;;  %v6085_v52 = vld [vmem:[%s16972_s8 + $0x40] sm:$0xff] }
 0x8f9   :  { %5811 = vrot.lane.b32.xlu1 %v5810_v19, %s9732_s25  ;;  %7792 = vmatpush3.bf16.msra.mxu0 %v7791_v50  ;;  %v7853_v33 = vpack.c.bf16 %v6086_v47, %v6085_v52 }
 0x8fa   :  { %7794 = vmatprep.subr.bf16.mxu0 %v7793_v58  ;;  %7834 = vmatprep.subr.bf16.mxu1 %v9746_v26 }
 0x8fc   :  { %7836 = vmatpush1.bf16.msra.mxu1 %v7835_v3 }
 0x8fd   :  { %5806 = vrot.lane.b32.xlu1 %v6321_v1, %s17522_s16  ;;  %7796 = vmatpush3.bf16.msra.mxu0 %v7795_v41 }
 0x8fe   :  { %7798 = vmatprep.subr.bf16.mxu0 %v7797_v12  ;;  %7837 = vmatprep.subr.bf16.mxu1 %v9746_v26 }
 0x900   :  { %7839 = vmatpush1.bf16.msra.mxu1 %v7838_v48  ;;  %v6178_v48 = vld [vmem:[%s16974_s10 + $0x28] sm:$0xff] }
 0x901   :  { %5819 = vrot.lane.b32.xlu1 %v6322_v55, %s9744_s18  ;;  %7800 = vmatpush3.bf16.msra.mxu0 %v7799_v36  ;;  %v6078_v36 = vld [vmem:[%s16972_s8 + $0x8] sm:$0xff]  ;;  %v7868_v5 = vpack.c.bf16 %v6178_v48, %v6177_v39 }
 0x902   :  { %7802 = vmatprep.subr.bf16.mxu0 %v7801_v28  ;;  %7861 = vmatprep.subr.bf16.mxu1 %v9746_v26  ;;  %v7841_v35 = vpack.c.bf16 %v6078_v36, %v6077_v4  ;;  %v6082_v28 = vld [vmem:[%s16972_s8 + $0x28] sm:$0xff] }
 0x905   :  { %5837 = vrot.lane.b32.xlu1 %v6323_v30, %s9745_s0  ;;  %7804 = vmatpush3.bf16.msra.mxu0 %v7803_v13 }
 0x906   :  { %7806 = vmatprep.subr.bf16.mxu0 %v7805_v15  ;;  %v6088_v15 = vld [vmem:[%s16972_s8 + $0x58] sm:$0xff] }
 0x907   :  { %v7856_v16 = vpack.c.bf16 %v6088_v15, %v6087_v23 }
 0x909   :  { %5848 = vrot.lane.b32.xlu1 %v6324_v40, %s9742_s28  ;;  %7808 = vmatpush3.bf16.msra.mxu0 %v7807_v14  ;;  %v7859_v14 = vpack.c.bf16 %v6090_v60, %v6089_v49  ;;  %v6091_v40 = vld [vmem:[%s16972_s8 + $0x70] sm:$0xff] }
 0x90a   :  { %7810 = vmatprep.subr.bf16.mxu0 %v7809_v0  ;;  %v6173_v0 = vld [vmem:[%s16974_s10] sm:$0xff] }
 0x90b   :  { %v7862_v3 = vpack.c.bf16 %v6174_v9, %v6173_v0 }
 0x90d   :  { %5842 = vrot.lane.b32.xlu1 %v5841_v17, %s18193_s24  ;;  %7812 = vmatpush3.bf16.msra.mxu0 %v7811_v20  ;;  %v7844_v17 = vpack.c.bf16 %v6080_v44, %v6079_v32  ;;  %v6176_v20 = vld [vmem:[%s16974_s10 + $0x18] sm:$0xff] }
 0x90e   :  { %7840 = vmatprep.subr.bf16.mxu0 %v9746_v26  ;;  %v7865_v8 = vpack.c.bf16 %v6176_v20, %v6175_v18 }
 0x953   :  { %v5747_v21 = vpop.permute.xlu1 %5746  ;;  %v5752_v57 = vpop.permute.xlu0 %5751 }
 0x954   :  { %5749 = vst.msk [vmem:[#allocation2 + $0x1] sm:$0x1] %vm5180_vm14, %v5747_v21  ;;  %vm18198_vm14 = vcmask 557408   ;;  %v6179_v21 = vld [vmem:[%s16974_s10 + $0x30] sm:$0xff] }
 0x955   :  { %5754 = vst.msk [vmem:[#allocation2 + $0x1] sm:$0x1] %vm5186_vm0, %v5752_v57  ;;  %vm18199_vm0 = vcmask 762408   ;;  %v6180_v57 = vld [vmem:[%s16974_s10 + $0x38] sm:$0xff] }
 0x957   :  { %v5770_v31 = vpop.permute.xlu1 %5769  ;;  %v5789_v19 = vpop.permute.xlu0 %5788 }
 0x95b   :  { %v5776_v6 = vpop.permute.xlu1 %5775  ;;  %v5832_v50 = vpop.permute.xlu0 %5831 }
 0x95c   :  { %v5777_v27 = vrot.slane %v5776_v6, 6 }
 0x95e   :  { %v5778_v56 = vsel %vm243_vm2, %v5777_v27, %v5776_v6  ;;  %vm18196_vm2 = vcmask 992008  }
 0x95f   :  { %v5758_v61 = vpop.permute.xlu1 %5757  ;;  %v5291_v37 = vpop.permute.xlu0 %5290 }
 0x960   :  { %5760 = vst.msk [vmem:[#allocation2 + $0x1] sm:$0x1] %vm5193_vm13, %v5758_v61  ;;  %vm9747_vm13 = vmmov 0  }
 0x961   :  { %5294 = vst.msk [vmem:[#allocation2 + $0x4] sm:$0x1] %vm5293_vm10, %v5291_v37 }
 0x962   :  { %5772 = vst.msk [vmem:[#allocation2 + $0x1] sm:$0x1] %vm5206_vm9, %v5770_v31  ;;  %v7871_v31 = vpack.c.bf16 %v6180_v57, %v6179_v21  ;;  %vm18201_vm9 = vcmask 982016  }
 0x963   :  { %5306 = vst.msk [vmem:[#allocation2 + $0x4] sm:$0x5] %vm16821_vm11, %v5301_v25  ;;  %v5783_v58 = vpop.permute.xlu1 %5782 }
 0x964   :  { %5780 = vst.msk [vmem:[#allocation2 + $0x1] sm:$0x5] %vm16607_vm12, %v5778_v56  ;;  %v6181_v56 = vld [vmem:[%s16974_s10 + $0x40] sm:$0xff]  ;;  %vm6195_vm12 = vcmask 1043456  }
 0x965   :  { %5785 = vst.msk [vmem:[#allocation2 + $0x3] sm:$0x1] %vm5223_vm1, %v5783_v58  ;;  %vm6191_vm1 = vcmask 687104  }
 0x966   :  { %5791 = vst.msk [vmem:[#allocation2 + $0x3] sm:$0x1] %vm5230_vm15, %v5789_v19  ;;  %vm6269_vm15 = vcmask 74752  }
 0x967   :  { %v5801_v41 = vpop.permute.xlu1 %5800 }
 0x968   :  { %5803 = vst.msk [vmem:[#allocation2 + $0x3] sm:$0x1] %vm5243_vm7, %v5801_v41  ;;  %v6183_v41 = vld [vmem:[%s16974_s10 + $0x50] sm:$0xf] }
 0x96b   :  { %v5812_v1 = vpop.permute.xlu1 %5811 }
 0x96c   :  { %v5813_v34 = vrot.slane %v5812_v1, 6 }
 0x96e   :  { %v5814_v51 = vsel %vm2694_vm4, %v5813_v34, %v5812_v1  ;;  %vm5933_vm4 = vcmask 130048   ;;  %v6327_v1 = vld [vmem:[%s16973_s9] ss:$0 sm:$0xff] }
 0x96f   :  { %v5807_v2 = vpop.permute.xlu1 %5806 }
 0x970   :  { %5809 = vst.msk [vmem:[#allocation2 + $0x3] sm:$0x1] %vm18196_vm2, %v5807_v2 }
 0x971   :  { %5816 = vst.msk [vmem:[#allocation2 + $0x3] sm:$0x5] %vm16624_vm8, %v5814_v51 }
 0x973   :  { %v5820_v45 = vpop.permute.xlu1 %5819 }
 0x974   :  { %5822 = vst.msk [vmem:[#allocation2 + $0x5] sm:$0x1] %vm18197_vm3, %v5820_v45 }
 0x975   :  { %5834 = vst.msk [vmem:[#allocation2 + $0x5] sm:$0x1] %vm18198_vm14, %v5832_v50  ;;  %v6325_v50 = vld [vmem:[%s16971_s7] ss:$0 sm:$0xff] }
 0x977   :  { %v5838_v10 = vpop.permute.xlu1 %5837 }
 0x978   :  { %5840 = vst.msk [vmem:[#allocation2 + $0x5] sm:$0x1] %vm18199_vm0, %v5838_v10  ;;  %v6329_v10 = vld [vmem:[%s16975_s11] ss:$0 sm:$0xff] }
 0x97b   :  { %v5849_v59 = vpop.permute.xlu1 %5848 }
 0x97c   :  { %v5850_v54 = vrot.slane %v5849_v59, 6 }
 0x97e   :  { %v5851_v12 = vsel %vm5300_vm6, %v5850_v54, %v5849_v59 }
 0x97f   :  { %v5843_v55 = vpop.permute.xlu1 %5842 }
 0x980   :  { %5845 = vst.msk [vmem:[#allocation2 + $0x5] sm:$0x1] %vm5293_vm10, %v5843_v55 }
 0x981   :  { %5853 = vst.msk [vmem:[#allocation2 + $0x5] sm:$0x5] %vm16821_vm11, %v5851_v12 }
 0x988   :  { %v5854_v43 = vld [vmem:[#allocation2] sm:$0xff] }
 0x989   :  { %v5913_v29 = vcombine.high %v5854_v43, %v5854_v43  ;;  %v5920_v11 = vrot.slane %v5854_v43, %v16581_v46 }
 0x98b   :  { %v5928_v63 = vcombine.high %v5920_v11, %v5920_v11  ;;  %v5927_v53 = vrot.slane %v5913_v29, %v16581_v46  ;;  %v6081_v46 = vld [vmem:[%s16972_s8 + $0x20] sm:$0xff] }
 0x98c   :  { %v7847_v13 = vpack.c.bf16 %v6082_v28, %v6081_v46 }
 0x98d   :  { %6000 = vmatprep.mubr.f32.mxu0 %v5928_v63  ;;  %v5929_v30 = vcombine.high %v5927_v53, %v5927_v53 }
 0x98e   :  { %6001 = vmatmul.mubr.f32.vlgmr.msra.gmra.mrb[40].mxu0 %v5920_v11 }
 0x98f   :  { %6326 = vmatprep.mubr.msk.f32.mxu1 %vm5933_vm4, %v5929_v30  ;;  %7842 = vmatpush3.bf16.msra.mxu0 %v7841_v35 }
 0x990   :  { %6071 = vmatmul.mubr.f32.vlgmr.msra.gmra.mrb[40].mxu1 %v5927_v53  ;;  %7843 = vmatprep.subr.bf16.mxu0 %v9746_v26 }
 0x991   :  { %6729 = vmatprep.mubr.msk.f32.mxu0 %vm9747_vm13, %v18200_v38  ;;  %6754 = vmatprep.mubr.msk.f32.mxu1 %vm9747_vm13, %v18200_v38 }
 0x992   :  { %7863 = vmatpush3.bf16.msra.mxu1 %v7862_v3 }
 0x993   :  { %7845 = vmatpush3.bf16.msra.mxu0 %v7844_v17  ;;  %7864 = vmatprep.subr.bf16.mxu1 %v9746_v26 }
 0x994   :  { %7846 = vmatprep.subr.bf16.mxu0 %v9746_v26 }
 0x996   :  { %7866 = vmatpush3.bf16.msra.mxu1 %v7865_v8 }
 0x997   :  { %7848 = vmatpush3.bf16.msra.mxu0 %v7847_v13  ;;  %7867 = vmatprep.subr.bf16.mxu1 %v9746_v26 }
 0x998   :  { %7849 = vmatprep.subr.bf16.mxu0 %v9746_v26 }
 0x99a   :  { %7869 = vmatpush3.bf16.msra.mxu1 %v7868_v5 }
 0x99b   :  { %7851 = vmatpush3.bf16.msra.mxu0 %v7850_v7  ;;  %7870 = vmatprep.subr.bf16.mxu1 %v9746_v26 }
 0x99c   :  { %7852 = vmatprep.subr.bf16.mxu0 %v9746_v26 }
 0x99e   :  { %7872 = vmatpush3.bf16.msra.mxu1 %v7871_v31 }
 0x99f   :  { %7854 = vmatpush3.bf16.msra.mxu0 %v7853_v33  ;;  %7873 = vmatprep.subr.bf16.mxu1 %v9746_v26 }
 0x9a0   :  { %7855 = vmatprep.subr.bf16.mxu0 %v9746_v26 }
 0x9a3   :  { %7857 = vmatpush3.bf16.msra.mxu0 %v7856_v16 }
 0x9a4   :  { %7858 = vmatprep.subr.bf16.mxu0 %v9746_v26  ;;  %v6182_v26 = vld [vmem:[%s16974_s10 + $0x48] sm:$0xff]  ;;  %s9686_s10 = scalar_lea.vmem %s6278_s4, 32 }
 0x9a5   :  { %v7874_v58 = vpack.c.bf16 %v6182_v26, %v6181_v56  ;;  %p9687_p0 = scmp.ne.s32.totalorder %s6278_s4, %s9686_s10  ;;  %p9692_p2 = scmp.lt.s32.totalorder %s9686_s10, %s9686_s10 }
 0x9a7   :  { %7860 = vmatpush3.bf16.msra.mxu0 %v7859_v14  ;;  %7875 = vmatpush3.bf16.msra.mxu1 %v7874_v58  ;;  %p9693_p3 = por %p9692_p2, %p9691_p1 }
 0x9a8   :  { %6727 = vmatprep.subr.mxu0 %v18200_v38  ;;  %6752 = vmatprep.subr.mxu1 %v18200_v38 }
 0x9a9   :  { %p9694_p4 = pnand %p9693_p3, %p9687_p0 }
 0x9ab   :  { %6728 = vmatpush3.msra.mxu0 %v6091_v40  ;;  %6753 = vmatpush3.msk.msra.mxu1 %vm6195_vm12, %v6183_v41 }
 0xa61   :  { %v6668_v19 = vpop.f32.mrb[40].mxu0 }
 0xa62   :  { %v6669_v6 = vpop.f32.mrb[41].mxu0 }
 0xa63   :  { %v6670_v62 = vadd.f32 %v6669_v6, %v6668_v19  ;;  %v6072_v27 = vpop.f32.mrb[40].mxu1 }
 0xa64   :  { %v6074_v22 = vpop.f32.mrb[41].mxu1 }
 0xa65   :  { %v6003_v61 = vadd.f32 %v6670_v62, %v6325_v50 }
 0xa67   :  { %v6073_v37 = vadd.f32 %v6072_v27, %v6003_v61 }
 0xa69   :  { %v6076_v25 = vmax.f32 %v6073_v37, 0.0 }
 0xa6b   :  { %6730 = vmatmul.mubr.msk.f32.vlgmr.msra.gmra.mrb[42].mxu0 %vm18201_vm9, %v6076_v25 }
 0xb3e   :  { %v6168_v34 = vpop.f32.mrb[42].mxu0 }
 0xb3f   :  { %v6169_v2 = vadd.f32 %v6327_v1, %v6168_v34  ;;  %v6731_v51 = vpop.f32.mrb[43].mxu0 }
 0xb41   :  { %v6172_v45 = vmax.f32 %v6169_v2, 0.0 }
 0xb43   :  { %6755 = vmatmul.mubr.msk.f32.vlgmr.msra.gmra.mrb[42].mxu1 %vm6191_vm1, %v6172_v45 }
 0xc16   :  { %v6265_v59 = vpop.f32.mrb[42].mxu1 }
 0xc17   :  { %v6266_v54 = vadd.f32 %v6329_v10, %v6265_v59  ;;  %v6756_v55 = vpop.f32.mrb[43].mxu1 }
 0xc19   :  { %6270 = vst.msk [vmem:[#allocation3] sm:$0x3] %vm6269_vm15, %v6266_v54 }
 0xc1a   :  { %9697 = shalt.err (!%p9694_p4)
}
 0xc1b   :  { %s9698_s29 = scalar_lea.hbm %s16976_s12, 32 }
 0xc1c   :  { %p9699_p5 = scmp.ne.s32.totalorder %s16976_s12, %s9698_s29  ;;  %p9702_p6 = scmp.lt.u32.totalorder %s9698_s29, %s16976_s12 }
 0xc1e   :  { %p9704_p7 = pnand %p9702_p6, %p9699_p5 }
 0xc20   :  { %9707 = shalt.err (!%p9704_p7)
}
 0xc21   :  { %6280 = dma.vmem_to_hbm [thread:$0]  %s6278_s4, 32, %s16976_s12, [#allocation4]  }
 0xc22   :  { %9708 = dma.done.wait [#allocation4], 32  }
 0xc23   :  { %9709 = vsyncadd [#allocation4], 4294967264 }
 0xc24   :  { %6284 = vsyncpa [#allocation4], 1 }

</bundles_post_ra>
